<compile_context>
chip_gen: v6e
topology: v6e:2x2x1
jax: 0.10.0
libtpu: 0.0.40
codegen_flags: <defaults>
</compile_context>

<pallas_src>
import functools

import numpy as np
import jax
import jax.numpy as jnp
from jax.experimental import pallas as pl
from jax.experimental.pallas import tpu as pltpu

# Scoped-VMEM limit passed to Mosaic: above the v5e/v6e defaults (16/32 MiB), below
# every generation's physical capacity (128/128/64 MiB).
_VMEM_LIMIT_BYTES = 48 * 1024 * 1024


def _round_up(x, m):
    return ((x + m - 1) // m) * m


# ---------------------------------------------------------------------------
# Kernel 1: guided map  =  Conv2d(3,64,1) -> ReLU -> Conv2d(64,num_classes,1)
#   input tile  : (Cin, TP)   channels on sublanes, pixels on lanes (lane-dense)
#   output tile : (Cout, TP)
# The NCHW image is viewed as (N, Cin, H*W) (free reshape) and the index maps do the
# "permutation": grid = (N, H*W // TP).
# ---------------------------------------------------------------------------
def _guided_map_kernel(x_ref, w1_ref, b1_ref, w2_ref, b2_ref, out_ref):
    x = x_ref[...]                                                      # (Cin, TP)
    h = jnp.dot(w1_ref[...], x, preferred_element_type=jnp.float32) + b1_ref[...]
    h = jnp.maximum(h, 0.0)                                             # ReLU
    out_ref[...] = (jnp.dot(w2_ref[...], h, preferred_element_type=jnp.float32)
                    + b2_ref[...])


def guided_map(img_nchw, w1, b1, w2, b2, *, tile_pixels=32768,
               vmem_limit_bytes=_VMEM_LIMIT_BYTES):
    """img_nchw: (N, 3, H, W) -> (N, num_classes, H, W).

    w1: (Cmid, Cin), b1: (Cmid,), w2: (Cout, Cmid), b2: (Cout,)
    (PyTorch Conv2d weights with the trailing 1x1 squeezed, no transpose).
    """
    N, Cin, H, W = img_nchw.shape
    Cmid = w1.shape[0]
    Cout = w2.shape[0]
    HW = H * W

    # Free reshape (merges the two trailing dims); no HBM transpose.
    x = img_nchw.reshape(N, Cin, HW).astype(jnp.float32)

    # Large lane-dense pixel tile: at 2048 the per-step DMA was ~56 KiB vs the
    # ~0.35 us fixed step overhead -> grid-overhead bound.  32768 pixels per step
    # keeps the footprint (~18 MiB f32 incl. the (Cmid, TP) hidden tile) well under
    # the explicit VMEM limit while tracking the HBM roofline.
    tp = HW if HW <= tile_pixels else _round_up(tile_pixels, 128)
    grid = (N, pl.cdiv(HW, tp))

    out = pl.pallas_call(
        _guided_map_kernel,
        grid=grid,
        in_specs=[
            pl.BlockSpec((None, Cin, tp), lambda n, j: (n, 0, j)),   # image pixels
            pl.BlockSpec((Cmid, Cin), lambda n, j: (0, 0)),          # W1
            pl.BlockSpec((Cmid, 1), lambda n, j: (0, 0)),            # b1
            pl.BlockSpec((Cout, Cmid), lambda n, j: (0, 0)),         # W2
            pl.BlockSpec((Cout, 1), lambda n, j: (0, 0)),            # b2
        ],
        out_specs=pl.BlockSpec((None, Cout, tp), lambda n, j: (n, 0, j)),
        out_shape=jax.ShapeDtypeStruct((N, Cout, HW), jnp.float32),
        compiler_params=pltpu.CompilerParams(
            dimension_semantics=("parallel", "parallel"),
            vmem_limit_bytes=vmem_limit_bytes),
    )(x,
      w1.astype(jnp.float32),
      b1.reshape(Cmid, 1).astype(jnp.float32),
      w2.astype(jnp.float32),
      b2.reshape(Cout, 1).astype(jnp.float32))

    # Free reshape back to NCHW (splits the trailing dim).
    return out.reshape(N, Cout, H, W)


# ---------------------------------------------------------------------------
# Kernel 2: bilinear upsample (align_corners=True) fused with the guided filter,
#           processing Cb planes per grid step.
# ---------------------------------------------------------------------------
def _bmm(a, b):
    """(Cb, M, K) @ (Cb, K, N) -> (Cb, M, N); single batched MXU contraction."""
    return jnp.einsum('cmk,ckn->cmn', a, b, preferred_element_type=jnp.float32)


def _guided_filter_math(x, y, box, inv_n, eps):
    mean_x = box(x) * inv_n
    mean_y = box(y) * inv_n
    cov_xy = box(x * y) * inv_n - mean_x * mean_y
    # clamp: box(x*x)/n - mean_x^2 can go slightly negative from f32 cancellation
    var_x = jnp.maximum(box(x * x) * inv_n - mean_x * mean_x, 0.0)
    a = cov_xy * pl.reciprocal(var_x + eps, approx=True)   # EUP, not a VALU divide
    b = mean_y - a * mean_x
    return (box(a) * inv_n) * x + box(b) * inv_n


def _make_box1d_roll(hh, ww, axis, r):
    """Zero-padded box sum of radius r along `axis` (1=H sublanes, 2=W lanes) using
    XLU rolls.  The iota + boundary masks are built ONCE (here) and reused by every
    box() call in the kernel (JAX does not CSE iota/broadcast)."""
    size = hh if axis == 1 else ww
    dim = 0 if axis == 1 else 1
    idx = jax.lax.broadcasted_iota(jnp.int32, (hh, ww), dim)
    fwd_m = [(idx < size - s).astype(jnp.float32) for s in range(1, r + 1)]
    bwd_m = [(idx >= s).astype(jnp.float32) for s in range(1, r + 1)]

    def box(z):
        acc = z
        for s in range(1, r + 1):
            fwd = pltpu.roll(z, shift=(-s) % size, axis=axis)   # fwd[i] = z[i + s]
            bwd = pltpu.roll(z, shift=s, axis=axis)             # bwd[i] = z[i - s]
            acc = acc + fwd * fwd_m[s - 1] + bwd * bwd_m[s - 1]
        return acc
    return box


def _make_gf_kernel(*, eps, r, cb, hh, ww, h_lo, w_lo, use_mm_h, use_mm_w):
    """Build the guided-filter kernel.  Ref order:
         x, ylo, Rh, RwT, [Bh if use_mm_h], [Bw if use_mm_w], inv_n, out
    """
    def kernel(*refs):
        refs = list(refs)
        x_ref, ylo_ref, rh_ref, rwT_ref = refs[:4]
        pos = 4
        bh_ref = None
        bw_ref = None
        if use_mm_h:
            bh_ref = refs[pos]; pos += 1
        if use_mm_w:
            bw_ref = refs[pos]; pos += 1
        invn_ref = refs[pos]
        out_ref = refs[pos + 1]

        x = x_ref[...].astype(jnp.float32)          # (Cb, H, W)
        ylo = ylo_ref[...].astype(jnp.float32)      # (Cb, h, w)
        inv_n = invn_ref[...]                       # (H, W), broadcasts over Cb

        # Bilinear upsample (align_corners=True):  y = Rh @ ylo @ RwT  per plane,
        # as two batched MXU matmuls (small matrices broadcast once, hoisted).
        rh_b = jnp.broadcast_to(rh_ref[...], (cb, hh, h_lo))
        rwT_b = jnp.broadcast_to(rwT_ref[...], (cb, w_lo, ww))
        y = _bmm(_bmm(rh_b, ylo), rwT_b)

        # Separable box filter: H axis on the (otherwise idle) MXU as a band-matrix
        # matmul when feasible, W axis via XLU rolls (masks hoisted) for large W.
        if use_mm_h:
            bh_b = jnp.broadcast_to(bh_ref[...], (cb, hh, hh))
            box_h = lambda z: _bmm(bh_b, z)
        else:
            box_h = _make_box1d_roll(hh, ww, axis=1, r=r)
        if use_mm_w:
            bw_b = jnp.broadcast_to(bw_ref[...], (cb, ww, ww))
            box_w = lambda z: _bmm(z, bw_b)
        else:
            box_w = _make_box1d_roll(hh, ww, axis=2, r=r)

        box = lambda z: box_w(box_h(z))

        out_ref[...] = _guided_filter_math(x, y, box, inv_n, eps)

    return kernel


def _interp_matrix(out_size, in_size):
    """Row-interpolation matrix for F.interpolate(mode='bilinear', align_corners=True)."""
    m = np.zeros((out_size, in_size), dtype=np.float32)
    if in_size == 1:
        m[:, 0] = 1.0
        return m
    if out_size == 1:
        m[0, 0] = 1.0
        return m
    scale = (in_size - 1) / (out_size - 1)
    for i in range(out_size):
        s = i * scale
        j0 = min(int(np.floor(s)), in_size - 1)
        frac = s - j0
        j1 = min(j0 + 1, in_size - 1)
        m[i, j0] += 1.0 - frac
        m[i, j1] += frac
    return m


def _box_matrix(size, r):
    idx = np.arange(size)
    return (np.abs(idx[:, None] - idx[None, :]) <= r).astype(np.float32)


def _box_counts(size, r):
    idx = np.arange(size)
    lo = np.maximum(idx - r, 0)
    hi = np.minimum(idx + r, size - 1)
    return (hi - lo + 1).astype(np.float32)


def guided_filter_upsample(guide_nchw, out_lowres_nchw, dgf_r, dgf_eps,
                           *, vmem_limit_bytes=_VMEM_LIMIT_BYTES):
    """guide: (N, C, H, W); out_lowres: (N, C, h, w)  ->  (N, C, H, W)."""
    N, C, H, W = guide_nchw.shape
    _, _, h, w = out_lowres_nchw.shape
    NC = N * C

    # Free reshapes (merge leading dims) -- no transposes, no pad copies.
    x_planes = guide_nchw.reshape(NC, H, W).astype(jnp.float32)
    y_planes = out_lowres_nchw.reshape(NC, h, w).astype(jnp.float32)

    rh = jnp.asarray(_interp_matrix(H, h))                 # (H, h)
    rwT = jnp.asarray(_interp_matrix(W, w).T)              # (w, W)
    # box(ones) is rank-1: precompute 1/N on host, no in-kernel divide / extra DMA.
    inv_n = jnp.asarray(1.0 / (_box_counts(H, dgf_r)[:, None]
                               * _box_counts(W, dgf_r)[None, :]))   # (H, W)

    # Box-filter strategy per axis:
    #  - W (lane) axis: band matmul only for tiny widths, XLU rolls otherwise.
    #  - H (sublane) axis: band matmul on the MXU ("hybrid") up to 512 rows, rolls above.
    use_mm_w = W < 128
    use_mm_h = H <= 512

    # Planes per grid step.  Budget = ~14 live f32 (H,W) temps per plane plus the
    # 2x double-buffered in and out blocks (4 more planes), against the explicit
    # scoped-VMEM limit.
    plane_bytes = H * W * 4
    per_plane = 18 * plane_bytes
    fixed = 4 * (H * h + w * W + H * W
                 + (H * H if use_mm_h else 0)
                 + (W * W if use_mm_w else 0)) + (2 << 20)   # matrices + margin
    budget = max(vmem_limit_bytes - fixed, per_plane)
    cb_cap = int(max(1, min(8, budget // per_plane, NC)))
    # Prefer an even division of NC (close to the cap); otherwise rely on Pallas
    # masking of the final partial block (per-plane math never crosses planes).
    cb = cb_cap
    for d in range(cb_cap, 0, -1):
        if NC % d == 0:
            cb = d
            break
    if cb < max(1, cb_cap // 2):
        cb = cb_cap

    in_specs = [
        pl.BlockSpec((cb, H, W), lambda i: (i, 0, 0)),     # guide planes
        pl.BlockSpec((cb, h, w), lambda i: (i, 0, 0)),     # low-res output planes
        pl.BlockSpec((H, h), lambda i: (0, 0)),            # Rh
        pl.BlockSpec((w, W), lambda i: (0, 0)),            # RwT
    ]
    operands = [x_planes, y_planes, rh, rwT]
    if use_mm_h:
        in_specs.append(pl.BlockSpec((H, H), lambda i: (0, 0)))
        operands.append(jnp.asarray(_box_matrix(H, dgf_r)))
    if use_mm_w:
        in_specs.append(pl.BlockSpec((W, W), lambda i: (0, 0)))
        operands.append(jnp.asarray(_box_matrix(W, dgf_r)))
    in_specs.append(pl.BlockSpec((H, W), lambda i: (0, 0)))
    operands.append(inv_n)

    kernel = _make_gf_kernel(eps=float(dgf_eps), r=int(dgf_r), cb=cb,
                             hh=H, ww=W, h_lo=h, w_lo=w,
                             use_mm_h=use_mm_h, use_mm_w=use_mm_w)

    out = pl.pallas_call(
        kernel,
        grid=(pl.cdiv(NC, cb),),
        in_specs=in_specs,
        out_specs=pl.BlockSpec((cb, H, W), lambda i: (i, 0, 0)),
        out_shape=jax.ShapeDtypeStruct((NC, H, W), jnp.float32),
        compiler_params=pltpu.CompilerParams(
            dimension_semantics=("parallel",),
            vmem_limit_bytes=vmem_limit_bytes),
    )(*operands)

    # Free reshape back to (N, C, H, W).
    return out.reshape(N, C, H, W)


# ---------------------------------------------------------------------------
# LGF forward
# ---------------------------------------------------------------------------
def lgf_forward(img, output, params, dgf_r, dgf_eps):
    gm = guided_map(img, params["w1"], params["b1"], params["w2"], params["b2"])
    return guided_filter_upsample(gm, output, dgf_r, dgf_eps)


def init_params(key, num_classes):
    k1, k2, k3, k4 = jax.random.split(key, 4)
    # PyTorch Conv2d weights are (Cout, Cin, 1, 1); we keep them as (Cout, Cin).
    w1 = jax.random.normal(k1, (64, 3), jnp.float32) * 0.1
    b1 = jax.random.normal(k2, (64,), jnp.float32) * 0.1
    w2 = jax.random.normal(k3, (num_classes, 64), jnp.float32) * 0.1
    b2 = jax.random.normal(k4, (num_classes,), jnp.float32) * 0.1
    return {"w1": w1, "b1": b1, "w2": w2, "b2": b2}


if __name__ == "__main__":
    num_classes = 4
    dgf_r, dgf_eps = 2, 1e-2
    N, H, W = 2, 48, 48          # full-res image (small test size)
    h, w = 24, 24                # low-res segmentation output

    key = jax.random.PRNGKey(0)
    k_img, k_out, k_par = jax.random.split(key, 3)
    img = jax.random.normal(k_img, (N, 3, H, W), jnp.float32)
    output = jax.random.normal(k_out, (N, num_classes, h, w), jnp.float32)
    params = init_params(k_par, num_classes)

    fwd = jax.jit(functools.partial(lgf_forward, dgf_r=dgf_r, dgf_eps=dgf_eps))
    result = fwd(img, output, params)
    jax.block_until_ready(result)
    assert result.shape == (N, num_classes, H, W)
    assert bool(jnp.all(jnp.isfinite(result)))
    print("KERNEL_OK")
</pallas_src>

<mosaic_0001>
module attributes {stable_mosaic.version = 11 : i64} {
  func.func @_guided_map_kernel(%arg0: i32, %arg1: i32, %arg2: memref<1x3x2304xf32, #tpu.memory_space<vmem>>, %arg3: memref<64x3xf32, #tpu.memory_space<vmem>>, %arg4: memref<64x1xf32, #tpu.memory_space<vmem>>, %arg5: memref<4x64xf32, #tpu.memory_space<vmem>>, %arg6: memref<4x1xf32, #tpu.memory_space<vmem>>, %arg7: memref<1x4x2304xf32, #tpu.memory_space<vmem>>) attributes {dimension_semantics = [#tpu.dimension_semantics<parallel>, #tpu.dimension_semantics<parallel>], iteration_bounds = array<i64: 2, 1>, scalar_prefetch = 0 : i64, scratch_operands = 0 : i64, tpu.core_type = #tpu.core_type<tc>, window_params = [{transform_indices = @transform_0, window_bounds = array<i64: 1, 3, 2304>}, {pipeline_mode = #tpu.pipeline_mode<synchronous>, transform_indices = @transform_1, window_bounds = array<i64: 64, 3>}, {pipeline_mode = #tpu.pipeline_mode<synchronous>, transform_indices = @transform_2, window_bounds = array<i64: 64, 1>}, {pipeline_mode = #tpu.pipeline_mode<synchronous>, transform_indices = @transform_3, window_bounds = array<i64: 4, 64>}, {pipeline_mode = #tpu.pipeline_mode<synchronous>, transform_indices = @transform_4, window_bounds = array<i64: 4, 1>}, {transform_indices = @transform_5, window_bounds = array<i64: 1, 4, 2304>}]} {
    %c0 = arith.constant 0 : index
    %c0_0 = arith.constant 0 : index
    %c0_1 = arith.constant 0 : index
    %0 = vector.load %arg2[%c0, %c0_0, %c0_1] : memref<1x3x2304xf32, #tpu.memory_space<vmem>>, vector<1x3x2304xf32>
    %1 = vector.shape_cast %0 : vector<1x3x2304xf32> to vector<3x2304xf32>
    %c0_2 = arith.constant 0 : index
    %c0_3 = arith.constant 0 : index
    %2 = vector.load %arg3[%c0_2, %c0_3] : memref<64x3xf32, #tpu.memory_space<vmem>>, vector<64x3xf32>
    %cst = arith.constant dense<0.000000e+00> : vector<64x2304xf32>
    %3 = tpu.matmul %2, %1, %cst {dimension_numbers = #tpu.dot_dimension_numbers<[1], [0], [0], [1], [0, 0, 1, 1], [], []>} : vector<64x3xf32>, vector<3x2304xf32>, vector<64x2304xf32> -> vector<64x2304xf32>
    %c0_4 = arith.constant 0 : index
    %c0_5 = arith.constant 0 : index
    %4 = vector.load %arg4[%c0_4, %c0_5] : memref<64x1xf32, #tpu.memory_space<vmem>>, vector<64x1xf32>
    %5 = vector.broadcast %4 : vector<64x1xf32> to vector<64x2304xf32>
    %6 = arith.addf %3, %5 : vector<64x2304xf32>
    %cst_6 = arith.constant 0.000000e+00 : f32
    %7 = vector.broadcast %cst_6 : f32 to vector<64x2304xf32>
    %8 = arith.maximumf %6, %7 : vector<64x2304xf32>
    %c0_7 = arith.constant 0 : index
    %c0_8 = arith.constant 0 : index
    %9 = vector.load %arg5[%c0_7, %c0_8] : memref<4x64xf32, #tpu.memory_space<vmem>>, vector<4x64xf32>
    %cst_9 = arith.constant dense<0.000000e+00> : vector<4x2304xf32>
    %10 = tpu.matmul %9, %8, %cst_9 {dimension_numbers = #tpu.dot_dimension_numbers<[1], [0], [0], [1], [0, 0, 1, 1], [], []>} : vector<4x64xf32>, vector<64x2304xf32>, vector<4x2304xf32> -> vector<4x2304xf32>
    %c0_10 = arith.constant 0 : index
    %c0_11 = arith.constant 0 : index
    %11 = vector.load %arg6[%c0_10, %c0_11] : memref<4x1xf32, #tpu.memory_space<vmem>>, vector<4x1xf32>
    %12 = vector.broadcast %11 : vector<4x1xf32> to vector<4x2304xf32>
    %13 = arith.addf %10, %12 : vector<4x2304xf32>
    %c0_12 = arith.constant 0 : index
    %c0_13 = arith.constant 0 : index
    %c0_14 = arith.constant 0 : index
    %14 = vector.load %arg7[%c0_12, %c0_13, %c0_14] : memref<1x4x2304xf32, #tpu.memory_space<vmem>>, vector<1x4x2304xf32>
    %15 = vector.shape_cast %14 : vector<1x4x2304xf32> to vector<4x2304xf32>
    %16 = vector.shape_cast %13 : vector<4x2304xf32> to vector<1x4x2304xf32>
    tpu.vector_store %arg7[%c0_12, %c0_13, %c0_14], %16 {strides = array<i32>} : memref<1x4x2304xf32, #tpu.memory_space<vmem>>, vector<1x4x2304xf32>,
    return
  }
  func.func @transform_0(%arg0: i32, %arg1: i32) -> (i32, i32, i32) {
    %c0_i32 = arith.constant 0 : i32
    %c0_i32_0 = arith.constant 0 : i32
    return %arg0, %c0_i32, %arg1 : i32, i32, i32
  }
  func.func @transform_1(%arg0: i32, %arg1: i32) -> (i32, i32) {
    %c0_i32 = arith.constant 0 : i32
    %c0_i32_0 = arith.constant 0 : i32
    %c0_i32_1 = arith.constant 0 : i32
    return %c0_i32, %c0_i32_0 : i32, i32
  }
  func.func @transform_2(%arg0: i32, %arg1: i32) -> (i32, i32) {
    %c0_i32 = arith.constant 0 : i32
    %c0_i32_0 = arith.constant 0 : i32
    %c0_i32_1 = arith.constant 0 : i32
    return %c0_i32, %c0_i32_0 : i32, i32
  }
  func.func @transform_3(%arg0: i32, %arg1: i32) -> (i32, i32) {
    %c0_i32 = arith.constant 0 : i32
    %c0_i32_0 = arith.constant 0 : i32
    %c0_i32_1 = arith.constant 0 : i32
    return %c0_i32, %c0_i32_0 : i32, i32
  }
  func.func @transform_4(%arg0: i32, %arg1: i32) -> (i32, i32) {
    %c0_i32 = arith.constant 0 : i32
    %c0_i32_0 = arith.constant 0 : i32
    %c0_i32_1 = arith.constant 0 : i32
    return %c0_i32, %c0_i32_0 : i32, i32
  }
  func.func @transform_5(%arg0: i32, %arg1: i32) -> (i32, i32, i32) {
    %c0_i32 = arith.constant 0 : i32
    %c0_i32_0 = arith.constant 0 : i32
    return %arg0, %c0_i32, %arg1 : i32, i32, i32
  }
}

module attributes {stable_mosaic.version = 11 : i64} {
  func.func @kernel(%arg0: i32, %arg1: memref<8x48x48xf32, #tpu.memory_space<vmem>>, %arg2: memref<8x24x24xf32, #tpu.memory_space<vmem>>, %arg3: memref<48x24xf32, #tpu.memory_space<vmem>>, %arg4: memref<24x48xf32, #tpu.memory_space<vmem>>, %arg5: memref<48x48xf32, #tpu.memory_space<vmem>>, %arg6: memref<48x48xf32, #tpu.memory_space<vmem>>, %arg7: memref<48x48xf32, #tpu.memory_space<vmem>>, %arg8: memref<8x48x48xf32, #tpu.memory_space<vmem>>) attributes {dimension_semantics = [#tpu.dimension_semantics<parallel>], iteration_bounds = array<i64: 1>, scalar_prefetch = 0 : i64, scratch_operands = 0 : i64, tpu.core_type = #tpu.core_type<tc>, window_params = [{transform_indices = @transform_0, window_bounds = array<i64: 8, 48, 48>}, {transform_indices = @transform_1, window_bounds = array<i64: 8, 24, 24>}, {pipeline_mode = #tpu.pipeline_mode<synchronous>, transform_indices = @transform_2, window_bounds = array<i64: 48, 24>}, {pipeline_mode = #tpu.pipeline_mode<synchronous>, transform_indices = @transform_3, window_bounds = array<i64: 24, 48>}, {pipeline_mode = #tpu.pipeline_mode<synchronous>, transform_indices = @transform_4, window_bounds = array<i64: 48, 48>}, {pipeline_mode = #tpu.pipeline_mode<synchronous>, transform_indices = @transform_5, window_bounds = array<i64: 48, 48>}, {pipeline_mode = #tpu.pipeline_mode<synchronous>, transform_indices = @transform_6, window_bounds = array<i64: 48, 48>}, {transform_indices = @transform_7, window_bounds = array<i64: 8, 48, 48>}]} {
    %c0 = arith.constant 0 : index
    %c0_0 = arith.constant 0 : index
    %c0_1 = arith.constant 0 : index
    %0 = vector.load %arg1[%c0, %c0_0, %c0_1] : memref<8x48x48xf32, #tpu.memory_space<vmem>>, vector<8x48x48xf32>
    %c0_2 = arith.constant 0 : index
    %c0_3 = arith.constant 0 : index
    %c0_4 = arith.constant 0 : index
    %1 = vector.load %arg2[%c0_2, %c0_3, %c0_4] : memref<8x24x24xf32, #tpu.memory_space<vmem>>, vector<8x24x24xf32>
    %c0_5 = arith.constant 0 : index
    %c0_6 = arith.constant 0 : index
    %2 = vector.load %arg7[%c0_5, %c0_6] : memref<48x48xf32, #tpu.memory_space<vmem>>, vector<48x48xf32>
    %c0_7 = arith.constant 0 : index
    %c0_8 = arith.constant 0 : index
    %3 = vector.load %arg3[%c0_7, %c0_8] : memref<48x24xf32, #tpu.memory_space<vmem>>, vector<48x24xf32>
    %4 = vector.shape_cast %3 : vector<48x24xf32> to vector<1x48x24xf32>
    %5 = vector.broadcast %4 : vector<1x48x24xf32> to vector<8x48x24xf32>
    %c0_9 = arith.constant 0 : index
    %c0_10 = arith.constant 0 : index
    %6 = vector.load %arg4[%c0_9, %c0_10] : memref<24x48xf32, #tpu.memory_space<vmem>>, vector<24x48xf32>
    %7 = vector.shape_cast %6 : vector<24x48xf32> to vector<1x24x48xf32>
    %8 = vector.broadcast %7 : vector<1x24x48xf32> to vector<8x24x48xf32>
    "tpu.trace_start"() <{level = 10 : i32, message = "cmk,ckn->cmn"}> : () -> ()
    %cst = arith.constant dense<0.000000e+00> : vector<8x48x24xf32>
    %9 = tpu.matmul %5, %1, %cst {dimension_numbers = #tpu.dot_dimension_numbers<[2], [1], [1], [2], [0, 0, 0, 1, 1, 2], [0], [0]>} : vector<8x48x24xf32>, vector<8x24x24xf32>, vector<8x48x24xf32> -> vector<8x48x24xf32>
    %cst_11 = arith.constant dense<0.000000e+00> : vector<8x48x48xf32>
    %10 = tpu.matmul %9, %8, %cst_11 {dimension_numbers = #tpu.dot_dimension_numbers<[2], [1], [1], [2], [0, 0, 0, 1, 1, 2], [0], [0]>} : vector<8x48x24xf32>, vector<8x24x48xf32>, vector<8x48x48xf32> -> vector<8x48x48xf32>
    "tpu.trace_stop"() : () -> ()
    %c0_12 = arith.constant 0 : index
    %c0_13 = arith.constant 0 : index
    %11 = vector.load %arg5[%c0_12, %c0_13] : memref<48x48xf32, #tpu.memory_space<vmem>>, vector<48x48xf32>
    %12 = vector.shape_cast %11 : vector<48x48xf32> to vector<1x48x48xf32>
    %13 = vector.broadcast %12 : vector<1x48x48xf32> to vector<8x48x48xf32>
    %c0_14 = arith.constant 0 : index
    %c0_15 = arith.constant 0 : index
    %14 = vector.load %arg6[%c0_14, %c0_15] : memref<48x48xf32, #tpu.memory_space<vmem>>, vector<48x48xf32>
    %15 = vector.shape_cast %14 : vector<48x48xf32> to vector<1x48x48xf32>
    %16 = vector.broadcast %15 : vector<1x48x48xf32> to vector<8x48x48xf32>
    "tpu.trace_start"() <{level = 10 : i32, message = "cmk,ckn->cmn"}> : () -> ()
    %cst_16 = arith.constant dense<0.000000e+00> : vector<8x48x48xf32>
    %17 = tpu.matmul %13, %0, %cst_16 {dimension_numbers = #tpu.dot_dimension_numbers<[2], [1], [1], [2], [0, 0, 0, 1, 1, 2], [0], [0]>} : vector<8x48x48xf32>, vector<8x48x48xf32>, vector<8x48x48xf32> -> vector<8x48x48xf32>
    %cst_17 = arith.constant dense<0.000000e+00> : vector<8x48x48xf32>
    %18 = tpu.matmul %17, %16, %cst_17 {dimension_numbers = #tpu.dot_dimension_numbers<[2], [1], [1], [2], [0, 0, 0, 1, 1, 2], [0], [0]>} : vector<8x48x48xf32>, vector<8x48x48xf32>, vector<8x48x48xf32> -> vector<8x48x48xf32>
    "tpu.trace_stop"() : () -> ()
    %19 = vector.shape_cast %2 : vector<48x48xf32> to vector<1x48x48xf32>
    %20 = vector.broadcast %19 : vector<1x48x48xf32> to vector<8x48x48xf32>
    %21 = arith.mulf %18, %20 : vector<8x48x48xf32>
    "tpu.trace_start"() <{level = 10 : i32, message = "cmk,ckn->cmn"}> : () -> ()
    %cst_18 = arith.constant dense<0.000000e+00> : vector<8x48x48xf32>
    %22 = tpu.matmul %13, %10, %cst_18 {dimension_numbers = #tpu.dot_dimension_numbers<[2], [1], [1], [2], [0, 0, 0, 1, 1, 2], [0], [0]>} : vector<8x48x48xf32>, vector<8x48x48xf32>, vector<8x48x48xf32> -> vector<8x48x48xf32>
    %cst_19 = arith.constant dense<0.000000e+00> : vector<8x48x48xf32>
    %23 = tpu.matmul %22, %16, %cst_19 {dimension_numbers = #tpu.dot_dimension_numbers<[2], [1], [1], [2], [0, 0, 0, 1, 1, 2], [0], [0]>} : vector<8x48x48xf32>, vector<8x48x48xf32>, vector<8x48x48xf32> -> vector<8x48x48xf32>
    "tpu.trace_stop"() : () -> ()
    %24 = vector.shape_cast %2 : vector<48x48xf32> to vector<1x48x48xf32>
    %25 = vector.broadcast %24 : vector<1x48x48xf32> to vector<8x48x48xf32>
    %26 = arith.mulf %23, %25 : vector<8x48x48xf32>
    %27 = arith.mulf %0, %10 : vector<8x48x48xf32>
    "tpu.trace_start"() <{level = 10 : i32, message = "cmk,ckn->cmn"}> : () -> ()
    %cst_20 = arith.constant dense<0.000000e+00> : vector<8x48x48xf32>
    %28 = tpu.matmul %13, %27, %cst_20 {dimension_numbers = #tpu.dot_dimension_numbers<[2], [1], [1], [2], [0, 0, 0, 1, 1, 2], [0], [0]>} : vector<8x48x48xf32>, vector<8x48x48xf32>, vector<8x48x48xf32> -> vector<8x48x48xf32>
    %cst_21 = arith.constant dense<0.000000e+00> : vector<8x48x48xf32>
    %29 = tpu.matmul %28, %16, %cst_21 {dimension_numbers = #tpu.dot_dimension_numbers<[2], [1], [1], [2], [0, 0, 0, 1, 1, 2], [0], [0]>} : vector<8x48x48xf32>, vector<8x48x48xf32>, vector<8x48x48xf32> -> vector<8x48x48xf32>
    "tpu.trace_stop"() : () -> ()
    %30 = vector.shape_cast %2 : vector<48x48xf32> to vector<1x48x48xf32>
    %31 = vector.broadcast %30 : vector<1x48x48xf32> to vector<8x48x48xf32>
    %32 = arith.mulf %29, %31 : vector<8x48x48xf32>
    %33 = arith.mulf %21, %26 : vector<8x48x48xf32>
    %34 = arith.subf %32, %33 : vector<8x48x48xf32>
    %35 = arith.mulf %0, %0 : vector<8x48x48xf32>
    "tpu.trace_start"() <{level = 10 : i32, message = "cmk,ckn->cmn"}> : () -> ()
    %cst_22 = arith.constant dense<0.000000e+00> : vector<8x48x48xf32>
    %36 = tpu.matmul %13, %35, %cst_22 {dimension_numbers = #tpu.dot_dimension_numbers<[2], [1], [1], [2], [0, 0, 0, 1, 1, 2], [0], [0]>} : vector<8x48x48xf32>, vector<8x48x48xf32>, vector<8x48x48xf32> -> vector<8x48x48xf32>
    %cst_23 = arith.constant dense<0.000000e+00> : vector<8x48x48xf32>
    %37 = tpu.matmul %36, %16, %cst_23 {dimension_numbers = #tpu.dot_dimension_numbers<[2], [1], [1], [2], [0, 0, 0, 1, 1, 2], [0], [0]>} : vector<8x48x48xf32>, vector<8x48x48xf32>, vector<8x48x48xf32> -> vector<8x48x48xf32>
    "tpu.trace_stop"() : () -> ()
    %38 = vector.shape_cast %2 : vector<48x48xf32> to vector<1x48x48xf32>
    %39 = vector.broadcast %38 : vector<1x48x48xf32> to vector<8x48x48xf32>
    %40 = arith.mulf %37, %39 : vector<8x48x48xf32>
    %41 = arith.mulf %21, %21 : vector<8x48x48xf32>
    %42 = arith.subf %40, %41 : vector<8x48x48xf32>
    %cst_24 = arith.constant 0.000000e+00 : f32
    %43 = vector.broadcast %cst_24 : f32 to vector<8x48x48xf32>
    %44 = arith.maximumf %42, %43 : vector<8x48x48xf32>
    %cst_25 = arith.constant 0.00999999977 : f32
    %45 = vector.broadcast %cst_25 : f32 to vector<8x48x48xf32>
    %46 = arith.addf %44, %45 : vector<8x48x48xf32>
    %47 = tpu.reciprocal %46 {approx = true} : vector<8x48x48xf32> -> vector<8x48x48xf32>
    %48 = arith.mulf %34, %47 : vector<8x48x48xf32>
    %49 = arith.mulf %48, %21 : vector<8x48x48xf32>
    %50 = arith.subf %26, %49 : vector<8x48x48xf32>
    "tpu.trace_start"() <{level = 10 : i32, message = "cmk,ckn->cmn"}> : () -> ()
    %cst_26 = arith.constant dense<0.000000e+00> : vector<8x48x48xf32>
    %51 = tpu.matmul %13, %48, %cst_26 {dimension_numbers = #tpu.dot_dimension_numbers<[2], [1], [1], [2], [0, 0, 0, 1, 1, 2], [0], [0]>} : vector<8x48x48xf32>, vector<8x48x48xf32>, vector<8x48x48xf32> -> vector<8x48x48xf32>
    %cst_27 = arith.constant dense<0.000000e+00> : vector<8x48x48xf32>
    %52 = tpu.matmul %51, %16, %cst_27 {dimension_numbers = #tpu.dot_dimension_numbers<[2], [1], [1], [2], [0, 0, 0, 1, 1, 2], [0], [0]>} : vector<8x48x48xf32>, vector<8x48x48xf32>, vector<8x48x48xf32> -> vector<8x48x48xf32>
    "tpu.trace_stop"() : () -> ()
    %53 = vector.shape_cast %2 : vector<48x48xf32> to vector<1x48x48xf32>
    %54 = vector.broadcast %53 : vector<1x48x48xf32> to vector<8x48x48xf32>
    %55 = arith.mulf %52, %54 : vector<8x48x48xf32>
    %56 = arith.mulf %55, %0 : vector<8x48x48xf32>
    "tpu.trace_start"() <{level = 10 : i32, message = "cmk,ckn->cmn"}> : () -> ()
    %cst_28 = arith.constant dense<0.000000e+00> : vector<8x48x48xf32>
    %57 = tpu.matmul %13, %50, %cst_28 {dimension_numbers = #tpu.dot_dimension_numbers<[2], [1], [1], [2], [0, 0, 0, 1, 1, 2], [0], [0]>} : vector<8x48x48xf32>, vector<8x48x48xf32>, vector<8x48x48xf32> -> vector<8x48x48xf32>
    %cst_29 = arith.constant dense<0.000000e+00> : vector<8x48x48xf32>
    %58 = tpu.matmul %57, %16, %cst_29 {dimension_numbers = #tpu.dot_dimension_numbers<[2], [1], [1], [2], [0, 0, 0, 1, 1, 2], [0], [0]>} : vector<8x48x48xf32>, vector<8x48x48xf32>, vector<8x48x48xf32> -> vector<8x48x48xf32>
    "tpu.trace_stop"() : () -> ()
    %59 = vector.shape_cast %2 : vector<48x48xf32> to vector<1x48x48xf32>
    %60 = vector.broadcast %59 : vector<1x48x48xf32> to vector<8x48x48xf32>
    %61 = arith.mulf %58, %60 : vector<8x48x48xf32>
    %62 = arith.addf %56, %61 : vector<8x48x48xf32>
    %c0_30 = arith.constant 0 : index
    %c0_31 = arith.constant 0 : index
    %c0_32 = arith.constant 0 : index
    %63 = vector.load %arg8[%c0_30, %c0_31, %c0_32] : memref<8x48x48xf32, #tpu.memory_space<vmem>>, vector<8x48x48xf32>
    tpu.vector_store %arg8[%c0_30, %c0_31, %c0_32], %62 {strides = array<i32>} : memref<8x48x48xf32, #tpu.memory_space<vmem>>, vector<8x48x48xf32>,
    return
  }
  func.func @transform_0(%arg0: i32) -> (i32, i32, i32) {
    %c0_i32 = arith.constant 0 : i32
    %c0_i32_0 = arith.constant 0 : i32
    %c0_i32_1 = arith.constant 0 : i32
    return %arg0, %c0_i32, %c0_i32_0 : i32, i32, i32
  }
  func.func @transform_1(%arg0: i32) -> (i32, i32, i32) {
    %c0_i32 = arith.constant 0 : i32
    %c0_i32_0 = arith.constant 0 : i32
    %c0_i32_1 = arith.constant 0 : i32
    return %arg0, %c0_i32, %c0_i32_0 : i32, i32, i32
  }
  func.func @transform_2(%arg0: i32) -> (i32, i32) {
    %c0_i32 = arith.constant 0 : i32
    %c0_i32_0 = arith.constant 0 : i32
    %c0_i32_1 = arith.constant 0 : i32
    return %c0_i32, %c0_i32_0 : i32, i32
  }
  func.func @transform_3(%arg0: i32) -> (i32, i32) {
    %c0_i32 = arith.constant 0 : i32
    %c0_i32_0 = arith.constant 0 : i32
    %c0_i32_1 = arith.constant 0 : i32
    return %c0_i32, %c0_i32_0 : i32, i32
  }
  func.func @transform_4(%arg0: i32) -> (i32, i32) {
    %c0_i32 = arith.constant 0 : i32
    %c0_i32_0 = arith.constant 0 : i32
    %c0_i32_1 = arith.constant 0 : i32
    return %c0_i32, %c0_i32_0 : i32, i32
  }
  func.func @transform_5(%arg0: i32) -> (i32, i32) {
    %c0_i32 = arith.constant 0 : i32
    %c0_i32_0 = arith.constant 0 : i32
    %c0_i32_1 = arith.constant 0 : i32
    return %c0_i32, %c0_i32_0 : i32, i32
  }
  func.func @transform_6(%arg0: i32) -> (i32, i32) {
    %c0_i32 = arith.constant 0 : i32
    %c0_i32_0 = arith.constant 0 : i32
    %c0_i32_1 = arith.constant 0 : i32
    return %c0_i32, %c0_i32_0 : i32, i32
  }
  func.func @transform_7(%arg0: i32) -> (i32, i32, i32) {
    %c0_i32 = arith.constant 0 : i32
    %c0_i32_0 = arith.constant 0 : i32
    %c0_i32_1 = arith.constant 0 : i32
    return %arg0, %c0_i32, %c0_i32_0 : i32, i32, i32
  }
}

</mosaic_0001>

<bundles_post_ra>
// kernel: lgf_forward.2
= control target key start
LH: loop header
LB: loop body
LE: loop exit
PB: predicated region body
PF: predicated region fallthrough
CT: control target
= control target key end

     0   :  { %s2556_s18 = smov 0   ;;  %s2558_s19 = smov 0   ;;  %s3366_s0 = inlined_call_operand.vmem [shape: f32[2,3,2304], index: 0, kind: input, shape index: {}]   ;;  %s3367_s1 = inlined_call_operand.vmem [shape: f32[64,3], index: 1, kind: input, shape index: {}]   ;;  %s3368_s2 = inlined_call_operand.vmem [shape: f32[64,1], index: 2, kind: input, shape index: {}]   ;;  %s3369_s3 = inlined_call_operand.vmem [shape: f32[4,64], index: 3, kind: input, shape index: {}]   ;;  %s3370_s4 = inlined_call_operand.vmem [shape: f32[4,1], index: 4, kind: input, shape index: {}]   ;;  %s3371_s5 = inlined_call_operand.vmem [shape: f32[2,4,2304], index: 5, kind: output, shape index: {}]  }
   0x1   :  { %s2560_s20 = smov 0  }
   0x2 LB: > { %s27_s21 = sadd.s32 1, %s2518_s19  ;;  %p2356_p0 = scmp.ge.s32.totalorder %s2522_s20, 1  ;;  %s2522_s20 = sphi %s2560_s20, %s15_s20   ;;  %s2518_s19 = sphi %s2558_s19, %s3373_s19   ;;  %s2514_s18 = sphi %s2556_s18, %s3372_s18  }
   0x3   : > { %p29_p1 = scmp.ge.s32.totalorder %s27_s21, 2  ;;  %p208_p2 = scmp.lt.s32.totalorder %s2522_s20, 3 }
   0x5   : > { %s3375_s21 = smov (%p29_p1, %s27_s21), 0  ;;  %p209_p3 = pnand %p2356_p0, %p208_p2 }
   0x6   : > { %p245_p4 = scmp.lt.s32.totalorder (!%p209_p3), %s2514_s18, 1 }
   0x7   : > { %212 = sbr.rel (%p209_p3) target bundleno = 585 (0x249), region = 40 }
   0xc   : > { %v2524_v0 = vmov 0.0   ;;  %s3377_s18 = smov (!%p245_p4, %s2514_s18), 1  ;;  %v2525_v1 = vmov 0   ;;  %v286_v2 = vld [vmem:[%s3368_s2 + $0x28] sm:$0xff]  ;;  %v288_v3 = vld [vmem:[%s3368_s2 + $0x38] sm:$0xff]  ;;  %v285_v4 = vld [vmem:[%s3368_s2 + $0x20] sm:$0xff] }
   0xd   : > { %473 = vmatprep.mubr.f32.mxu0 %v2524_v0  ;;  %509 = vmatprep.mubr.f32.mxu1 %v2524_v0  ;;  %s2462_s26 = smul.u32 72, %s3377_s18  ;;  %v287_v5 = vld [vmem:[%s3368_s2 + $0x30] sm:$0xff]  ;;  %vm372_vm0 = vcmask 1042432   ;;  %v2607_v11 = vld [vmem:[%s3367_s1] sm:$0xff]  ;;  %vm347_vm1 = vcmask 23552   ;;  %v2630_v17 = vld [vmem:[%s3367_s1 + $0x8] sm:$0xff] }
   0xe   : > { %2490 = vset.pattern.permute.xlu1 %v2525_v1  ;;  %2489 = vset.pattern.permute.xlu0 %v2525_v1  ;;  %v2612_v12 = vld [vmem:[%s3367_s1 + $0x30] sm:$0xff]  ;;  %v2635_v18 = vld [vmem:[%s3367_s1 + $0x38] sm:$0xff]  ;;  %v281_v25 = vld [vmem:[%s3368_s2] sm:$0xff]  ;;  %vm1577_vm2 = vcmask 523264  }
   0xf   : > { %316 = vperm.xlu1 %2490, %v286_v2   ;;  %326 = vperm.xlu0 %2489, %v288_v3   ;;  %s2596_s8 = scalar_lea.vmem %s3366_s0, %s2462_s26  ;;  %v283_v21 = vld [vmem:[%s3368_s2 + $0x10] sm:$0xff]  ;;  %v284_v22 = vld [vmem:[%s3368_s2 + $0x18] sm:$0xff]  ;;  %v282_v27 = vld [vmem:[%s3368_s2 + $0x8] sm:$0xff]  ;;  %s3346_s23 = scalar_lea.vmem %s3371_s5, %s2462_s26 }
  0x10   : > { %v264_v6 = vld [vmem:[%s2596_s8] sm:$0x77]  ;;  %v266_v7 = vld [vmem:[%s2596_s8 + $0x10] sm:$0x77]  ;;  %v265_v9 = vld [vmem:[%s2596_s8 + $0x8] sm:$0x77] }
  0x11   : > { %v338_v8 = vcombine.high %v264_v6, %v264_v6  ;;  %v2602_v10 = vld [vmem:[%s2596_s8 + $0x20] sm:$0x77]  ;;  %v340_v13 = vcombine.high %v266_v7, %v266_v7  ;;  %v339_v14 = vcombine.high %v265_v9, %v265_v9  ;;  %v267_v15 = vld [vmem:[%s2596_s8 + $0x18] sm:$0x77]  ;;  %v2646_v20 = vld [vmem:[%s2596_s8 + $0x28] sm:$0x77] }
  0x12   : > { %v342_v16 = vcombine.high %v2602_v10, %v2602_v10  ;;  %v341_v19 = vcombine.high %v267_v15, %v267_v15  ;;  %v2659_v23 = vld [vmem:[%s3367_s1 + $0x10] sm:$0xff]  ;;  %v343_v24 = vcombine.high %v2646_v20, %v2646_v20  ;;  %v2677_v26 = vld [vmem:[%s3367_s1 + $0x18] sm:$0xff]  ;;  %v2693_v28 = vld [vmem:[%s3367_s1 + $0x20] sm:$0xff] }
  0x13   : > { %311 = vperm.xlu1 %2490, %v285_v4   ;;  %321 = vperm.xlu0 %2489, %v287_v5   ;;  %v1571_v29 = vld [vmem:[%s3370_s4] sm:$0xf]  ;;  %v2707_v30 = vld [vmem:[%s3367_s1 + $0x28] sm:$0xff]  ;;  %v270_v31 = vld [vmem:[%s2596_s8 + $0x30] sm:$0x77] }
  0x14   : > { %2359 = vmatprep.subr.msk.mxu0 %vm372_vm0, %v338_v8  ;;  %2460 = vmatprep.subr.msk.mxu1 %vm372_vm0, %v338_v8  ;;  %v344_v32 = vcombine.high %v270_v31, %v270_v31  ;;  %v271_v33 = vld [vmem:[%s2596_s8 + $0x38] sm:$0x77]  ;;  %v272_v35 = vld [vmem:[%s2596_s8 + $0x40] sm:$0x77] }
  0x15   : > { %2360 = vmatpush1.msk.msra.mxu0 %vm372_vm0, %v264_v6  ;;  %2461 = vmatpush1.msk.msra.mxu1 %vm372_vm0, %v264_v6  ;;  %v345_v34 = vcombine.high %v271_v33, %v271_v33  ;;  %v346_v36 = vcombine.high %v272_v35, %v272_v35 }
  0x16   : > { %2361 = vmatmul.mubr.msk.f32.vlgmr.msra.gmra.mxu0 %vm347_vm1, %v2607_v11  ;;  %2367 = vmatmul.mubr.msk.f32.vlgmr.msra.gmra.mxu1 %vm347_vm1, %v2612_v12 }
  0x17   : > { %2379 = vmatprep.subr.msk.mxu0 %vm372_vm0, %v340_v13  ;;  %479 = vmatprep.mubr.f32.mxu0 %v2524_v0 }
  0x18   : > { %2380 = vmatpush1.msk.msra.mxu0 %vm372_vm0, %v266_v7  ;;  %515 = vmatprep.mubr.f32.mxu1 %v2524_v0 }
  0x19   : > { %2369 = vmatprep.subr.msk.mxu1 %vm372_vm0, %v339_v14  ;;  %2399 = vmatprep.subr.msk.mxu0 %vm372_vm0, %v342_v16 }
  0x1a   : > { %2362 = vmatmul.mubr.msk.f32.gmra.mxu0 %vm347_vm1, %v2630_v17  ;;  %2368 = vmatmul.mubr.msk.f32.gmra.mxu1 %vm347_vm1, %v2635_v18 }
  0x1b   : > { %485 = vmatprep.mubr.f32.mxu0 %v2524_v0  ;;  %2370 = vmatpush1.msk.msra.mxu1 %vm372_vm0, %v265_v9 }
  0x1c   : > { %586 = vmatprep.mubr.f32.mxu1 %v2524_v0  ;;  %2389 = vmatprep.subr.msk.mxu1 %vm372_vm0, %v341_v19 }
  0x1d   : > { %301 = vperm.xlu1 %2490, %v283_v21   ;;  %306 = vperm.xlu0 %2489, %v284_v22  }
  0x1e   : > { %2363 = vmatmul.mubr.msk.f32.gmra.mxu0 %vm347_vm1, %v2659_v23  ;;  %2371 = vmatmul.mubr.msk.f32.vlgmr.msra.gmra.mxu1 %vm347_vm1, %v2607_v11 }
  0x1f   : > { %491 = vmatprep.mubr.f32.mxu0 %v2524_v0  ;;  %592 = vmatprep.mubr.f32.mxu1 %v2524_v0 }
  0x20   : > { %2390 = vmatpush1.msk.msra.mxu1 %vm372_vm0, %v267_v15 }
  0x21   : > { %2409 = vmatprep.subr.msk.mxu1 %vm372_vm0, %v343_v24  ;;  %291 = vperm.xlu1 %2490, %v281_v25  }
  0x22   : > { %2364 = vmatmul.mubr.msk.f32.gmra.mxu0 %vm347_vm1, %v2677_v26  ;;  %2372 = vmatmul.mubr.msk.f32.gmra.mxu1 %vm347_vm1, %v2630_v17 }
  0x23   : > { %497 = vmatprep.mubr.f32.mxu0 %v2524_v0  ;;  %598 = vmatprep.mubr.f32.mxu1 %v2524_v0 }
  0x24   : > { %296 = vperm.xlu0 %2489, %v282_v27  }
  0x26   : > { %2365 = vmatmul.mubr.msk.f32.gmra.mxu0 %vm347_vm1, %v2693_v28  ;;  %2373 = vmatmul.mubr.msk.f32.gmra.mxu1 %vm347_vm1, %v2659_v23 }
  0x27   : > { %503 = vmatprep.mubr.f32.mxu0 %v2524_v0  ;;  %604 = vmatprep.mubr.f32.mxu1 %v2524_v0 }
  0x28   : > { %1574 = vperm.xlu0 %2489, %v1571_v29  }
  0x2a   : > { %2366 = vmatmul.mubr.msk.f32.gmra.mxu0 %vm347_vm1, %v2707_v30  ;;  %2374 = vmatmul.mubr.msk.f32.gmra.mxu1 %vm347_vm1, %v2677_v26 }
  0x2b   : > { %610 = vmatprep.mubr.f32.mxu1 %v2524_v0  ;;  %699 = vmatprep.mubr.f32.mxu0 %v2524_v0 }
  0x2e   : > { %2375 = vmatmul.mubr.msk.f32.gmra.mxu1 %vm347_vm1, %v2693_v28  ;;  %2381 = vmatmul.mubr.msk.f32.vlgmr.msra.gmra.mxu0 %vm347_vm1, %v2607_v11 }
  0x2f   : > { %2400 = vmatpush1.msk.msra.mxu0 %vm372_vm0, %v2602_v10  ;;  %616 = vmatprep.mubr.f32.mxu1 %v2524_v0 }
  0x30   : > { %705 = vmatprep.mubr.f32.mxu0 %v2524_v0  ;;  %2419 = vmatprep.subr.msk.mxu0 %vm372_vm0, %v344_v32 }
  0x32   : > { %2376 = vmatmul.mubr.msk.f32.gmra.mxu1 %vm347_vm1, %v2707_v30  ;;  %2382 = vmatmul.mubr.msk.f32.gmra.mxu0 %vm347_vm1, %v2630_v17 }
  0x33   : > { %622 = vmatprep.mubr.f32.mxu1 %v2524_v0  ;;  %711 = vmatprep.mubr.f32.mxu0 %v2524_v0 }
  0x36   : > { %2377 = vmatmul.mubr.msk.f32.gmra.mxu1 %vm347_vm1, %v2612_v12  ;;  %2383 = vmatmul.mubr.msk.f32.gmra.mxu0 %vm347_vm1, %v2659_v23 }
  0x37   : > { %628 = vmatprep.mubr.f32.mxu1 %v2524_v0  ;;  %717 = vmatprep.mubr.f32.mxu0 %v2524_v0 }
  0x3a   : > { %2378 = vmatmul.mubr.msk.f32.gmra.mxu1 %vm347_vm1, %v2635_v18  ;;  %2384 = vmatmul.mubr.msk.f32.gmra.mxu0 %vm347_vm1, %v2677_v26 }
  0x3b   : > { %723 = vmatprep.mubr.f32.mxu0 %v2524_v0  ;;  %812 = vmatprep.mubr.f32.mxu1 %v2524_v0 }
  0x3e   : > { %2385 = vmatmul.mubr.msk.f32.gmra.mxu0 %vm347_vm1, %v2693_v28  ;;  %2391 = vmatmul.mubr.msk.f32.vlgmr.msra.gmra.mxu1 %vm347_vm1, %v2607_v11 }
  0x3f   : > { %729 = vmatprep.mubr.f32.mxu0 %v2524_v0  ;;  %818 = vmatprep.mubr.f32.mxu1 %v2524_v0 }
  0x40   : > { %2410 = vmatpush1.msk.msra.mxu1 %vm372_vm0, %v2646_v20 }
  0x41   : > { %2429 = vmatprep.subr.msk.mxu1 %vm372_vm0, %v345_v34 }
  0x42   : > { %2386 = vmatmul.mubr.msk.f32.gmra.mxu0 %vm347_vm1, %v2707_v30  ;;  %2392 = vmatmul.mubr.msk.f32.gmra.mxu1 %vm347_vm1, %v2630_v17 }
  0x43   : > { %735 = vmatprep.mubr.f32.mxu0 %v2524_v0  ;;  %824 = vmatprep.mubr.f32.mxu1 %v2524_v0 }
  0x46   : > { %2387 = vmatmul.mubr.msk.f32.gmra.mxu0 %vm347_vm1, %v2612_v12  ;;  %2393 = vmatmul.mubr.msk.f32.gmra.mxu1 %vm347_vm1, %v2659_v23 }
  0x47   : > { %741 = vmatprep.mubr.f32.mxu0 %v2524_v0  ;;  %830 = vmatprep.mubr.f32.mxu1 %v2524_v0 }
  0x4a   : > { %2388 = vmatmul.mubr.msk.f32.gmra.mxu0 %vm347_vm1, %v2635_v18  ;;  %2394 = vmatmul.mubr.msk.f32.gmra.mxu1 %vm347_vm1, %v2677_v26 }
  0x4b   : > { %836 = vmatprep.mubr.f32.mxu1 %v2524_v0  ;;  %925 = vmatprep.mubr.f32.mxu0 %v2524_v0 }
  0x4e   : > { %2395 = vmatmul.mubr.msk.f32.gmra.mxu1 %vm347_vm1, %v2693_v28  ;;  %2401 = vmatmul.mubr.msk.f32.vlgmr.msra.gmra.mxu0 %vm347_vm1, %v2607_v11 }
  0x4f   : > { %2420 = vmatpush1.msk.msra.mxu0 %vm372_vm0, %v270_v31  ;;  %842 = vmatprep.mubr.f32.mxu1 %v2524_v0 }
  0x50   : > { %931 = vmatprep.mubr.f32.mxu0 %v2524_v0  ;;  %2439 = vmatprep.subr.msk.mxu0 %vm372_vm0, %v346_v36 }
  0x52   : > { %2396 = vmatmul.mubr.msk.f32.gmra.mxu1 %vm347_vm1, %v2707_v30  ;;  %2402 = vmatmul.mubr.msk.f32.gmra.mxu0 %vm347_vm1, %v2630_v17 }
  0x53   : > { %848 = vmatprep.mubr.f32.mxu1 %v2524_v0  ;;  %937 = vmatprep.mubr.f32.mxu0 %v2524_v0 }
  0x56   : > { %2397 = vmatmul.mubr.msk.f32.gmra.mxu1 %vm347_vm1, %v2612_v12  ;;  %2403 = vmatmul.mubr.msk.f32.gmra.mxu0 %vm347_vm1, %v2659_v23 }
  0x57   : > { %854 = vmatprep.mubr.f32.mxu1 %v2524_v0  ;;  %943 = vmatprep.mubr.f32.mxu0 %v2524_v0 }
  0x5a   : > { %2398 = vmatmul.mubr.msk.f32.gmra.mxu1 %vm347_vm1, %v2635_v18  ;;  %2404 = vmatmul.mubr.msk.f32.gmra.mxu0 %vm347_vm1, %v2677_v26 }
  0x5b   : > { %949 = vmatprep.mubr.f32.mxu0 %v2524_v0  ;;  %1038 = vmatprep.mubr.f32.mxu1 %v2524_v0 }
  0x5e   : > { %2405 = vmatmul.mubr.msk.f32.gmra.mxu0 %vm347_vm1, %v2693_v28  ;;  %2411 = vmatmul.mubr.msk.f32.vlgmr.msra.gmra.mxu1 %vm347_vm1, %v2607_v11 }
  0x5f   : > { %955 = vmatprep.mubr.f32.mxu0 %v2524_v0  ;;  %1044 = vmatprep.mubr.f32.mxu1 %v2524_v0 }
  0x60   : > { %2430 = vmatpush1.msk.msra.mxu1 %vm372_vm0, %v271_v33 }
  0x62   : > { %2406 = vmatmul.mubr.msk.f32.gmra.mxu0 %vm347_vm1, %v2707_v30  ;;  %2412 = vmatmul.mubr.msk.f32.gmra.mxu1 %vm347_vm1, %v2630_v17 }
  0x63   : > { %961 = vmatprep.mubr.f32.mxu0 %v2524_v0  ;;  %1050 = vmatprep.mubr.f32.mxu1 %v2524_v0 }
  0x66   : > { %2407 = vmatmul.mubr.msk.f32.gmra.mxu0 %vm347_vm1, %v2612_v12  ;;  %2413 = vmatmul.mubr.msk.f32.gmra.mxu1 %vm347_vm1, %v2659_v23 }
  0x67   : > { %967 = vmatprep.mubr.f32.mxu0 %v2524_v0  ;;  %1056 = vmatprep.mubr.f32.mxu1 %v2524_v0 }
  0x6a   : > { %2408 = vmatmul.mubr.msk.f32.gmra.mxu0 %vm347_vm1, %v2635_v18  ;;  %2414 = vmatmul.mubr.msk.f32.gmra.mxu1 %vm347_vm1, %v2677_v26 }
  0x6b   : > { %1062 = vmatprep.mubr.f32.mxu1 %v2524_v0  ;;  %1151 = vmatprep.mubr.f32.mxu0 %v2524_v0 }
  0x6e   : > { %2415 = vmatmul.mubr.msk.f32.gmra.mxu1 %vm347_vm1, %v2693_v28  ;;  %2421 = vmatmul.mubr.msk.f32.vlgmr.msra.gmra.mxu0 %vm347_vm1, %v2607_v11 }
  0x6f   : > { %2440 = vmatpush1.msk.msra.mxu0 %vm372_vm0, %v272_v35  ;;  %1068 = vmatprep.mubr.f32.mxu1 %v2524_v0 }
  0x70   : > { %1157 = vmatprep.mubr.f32.mxu0 %v2524_v0 }
  0x72   : > { %2416 = vmatmul.mubr.msk.f32.gmra.mxu1 %vm347_vm1, %v2707_v30  ;;  %2422 = vmatmul.mubr.msk.f32.gmra.mxu0 %vm347_vm1, %v2630_v17 }
  0x73   : > { %1074 = vmatprep.mubr.f32.mxu1 %v2524_v0  ;;  %1163 = vmatprep.mubr.f32.mxu0 %v2524_v0 }
  0x76   : > { %2417 = vmatmul.mubr.msk.f32.gmra.mxu1 %vm347_vm1, %v2612_v12  ;;  %2423 = vmatmul.mubr.msk.f32.gmra.mxu0 %vm347_vm1, %v2659_v23 }
  0x77   : > { %1080 = vmatprep.mubr.f32.mxu1 %v2524_v0  ;;  %1169 = vmatprep.mubr.f32.mxu0 %v2524_v0 }
  0x7a   : > { %2418 = vmatmul.mubr.msk.f32.gmra.mxu1 %vm347_vm1, %v2635_v18  ;;  %2424 = vmatmul.mubr.msk.f32.gmra.mxu0 %vm347_vm1, %v2677_v26 }
  0x7b   : > { %1175 = vmatprep.mubr.f32.mxu0 %v2524_v0  ;;  %1264 = vmatprep.mubr.f32.mxu1 %v2524_v0 }
  0x7e   : > { %2425 = vmatmul.mubr.msk.f32.gmra.mxu0 %vm347_vm1, %v2693_v28  ;;  %2431 = vmatmul.mubr.msk.f32.vlgmr.msra.gmra.mxu1 %vm347_vm1, %v2607_v11 }
  0x7f   : > { %1181 = vmatprep.mubr.f32.mxu0 %v2524_v0  ;;  %1270 = vmatprep.mubr.f32.mxu1 %v2524_v0 }
  0x82   : > { %2426 = vmatmul.mubr.msk.f32.gmra.mxu0 %vm347_vm1, %v2707_v30  ;;  %2432 = vmatmul.mubr.msk.f32.gmra.mxu1 %vm347_vm1, %v2630_v17 }
  0x83   : > { %1187 = vmatprep.mubr.f32.mxu0 %v2524_v0  ;;  %1276 = vmatprep.mubr.f32.mxu1 %v2524_v0 }
  0x86   : > { %2427 = vmatmul.mubr.msk.f32.gmra.mxu0 %vm347_vm1, %v2612_v12  ;;  %2433 = vmatmul.mubr.msk.f32.gmra.mxu1 %vm347_vm1, %v2659_v23 }
  0x87   : > { %1193 = vmatprep.mubr.f32.mxu0 %v2524_v0  ;;  %1282 = vmatprep.mubr.f32.mxu1 %v2524_v0 }
  0x8a   : > { %2428 = vmatmul.mubr.msk.f32.gmra.mxu0 %vm347_vm1, %v2635_v18  ;;  %2434 = vmatmul.mubr.msk.f32.gmra.mxu1 %vm347_vm1, %v2677_v26  ;;  %v2908_v37 = vpop.permute.xlu0 %326  ;;  %v2926_v59 = vpop.permute.xlu1 %316 }
  0x8b   : > { %1288 = vmatprep.mubr.f32.mxu1 %v2524_v0  ;;  %1377 = vmatprep.mubr.f32.mxu0 %v2524_v0 }
  0x8e   : > { %2435 = vmatmul.mubr.msk.f32.gmra.mxu1 %vm347_vm1, %v2693_v28  ;;  %2441 = vmatmul.mubr.msk.f32.vlgmr.msra.gmra.mxu0 %vm347_vm1, %v2607_v11  ;;  %v2914_v42 = vpop.permute.xlu0 %321  ;;  %v2934_v3 = vpop.permute.xlu1 %311 }
  0x8f   : > { %1294 = vmatprep.mubr.f32.mxu1 %v2524_v0  ;;  %1383 = vmatprep.mubr.f32.mxu0 %v2524_v0 }
  0x92   : > { %2436 = vmatmul.mubr.msk.f32.gmra.mxu1 %vm347_vm1, %v2707_v30  ;;  %2442 = vmatmul.mubr.msk.f32.gmra.mxu0 %vm347_vm1, %v2630_v17 }
  0x93   : > { %1300 = vmatprep.mubr.f32.mxu1 %v2524_v0  ;;  %1389 = vmatprep.mubr.f32.mxu0 %v2524_v0 }
  0x96   : > { %2437 = vmatmul.mubr.msk.f32.gmra.mxu1 %vm347_vm1, %v2612_v12  ;;  %2443 = vmatmul.mubr.msk.f32.gmra.mxu0 %vm347_vm1, %v2659_v23 }
  0x97   : > { %1306 = vmatprep.mubr.f32.mxu1 %v2524_v0  ;;  %1395 = vmatprep.mubr.f32.mxu0 %v2524_v0 }
  0x98   : > { %v2940_v8 = vpop.permute.xlu0 %306 }
  0x9a   : > { %2438 = vmatmul.mubr.msk.f32.gmra.mxu1 %vm347_vm1, %v2635_v18  ;;  %2444 = vmatmul.mubr.msk.f32.gmra.mxu0 %vm347_vm1, %v2677_v26 }
  0x9b   : > { %1401 = vmatprep.mubr.f32.mxu0 %v2524_v0  ;;  %1645 = vmatprep.mubr.f32.mxu1 %v2524_v0 }
  0x9e   : > { %2445 = vmatmul.mubr.msk.f32.gmra.mxu0 %vm347_vm1, %v2693_v28 }
  0x9f   : > { %1407 = vmatprep.mubr.f32.mxu0 %v2524_v0  ;;  %v2958_v24 = vpop.permute.xlu0 %296 }
  0xa2   : > { %2446 = vmatmul.mubr.msk.f32.gmra.mxu0 %vm347_vm1, %v2707_v30 }
  0xa3   : > { %1413 = vmatprep.mubr.f32.mxu0 %v2524_v0 }
  0xa6   : > { %2447 = vmatmul.mubr.msk.f32.gmra.mxu0 %vm347_vm1, %v2612_v12  ;;  %v2945_v12 = vpop.permute.xlu1 %301 }
  0xa7   : > { %1419 = vmatprep.mubr.f32.mxu0 %v2524_v0 }
  0xaa   : > { %2448 = vmatmul.mubr.msk.f32.gmra.mxu0 %vm347_vm1, %v2635_v18  ;;  %v2964_v31 = vpop.permute.xlu1 %291 }
  0xab   : > { %1787 = vmatprep.mubr.f32.mxu0 %v2524_v0 }
  0xd6   : > { %v2910_v38 = vpop.f32.mrf.mxu0  ;;  %v511_v39 = vpop.f32.mrf.mxu1 }
  0xd7   : > { %v512_v47 = vadd.f32 %v511_v39, %v2914_v42 }
  0xd8   : > { %v2912_v40 = vpop.f32.mrf.mxu0  ;;  %v513_v41 = vpop.f32.mrf.mxu1 }
  0xd9   : > { %v514_v45 = vadd.f32 %v513_v41, %v2914_v42  ;;  %v1534_v56 = vmax.f32 %v512_v47, 0.0  ;;  %v478_v41 = vadd.f32 %v2912_v40, %v2964_v31 }
  0xda   : > { %v2916_v43 = vpop.f32.mrf.mxu0  ;;  %v517_v44 = vpop.f32.mrf.mxu1 }
  0xdb   : > { %v518_v46 = vadd.f32 %v517_v44, %v2908_v37  ;;  %v1535_v54 = vmax.f32 %v514_v45, 0.0  ;;  %v482_v39 = vadd.f32 %v2916_v43, %v2958_v24 }
  0xdc   : > { %v483_v48 = vpop.f32.mrf.mxu0  ;;  %v519_v49 = vpop.f32.mrf.mxu1 }
  0xdd   : > { %v520_v50 = vadd.f32 %v519_v49, %v2908_v37  ;;  %v1552_v51 = vmax.f32 %v518_v46, 0.0  ;;  %v484_v32 = vadd.f32 %v483_v48, %v2958_v24  ;;  %v476_v48 = vadd.f32 %v2910_v38, %v2964_v31 }
  0xde   : > { %v487_v52 = vpop.f32.mrf.mxu0  ;;  %v2922_v53 = vpop.f32.mrf.mxu1  ;;  %v1444_v43 = vmax.f32 %v482_v39, 0.0 }
  0xdf   : > { %v1553_v55 = vmax.f32 %v520_v50, 0.0  ;;  %v488_v27 = vadd.f32 %v487_v52, %v2945_v12  ;;  %v1445_v49 = vmax.f32 %v484_v32, 0.0  ;;  %v1427_v52 = vmax.f32 %v478_v41, 0.0 }
  0xe0   : > { %v489_v57 = vpop.f32.mrf.mxu0  ;;  %v2924_v58 = vpop.f32.mrf.mxu1 }
  0xe1   : > { %1597 = vmatprep.subr.mxu1 %v1553_v55  ;;  %v490_v25 = vadd.f32 %v489_v57, %v2945_v12  ;;  %v1462_v45 = vmax.f32 %v488_v27, 0.0  ;;  %v1426_v55 = vmax.f32 %v476_v48, 0.0 }
  0xe2   : > { %v493_v60 = vpop.f32.mrf.mxu0  ;;  %v2928_v61 = vpop.f32.mrf.mxu1  ;;  %1598 = vmatpush1.msra.mxu1 %v1552_v51 }
  0xe3   : > { %1599 = vmatprep.subr.mxu1 %v1535_v54  ;;  %v494_v20 = vadd.f32 %v493_v60, %v2940_v8  ;;  %v1463_v44 = vmax.f32 %v490_v25, 0.0  ;;  %v595_v48 = vadd.f32 %v2928_v61, %v2958_v24 }
  0xe4   : > { %v495_v62 = vpop.f32.mrf.mxu0  ;;  %v2930_v63 = vpop.f32.mrf.mxu1  ;;  %1600 = vmatpush1.msra.mxu1 %v1534_v56  ;;  %v2984_v56 = vld [vmem:[%s3369_s3] sm:$0xf] }
  0xe5   : > { %v496_v18 = vadd.f32 %v495_v62, %v2940_v8  ;;  %v1480_v34 = vmax.f32 %v494_v20, 0.0  ;;  %v1446_v61 = vmax.f32 %v595_v48, 0.0 }
  0xe6   : > { %v499_v1 = vpop.f32.mrf.mxu0  ;;  %v2932_v2 = vpop.f32.mrf.mxu1 }
  0xe7   : > { %v500_v15 = vadd.f32 %v499_v1, %v2934_v3  ;;  %v1481_v33 = vmax.f32 %v496_v18, 0.0  ;;  %v601_v41 = vadd.f32 %v2932_v2, %v2945_v12  ;;  %v591_v2 = vadd.f32 %v2924_v58, %v2964_v31 }
  0xe8   : > { %v501_v4 = vpop.f32.mrf.mxu0  ;;  %v2936_v5 = vpop.f32.mrf.mxu1 }
  0xe9   : > { %v502_v13 = vadd.f32 %v501_v4, %v2934_v3  ;;  %v1498_v28 = vmax.f32 %v500_v15, 0.0  ;;  %v1429_v58 = vmax.f32 %v591_v2, 0.0 }
  0xea   : > { %v505_v6 = vpop.f32.mrf.mxu0  ;;  %v2938_v7 = vpop.f32.mrf.mxu1 }
  0xeb   : > { %v506_v9 = vadd.f32 %v505_v6, %v2926_v59  ;;  %v1499_v26 = vmax.f32 %v502_v13, 0.0 }
  0xec   : > { %v507_v10 = vpop.f32.mrf.mxu0  ;;  %v2943_v11 = vpop.f32.mrf.mxu1 }
  0xed   : > { %v508_v14 = vadd.f32 %v507_v10, %v2926_v59  ;;  %v1516_v21 = vmax.f32 %v506_v9, 0.0 }
  0xee   : > { %v2950_v16 = vpop.f32.mrf.mxu1  ;;  %v2952_v17 = vpop.f32.mrf.mxu0 }
  0xef   : > { %v1517_v19 = vmax.f32 %v508_v14, 0.0  ;;  %v613_v27 = vadd.f32 %v2950_v16, %v2934_v3 }
  0xf0   : > { %v614_v22 = vpop.f32.mrf.mxu1  ;;  %v2956_v23 = vpop.f32.mrf.mxu0 }
  0xf1   : > { %1601 = vmatprep.subr.mxu1 %v1517_v19  ;;  %v615_v25 = vadd.f32 %v614_v22, %v2934_v3  ;;  %v603_v22 = vadd.f32 %v2936_v5, %v2945_v12 }
  0xf2   : > { %v618_v29 = vpop.f32.mrf.mxu1  ;;  %v2962_v30 = vpop.f32.mrf.mxu0  ;;  %1602 = vmatpush1.msra.mxu1 %v1516_v21 }
  0xf3   : > { %1603 = vmatprep.subr.mxu1 %v1499_v26  ;;  %v619_v9 = vadd.f32 %v618_v29, %v2926_v59  ;;  %v1501_v16 = vmax.f32 %v615_v25, 0.0 }
  0xf4   : > { %v620_v35 = vpop.f32.mrf.mxu1  ;;  %v2967_v36 = vpop.f32.mrf.mxu0  ;;  %1604 = vmatpush1.msra.mxu1 %v1498_v28 }
  0xf5   : > { %1605 = vmatprep.subr.mxu1 %v1481_v33  ;;  %v621_v4 = vadd.f32 %v620_v35, %v2926_v59  ;;  %v1518_v28 = vmax.f32 %v619_v9, 0.0  ;;  %v609_v33 = vadd.f32 %v2943_v11, %v2940_v8 }
  0xf6   : > { %v624_v46 = vpop.f32.mrf.mxu1  ;;  %v2973_v47 = vpop.f32.mrf.mxu0  ;;  %1606 = vmatpush1.msra.mxu1 %v1480_v34  ;;  %v607_v34 = vadd.f32 %v2938_v7, %v2940_v8  ;;  %v597_v7 = vadd.f32 %v2930_v63, %v2958_v24 }
  0xf7   : > { %1607 = vmatprep.subr.mxu1 %v1463_v44  ;;  %v625_v60 = vadd.f32 %v624_v46, %v2914_v42  ;;  %v1519_v26 = vmax.f32 %v621_v4, 0.0  ;;  %v1500_v44 = vmax.f32 %v613_v27, 0.0  ;;  %v1483_v11 = vmax.f32 %v609_v33, 0.0 }
  0xf8   : > { %v626_v50 = vpop.f32.mrf.mxu1  ;;  %v2977_v51 = vpop.f32.mrf.mxu0  ;;  %1608 = vmatpush1.msra.mxu1 %v1462_v45 }
  0xf9   : > { %1609 = vmatprep.subr.mxu1 %v1445_v49  ;;  %v627_v38 = vadd.f32 %v626_v50, %v2914_v42  ;;  %v1536_v19 = vmax.f32 %v625_v60, 0.0  ;;  %v1482_v49 = vmax.f32 %v607_v34, 0.0 }
  0xfa   : > { %v630_v40 = vpop.f32.mrf.mxu1  ;;  %v2979_v54 = vpop.f32.mrf.mxu0  ;;  %1610 = vmatpush1.msra.mxu1 %v1444_v43  ;;  %v1465_v43 = vmax.f32 %v603_v22, 0.0 }
  0xfb   : > { %v631_v57 = vadd.f32 %v630_v40, %v2908_v37  ;;  %1611 = vmatprep.subr.mxu1 %v1427_v52  ;;  %v1537_v15 = vmax.f32 %v627_v38, 0.0  ;;  %v589_v52 = vadd.f32 %v2922_v53, %v2964_v31  ;;  %v1464_v40 = vmax.f32 %v601_v41, 0.0 }
  0xfc   : > { %v632_v62 = vpop.f32.mrf.mxu1  ;;  %v2989_v1 = vpop.f32.mrf.mxu0  ;;  %1612 = vmatpush1.msra.mxu1 %v1426_v55  ;;  %v1447_v38 = vmax.f32 %v597_v7, 0.0 }
  0xfd   : > { %v633_v6 = vadd.f32 %v632_v62, %v2908_v37  ;;  %2449 = vmatmul.mubr.msk.f32.vlgmr.msra.gmra.mxu1 %vm1577_vm2, %v2984_v56  ;;  %v1554_v10 = vmax.f32 %v631_v57, 0.0  ;;  %v1428_v53 = vmax.f32 %v589_v52, 0.0  ;;  %v722_v41 = vadd.f32 %v2989_v1, %v2940_v8 }
  0xfe   : > { %v2996_v13 = vpop.f32.mrf.mxu0  ;;  %v2998_v14 = vpop.f32.mrf.mxu1  ;;  %1716 = vmatprep.mubr.f32.mxu1 %v2524_v0  ;;  %v708_v52 = vadd.f32 %v2962_v30, %v2958_v24 }
  0xff   : > { %v1555_v18 = vmax.f32 %v633_v6, 0.0 }
 0x100   : > { %v3001_v20 = vpop.f32.mrf.mxu0  ;;  %v3003_v21 = vpop.f32.mrf.mxu1 }
 0x101   : > { %1668 = vmatprep.subr.mxu1 %v1555_v18  ;;  %v728_v33 = vadd.f32 %v3001_v20, %v2934_v3  ;;  %v720_v20 = vadd.f32 %v2979_v54, %v2940_v8  ;;  %v710_v54 = vadd.f32 %v2967_v36, %v2958_v24 }
 0x102   : > { %v731_v29 = vpop.f32.mrf.mxu0  ;;  %v3008_v32 = vpop.f32.mrf.mxu1  ;;  %1669 = vmatpush1.msra.mxu1 %v1554_v10 }
 0x103   : > { %1670 = vmatprep.subr.mxu1 %v1537_v15  ;;  %v732_v25 = vadd.f32 %v731_v29, %v2926_v59  ;;  %v1503_v48 = vmax.f32 %v728_v33, 0.0 }
 0x104   : > { %v733_v35 = vpop.f32.mrf.mxu0  ;;  %v3014_v39 = vpop.f32.mrf.mxu1  ;;  %1671 = vmatpush1.msra.mxu1 %v1536_v19 }
 0x105   : > { %1672 = vmatprep.subr.mxu1 %v1519_v26  ;;  %v734_v18 = vadd.f32 %v733_v35, %v2926_v59  ;;  %v726_v35 = vadd.f32 %v2996_v13, %v2934_v3  ;;  %v716_v13 = vadd.f32 %v2977_v51, %v2945_v12 }
 0x106   : > { %v737_v45 = vpop.f32.mrf.mxu0  ;;  %v3020_v46 = vpop.f32.mrf.mxu1  ;;  %1673 = vmatpush1.msra.mxu1 %v1518_v28 }
 0x107   : > { %1674 = vmatprep.subr.mxu1 %v1501_v16  ;;  %v738_v9 = vadd.f32 %v737_v45, %v2914_v42  ;;  %v1520_v45 = vmax.f32 %v732_v25, 0.0 }
 0x108   : > { %v739_v5 = vpop.f32.mrf.mxu0  ;;  %v3026_v50 = vpop.f32.mrf.mxu1  ;;  %1675 = vmatpush1.msra.mxu1 %v1500_v44  ;;  %v1521_v44 = vmax.f32 %v734_v18, 0.0 }
 0x109   : > { %1676 = vmatprep.subr.mxu1 %v1483_v11  ;;  %v740_v4 = vadd.f32 %v739_v5, %v2914_v42  ;;  %v1538_v22 = vmax.f32 %v738_v9, 0.0  ;;  %v1502_v5 = vmax.f32 %v726_v35, 0.0 }
 0x10a   : > { %v743_v63 = vpop.f32.mrf.mxu0  ;;  %v3032_v55 = vpop.f32.mrf.mxu1  ;;  %1677 = vmatpush1.msra.mxu1 %v1482_v49  ;;  %v714_v49 = vadd.f32 %v2973_v47, %v2945_v12  ;;  %v704_v47 = vadd.f32 %v2956_v23, %v2964_v31 }
 0x10b   : > { %1678 = vmatprep.subr.mxu1 %v1465_v43  ;;  %v744_v57 = vadd.f32 %v743_v63, %v2908_v37  ;;  %v1539_v34 = vmax.f32 %v740_v4, 0.0  ;;  %v1485_v43 = vmax.f32 %v722_v41, 0.0 }
 0x10c   : > { %v745_v60 = vpop.f32.mrf.mxu0  ;;  %v3035_v62 = vpop.f32.mrf.mxu1  ;;  %1679 = vmatpush1.msra.mxu1 %v1464_v40  ;;  %v1484_v40 = vmax.f32 %v720_v20, 0.0  ;;  %v1431_v18 = vmax.f32 %v704_v47, 0.0 }
 0x10d   : > { %v746_v6 = vadd.f32 %v745_v60, %v2908_v37  ;;  %1680 = vmatprep.subr.mxu1 %v1447_v38  ;;  %v1556_v26 = vmax.f32 %v744_v57, 0.0  ;;  %v1467_v38 = vmax.f32 %v716_v13, 0.0  ;;  %v1466_v57 = vmax.f32 %v714_v49, 0.0 }
 0x10e   : > { %v3040_v10 = vpop.f32.mrf.mxu1  ;;  %v3042_v15 = vpop.f32.mrf.mxu0  ;;  %1681 = vmatpush1.msra.mxu1 %v1446_v61  ;;  %v702_v61 = vadd.f32 %v2952_v17, %v2964_v31 }
 0x10f   : > { %v1557_v19 = vmax.f32 %v746_v6, 0.0  ;;  %1682 = vmatprep.subr.mxu1 %v1429_v58  ;;  %v1449_v58 = vmax.f32 %v710_v54, 0.0  ;;  %v1448_v6 = vmax.f32 %v708_v52, 0.0 }
 0x110   : > { %v3046_v27 = vpop.f32.mrf.mxu1  ;;  %v3048_v28 = vpop.f32.mrf.mxu0  ;;  %1683 = vmatpush1.msra.mxu1 %v1428_v53  ;;  %v1430_v25 = vmax.f32 %v702_v61, 0.0  ;;  %v821_v61 = vadd.f32 %v3008_v32, %v2958_v24 }
 0x111   : > { %2450 = vmatmul.mubr.msk.f32.vlgmr.msra.gmra.mxu1 %vm1577_vm2, %v2984_v56  ;;  %1739 = vmatprep.subr.mxu0 %v1557_v19 }
 0x112   : > { %v844_v16 = vpop.f32.mrf.mxu1  ;;  %v3056_v29 = vpop.f32.mrf.mxu0  ;;  %1740 = vmatpush1.msra.mxu0 %v1556_v26  ;;  %1858 = vmatprep.mubr.f32.mxu1 %v2524_v0  ;;  %v1450_v32 = vmax.f32 %v821_v61, 0.0 }
 0x113   : > { %1741 = vmatprep.subr.mxu0 %v1539_v34  ;;  %v845_v26 = vadd.f32 %v844_v16, %v2926_v59  ;;  %v839_v16 = vadd.f32 %v3040_v10, %v2934_v3  ;;  %v829_v10 = vadd.f32 %v3026_v50, %v2945_v12 }
 0x114   : > { %v846_v7 = vpop.f32.mrf.mxu1  ;;  %v3063_v11 = vpop.f32.mrf.mxu0  ;;  %1742 = vmatpush1.msra.mxu0 %v1538_v22 }
 0x115   : > { %1743 = vmatprep.subr.mxu0 %v1521_v44  ;;  %v847_v17 = vadd.f32 %v846_v7, %v2926_v59  ;;  %v841_v7 = vadd.f32 %v3046_v27, %v2934_v3  ;;  %v833_v27 = vadd.f32 %v3032_v55, %v2940_v8  ;;  %v823_v55 = vadd.f32 %v3014_v39, %v2958_v24 }
 0x116   : > { %v850_v1 = vpop.f32.mrf.mxu1  ;;  %v3069_v2 = vpop.f32.mrf.mxu0  ;;  %1744 = vmatpush1.msra.mxu0 %v1520_v45 }
 0x117   : > { %1745 = vmatprep.subr.mxu0 %v1503_v48  ;;  %v851_v53 = vadd.f32 %v850_v1, %v2914_v42  ;;  %v1523_v13 = vmax.f32 %v847_v17, 0.0  ;;  %v1522_v48 = vmax.f32 %v845_v26, 0.0  ;;  %v835_v1 = vadd.f32 %v3035_v62, %v2940_v8 }
 0x118   : > { %v852_v51 = vpop.f32.mrf.mxu1  ;;  %v3075_v63 = vpop.f32.mrf.mxu0  ;;  %1746 = vmatpush1.msra.mxu0 %v1502_v5  ;;  %v1505_v52 = vmax.f32 %v841_v7, 0.0 }
 0x119   : > { %1747 = vmatprep.subr.mxu0 %v1485_v43  ;;  %v853_v30 = vadd.f32 %v852_v51, %v2914_v42  ;;  %v1540_v44 = vmax.f32 %v851_v53, 0.0  ;;  %v1504_v51 = vmax.f32 %v839_v16, 0.0  ;;  %v1487_v62 = vmax.f32 %v835_v1, 0.0 }
 0x11a   : > { %v856_v36 = vpop.f32.mrf.mxu1  ;;  %v3081_v60 = vpop.f32.mrf.mxu0  ;;  %1748 = vmatpush1.msra.mxu0 %v1484_v40  ;;  %v827_v40 = vadd.f32 %v3020_v46, %v2945_v12  ;;  %v817_v46 = vadd.f32 %v3003_v21, %v2964_v31  ;;  %v1451_v53 = vmax.f32 %v823_v55, 0.0 }
 0x11b   : > { %v857_v4 = vadd.f32 %v856_v36, %v2908_v37  ;;  %1749 = vmatprep.subr.mxu0 %v1467_v38  ;;  %v1541_v22 = vmax.f32 %v853_v30, 0.0  ;;  %v815_v30 = vadd.f32 %v2998_v14, %v2964_v31 }
 0x11c   : > { %v858_v23 = vpop.f32.mrf.mxu1  ;;  %v3086_v9 = vpop.f32.mrf.mxu0  ;;  %1750 = vmatpush1.msra.mxu0 %v1466_v57  ;;  %v1486_v57 = vmax.f32 %v833_v27, 0.0  ;;  %v1433_v21 = vmax.f32 %v817_v46, 0.0 }
 0x11d   : > { %v859_v19 = vadd.f32 %v858_v23, %v2908_v37  ;;  %1751 = vmatprep.subr.mxu0 %v1449_v58  ;;  %v1558_v33 = vmax.f32 %v857_v4, 0.0  ;;  %v1469_v58 = vmax.f32 %v829_v10, 0.0  ;;  %v1468_v4 = vmax.f32 %v827_v40, 0.0 }
 0x11e   : > { %v3091_v34 = vpop.f32.mrf.mxu0  ;;  %v3093_v35 = vpop.f32.mrf.mxu1  ;;  %1752 = vmatpush1.msra.mxu0 %v1448_v6  ;;  %v1432_v14 = vmax.f32 %v815_v30, 0.0  ;;  %v948_v40 = vadd.f32 %v3086_v9, %v2940_v8  ;;  %v934_v30 = vadd.f32 %v3056_v29, %v2958_v24 }
 0x11f   : > { %v1559_v41 = vmax.f32 %v859_v19, 0.0  ;;  %1753 = vmatprep.subr.mxu0 %v1431_v18 }
 0x120   : > { %v3095_v20 = vpop.f32.mrf.mxu0  ;;  %v3097_v45 = vpop.f32.mrf.mxu1  ;;  %1754 = vmatpush1.msra.mxu0 %v1430_v25  ;;  %v1452_v29 = vmax.f32 %v934_v30, 0.0 }
 0x121   : > { %2451 = vmatmul.mubr.msk.f32.vlgmr.msra.gmra.mxu0 %vm1577_vm2, %v2984_v56  ;;  %1810 = vmatprep.subr.mxu1 %v1559_v41  ;;  %v954_v1 = vadd.f32 %v3095_v20, %v2934_v3  ;;  %v946_v20 = vadd.f32 %v3081_v60, %v2940_v8  ;;  %v936_v60 = vadd.f32 %v3063_v11, %v2958_v24 }
 0x122   : > { %v957_v49 = vpop.f32.mrf.mxu0  ;;  %v3105_v5 = vpop.f32.mrf.mxu1  ;;  %1811 = vmatpush1.msra.mxu1 %v1558_v33  ;;  %1929 = vmatprep.mubr.f32.mxu0 %v2524_v0 }
 0x123   : > { %1812 = vmatprep.subr.mxu1 %v1541_v22  ;;  %v958_v7 = vadd.f32 %v957_v49, %v2926_v59  ;;  %v1507_v61 = vmax.f32 %v954_v1, 0.0 }
 0x124   : > { %v959_v54 = vpop.f32.mrf.mxu0  ;;  %v3112_v43 = vpop.f32.mrf.mxu1  ;;  %1813 = vmatpush1.msra.mxu1 %v1540_v44 }
 0x125   : > { %1814 = vmatprep.subr.mxu1 %v1523_v13  ;;  %v960_v41 = vadd.f32 %v959_v54, %v2926_v59  ;;  %v952_v54 = vadd.f32 %v3091_v34, %v2934_v3  ;;  %v942_v34 = vadd.f32 %v3075_v63, %v2945_v12 }
 0x126   : > { %v963_v47 = vpop.f32.mrf.mxu0  ;;  %v3118_v38 = vpop.f32.mrf.mxu1  ;;  %1815 = vmatpush1.msra.mxu1 %v1522_v48 }
 0x127   : > { %1816 = vmatprep.subr.mxu1 %v1505_v52  ;;  %v964_v26 = vadd.f32 %v963_v47, %v2914_v42  ;;  %v1524_v47 = vmax.f32 %v958_v7, 0.0 }
 0x128   : > { %v965_v50 = vpop.f32.mrf.mxu0  ;;  %v3124_v36 = vpop.f32.mrf.mxu1  ;;  %1817 = vmatpush1.msra.mxu1 %v1504_v51  ;;  %v1525_v51 = vmax.f32 %v960_v41, 0.0 }
 0x129   : > { %1818 = vmatprep.subr.mxu1 %v1487_v62  ;;  %v966_v19 = vadd.f32 %v965_v50, %v2914_v42  ;;  %v1542_v10 = vmax.f32 %v964_v26, 0.0  ;;  %v1506_v50 = vmax.f32 %v952_v54, 0.0 }
 0x12a   : > { %v969_v39 = vpop.f32.mrf.mxu0  ;;  %v3130_v6 = vpop.f32.mrf.mxu1  ;;  %1819 = vmatpush1.msra.mxu1 %v1486_v57  ;;  %v940_v57 = vadd.f32 %v3069_v2, %v2945_v12  ;;  %v930_v2 = vadd.f32 %v3048_v28, %v2964_v31 }
 0x12b   : > { %1820 = vmatprep.subr.mxu1 %v1469_v58  ;;  %v970_v23 = vadd.f32 %v969_v39, %v2908_v37  ;;  %v1543_v27 = vmax.f32 %v966_v19, 0.0  ;;  %v1489_v58 = vmax.f32 %v948_v40, 0.0 }
 0x12c   : > { %v971_v18 = vpop.f32.mrf.mxu0  ;;  %v3133_v17 = vpop.f32.mrf.mxu1  ;;  %1821 = vmatpush1.msra.mxu1 %v1468_v4  ;;  %v1488_v4 = vmax.f32 %v946_v20, 0.0  ;;  %v1435_v28 = vmax.f32 %v930_v2, 0.0 }
 0x12d   : > { %v972_v25 = vadd.f32 %v971_v18, %v2908_v37  ;;  %1822 = vmatprep.subr.mxu1 %v1451_v53  ;;  %v1560_v13 = vmax.f32 %v970_v23, 0.0  ;;  %v1471_v53 = vmax.f32 %v942_v34, 0.0  ;;  %v1470_v23 = vmax.f32 %v940_v57, 0.0 }
 0x12e   : > { %v3138_v33 = vpop.f32.mrf.mxu1  ;;  %v3140_v22 = vpop.f32.mrf.mxu0  ;;  %1823 = vmatpush1.msra.mxu1 %v1450_v32  ;;  %v928_v32 = vadd.f32 %v3042_v15, %v2964_v31  ;;  %v1061_v57 = vadd.f32 %v3133_v17, %v2940_v8 }
 0x12f   : > { %v1561_v44 = vmax.f32 %v972_v25, 0.0  ;;  %1824 = vmatprep.subr.mxu1 %v1433_v21  ;;  %v1453_v21 = vmax.f32 %v936_v60, 0.0 }
 0x130   : > { %v3144_v16 = vpop.f32.mrf.mxu1  ;;  %v3146_v48 = vpop.f32.mrf.mxu0  ;;  %1825 = vmatpush1.msra.mxu1 %v1432_v14  ;;  %v1434_v15 = vmax.f32 %v928_v32, 0.0  ;;  %v1047_v32 = vadd.f32 %v3105_v5, %v2958_v24 }
 0x131   : > { %2452 = vmatmul.mubr.msk.f32.vlgmr.msra.gmra.mxu1 %vm1577_vm2, %v2984_v56  ;;  %1881 = vmatprep.subr.mxu0 %v1561_v44  ;;  %v1067_v20 = vadd.f32 %v3144_v16, %v2934_v3  ;;  %v1059_v16 = vadd.f32 %v3130_v6, %v2940_v8  ;;  %v1049_v6 = vadd.f32 %v3112_v43, %v2958_v24 }
 0x132   : > { %v1070_v52 = vpop.f32.mrf.mxu1  ;;  %v3154_v49 = vpop.f32.mrf.mxu0  ;;  %1882 = vmatpush1.msra.mxu0 %v1560_v13  ;;  %2000 = vmatprep.mubr.f32.mxu1 %v2524_v0  ;;  %v1454_v5 = vmax.f32 %v1047_v32, 0.0 }
 0x133   : > { %1883 = vmatprep.subr.mxu0 %v1543_v27  ;;  %v1071_v54 = vadd.f32 %v1070_v52, %v2926_v59  ;;  %v1509_v30 = vmax.f32 %v1067_v20, 0.0 }
 0x134   : > { %v1072_v55 = vpop.f32.mrf.mxu1  ;;  %v3161_v62 = vpop.f32.mrf.mxu0  ;;  %1884 = vmatpush1.msra.mxu0 %v1542_v10 }
 0x135   : > { %1885 = vmatprep.subr.mxu0 %v1525_v51  ;;  %v1073_v1 = vadd.f32 %v1072_v55, %v2926_v59  ;;  %v1065_v55 = vadd.f32 %v3138_v33, %v2934_v3  ;;  %v1055_v33 = vadd.f32 %v3124_v36, %v2945_v12 }
 0x136   : > { %v1076_v9 = vpop.f32.mrf.mxu1  ;;  %v3167_v46 = vpop.f32.mrf.mxu0  ;;  %1886 = vmatpush1.msra.mxu0 %v1524_v47 }
 0x137   : > { %1887 = vmatprep.subr.mxu0 %v1507_v61  ;;  %v1077_v44 = vadd.f32 %v1076_v9, %v2914_v42  ;;  %v1526_v9 = vmax.f32 %v1071_v54, 0.0 }
 0x138   : > { %v1078_v63 = vpop.f32.mrf.mxu1  ;;  %v3173_v39 = vpop.f32.mrf.mxu0  ;;  %1888 = vmatpush1.msra.mxu0 %v1506_v50  ;;  %v1527_v50 = vmax.f32 %v1073_v1, 0.0 }
 0x139   : > { %1889 = vmatprep.subr.mxu0 %v1489_v58  ;;  %v1079_v26 = vadd.f32 %v1078_v63, %v2914_v42  ;;  %v1544_v34 = vmax.f32 %v1077_v44, 0.0  ;;  %v1508_v63 = vmax.f32 %v1065_v55, 0.0 }
 0x13a   : > { %v1082_v11 = vpop.f32.mrf.mxu1  ;;  %v3179_v18 = vpop.f32.mrf.mxu0  ;;  %1890 = vmatpush1.msra.mxu0 %v1488_v4  ;;  %v1053_v4 = vadd.f32 %v3118_v38, %v2945_v12  ;;  %v1043_v38 = vadd.f32 %v3097_v45, %v2964_v31 }
 0x13b   : > { %1891 = vmatprep.subr.mxu0 %v1471_v53  ;;  %v1083_v19 = vadd.f32 %v1082_v11, %v2908_v37  ;;  %v1545_v47 = vmax.f32 %v1079_v26, 0.0  ;;  %v1491_v53 = vmax.f32 %v1061_v57, 0.0 }
 0x13c   : > { %v1084_v25 = vpop.f32.mrf.mxu1  ;;  %v3182_v14 = vpop.f32.mrf.mxu0  ;;  %1892 = vmatpush1.msra.mxu0 %v1470_v23  ;;  %v1490_v23 = vmax.f32 %v1059_v16, 0.0  ;;  %v1437_v45 = vmax.f32 %v1043_v38, 0.0 }
 0x13d   : > { %v1085_v41 = vadd.f32 %v1084_v25, %v2908_v37  ;;  %1893 = vmatprep.subr.mxu0 %v1453_v21  ;;  %v1562_v10 = vmax.f32 %v1083_v19, 0.0  ;;  %v1473_v21 = vmax.f32 %v1055_v33, 0.0  ;;  %v1472_v19 = vmax.f32 %v1053_v4, 0.0 }
 0x13e   : > { %v3187_v7 = vpop.f32.mrf.mxu0  ;;  %v3189_v13 = vpop.f32.mrf.mxu1  ;;  %1894 = vmatpush1.msra.mxu0 %v1452_v29  ;;  %v1041_v29 = vadd.f32 %v3093_v35, %v2964_v31  ;;  %v1174_v4 = vadd.f32 %v3182_v14, %v2940_v8 }
 0x13f   : > { %v1563_v27 = vmax.f32 %v1085_v41, 0.0  ;;  %1895 = vmatprep.subr.mxu0 %v1435_v28  ;;  %v1455_v28 = vmax.f32 %v1049_v6, 0.0 }
 0x140   : > { %v3193_v40 = vpop.f32.mrf.mxu0  ;;  %v3195_v51 = vpop.f32.mrf.mxu1  ;;  %1896 = vmatpush1.msra.mxu0 %v1434_v15  ;;  %v1436_v35 = vmax.f32 %v1041_v29, 0.0  ;;  %v1160_v29 = vadd.f32 %v3154_v49, %v2958_v24 }
 0x141   : > { %2453 = vmatmul.mubr.msk.f32.vlgmr.msra.gmra.mxu0 %vm1577_vm2, %v2984_v56  ;;  %1952 = vmatprep.subr.mxu1 %v1563_v27  ;;  %v1180_v16 = vadd.f32 %v3193_v40, %v2934_v3  ;;  %v1172_v40 = vadd.f32 %v3179_v18, %v2940_v8  ;;  %v1162_v18 = vadd.f32 %v3161_v62, %v2958_v24 }
 0x142   : > { %v1183_v61 = vpop.f32.mrf.mxu0  ;;  %v3203_v52 = vpop.f32.mrf.mxu1  ;;  %1953 = vmatpush1.msra.mxu1 %v1562_v10  ;;  %2071 = vmatprep.mubr.f32.mxu0 %v2524_v0  ;;  %v1456_v49 = vmax.f32 %v1160_v29, 0.0 }
 0x143   : > { %1954 = vmatprep.subr.mxu1 %v1545_v47  ;;  %v1184_v55 = vadd.f32 %v1183_v61, %v2926_v59  ;;  %v1511_v32 = vmax.f32 %v1180_v16, 0.0 }
 0x144   : > { %v1185_v60 = vpop.f32.mrf.mxu0  ;;  %v3210_v58 = vpop.f32.mrf.mxu1  ;;  %1955 = vmatpush1.msra.mxu1 %v1544_v34 }
 0x145   : > { %1956 = vmatprep.subr.mxu1 %v1527_v50  ;;  %v1186_v20 = vadd.f32 %v1185_v60, %v2926_v59  ;;  %v1178_v60 = vadd.f32 %v3187_v7, %v2934_v3  ;;  %v1168_v7 = vadd.f32 %v3173_v39, %v2945_v12 }
 0x146   : > { %v1189_v17 = vpop.f32.mrf.mxu0  ;;  %v3216_v2 = vpop.f32.mrf.mxu1  ;;  %1957 = vmatpush1.msra.mxu1 %v1526_v9 }
 0x147   : > { %1958 = vmatprep.subr.mxu1 %v1509_v30  ;;  %v1190_v27 = vadd.f32 %v1189_v17, %v2914_v42  ;;  %v1528_v17 = vmax.f32 %v1184_v55, 0.0 }
 0x148   : > { %v1191_v36 = vpop.f32.mrf.mxu0  ;;  %v3222_v11 = vpop.f32.mrf.mxu1  ;;  %1959 = vmatpush1.msra.mxu1 %v1508_v63  ;;  %v1529_v63 = vmax.f32 %v1186_v20, 0.0 }
 0x149   : > { %1960 = vmatprep.subr.mxu1 %v1491_v53  ;;  %v1192_v44 = vadd.f32 %v1191_v36, %v2914_v42  ;;  %v1546_v33 = vmax.f32 %v1190_v27, 0.0  ;;  %v1510_v36 = vmax.f32 %v1178_v60, 0.0 }
 0x14a   : > { %v1195_v43 = vpop.f32.mrf.mxu0  ;;  %v3228_v25 = vpop.f32.mrf.mxu1  ;;  %1961 = vmatpush1.msra.mxu1 %v1490_v23  ;;  %v1166_v23 = vadd.f32 %v3167_v46, %v2945_v12  ;;  %v1156_v46 = vadd.f32 %v3146_v48, %v2964_v31 }
 0x14b   : > { %1962 = vmatprep.subr.mxu1 %v1473_v21  ;;  %v1196_v26 = vadd.f32 %v1195_v43, %v2908_v37  ;;  %v1547_v9 = vmax.f32 %v1192_v44, 0.0  ;;  %v1493_v21 = vmax.f32 %v1174_v4, 0.0 }
 0x14c   : > { %v1197_v41 = vpop.f32.mrf.mxu0  ;;  %v3231_v15 = vpop.f32.mrf.mxu1  ;;  %1963 = vmatpush1.msra.mxu1 %v1472_v19  ;;  %v1492_v19 = vmax.f32 %v1172_v40, 0.0  ;;  %v1439_v48 = vmax.f32 %v1156_v46, 0.0 }
 0x14d   : > { %v1198_v1 = vadd.f32 %v1197_v41, %v2908_v37  ;;  %1964 = vmatprep.subr.mxu1 %v1455_v28  ;;  %v1564_v34 = vmax.f32 %v1196_v26, 0.0  ;;  %v1475_v28 = vmax.f32 %v1168_v7, 0.0  ;;  %v1474_v26 = vmax.f32 %v1166_v23, 0.0 }
 0x14e   : > { %v3236_v54 = vpop.f32.mrf.mxu1  ;;  %v3238_v10 = vpop.f32.mrf.mxu0  ;;  %1965 = vmatpush1.msra.mxu1 %v1454_v5  ;;  %v1154_v5 = vadd.f32 %v3140_v22, %v2964_v31 }
 0x14f   : > { %v1565_v47 = vmax.f32 %v1198_v1, 0.0  ;;  %1966 = vmatprep.subr.mxu1 %v1437_v45  ;;  %v1457_v45 = vmax.f32 %v1162_v18, 0.0  ;;  %v1291_v40 = vadd.f32 %v3236_v54, %v2934_v3 }
 0x150   : > { %v3242_v57 = vpop.f32.mrf.mxu1  ;;  %v3244_v50 = vpop.f32.mrf.mxu0  ;;  %1967 = vmatpush1.msra.mxu1 %v1436_v35  ;;  %v1438_v22 = vmax.f32 %v1154_v5, 0.0 }
 0x151   : > { %2454 = vmatmul.mubr.msk.f32.vlgmr.msra.gmra.mxu1 %vm1577_vm2, %v2984_v56  ;;  %2023 = vmatprep.subr.mxu0 %v1565_v47  ;;  %v1293_v4 = vadd.f32 %v3242_v57, %v2934_v3  ;;  %v1285_v57 = vadd.f32 %v3228_v25, %v2940_v8  ;;  %v1273_v25 = vadd.f32 %v3203_v52, %v2958_v24 }
 0x152   : > { %v1296_v30 = vpop.f32.mrf.mxu1  ;;  %v3252_v61 = vpop.f32.mrf.mxu0  ;;  %2024 = vmatpush1.msra.mxu0 %v1564_v34  ;;  %2142 = vmatprep.mubr.f32.mxu1 %v2524_v0 }
 0x153   : > { %2025 = vmatprep.subr.mxu0 %v1547_v9  ;;  %v1297_v9 = vadd.f32 %v1296_v30, %v2926_v59  ;;  %v1287_v30 = vadd.f32 %v3231_v15, %v2940_v8  ;;  %v1513_v54 = vmax.f32 %v1293_v4, 0.0  ;;  %v1275_v15 = vadd.f32 %v3210_v58, %v2958_v24 }
 0x154   : > { %v1298_v6 = vpop.f32.mrf.mxu1  ;;  %v3259_v53 = vpop.f32.mrf.mxu0  ;;  %2026 = vmatpush1.msra.mxu0 %v1546_v33  ;;  %v1494_v29 = vmax.f32 %v1285_v57, 0.0  ;;  %v1458_v5 = vmax.f32 %v1273_v25, 0.0 }
 0x155   : > { %2027 = vmatprep.subr.mxu0 %v1529_v63  ;;  %v1299_v34 = vadd.f32 %v1298_v6, %v2926_v59  ;;  %v1459_v58 = vmax.f32 %v1275_v15, 0.0 }
 0x156   : > { %v1302_v14 = vpop.f32.mrf.mxu1  ;;  %v3265_v38 = vpop.f32.mrf.mxu0  ;;  %2028 = vmatpush1.msra.mxu0 %v1528_v17 }
 0x157   : > { %2029 = vmatprep.subr.mxu0 %v1511_v32  ;;  %v1303_v47 = vadd.f32 %v1302_v14, %v2914_v42  ;;  %v1531_v7 = vmax.f32 %v1299_v34, 0.0  ;;  %v1530_v32 = vmax.f32 %v1297_v9, 0.0  ;;  %v1279_v14 = vadd.f32 %v3216_v2, %v2945_v12 }
 0x158   : > { %v1304_v39 = vpop.f32.mrf.mxu1  ;;  %v3271_v43 = vpop.f32.mrf.mxu0  ;;  %2030 = vmatpush1.msra.mxu0 %v1510_v36  ;;  %v1281_v36 = vadd.f32 %v3222_v11, %v2945_v12  ;;  %v1269_v11 = vadd.f32 %v3195_v51, %v2964_v31  ;;  %v1267_v2 = vadd.f32 %v3189_v13, %v2964_v31 }
 0x159   : > { %2031 = vmatprep.subr.mxu0 %v1493_v21  ;;  %v1305_v27 = vadd.f32 %v1304_v39, %v2914_v42  ;;  %v1548_v17 = vmax.f32 %v1303_v47, 0.0  ;;  %v1495_v21 = vmax.f32 %v1287_v30, 0.0  ;;  %v1476_v46 = vmax.f32 %v1279_v14, 0.0 }
 0x15a   : > { %v1308_v62 = vpop.f32.mrf.mxu1  ;;  %v3277_v41 = vpop.f32.mrf.mxu0  ;;  %2032 = vmatpush1.msra.mxu0 %v1492_v19  ;;  %v1477_v39 = vmax.f32 %v1281_v36, 0.0  ;;  %v1394_v9 = vadd.f32 %v3271_v43, %v2945_v12  ;;  %v1382_v43 = vadd.f32 %v3244_v50, %v2964_v31 }
 0x15b   : > { %2033 = vmatprep.subr.mxu0 %v1475_v28  ;;  %v1309_v44 = vadd.f32 %v1308_v62, %v2908_v37  ;;  %v1549_v63 = vmax.f32 %v1305_v27, 0.0  ;;  %v1441_v62 = vmax.f32 %v1269_v11, 0.0 }
 0x15c   : > { %v1310_v1 = vpop.f32.mrf.mxu1  ;;  %v3280_v35 = vpop.f32.mrf.mxu0  ;;  %2034 = vmatpush1.msra.mxu0 %v1474_v26  ;;  %v1479_v4 = vmax.f32 %v1394_v9, 0.0 }
 0x15d   : > { %v1311_v20 = vadd.f32 %v1310_v1, %v2908_v37  ;;  %2035 = vmatprep.subr.mxu0 %v1457_v45  ;;  %v1566_v60 = vmax.f32 %v1309_v44, 0.0  ;;  %v1400_v47 = vadd.f32 %v3280_v35, %v2940_v8  ;;  %v1388_v35 = vadd.f32 %v3259_v53, %v2958_v24 }
 0x15e   : > { %v3285_v55 = vpop.f32.mrf.mxu0  ;;  %2036 = vmatpush1.msra.mxu0 %v1456_v49  ;;  %v1440_v49 = vmax.f32 %v1267_v2, 0.0 }
 0x15f   : > { %v1567_v16 = vmax.f32 %v1311_v20, 0.0  ;;  %2037 = vmatprep.subr.mxu0 %v1439_v48 }
 0x160   : > { %v1405_v33 = vpop.f32.mrf.mxu0  ;;  %2038 = vmatpush1.msra.mxu0 %v1438_v22 }
 0x161   : > { %2455 = vmatmul.mubr.msk.f32.vlgmr.msra.gmra.mxu0 %vm1577_vm2, %v2984_v56  ;;  %2094 = vmatprep.subr.mxu1 %v1567_v16  ;;  %v1406_v20 = vadd.f32 %v1405_v33, %v2934_v3  ;;  %v1497_v33 = vmax.f32 %v1400_v47, 0.0 }
 0x162   : > { %v1409_v6 = vpop.f32.mrf.mxu0  ;;  %2095 = vmatpush1.msra.mxu1 %v1566_v60  ;;  %2213 = vmatprep.mubr.f32.mxu0 %v2524_v0  ;;  %v1512_v0 = vmax.f32 %v1291_v40, 0.0  ;;  %v1443_v40 = vmax.f32 %v1382_v43, 0.0 }
 0x163   : > { %2096 = vmatprep.subr.mxu1 %v1549_v63  ;;  %v1410_v48 = vadd.f32 %v1409_v6, %v2926_v59  ;;  %v1515_v60 = vmax.f32 %v1406_v20, 0.0  ;;  %v1461_v63 = vmax.f32 %v1388_v35, 0.0 }
 0x164   : > { %v1411_v23 = vpop.f32.mrf.mxu0  ;;  %2097 = vmatpush1.msra.mxu1 %v1548_v17 }
 0x165   : > { %2098 = vmatprep.subr.mxu1 %v1531_v7  ;;  %v1412_v13 = vadd.f32 %v1411_v23, %v2926_v59  ;;  %v1398_v59 = vadd.f32 %v3277_v41, %v2940_v8  ;;  %v1532_v16 = vmax.f32 %v1410_v48, 0.0  ;;  %v1386_v8 = vadd.f32 %v3252_v61, %v2958_v24  ;;  %v1575_v61 = vpop.permute.xlu0 %1574 }
 0x166   : > { %v1415_v18 = vpop.f32.mrf.mxu0  ;;  %2099 = vmatpush1.msra.mxu1 %v1530_v32 }
 0x167   : > { %2100 = vmatprep.subr.mxu1 %v1513_v54  ;;  %v1416_v44 = vadd.f32 %v1415_v18, %v2914_v42  ;;  %v1533_v34 = vmax.f32 %v1412_v13, 0.0  ;;  %v1496_v41 = vmax.f32 %v1398_v59, 0.0  ;;  %v1460_v53 = vmax.f32 %v1386_v8, 0.0 }
 0x168   : > { %v1417_v19 = vpop.f32.mrf.mxu0  ;;  %2101 = vmatpush1.msra.mxu1 %v1512_v0 }
 0x169   : > { %2102 = vmatprep.subr.mxu1 %v1495_v21  ;;  %v1418_v45 = vadd.f32 %v1417_v19, %v2914_v42  ;;  %v1550_v42 = vmax.f32 %v1416_v44, 0.0 }
 0x16a   : > { %v1421_v28 = vpop.f32.mrf.mxu0  ;;  %2103 = vmatpush1.msra.mxu1 %v1494_v29 }
 0x16b   : > { %2104 = vmatprep.subr.mxu1 %v1477_v39  ;;  %v1422_v26 = vadd.f32 %v1421_v28, %v2908_v37  ;;  %v1551_v22 = vmax.f32 %v1418_v45, 0.0 }
 0x16c   : > { %v1423_v52 = vpop.f32.mrf.mxu0  ;;  %2105 = vmatpush1.msra.mxu1 %v1476_v46 }
 0x16d   : > { %v1424_v51 = vadd.f32 %v1423_v52, %v2908_v37  ;;  %2106 = vmatprep.subr.mxu1 %v1459_v58  ;;  %v1568_v27 = vmax.f32 %v1422_v26, 0.0  ;;  %v1404_v37 = vadd.f32 %v3285_v55, %v2934_v3  ;;  %v1392_v3 = vadd.f32 %v3265_v38, %v2945_v12 }
 0x16e   : > { %2107 = vmatpush1.msra.mxu1 %v1458_v5  ;;  %v1380_v12 = vadd.f32 %v3238_v10, %v2964_v31 }
 0x16f   : > { %v1569_v1 = vmax.f32 %v1424_v51, 0.0  ;;  %2108 = vmatprep.subr.mxu1 %v1441_v62  ;;  %v1514_v55 = vmax.f32 %v1404_v37, 0.0  ;;  %v1478_v38 = vmax.f32 %v1392_v3, 0.0 }
 0x170   : > { %2109 = vmatpush1.msra.mxu1 %v1440_v49  ;;  %v1442_v24 = vmax.f32 %v1380_v12, 0.0 }
 0x171   : > { %2456 = vmatmul.mubr.msk.f32.vlgmr.msra.gmra.mxu1 %vm1577_vm2, %v2984_v56  ;;  %2165 = vmatprep.subr.mxu0 %v1569_v1 }
 0x172   : > { %2166 = vmatpush1.msra.mxu0 %v1568_v27 }
 0x173   : > { %2167 = vmatprep.subr.mxu0 %v1551_v22 }
 0x174   : > { %2168 = vmatpush1.msra.mxu0 %v1550_v42 }
 0x175   : > { %2169 = vmatprep.subr.mxu0 %v1533_v34 }
 0x176   : > { %2170 = vmatpush1.msra.mxu0 %v1532_v16 }
 0x177   : > { %2171 = vmatprep.subr.mxu0 %v1515_v60 }
 0x178   : > { %2172 = vmatpush1.msra.mxu0 %v1514_v55 }
 0x179   : > { %2173 = vmatprep.subr.mxu0 %v1497_v33 }
 0x17a   : > { %2174 = vmatpush1.msra.mxu0 %v1496_v41 }
 0x17b   : > { %2175 = vmatprep.subr.mxu0 %v1479_v4 }
 0x17c   : > { %2176 = vmatpush1.msra.mxu0 %v1478_v38 }
 0x17d   : > { %2177 = vmatprep.subr.mxu0 %v1461_v63 }
 0x17e   : > { %2178 = vmatpush1.msra.mxu0 %v1460_v53 }
 0x17f   : > { %2179 = vmatprep.subr.mxu0 %v1443_v40 }
 0x180   : > { %2180 = vmatpush1.msra.mxu0 %v1442_v24 }
 0x181   : > { %2457 = vmatmul.mubr.msk.f32.vlgmr.msra.gmra.mxu0 %vm1577_vm2, %v2984_v56 }
 0x1bd   : > { %v1647_v50 = vpop.f32.mrf.mxu1 }
 0x1be   : > { %v1648_v31 = vadd.f32 %v1647_v50, %v1575_v61 }
 0x1bf   : > { %v1649_v17 = vpop.f32.mrf.mxu1 }
 0x1c0   : > { %v1650_v10 = vadd.f32 %v1649_v17, %v1575_v61 }
 0x1c2   : > { %v2238_v6 = vcombine.low %v1648_v31, %v1650_v10 }
 0x1c4   : > { %2256 = vst [vmem:[%s3346_s23] sm:$0xff] %v2238_v6 }
 0x1d1   : > { %v1718_v30 = vpop.f32.mrf.mxu1 }
 0x1d2   : > { %v1719_v56 = vadd.f32 %v1718_v30, %v1575_v61 }
 0x1d3   : > { %v1720_v7 = vpop.f32.mrf.mxu1 }
 0x1d4   : > { %v1721_v57 = vadd.f32 %v1720_v7, %v1575_v61 }
 0x1d6   : > { %v2239_v32 = vcombine.low %v1719_v56, %v1721_v57 }
 0x1d8   : > { %2257 = vst [vmem:[%s3346_s23 + $0x8] sm:$0xff] %v2239_v32 }
 0x1e1   : > { %v1789_v23 = vpop.f32.mrf.mxu0 }
 0x1e2   : > { %v1790_v54 = vadd.f32 %v1789_v23, %v1575_v61 }
 0x1e3   : > { %v1791_v36 = vpop.f32.mrf.mxu0 }
 0x1e4   : > { %v1792_v14 = vadd.f32 %v1791_v36, %v1575_v61 }
 0x1e6   : > { %v2240_v0 = vcombine.low %v1790_v54, %v1792_v14 }
 0x1e8   : > { %2258 = vst [vmem:[%s3346_s23 + $0x10] sm:$0xff] %v2240_v0 }
 0x1f1   : > { %v1860_v18 = vpop.f32.mrf.mxu1 }
 0x1f2   : > { %v1861_v21 = vadd.f32 %v1860_v18, %v1575_v61 }
 0x1f3   : > { %v1862_v15 = vpop.f32.mrf.mxu1 }
 0x1f4   : > { %v1863_v25 = vadd.f32 %v1862_v15, %v1575_v61 }
 0x1f6   : > { %v2241_v29 = vcombine.low %v1861_v21, %v1863_v25 }
 0x1f8   : > { %2259 = vst [vmem:[%s3346_s23 + $0x18] sm:$0xff] %v2241_v29 }
 0x201   : > { %v1931_v19 = vpop.f32.mrf.mxu0 }
 0x202   : > { %v1932_v39 = vadd.f32 %v1931_v19, %v1575_v61 }
 0x203   : > { %v1933_v11 = vpop.f32.mrf.mxu0 }
 0x204   : > { %v1934_v2 = vadd.f32 %v1933_v11, %v1575_v61 }
 0x206   : > { %v2242_v46 = vcombine.low %v1932_v39, %v1934_v2 }
 0x208   : > { %2260 = vst [vmem:[%s3346_s23 + $0x20] sm:$0xff] %v2242_v46 }
 0x211   : > { %v2002_v28 = vpop.f32.mrf.mxu1 }
 0x212   : > { %v2003_v5 = vadd.f32 %v2002_v28, %v1575_v61 }
 0x213   : > { %v2004_v58 = vpop.f32.mrf.mxu1 }
 0x214   : > { %v2005_v26 = vadd.f32 %v2004_v58, %v1575_v61 }
 0x216   : > { %v2243_v52 = vcombine.low %v2003_v5, %v2005_v26 }
 0x218   : > { %2261 = vst [vmem:[%s3346_s23 + $0x28] sm:$0xff] %v2243_v52 }
 0x221   : > { %v2073_v62 = vpop.f32.mrf.mxu0 }
 0x222   : > { %v2074_v51 = vadd.f32 %v2073_v62, %v1575_v61 }
 0x223   : > { %v2075_v45 = vpop.f32.mrf.mxu0 }
 0x224   : > { %v2076_v49 = vadd.f32 %v2075_v45, %v1575_v61 }
 0x226   : > { %v2244_v44 = vcombine.low %v2074_v51, %v2076_v49 }
 0x228   : > { %2262 = vst [vmem:[%s3346_s23 + $0x30] sm:$0xff] %v2244_v44 }
 0x231   : > { %v2144_v13 = vpop.f32.mrf.mxu1 }
 0x232   : > { %v2145_v48 = vadd.f32 %v2144_v13, %v1575_v61 }
 0x233   : > { %v2146_v1 = vpop.f32.mrf.mxu1 }
 0x234   : > { %v2147_v27 = vadd.f32 %v2146_v1, %v1575_v61 }
 0x236   : > { %v2245_v20 = vcombine.low %v2145_v48, %v2147_v27 }
 0x238   : > { %2263 = vst [vmem:[%s3346_s23 + $0x38] sm:$0xff] %v2245_v20 }
 0x241   : > { %v2215_v22 = vpop.f32.mrf.mxu0 }
 0x242   : > { %v2216_v42 = vadd.f32 %v2215_v22, %v1575_v61 }
 0x243   : > { %v2217_v37 = vpop.f32.mrf.mxu0 }
 0x244   : > { %v2218_v47 = vadd.f32 %v2217_v37, %v1575_v61 }
 0x246   : > { %v2246_v34 = vcombine.low %v2216_v42, %v2218_v47 }
 0x248   : > { %2264 = vst [vmem:[%s3346_s23 + $0x40] sm:$0xff] %v2246_v34 }
 0x249 PF: > { %s15_s20 = sadd.s32 1, %s2522_s20   ;;  %s3372_s18 = smov %s2518_s19 }
 0x24a   : > { %p12_p5 = scmp.ge.s32.totalorder %s15_s20, 4   ;;  %s3373_s19 = smov %s3375_s21 }
 0x24c   :  { %14 = sbr.rel (!%p12_p5) target bundleno = 2 (0x2), region = 70 }

// kernel: lgf_forward.3
= control target key start
LH: loop header
LB: loop body
LE: loop exit
PB: predicated region body
PF: predicated region fallthrough
CT: control target
= control target key end

     0   :  { %vm114_vm0 = vcmask 195584   ;;  %s22561_s0 = inlined_call_operand.vmem [shape: f32[8,48,48], index: 0, kind: input, shape index: {}]   ;;  %s22562_s1 = inlined_call_operand.vmem [shape: f32[8,24,24], index: 1, kind: input, shape index: {}]   ;;  %s22563_s2 = inlined_call_operand.vmem [shape: f32[48,24], index: 2, kind: input, shape index: {}]   ;;  %s22564_s3 = inlined_call_operand.vmem [shape: f32[24,48], index: 3, kind: input, shape index: {}]   ;;  %s22565_s4 = inlined_call_operand.vmem [shape: f32[48,48], index: 4, kind: input, shape index: {}, may-alias: {4,5}]   ;;  %s22566_s5 = inlined_call_operand.vmem [shape: f32[48,48], index: 5, kind: input, shape index: {}, may-alias: {4,5}]   ;;  %s22567_s6 = inlined_call_operand.vmem [shape: f32[48,48], index: 6, kind: input, shape index: {}]   ;;  %s22568_s7 = inlined_call_operand.hbm [shape: f32[8,48,48], index: 7, kind: output, shape index: {}]  }
   0x1   :  { %v77_v0 = vld [vmem:[%s22562_s1 + $0x10] sm:$0xff]  ;;  %v80_v1 = vld [vmem:[%s22562_s1 + $0x28] sm:$0xff]  ;;  %v79_v3 = vld [vmem:[%s22562_s1 + $0x20] sm:$0xff] }
   0x2   :  { %v76_v2 = vld [vmem:[%s22562_s1 + $0x8] sm:$0xff]  ;;  %14804 = vmatprep.subr.mxu0 %v77_v0  ;;  %14819 = vmatprep.subr.mxu1 %v80_v1  ;;  %v75_v4 = vld [vmem:[%s22562_s1] sm:$0xff]  ;;  %v78_v5 = vld [vmem:[%s22562_s1 + $0x18] sm:$0xff] }
   0x3   :  { %14805 = vmatpush3.msra.mxu0 %v77_v0  ;;  %14820 = vmatpush3.msra.mxu1 %v80_v1  ;;  %v17401_v6 = vld [vmem:[%s22563_s2] sm:$0xff]  ;;  %v17406_v7 = vld [vmem:[%s22563_s2 + $0x8] sm:$0xff]  ;;  %v86_v9 = vld [vmem:[%s22562_s1 + $0x58] sm:$0xff] }
   0x4   :  { %14806 = vmatprep.subr.mxu0 %v76_v2  ;;  %14821 = vmatprep.subr.mxu1 %v79_v3  ;;  %v83_v8 = vld [vmem:[%s22562_s1 + $0x40] sm:$0xff]  ;;  %v17425_v10 = vld [vmem:[%s22563_s2 + $0x10] sm:$0xff]  ;;  %v17430_v11 = vld [vmem:[%s22563_s2 + $0x18] sm:$0xff] }
   0x5   :  { %14807 = vmatpush3.msra.mxu0 %v76_v2  ;;  %14822 = vmatpush3.msra.mxu1 %v79_v3  ;;  %v82_v12 = vld [vmem:[%s22562_s1 + $0x38] sm:$0xff]  ;;  %v85_v13 = vld [vmem:[%s22562_s1 + $0x50] sm:$0xff] }
   0x6   :  { %14808 = vmatprep.subr.mxu0 %v75_v4  ;;  %14823 = vmatprep.subr.mxu1 %v78_v5 }
   0x7   :  { %14809 = vmatpush3.msra.mxu0 %v75_v4  ;;  %14810 = vmatprep.mubr.msk.f32.mxu0 %vm114_vm0, %v17401_v6 }
   0x8   :  { %14824 = vmatpush3.msra.mxu1 %v78_v5  ;;  %14825 = vmatprep.mubr.msk.f32.mxu1 %vm114_vm0, %v17401_v6 }
   0x9   :  { %14811 = vmatmul.mubr.msk.f32.vlgmr.msra.gmra.mxu0 %vm114_vm0, %v17406_v7  ;;  %14826 = vmatmul.mubr.msk.f32.vlgmr.msra.gmra.mxu1 %vm114_vm0, %v17406_v7 }
   0xa   :  { %14834 = vmatprep.subr.mxu0 %v83_v8  ;;  %14849 = vmatprep.subr.mxu1 %v86_v9 }
   0xb   :  { %14835 = vmatpush3.msra.mxu0 %v83_v8  ;;  %14850 = vmatpush3.msra.mxu1 %v86_v9 }
   0xc   :  { %12 = vsyncpa [#allocation3], 0  ;;  %14813 = vmatprep.mubr.msk.f32.mxu0 %vm114_vm0, %v17425_v10  ;;  %14828 = vmatprep.mubr.msk.f32.mxu1 %vm114_vm0, %v17425_v10  ;;  %v17449_v14 = vld [vmem:[%s22563_s2 + $0x20] sm:$0xff]  ;;  %v17454_v15 = vld [vmem:[%s22563_s2 + $0x28] sm:$0xff]  ;;  %vm1809_vm1 = vcmask 392192   ;;  %s17337_s10 = smov [#allocation2]  }
   0xd   :  { %14814 = vmatmul.mubr.msk.f32.gmra.mxu0 %vm114_vm0, %v17430_v11  ;;  %14829 = vmatmul.mubr.msk.f32.gmra.mxu1 %vm114_vm0, %v17430_v11  ;;  %v81_v16 = vld [vmem:[%s22562_s1 + $0x30] sm:$0xff]  ;;  %v84_v17 = vld [vmem:[%s22562_s1 + $0x48] sm:$0xff]  ;;  %v91_v21 = vld [vmem:[%s22562_s1 + $0x80] sm:$0xff]  ;;  %s12825_s11 = sshll.u32 %s17337_s10, 4  ;;  %s12826_s11 = int_to_ptr.vmem [resolvable:$true] %s12825_s11 }
   0xe   :  { %14836 = vmatprep.subr.mxu0 %v82_v12  ;;  %14851 = vmatprep.subr.mxu1 %v85_v13  ;;  %v89_v18 = vld [vmem:[%s22562_s1 + $0x70] sm:$0xff]  ;;  %v92_v19 = vld [vmem:[%s22562_s1 + $0x88] sm:$0xff]  ;;  %v87_v22 = vld [vmem:[%s22562_s1 + $0x60] sm:$0xff]  ;;  %p17320_p1 = scmp.lt.s32.totalorder %s12826_s11, %s12826_s11 }
   0xf   :  { %14837 = vmatpush3.msra.mxu0 %v82_v12  ;;  %14852 = vmatpush3.msra.mxu1 %v85_v13  ;;  %v88_v20 = vld [vmem:[%s22562_s1 + $0x68] sm:$0xff]  ;;  %v90_v23 = vld [vmem:[%s22562_s1 + $0x78] sm:$0xff]  ;;  %v95_v24 = vld [vmem:[%s22562_s1 + $0xa0] sm:$0xff] }
  0x10   :  { %14816 = vmatprep.mubr.msk.f32.mxu0 %vm114_vm0, %v17449_v14  ;;  %14831 = vmatprep.mubr.msk.f32.mxu1 %vm114_vm0, %v17449_v14  ;;  %v98_v25 = vld [vmem:[%s22562_s1 + $0xb8] sm:$0xff]  ;;  %v97_v27 = vld [vmem:[%s22562_s1 + $0xb0] sm:$0xff]  ;;  %v96_v29 = vld [vmem:[%s22562_s1 + $0xa8] sm:$0xff] }
  0x11   :  { %14817 = vmatmul.mubr.msk.f32.gmra.mxu0 %vm114_vm0, %v17454_v15  ;;  %14832 = vmatmul.mubr.msk.f32.gmra.mxu1 %vm114_vm0, %v17454_v15  ;;  %v94_v26 = vld [vmem:[%s22562_s1 + $0x98] sm:$0xff]  ;;  %v93_v28 = vld [vmem:[%s22562_s1 + $0x90] sm:$0xff]  ;;  %v17578_v31 = vld [vmem:[%s22564_s3 + $0x8] sm:$0xff] }
  0x12   :  { %14838 = vmatprep.subr.mxu0 %v81_v16  ;;  %14853 = vmatprep.subr.mxu1 %v84_v17  ;;  %v17561_v30 = vld [vmem:[%s22564_s3 + $0x10] sm:$0xff]  ;;  %v17599_v32 = vld [vmem:[%s22564_s3] sm:$0xff]  ;;  %v32_v5 = vld [vmem:[%s22561_s0 + $0x28] sm:$0xff] }
  0x13   :  { %14839 = vmatpush3.msra.mxu0 %v81_v16  ;;  %14854 = vmatpush3.msra.mxu1 %v84_v17  ;;  %v37_v12 = vld [vmem:[%s22561_s0 + $0x50] sm:$0xff]  ;;  %v30_v17 = vld [vmem:[%s22561_s0 + $0x18] sm:$0xff] }
  0x14   :  { %14840 = vmatprep.mubr.msk.f32.mxu0 %vm114_vm0, %v17401_v6  ;;  %14855 = vmatprep.mubr.msk.f32.mxu1 %vm114_vm0, %v17401_v6 }
  0x15   :  { %14841 = vmatmul.mubr.msk.f32.vlgmr.msra.gmra.mxu0 %vm114_vm0, %v17406_v7  ;;  %14856 = vmatmul.mubr.msk.f32.vlgmr.msra.gmra.mxu1 %vm114_vm0, %v17406_v7 }
  0x16   :  { %14864 = vmatprep.subr.mxu0 %v89_v18  ;;  %14879 = vmatprep.subr.mxu1 %v92_v19 }
  0x17   :  { %14865 = vmatpush3.msra.mxu0 %v89_v18  ;;  %14880 = vmatpush3.msra.mxu1 %v92_v19  ;;  %v36_v18 = vld [vmem:[%s22561_s0 + $0x48] sm:$0xff] }
  0x18   :  { %14843 = vmatprep.mubr.msk.f32.mxu0 %vm114_vm0, %v17425_v10  ;;  %14858 = vmatprep.mubr.msk.f32.mxu1 %vm114_vm0, %v17425_v10 }
  0x19   :  { %14844 = vmatmul.mubr.msk.f32.gmra.mxu0 %vm114_vm0, %v17430_v11  ;;  %14859 = vmatmul.mubr.msk.f32.gmra.mxu1 %vm114_vm0, %v17430_v11 }
  0x1a   :  { %14866 = vmatprep.subr.mxu0 %v88_v20  ;;  %14881 = vmatprep.subr.mxu1 %v91_v21 }
  0x1b   :  { %14867 = vmatpush3.msra.mxu0 %v88_v20  ;;  %14882 = vmatpush3.msra.mxu1 %v91_v21  ;;  %v29_v21 = vld [vmem:[%s22561_s0 + $0x10] sm:$0xff] }
  0x1c   :  { %14846 = vmatprep.mubr.msk.f32.mxu0 %vm114_vm0, %v17449_v14  ;;  %14861 = vmatprep.mubr.msk.f32.mxu1 %vm114_vm0, %v17449_v14 }
  0x1d   :  { %14847 = vmatmul.mubr.msk.f32.gmra.mxu0 %vm114_vm0, %v17454_v15  ;;  %14862 = vmatmul.mubr.msk.f32.gmra.mxu1 %vm114_vm0, %v17454_v15 }
  0x1e   :  { %14868 = vmatprep.subr.mxu0 %v87_v22  ;;  %14883 = vmatprep.subr.mxu1 %v90_v23 }
  0x1f   :  { %14869 = vmatpush3.msra.mxu0 %v87_v22  ;;  %14884 = vmatpush3.msra.mxu1 %v90_v23  ;;  %v35_v22 = vld [vmem:[%s22561_s0 + $0x40] sm:$0xff] }
  0x20   :  { %14870 = vmatprep.mubr.msk.f32.mxu0 %vm114_vm0, %v17401_v6  ;;  %14885 = vmatprep.mubr.msk.f32.mxu1 %vm114_vm0, %v17401_v6 }
  0x21   :  { %14871 = vmatmul.mubr.msk.f32.vlgmr.msra.gmra.mxu0 %vm114_vm0, %v17406_v7  ;;  %14886 = vmatmul.mubr.msk.f32.vlgmr.msra.gmra.mxu1 %vm114_vm0, %v17406_v7 }
  0x22   :  { %14894 = vmatprep.subr.mxu0 %v95_v24  ;;  %14909 = vmatprep.subr.mxu1 %v98_v25 }
  0x23   :  { %14895 = vmatpush3.msra.mxu0 %v95_v24  ;;  %14910 = vmatpush3.msra.mxu1 %v98_v25  ;;  %v28_v25 = vld [vmem:[%s22561_s0 + $0x8] sm:$0xff] }
  0x24   :  { %14873 = vmatprep.mubr.msk.f32.mxu0 %vm114_vm0, %v17425_v10  ;;  %14888 = vmatprep.mubr.msk.f32.mxu1 %vm114_vm0, %v17425_v10 }
  0x25   :  { %14874 = vmatmul.mubr.msk.f32.gmra.mxu0 %vm114_vm0, %v17430_v11  ;;  %14889 = vmatmul.mubr.msk.f32.gmra.mxu1 %vm114_vm0, %v17430_v11 }
  0x26   :  { %14896 = vmatprep.subr.mxu0 %v94_v26  ;;  %14911 = vmatprep.subr.mxu1 %v97_v27 }
  0x27   :  { %14897 = vmatpush3.msra.mxu0 %v94_v26  ;;  %14912 = vmatpush3.msra.mxu1 %v97_v27  ;;  %v34_v26 = vld [vmem:[%s22561_s0 + $0x38] sm:$0xff]  ;;  %v27_v27 = vld [vmem:[%s22561_s0] sm:$0xff] }
  0x28   :  { %14876 = vmatprep.mubr.msk.f32.mxu0 %vm114_vm0, %v17449_v14  ;;  %14891 = vmatprep.mubr.msk.f32.mxu1 %vm114_vm0, %v17449_v14 }
  0x29   :  { %14877 = vmatmul.mubr.msk.f32.gmra.mxu0 %vm114_vm0, %v17454_v15  ;;  %14892 = vmatmul.mubr.msk.f32.gmra.mxu1 %vm114_vm0, %v17454_v15 }
  0x2a   :  { %14898 = vmatprep.subr.mxu0 %v93_v28  ;;  %14913 = vmatprep.subr.mxu1 %v96_v29 }
  0x2b   :  { %14899 = vmatpush3.msra.mxu0 %v93_v28  ;;  %14914 = vmatpush3.msra.mxu1 %v96_v29  ;;  %v33_v28 = vld [vmem:[%s22561_s0 + $0x30] sm:$0xff]  ;;  %v17728_v29 = vld [vmem:[%s22565_s4] sm:$0xff] }
  0x2c   :  { %14900 = vmatprep.mubr.msk.f32.mxu0 %vm114_vm0, %v17401_v6  ;;  %14915 = vmatprep.mubr.msk.f32.mxu1 %vm114_vm0, %v17401_v6  ;;  %v38_v6 = vld [vmem:[%s22561_s0 + $0x58] sm:$0xff] }
  0x2d   :  { %14901 = vmatmul.mubr.msk.f32.vlgmr.msra.gmra.mxu0 %vm114_vm0, %v17406_v7  ;;  %14916 = vmatmul.mubr.msk.f32.vlgmr.msra.gmra.mxu1 %vm114_vm0, %v17406_v7 }
  0x2e   :  { %14903 = vmatprep.mubr.msk.f32.mxu0 %vm114_vm0, %v17425_v10  ;;  %14918 = vmatprep.mubr.msk.f32.mxu1 %vm114_vm0, %v17425_v10 }
  0x2f   :  { %14924 = vmatprep.subr.mxu0 %v17561_v30  ;;  %14939 = vmatprep.subr.mxu1 %v17561_v30 }
  0x30   :  { %14925 = vmatpush3.msra.mxu0 %v17561_v30  ;;  %14940 = vmatpush3.msra.mxu1 %v17561_v30 }
  0x31   :  { %14904 = vmatmul.mubr.msk.f32.gmra.mxu0 %vm114_vm0, %v17430_v11  ;;  %14919 = vmatmul.mubr.msk.f32.gmra.mxu1 %vm114_vm0, %v17430_v11  ;;  %v31_v11 = vld [vmem:[%s22561_s0 + $0x20] sm:$0xff] }
  0x32   :  { %14906 = vmatprep.mubr.msk.f32.mxu0 %vm114_vm0, %v17449_v14  ;;  %14921 = vmatprep.mubr.msk.f32.mxu1 %vm114_vm0, %v17449_v14 }
  0x33   :  { %14926 = vmatprep.subr.mxu0 %v17578_v31  ;;  %14941 = vmatprep.subr.mxu1 %v17578_v31 }
  0x34   :  { %14927 = vmatpush3.msra.mxu0 %v17578_v31  ;;  %14942 = vmatpush3.msra.mxu1 %v17578_v31 }
  0x35   :  { %14907 = vmatmul.mubr.msk.f32.gmra.mxu0 %vm114_vm0, %v17454_v15  ;;  %14922 = vmatmul.mubr.msk.f32.gmra.mxu1 %vm114_vm0, %v17454_v15 }
  0x36   :  { %14928 = vmatprep.subr.mxu0 %v17599_v32  ;;  %14943 = vmatprep.subr.mxu1 %v17599_v32 }
  0x37   :  { %14929 = vmatpush3.msra.mxu0 %v17599_v32  ;;  %14944 = vmatpush3.msra.mxu1 %v17599_v32 }
  0x38   :  { %14954 = vmatprep.subr.mxu0 %v17561_v30  ;;  %14969 = vmatprep.subr.mxu1 %v17561_v30 }
  0xc9   :  { %v14812_v33 = vpop.f32.mrf.mxu0  ;;  %v14827_v34 = vpop.f32.mrf.mxu1 }
  0xcb   :  { %v199_v35 = vpop.f32.mrf.mxu0  ;;  %v294_v36 = vpop.f32.mrf.mxu1 }
  0xcc   :  { %14930 = vmatprep.mubr.msk.f32.mxu0 %vm114_vm0, %v199_v35  ;;  %14945 = vmatprep.mubr.msk.f32.mxu1 %vm114_vm0, %v294_v36  ;;  %v17758_v35 = vld [vmem:[%s22565_s4 + $0x10] sm:$0xff]  ;;  %v17763_v36 = vld [vmem:[%s22565_s4 + $0x18] sm:$0xff] }
  0xcd   :  { %v14815_v37 = vpop.f32.mrf.mxu0  ;;  %v14830_v38 = vpop.f32.mrf.mxu1  ;;  %14931 = vmatmul.mubr.msk.f32.vlgmr.msra.gmra.mxu0 %vm114_vm0, %v14812_v33  ;;  %14946 = vmatmul.mubr.msk.f32.vlgmr.msra.gmra.mxu1 %vm114_vm0, %v14827_v34  ;;  %v43_v33 = vld [vmem:[%s22561_s0 + $0x80] sm:$0xff]  ;;  %v49_v34 = vld [vmem:[%s22561_s0 + $0xb0] sm:$0xff] }
  0xce   :  { %14955 = vmatpush3.msra.mxu0 %v17561_v30  ;;  %14970 = vmatpush3.msra.mxu1 %v17561_v30 }
  0xcf   :  { %v209_v39 = vpop.f32.mrf.mxu0  ;;  %v304_v40 = vpop.f32.mrf.mxu1  ;;  %14956 = vmatprep.subr.mxu0 %v17578_v31  ;;  %14971 = vmatprep.subr.mxu1 %v17578_v31 }
  0xd0   :  { %14933 = vmatprep.mubr.msk.f32.mxu0 %vm114_vm0, %v209_v39  ;;  %14948 = vmatprep.mubr.msk.f32.mxu1 %vm114_vm0, %v304_v40  ;;  %v41_v39 = vld [vmem:[%s22561_s0 + $0x70] sm:$0xff]  ;;  %v47_v40 = vld [vmem:[%s22561_s0 + $0xa0] sm:$0xff] }
  0xd1   :  { %v14818_v41 = vpop.f32.mrf.mxu0  ;;  %v14833_v42 = vpop.f32.mrf.mxu1  ;;  %14934 = vmatmul.mubr.msk.f32.gmra.mxu0 %vm114_vm0, %v14815_v37  ;;  %14949 = vmatmul.mubr.msk.f32.gmra.mxu1 %vm114_vm0, %v14830_v38  ;;  %v42_v37 = vld [vmem:[%s22561_s0 + $0x78] sm:$0xff]  ;;  %v48_v38 = vld [vmem:[%s22561_s0 + $0xa8] sm:$0xff] }
  0xd2   :  { %14957 = vmatpush3.msra.mxu0 %v17578_v31  ;;  %14972 = vmatpush3.msra.mxu1 %v17578_v31 }
  0xd3   :  { %v219_v43 = vpop.f32.mrf.mxu0  ;;  %v314_v44 = vpop.f32.mrf.mxu1  ;;  %14958 = vmatprep.subr.mxu0 %v17599_v32  ;;  %14973 = vmatprep.subr.mxu1 %v17599_v32 }
  0xd4   :  { %14936 = vmatprep.mubr.msk.f32.mxu0 %vm114_vm0, %v219_v43  ;;  %14951 = vmatprep.mubr.msk.f32.mxu1 %vm114_vm0, %v314_v44  ;;  %v40_v43 = vld [vmem:[%s22561_s0 + $0x68] sm:$0xff]  ;;  %v46_v44 = vld [vmem:[%s22561_s0 + $0x98] sm:$0xff] }
  0xd5   :  { %v14842_v45 = vpop.f32.mrf.mxu0  ;;  %v14857_v46 = vpop.f32.mrf.mxu1  ;;  %14937 = vmatmul.mubr.msk.f32.gmra.mxu0 %vm114_vm0, %v14818_v41  ;;  %14952 = vmatmul.mubr.msk.f32.gmra.mxu1 %vm114_vm0, %v14833_v42  ;;  %v17788_v41 = vld [vmem:[%s22565_s4 + $0x20] sm:$0xff]  ;;  %v17793_v42 = vld [vmem:[%s22565_s4 + $0x28] sm:$0xff] }
  0xd6   :  { %14959 = vmatpush3.msra.mxu0 %v17599_v32  ;;  %14974 = vmatpush3.msra.mxu1 %v17599_v32 }
  0xd7   :  { %v389_v47 = vpop.f32.mrf.mxu0  ;;  %v484_v48 = vpop.f32.mrf.mxu1  ;;  %14984 = vmatprep.subr.mxu0 %v17561_v30  ;;  %14999 = vmatprep.subr.mxu1 %v17561_v30 }
  0xd8   :  { %14960 = vmatprep.mubr.msk.f32.mxu0 %vm114_vm0, %v389_v47  ;;  %14975 = vmatprep.mubr.msk.f32.mxu1 %vm114_vm0, %v484_v48  ;;  %v56_v47 = vld [vmem:[%s22561_s0 + $0xe8] sm:$0xff]  ;;  %v62_v48 = vld [vmem:[%s22561_s0 + $0x118] sm:$0xff] }
  0xd9   :  { %v14845_v49 = vpop.f32.mrf.mxu0  ;;  %v14860_v50 = vpop.f32.mrf.mxu1  ;;  %14961 = vmatmul.mubr.msk.f32.vlgmr.msra.gmra.mxu0 %vm114_vm0, %v14842_v45  ;;  %14976 = vmatmul.mubr.msk.f32.vlgmr.msra.gmra.mxu1 %vm114_vm0, %v14857_v46  ;;  %v39_v45 = vld [vmem:[%s22561_s0 + $0x60] sm:$0xff]  ;;  %v45_v46 = vld [vmem:[%s22561_s0 + $0x90] sm:$0xff] }
  0xda   :  { %14985 = vmatpush3.msra.mxu0 %v17561_v30  ;;  %15000 = vmatpush3.msra.mxu1 %v17561_v30 }
  0xdb   :  { %v399_v51 = vpop.f32.mrf.mxu0  ;;  %v494_v52 = vpop.f32.mrf.mxu1  ;;  %14986 = vmatprep.subr.mxu0 %v17578_v31  ;;  %15001 = vmatprep.subr.mxu1 %v17578_v31 }
  0xdc   :  { %14963 = vmatprep.mubr.msk.f32.mxu0 %vm114_vm0, %v399_v51  ;;  %14978 = vmatprep.mubr.msk.f32.mxu1 %vm114_vm0, %v494_v52  ;;  %v54_v51 = vld [vmem:[%s22561_s0 + $0xd8] sm:$0xff]  ;;  %v60_v52 = vld [vmem:[%s22561_s0 + $0x108] sm:$0xff] }
  0xdd   :  { %v14848_v53 = vpop.f32.mrf.mxu0  ;;  %v14863_v54 = vpop.f32.mrf.mxu1  ;;  %14964 = vmatmul.mubr.msk.f32.gmra.mxu0 %vm114_vm0, %v14845_v49  ;;  %14979 = vmatmul.mubr.msk.f32.gmra.mxu1 %vm114_vm0, %v14860_v50  ;;  %v55_v49 = vld [vmem:[%s22561_s0 + $0xe0] sm:$0xff]  ;;  %v61_v50 = vld [vmem:[%s22561_s0 + $0x110] sm:$0xff] }
  0xde   :  { %14987 = vmatpush3.msra.mxu0 %v17578_v31  ;;  %15002 = vmatpush3.msra.mxu1 %v17578_v31 }
  0xdf   :  { %v409_v55 = vpop.f32.mrf.mxu0  ;;  %v504_v56 = vpop.f32.mrf.mxu1  ;;  %14988 = vmatprep.subr.mxu0 %v17599_v32  ;;  %15003 = vmatprep.subr.mxu1 %v17599_v32 }
  0xe0   :  { %14966 = vmatprep.mubr.msk.f32.mxu0 %vm114_vm0, %v409_v55  ;;  %14981 = vmatprep.mubr.msk.f32.mxu1 %vm114_vm0, %v504_v56  ;;  %v52_v55 = vld [vmem:[%s22561_s0 + $0xc8] sm:$0xff]  ;;  %v58_v56 = vld [vmem:[%s22561_s0 + $0xf8] sm:$0xff] }
  0xe1   :  { %v14872_v57 = vpop.f32.mrf.mxu0  ;;  %v14887_v58 = vpop.f32.mrf.mxu1  ;;  %14967 = vmatmul.mubr.msk.f32.gmra.mxu0 %vm114_vm0, %v14848_v53  ;;  %14982 = vmatmul.mubr.msk.f32.gmra.mxu1 %vm114_vm0, %v14863_v54  ;;  %v53_v53 = vld [vmem:[%s22561_s0 + $0xd0] sm:$0xff]  ;;  %v59_v54 = vld [vmem:[%s22561_s0 + $0x100] sm:$0xff] }
  0xe2   :  { %14989 = vmatpush3.msra.mxu0 %v17599_v32  ;;  %15004 = vmatpush3.msra.mxu1 %v17599_v32 }
  0xe3   :  { %v579_v59 = vpop.f32.mrf.mxu0  ;;  %v674_v60 = vpop.f32.mrf.mxu1  ;;  %15014 = vmatprep.subr.mxu0 %v17561_v30  ;;  %15029 = vmatprep.subr.mxu1 %v17561_v30 }
  0xe4   :  { %14990 = vmatprep.mubr.msk.f32.mxu0 %vm114_vm0, %v579_v59  ;;  %15005 = vmatprep.mubr.msk.f32.mxu1 %vm114_vm0, %v674_v60  ;;  %v68_v59 = vld [vmem:[%s22561_s0 + $0x148] sm:$0xff]  ;;  %v74_v60 = vld [vmem:[%s22561_s0 + $0x178] sm:$0xff] }
  0xe5   :  { %v14875_v61 = vpop.f32.mrf.mxu0  ;;  %v14890_v62 = vpop.f32.mrf.mxu1  ;;  %14991 = vmatmul.mubr.msk.f32.vlgmr.msra.gmra.mxu0 %vm114_vm0, %v14872_v57  ;;  %15006 = vmatmul.mubr.msk.f32.vlgmr.msra.gmra.mxu1 %vm114_vm0, %v14887_v58  ;;  %v51_v57 = vld [vmem:[%s22561_s0 + $0xc0] sm:$0xff]  ;;  %v57_v58 = vld [vmem:[%s22561_s0 + $0xf0] sm:$0xff] }
  0xe6   :  { %15015 = vmatpush3.msra.mxu0 %v17561_v30  ;;  %15030 = vmatpush3.msra.mxu1 %v17561_v30  ;;  %v17733_v30 = vld [vmem:[%s22565_s4 + $0x8] sm:$0xff] }
  0xe7   :  { %v589_v63 = vpop.f32.mrf.mxu0  ;;  %v684_v0 = vpop.f32.mrf.mxu1  ;;  %15016 = vmatprep.subr.mxu0 %v17578_v31  ;;  %15031 = vmatprep.subr.mxu1 %v17578_v31 }
  0xe8   :  { %14993 = vmatprep.mubr.msk.f32.mxu0 %vm114_vm0, %v589_v63  ;;  %15008 = vmatprep.mubr.msk.f32.mxu1 %vm114_vm0, %v684_v0  ;;  %v66_v63 = vld [vmem:[%s22561_s0 + $0x138] sm:$0xff]  ;;  %v72_v0 = vld [vmem:[%s22561_s0 + $0x168] sm:$0xff] }
  0xe9   :  { %v14878_v1 = vpop.f32.mrf.mxu0  ;;  %v14893_v2 = vpop.f32.mrf.mxu1  ;;  %14994 = vmatmul.mubr.msk.f32.gmra.mxu0 %vm114_vm0, %v14875_v61  ;;  %15009 = vmatmul.mubr.msk.f32.gmra.mxu1 %vm114_vm0, %v14890_v62  ;;  %v67_v61 = vld [vmem:[%s22561_s0 + $0x140] sm:$0xff]  ;;  %v73_v62 = vld [vmem:[%s22561_s0 + $0x170] sm:$0xff] }
  0xea   :  { %15017 = vmatpush3.msra.mxu0 %v17578_v31  ;;  %15032 = vmatpush3.msra.mxu1 %v17578_v31  ;;  %v44_v31 = vld [vmem:[%s22561_s0 + $0x88] sm:$0xff] }
  0xeb   :  { %v599_v3 = vpop.f32.mrf.mxu0  ;;  %v694_v4 = vpop.f32.mrf.mxu1  ;;  %15018 = vmatprep.subr.mxu0 %v17599_v32  ;;  %15033 = vmatprep.subr.mxu1 %v17599_v32 }
  0xec   :  { %14996 = vmatprep.mubr.msk.f32.mxu0 %vm114_vm0, %v599_v3  ;;  %15011 = vmatprep.mubr.msk.f32.mxu1 %vm114_vm0, %v694_v4  ;;  %v64_v3 = vld [vmem:[%s22561_s0 + $0x128] sm:$0xff]  ;;  %v70_v4 = vld [vmem:[%s22561_s0 + $0x158] sm:$0xff] }
  0xed   :  { %v14902_v7 = vpop.f32.mrf.mxu0  ;;  %v14917_v8 = vpop.f32.mrf.mxu1  ;;  %14997 = vmatmul.mubr.msk.f32.gmra.mxu0 %vm114_vm0, %v14878_v1  ;;  %15012 = vmatmul.mubr.msk.f32.gmra.mxu1 %vm114_vm0, %v14893_v2  ;;  %v65_v1 = vld [vmem:[%s22561_s0 + $0x130] sm:$0xff]  ;;  %v71_v2 = vld [vmem:[%s22561_s0 + $0x160] sm:$0xff] }
  0xee   :  { %15019 = vmatpush3.msra.mxu0 %v17599_v32  ;;  %15034 = vmatpush3.msra.mxu1 %v17599_v32  ;;  %v50_v32 = vld [vmem:[%s22561_s0 + $0xb8] sm:$0xff] }
  0xef   :  { %v769_v9 = vpop.f32.mrf.mxu0  ;;  %v864_v10 = vpop.f32.mrf.mxu1  ;;  %15044 = vmatprep.subr.mxu0 %v32_v5  ;;  %15065 = vmatprep.subr.mxu1 %v38_v6 }
  0xf0   :  { %15020 = vmatprep.mubr.msk.f32.mxu0 %vm114_vm0, %v769_v9  ;;  %15035 = vmatprep.mubr.msk.f32.mxu1 %vm114_vm0, %v864_v10  ;;  %v17974_v9 = vld [vmem:[%s22566_s5 + $0x18] sm:$0xff]  ;;  %v17985_v10 = vld [vmem:[%s22566_s5 + $0x10] sm:$0xff] }
  0xf1   :  { %v14905_v13 = vpop.f32.mrf.mxu0  ;;  %v14920_v14 = vpop.f32.mrf.mxu1  ;;  %15021 = vmatmul.mubr.msk.f32.vlgmr.msra.gmra.mxu0 %vm114_vm0, %v14902_v7  ;;  %15036 = vmatmul.mubr.msk.f32.vlgmr.msra.gmra.mxu1 %vm114_vm0, %v14917_v8  ;;  %v17942_v7 = vld [vmem:[%s22566_s5 + $0x28] sm:$0xff]  ;;  %v17959_v8 = vld [vmem:[%s22566_s5 + $0x20] sm:$0xff] }
  0xf2   :  { %15045 = vmatpush3.msra.mxu0 %v32_v5  ;;  %15066 = vmatpush3.msra.mxu1 %v38_v6  ;;  %v63_v5 = vld [vmem:[%s22561_s0 + $0x120] sm:$0xff]  ;;  %v69_v6 = vld [vmem:[%s22561_s0 + $0x150] sm:$0xff] }
  0xf3   :  { %v779_v15 = vpop.f32.mrf.mxu0  ;;  %v874_v16 = vpop.f32.mrf.mxu1  ;;  %15046 = vmatprep.subr.mxu0 %v31_v11  ;;  %15067 = vmatprep.subr.mxu1 %v37_v12 }
  0xf4   :  { %15023 = vmatprep.mubr.msk.f32.mxu0 %vm114_vm0, %v779_v15  ;;  %15038 = vmatprep.mubr.msk.f32.mxu1 %vm114_vm0, %v874_v16 }
  0xf5   :  { %15047 = vmatpush3.msra.mxu0 %v31_v11  ;;  %15068 = vmatpush3.msra.mxu1 %v37_v12  ;;  %v14908_v19 = vpop.f32.mrf.mxu0  ;;  %v14923_v20 = vpop.f32.mrf.mxu1  ;;  %v17994_v11 = vld [vmem:[%s22566_s5 + $0x8] sm:$0xff]  ;;  %v18003_v12 = vld [vmem:[%s22566_s5] sm:$0xff] }
  0xf6   :  { %15024 = vmatmul.mubr.msk.f32.gmra.mxu0 %vm114_vm0, %v14905_v13  ;;  %15039 = vmatmul.mubr.msk.f32.gmra.mxu1 %vm114_vm0, %v14920_v14  ;;  %22735 = vst [vmem:[#allocation5_spill] sm:$0xff] %v17994_v11  ;;  %22736 = vst [vmem:[#allocation6_spill] sm:$0xff] %v18003_v12 }
  0xf7   :  { %15048 = vmatprep.subr.mxu0 %v30_v17  ;;  %15069 = vmatprep.subr.mxu1 %v36_v18  ;;  %v789_v23 = vpop.f32.mrf.mxu0  ;;  %v884_v24 = vpop.f32.mrf.mxu1 }
  0xf8   :  { %15049 = vmatpush3.msra.mxu0 %v30_v17  ;;  %15070 = vmatpush3.msra.mxu1 %v36_v18 }
  0xf9   :  { %15050 = vmatprep.subr.mxu0 %v29_v21  ;;  %15071 = vmatprep.subr.mxu1 %v35_v22 }
  0xfa   :  { %15026 = vmatprep.mubr.msk.f32.mxu0 %vm114_vm0, %v789_v23  ;;  %15041 = vmatprep.mubr.msk.f32.mxu1 %vm114_vm0, %v884_v24 }
  0xfb   :  { %15051 = vmatpush3.msra.mxu0 %v29_v21  ;;  %15072 = vmatpush3.msra.mxu1 %v35_v22 }
  0xfc   :  { %15027 = vmatmul.mubr.msk.f32.gmra.mxu0 %vm114_vm0, %v14908_v19  ;;  %15042 = vmatmul.mubr.msk.f32.gmra.mxu1 %vm114_vm0, %v14923_v20 }
  0xfd   :  { %15052 = vmatprep.subr.mxu0 %v28_v25  ;;  %15073 = vmatprep.subr.mxu1 %v34_v26 }
  0xfe   :  { %15053 = vmatpush3.msra.mxu0 %v28_v25  ;;  %15074 = vmatpush3.msra.mxu1 %v34_v26 }
  0xff   :  { %15054 = vmatprep.subr.mxu0 %v27_v27  ;;  %15075 = vmatprep.subr.mxu1 %v33_v28 }
 0x100   :  { %15055 = vmatpush3.msra.mxu0 %v27_v27  ;;  %15056 = vmatprep.mubr.msk.f32.mxu0 %vm1809_vm1, %v17728_v29 }
 0x101   :  { %15076 = vmatpush3.msra.mxu1 %v33_v28  ;;  %15077 = vmatprep.mubr.msk.f32.mxu1 %vm1809_vm1, %v17728_v29 }
 0x102   :  { %15057 = vmatmul.mubr.msk.f32.vlgmr.msra.gmra.mxu0 %vm1809_vm1, %v17733_v30  ;;  %15078 = vmatmul.mubr.msk.f32.vlgmr.msra.gmra.mxu1 %vm1809_vm1, %v17733_v30 }
 0x103   :  { %15086 = vmatprep.subr.mxu0 %v44_v31  ;;  %15107 = vmatprep.subr.mxu1 %v50_v32 }
 0x104   :  { %15087 = vmatpush3.msra.mxu0 %v44_v31  ;;  %15108 = vmatpush3.msra.mxu1 %v50_v32 }
 0x105   :  { %15088 = vmatprep.subr.mxu0 %v43_v33  ;;  %15109 = vmatprep.subr.mxu1 %v49_v34 }
 0x106   :  { %15059 = vmatprep.mubr.msk.f32.mxu0 %vm1809_vm1, %v17758_v35  ;;  %15080 = vmatprep.mubr.msk.f32.mxu1 %vm1809_vm1, %v17758_v35 }
 0x107   :  { %15089 = vmatpush3.msra.mxu0 %v43_v33  ;;  %15110 = vmatpush3.msra.mxu1 %v49_v34 }
 0x108   :  { %15060 = vmatmul.mubr.msk.f32.gmra.mxu0 %vm1809_vm1, %v17763_v36  ;;  %15081 = vmatmul.mubr.msk.f32.gmra.mxu1 %vm1809_vm1, %v17763_v36 }
 0x109   :  { %15090 = vmatprep.subr.mxu0 %v42_v37  ;;  %15111 = vmatprep.subr.mxu1 %v48_v38 }
 0x10a   :  { %15091 = vmatpush3.msra.mxu0 %v42_v37  ;;  %15112 = vmatpush3.msra.mxu1 %v48_v38 }
 0x10b   :  { %15092 = vmatprep.subr.mxu0 %v41_v39  ;;  %15113 = vmatprep.subr.mxu1 %v47_v40 }
 0x10c   :  { %15062 = vmatprep.mubr.msk.f32.mxu0 %vm1809_vm1, %v17788_v41  ;;  %15083 = vmatprep.mubr.msk.f32.mxu1 %vm1809_vm1, %v17788_v41 }
 0x10d   :  { %15093 = vmatpush3.msra.mxu0 %v41_v39  ;;  %15114 = vmatpush3.msra.mxu1 %v47_v40 }
 0x10e   :  { %15063 = vmatmul.mubr.msk.f32.gmra.mxu0 %vm1809_vm1, %v17793_v42  ;;  %15084 = vmatmul.mubr.msk.f32.gmra.mxu1 %vm1809_vm1, %v17793_v42 }
 0x10f   :  { %15094 = vmatprep.subr.mxu0 %v40_v43  ;;  %15115 = vmatprep.subr.mxu1 %v46_v44 }
 0x110   :  { %15095 = vmatpush3.msra.mxu0 %v40_v43  ;;  %15116 = vmatpush3.msra.mxu1 %v46_v44 }
 0x111   :  { %15096 = vmatprep.subr.mxu0 %v39_v45  ;;  %15117 = vmatprep.subr.mxu1 %v45_v46 }
 0x112   :  { %15097 = vmatpush3.msra.mxu0 %v39_v45  ;;  %15098 = vmatprep.mubr.msk.f32.mxu0 %vm1809_vm1, %v17728_v29 }
 0x113   :  { %15118 = vmatpush3.msra.mxu1 %v45_v46  ;;  %15119 = vmatprep.mubr.msk.f32.mxu1 %vm1809_vm1, %v17728_v29 }
 0x114   :  { %15099 = vmatmul.mubr.msk.f32.vlgmr.msra.gmra.mxu0 %vm1809_vm1, %v17733_v30  ;;  %15120 = vmatmul.mubr.msk.f32.vlgmr.msra.gmra.mxu1 %vm1809_vm1, %v17733_v30 }
 0x115   :  { %15128 = vmatprep.subr.mxu0 %v56_v47  ;;  %15149 = vmatprep.subr.mxu1 %v62_v48 }
 0x116   :  { %15129 = vmatpush3.msra.mxu0 %v56_v47  ;;  %15150 = vmatpush3.msra.mxu1 %v62_v48 }
 0x117   :  { %15130 = vmatprep.subr.mxu0 %v55_v49  ;;  %15151 = vmatprep.subr.mxu1 %v61_v50 }
 0x118   :  { %15101 = vmatprep.mubr.msk.f32.mxu0 %vm1809_vm1, %v17758_v35  ;;  %15122 = vmatprep.mubr.msk.f32.mxu1 %vm1809_vm1, %v17758_v35 }
 0x119   :  { %15131 = vmatpush3.msra.mxu0 %v55_v49  ;;  %15152 = vmatpush3.msra.mxu1 %v61_v50 }
 0x11a   :  { %15102 = vmatmul.mubr.msk.f32.gmra.mxu0 %vm1809_vm1, %v17763_v36  ;;  %15123 = vmatmul.mubr.msk.f32.gmra.mxu1 %vm1809_vm1, %v17763_v36 }
 0x11b   :  { %15132 = vmatprep.subr.mxu0 %v54_v51  ;;  %15153 = vmatprep.subr.mxu1 %v60_v52 }
 0x11c   :  { %15133 = vmatpush3.msra.mxu0 %v54_v51  ;;  %15154 = vmatpush3.msra.mxu1 %v60_v52 }
 0x11d   :  { %15134 = vmatprep.subr.mxu0 %v53_v53  ;;  %15155 = vmatprep.subr.mxu1 %v59_v54 }
 0x11e   :  { %15104 = vmatprep.mubr.msk.f32.mxu0 %vm1809_vm1, %v17788_v41  ;;  %15125 = vmatprep.mubr.msk.f32.mxu1 %vm1809_vm1, %v17788_v41 }
 0x11f   :  { %15135 = vmatpush3.msra.mxu0 %v53_v53  ;;  %15156 = vmatpush3.msra.mxu1 %v59_v54 }
 0x120   :  { %15105 = vmatmul.mubr.msk.f32.gmra.mxu0 %vm1809_vm1, %v17793_v42  ;;  %15126 = vmatmul.mubr.msk.f32.gmra.mxu1 %vm1809_vm1, %v17793_v42 }
 0x121   :  { %15136 = vmatprep.subr.mxu0 %v52_v55  ;;  %15157 = vmatprep.subr.mxu1 %v58_v56 }
 0x122   :  { %15137 = vmatpush3.msra.mxu0 %v52_v55  ;;  %15158 = vmatpush3.msra.mxu1 %v58_v56 }
 0x123   :  { %15138 = vmatprep.subr.mxu0 %v51_v57  ;;  %15159 = vmatprep.subr.mxu1 %v57_v58 }
 0x124   :  { %15139 = vmatpush3.msra.mxu0 %v51_v57  ;;  %15140 = vmatprep.mubr.msk.f32.mxu0 %vm1809_vm1, %v17728_v29 }
 0x125   :  { %15160 = vmatpush3.msra.mxu1 %v57_v58  ;;  %15161 = vmatprep.mubr.msk.f32.mxu1 %vm1809_vm1, %v17728_v29 }
 0x126   :  { %15141 = vmatmul.mubr.msk.f32.vlgmr.msra.gmra.mxu0 %vm1809_vm1, %v17733_v30  ;;  %15162 = vmatmul.mubr.msk.f32.vlgmr.msra.gmra.mxu1 %vm1809_vm1, %v17733_v30 }
 0x127   :  { %15170 = vmatprep.subr.mxu0 %v68_v59  ;;  %15191 = vmatprep.subr.mxu1 %v74_v60 }
 0x128   :  { %15171 = vmatpush3.msra.mxu0 %v68_v59  ;;  %15192 = vmatpush3.msra.mxu1 %v74_v60 }
 0x129   :  { %15172 = vmatprep.subr.mxu0 %v67_v61  ;;  %15193 = vmatprep.subr.mxu1 %v73_v62 }
 0x12a   :  { %15143 = vmatprep.mubr.msk.f32.mxu0 %vm1809_vm1, %v17758_v35  ;;  %15164 = vmatprep.mubr.msk.f32.mxu1 %vm1809_vm1, %v17758_v35 }
 0x12b   :  { %15173 = vmatpush3.msra.mxu0 %v67_v61  ;;  %15194 = vmatpush3.msra.mxu1 %v73_v62 }
 0x12c   :  { %15144 = vmatmul.mubr.msk.f32.gmra.mxu0 %vm1809_vm1, %v17763_v36  ;;  %15165 = vmatmul.mubr.msk.f32.gmra.mxu1 %vm1809_vm1, %v17763_v36 }
 0x12d   :  { %15174 = vmatprep.subr.mxu0 %v66_v63  ;;  %15195 = vmatprep.subr.mxu1 %v72_v0 }
 0x12e   :  { %15175 = vmatpush3.msra.mxu0 %v66_v63  ;;  %15196 = vmatpush3.msra.mxu1 %v72_v0 }
 0x12f   :  { %15176 = vmatprep.subr.mxu0 %v65_v1  ;;  %15197 = vmatprep.subr.mxu1 %v71_v2 }
 0x130   :  { %15146 = vmatprep.mubr.msk.f32.mxu0 %vm1809_vm1, %v17788_v41  ;;  %15167 = vmatprep.mubr.msk.f32.mxu1 %vm1809_vm1, %v17788_v41 }
 0x131   :  { %15177 = vmatpush3.msra.mxu0 %v65_v1  ;;  %15198 = vmatpush3.msra.mxu1 %v71_v2 }
 0x132   :  { %15147 = vmatmul.mubr.msk.f32.gmra.mxu0 %vm1809_vm1, %v17793_v42  ;;  %15168 = vmatmul.mubr.msk.f32.gmra.mxu1 %vm1809_vm1, %v17793_v42 }
 0x133   :  { %15178 = vmatprep.subr.mxu0 %v64_v3  ;;  %15199 = vmatprep.subr.mxu1 %v70_v4 }
 0x134   :  { %15179 = vmatpush3.msra.mxu0 %v64_v3  ;;  %15200 = vmatpush3.msra.mxu1 %v70_v4 }
 0x135   :  { %15180 = vmatprep.subr.mxu0 %v63_v5  ;;  %15201 = vmatprep.subr.mxu1 %v69_v6 }
 0x136   :  { %15181 = vmatpush3.msra.mxu0 %v63_v5  ;;  %15182 = vmatprep.mubr.msk.f32.mxu0 %vm1809_vm1, %v17728_v29 }
 0x137   :  { %15202 = vmatpush3.msra.mxu1 %v69_v6  ;;  %15203 = vmatprep.mubr.msk.f32.mxu1 %vm1809_vm1, %v17728_v29 }
 0x138   :  { %15183 = vmatmul.mubr.msk.f32.vlgmr.msra.gmra.mxu0 %vm1809_vm1, %v17733_v30  ;;  %15204 = vmatmul.mubr.msk.f32.vlgmr.msra.gmra.mxu1 %vm1809_vm1, %v17733_v30 }
 0x139   :  { %15185 = vmatprep.mubr.msk.f32.mxu0 %vm1809_vm1, %v17758_v35  ;;  %15206 = vmatprep.mubr.msk.f32.mxu1 %vm1809_vm1, %v17758_v35 }
 0x13a   :  { %15212 = vmatprep.subr.mxu0 %v17942_v7  ;;  %15233 = vmatprep.subr.mxu1 %v17942_v7 }
 0x13b   :  { %15213 = vmatpush3.msra.mxu0 %v17942_v7  ;;  %15234 = vmatpush3.msra.mxu1 %v17942_v7 }
 0x13c   :  { %15186 = vmatmul.mubr.msk.f32.gmra.mxu0 %vm1809_vm1, %v17763_v36  ;;  %15207 = vmatmul.mubr.msk.f32.gmra.mxu1 %vm1809_vm1, %v17763_v36 }
 0x13d   :  { %15188 = vmatprep.mubr.msk.f32.mxu0 %vm1809_vm1, %v17788_v41  ;;  %15209 = vmatprep.mubr.msk.f32.mxu1 %vm1809_vm1, %v17788_v41 }
 0x13e   :  { %15214 = vmatprep.subr.mxu0 %v17959_v8  ;;  %15235 = vmatprep.subr.mxu1 %v17959_v8 }
 0x13f   :  { %15215 = vmatpush3.msra.mxu0 %v17959_v8  ;;  %15236 = vmatpush3.msra.mxu1 %v17959_v8 }
 0x140   :  { %15189 = vmatmul.mubr.msk.f32.gmra.mxu0 %vm1809_vm1, %v17793_v42  ;;  %15210 = vmatmul.mubr.msk.f32.gmra.mxu1 %vm1809_vm1, %v17793_v42 }
 0x141   :  { %15216 = vmatprep.subr.mxu0 %v17974_v9  ;;  %15237 = vmatprep.subr.mxu1 %v17974_v9 }
 0x142   :  { %15217 = vmatpush3.msra.mxu0 %v17974_v9  ;;  %15238 = vmatpush3.msra.mxu1 %v17974_v9 }
 0x143   :  { %15218 = vmatprep.subr.mxu0 %v17985_v10  ;;  %15239 = vmatprep.subr.mxu1 %v17985_v10 }
 0x144   :  { %15219 = vmatpush3.msra.mxu0 %v17985_v10  ;;  %15240 = vmatpush3.msra.mxu1 %v17985_v10 }
 0x145   :  { %15220 = vmatprep.subr.mxu0 %v17994_v11  ;;  %15241 = vmatprep.subr.mxu1 %v17994_v11 }
 0x146   :  { %15221 = vmatpush3.msra.mxu0 %v17994_v11  ;;  %15242 = vmatpush3.msra.mxu1 %v17994_v11 }
 0x147   :  { %15222 = vmatprep.subr.mxu0 %v18003_v12  ;;  %15243 = vmatprep.subr.mxu1 %v18003_v12 }
 0x148   :  { %15223 = vmatpush3.msra.mxu0 %v18003_v12  ;;  %15244 = vmatpush3.msra.mxu1 %v18003_v12 }
 0x149   :  { %15254 = vmatprep.subr.mxu0 %v17942_v7  ;;  %15275 = vmatprep.subr.mxu1 %v17942_v7 }
 0x18d   :  { %v18015_v13 = vpop.f32.mrf.mxu0  ;;  %v18017_v14 = vpop.f32.mrf.mxu1 }
 0x18f   :  { %v18019_v15 = vpop.f32.mrf.mxu0  ;;  %v18021_v16 = vpop.f32.mrf.mxu1 }
 0x191   :  { %v18023_v17 = vpop.f32.mrf.mxu0  ;;  %v18025_v18 = vpop.f32.mrf.mxu1 }
 0x193   :  { %v18027_v19 = vpop.f32.mrf.mxu0  ;;  %v18029_v20 = vpop.f32.mrf.mxu1 }
 0x195   :  { %v18031_v21 = vpop.f32.mrf.mxu0  ;;  %v18033_v22 = vpop.f32.mrf.mxu1 }
 0x197   :  { %v18035_v23 = vpop.f32.mrf.mxu0  ;;  %v18037_v24 = vpop.f32.mrf.mxu1 }
 0x199   :  { %v18039_v25 = vpop.f32.mrf.mxu0  ;;  %v18041_v26 = vpop.f32.mrf.mxu1 }
 0x19b   :  { %v18043_v27 = vpop.f32.mrf.mxu0  ;;  %v18045_v28 = vpop.f32.mrf.mxu1 }
 0x19d   :  { %v18047_v31 = vpop.f32.mrf.mxu0  ;;  %v18049_v32 = vpop.f32.mrf.mxu1 }
 0x19f   :  { %v18051_v33 = vpop.f32.mrf.mxu0  ;;  %v18053_v34 = vpop.f32.mrf.mxu1 }
 0x1a1   :  { %v18055_v37 = vpop.f32.mrf.mxu0  ;;  %v18057_v38 = vpop.f32.mrf.mxu1 }
 0x1a3   :  { %v18059_v39 = vpop.f32.mrf.mxu0  ;;  %v18061_v40 = vpop.f32.mrf.mxu1 }
 0x1a5   :  { %v18063_v43 = vpop.f32.mrf.mxu0  ;;  %v18065_v44 = vpop.f32.mrf.mxu1 }
 0x1a7   :  { %v18067_v45 = vpop.f32.mrf.mxu0  ;;  %v18069_v46 = vpop.f32.mrf.mxu1 }
 0x1a9   :  { %v18071_v47 = vpop.f32.mrf.mxu0  ;;  %v18073_v48 = vpop.f32.mrf.mxu1 }
 0x1ab   :  { %v18075_v49 = vpop.f32.mrf.mxu0  ;;  %v18077_v50 = vpop.f32.mrf.mxu1 }
 0x1ad   :  { %v18079_v51 = vpop.f32.mrf.mxu0  ;;  %v18081_v52 = vpop.f32.mrf.mxu1 }
 0x1af   :  { %v18083_v53 = vpop.f32.mrf.mxu0  ;;  %v18085_v54 = vpop.f32.mrf.mxu1 }
 0x1b1   :  { %v18087_v55 = vpop.f32.mrf.mxu0  ;;  %v18089_v56 = vpop.f32.mrf.mxu1 }
 0x1b2   :  { %22737 = vst [vmem:[#allocation7_spill] sm:$0xff] %v18087_v55  ;;  %22738 = vst [vmem:[#allocation8_spill] sm:$0xff] %v18089_v56 }
 0x1b3   :  { %v18091_v57 = vpop.f32.mrf.mxu0  ;;  %v18093_v58 = vpop.f32.mrf.mxu1 }
 0x1b4   :  { %22739 = vst [vmem:[#allocation9_spill] sm:$0xff] %v18091_v57  ;;  %22740 = vst [vmem:[#allocation10_spill] sm:$0xff] %v18093_v58 }
 0x1b6   :  { %v18095_v59 = vpop.f32.mrf.mxu0  ;;  %v18097_v60 = vpop.f32.mrf.mxu1 }
 0x1b7   :  { %22741 = vst [vmem:[#allocation11_spill] sm:$0xff] %v18095_v59  ;;  %22742 = vst [vmem:[#allocation12_spill] sm:$0xff] %v18097_v60 }
 0x1b8   :  { %v18099_v61 = vpop.f32.mrf.mxu0  ;;  %v18101_v62 = vpop.f32.mrf.mxu1 }
 0x1b9   :  { %22743 = vst [vmem:[#allocation13_spill] sm:$0xff] %v18099_v61  ;;  %22744 = vst [vmem:[#allocation14_spill] sm:$0xff] %v18101_v62 }
 0x1bc   :  { %v18103_v63 = vpop.f32.mrf.mxu0  ;;  %v18105_v0 = vpop.f32.mrf.mxu1 }
 0x1be   :  { %v18107_v1 = vpop.f32.mrf.mxu0  ;;  %v18109_v2 = vpop.f32.mrf.mxu1 }
 0x1c2   :  { %v15058_v3 = vpop.f32.mrf.mxu0  ;;  %v15079_v4 = vpop.f32.mrf.mxu1 }
 0x1c4   :  { %v1894_v5 = vpop.f32.mrf.mxu0  ;;  %v1989_v6 = vpop.f32.mrf.mxu1 }
 0x1c5   :  { %15224 = vmatprep.mubr.msk.f32.mxu0 %vm1809_vm1, %v1894_v5  ;;  %15245 = vmatprep.mubr.msk.f32.mxu1 %vm1809_vm1, %v1989_v6 }
 0x1c6   :  { %15225 = vmatmul.mubr.msk.f32.vlgmr.msra.gmra.mxu0 %vm1809_vm1, %v15058_v3  ;;  %15246 = vmatmul.mubr.msk.f32.vlgmr.msra.gmra.mxu1 %vm1809_vm1, %v15079_v4 }
 0x1c7   :  { %15255 = vmatpush3.msra.mxu0 %v17942_v7  ;;  %15276 = vmatpush3.msra.mxu1 %v17942_v7 }
 0x1c8   :  { %v15061_v58 = vpop.f32.mrf.mxu0  ;;  %v15082_v57 = vpop.f32.mrf.mxu1  ;;  %15256 = vmatprep.subr.mxu0 %v17959_v8  ;;  %15277 = vmatprep.subr.mxu1 %v17959_v8 }
 0x1c9   :  { %15257 = vmatpush3.msra.mxu0 %v17959_v8  ;;  %15278 = vmatpush3.msra.mxu1 %v17959_v8 }
 0x1ca   :  { %v1904_v5 = vpop.f32.mrf.mxu0  ;;  %v1999_v6 = vpop.f32.mrf.mxu1  ;;  %15258 = vmatprep.subr.mxu0 %v17974_v9  ;;  %15279 = vmatprep.subr.mxu1 %v17974_v9 }
 0x1cb   :  { %15227 = vmatprep.mubr.msk.f32.mxu0 %vm1809_vm1, %v1904_v5  ;;  %15248 = vmatprep.mubr.msk.f32.mxu1 %vm1809_vm1, %v1999_v6 }
 0x1cc   :  { %15228 = vmatmul.mubr.msk.f32.gmra.mxu0 %vm1809_vm1, %v15061_v58  ;;  %15249 = vmatmul.mubr.msk.f32.gmra.mxu1 %vm1809_vm1, %v15082_v57 }
 0x1cd   :  { %15259 = vmatpush3.msra.mxu0 %v17974_v9  ;;  %15280 = vmatpush3.msra.mxu1 %v17974_v9 }
 0x1ce   :  { %v15064_v3 = vpop.f32.mrf.mxu0  ;;  %v15085_v4 = vpop.f32.mrf.mxu1  ;;  %15260 = vmatprep.subr.mxu0 %v17985_v10  ;;  %15281 = vmatprep.subr.mxu1 %v17985_v10 }
 0x1cf   :  { %15261 = vmatpush3.msra.mxu0 %v17985_v10  ;;  %15282 = vmatpush3.msra.mxu1 %v17985_v10 }
 0x1d0   :  { %v1914_v5 = vpop.f32.mrf.mxu0  ;;  %v2009_v6 = vpop.f32.mrf.mxu1  ;;  %15262 = vmatprep.subr.mxu0 %v17994_v11  ;;  %15283 = vmatprep.subr.mxu1 %v17994_v11 }
 0x1d1   :  { %15230 = vmatprep.mubr.msk.f32.mxu0 %vm1809_vm1, %v1914_v5  ;;  %15251 = vmatprep.mubr.msk.f32.mxu1 %vm1809_vm1, %v2009_v6 }
 0x1d2   :  { %15231 = vmatmul.mubr.msk.f32.gmra.mxu0 %vm1809_vm1, %v15064_v3  ;;  %15252 = vmatmul.mubr.msk.f32.gmra.mxu1 %vm1809_vm1, %v15085_v4 }
 0x1d3   :  { %15263 = vmatpush3.msra.mxu0 %v17994_v11  ;;  %15284 = vmatpush3.msra.mxu1 %v17994_v11 }
 0x1d4   :  { %v15100_v57 = vpop.f32.mrf.mxu0  ;;  %v15121_v58 = vpop.f32.mrf.mxu1  ;;  %15264 = vmatprep.subr.mxu0 %v18003_v12  ;;  %15285 = vmatprep.subr.mxu1 %v18003_v12 }
 0x1d5   :  { %15265 = vmatpush3.msra.mxu0 %v18003_v12  ;;  %15286 = vmatpush3.msra.mxu1 %v18003_v12 }
 0x1d6   :  { %v2084_v5 = vpop.f32.mrf.mxu0  ;;  %v2179_v6 = vpop.f32.mrf.mxu1  ;;  %15296 = vmatprep.subr.mxu0 %v17942_v7  ;;  %15317 = vmatprep.subr.mxu1 %v17942_v7 }
 0x1d7   :  { %15266 = vmatprep.mubr.msk.f32.mxu0 %vm1809_vm1, %v2084_v5  ;;  %15287 = vmatprep.mubr.msk.f32.mxu1 %vm1809_vm1, %v2179_v6 }
 0x1d8   :  { %15267 = vmatmul.mubr.msk.f32.vlgmr.msra.gmra.mxu0 %vm1809_vm1, %v15100_v57  ;;  %15288 = vmatmul.mubr.msk.f32.vlgmr.msra.gmra.mxu1 %vm1809_vm1, %v15121_v58 }
 0x1d9   :  { %15297 = vmatpush3.msra.mxu0 %v17942_v7  ;;  %15318 = vmatpush3.msra.mxu1 %v17942_v7 }
 0x1da   :  { %v15103_v3 = vpop.f32.mrf.mxu0  ;;  %v15124_v4 = vpop.f32.mrf.mxu1  ;;  %15298 = vmatprep.subr.mxu0 %v17959_v8  ;;  %15319 = vmatprep.subr.mxu1 %v17959_v8 }
 0x1db   :  { %15299 = vmatpush3.msra.mxu0 %v17959_v8  ;;  %15320 = vmatpush3.msra.mxu1 %v17959_v8 }
 0x1dc   :  { %v2094_v5 = vpop.f32.mrf.mxu0  ;;  %v2189_v6 = vpop.f32.mrf.mxu1  ;;  %15300 = vmatprep.subr.mxu0 %v17974_v9  ;;  %15321 = vmatprep.subr.mxu1 %v17974_v9 }
 0x1dd   :  { %15269 = vmatprep.mubr.msk.f32.mxu0 %vm1809_vm1, %v2094_v5  ;;  %15290 = vmatprep.mubr.msk.f32.mxu1 %vm1809_vm1, %v2189_v6 }
 0x1de   :  { %15270 = vmatmul.mubr.msk.f32.gmra.mxu0 %vm1809_vm1, %v15103_v3  ;;  %15291 = vmatmul.mubr.msk.f32.gmra.mxu1 %vm1809_vm1, %v15124_v4 }
 0x1df   :  { %15301 = vmatpush3.msra.mxu0 %v17974_v9  ;;  %15322 = vmatpush3.msra.mxu1 %v17974_v9 }
 0x1e0   :  { %v15106_v57 = vpop.f32.mrf.mxu0  ;;  %v15127_v58 = vpop.f32.mrf.mxu1  ;;  %15302 = vmatprep.subr.mxu0 %v17985_v10  ;;  %15323 = vmatprep.subr.mxu1 %v17985_v10 }
 0x1e1   :  { %15303 = vmatpush3.msra.mxu0 %v17985_v10  ;;  %15324 = vmatpush3.msra.mxu1 %v17985_v10 }
 0x1e2   :  { %v2104_v5 = vpop.f32.mrf.mxu0  ;;  %v2199_v6 = vpop.f32.mrf.mxu1  ;;  %15304 = vmatprep.subr.mxu0 %v17994_v11  ;;  %15325 = vmatprep.subr.mxu1 %v17994_v11 }
 0x1e3   :  { %15272 = vmatprep.mubr.msk.f32.mxu0 %vm1809_vm1, %v2104_v5  ;;  %15293 = vmatprep.mubr.msk.f32.mxu1 %vm1809_vm1, %v2199_v6 }
 0x1e4   :  { %15273 = vmatmul.mubr.msk.f32.gmra.mxu0 %vm1809_vm1, %v15106_v57  ;;  %15294 = vmatmul.mubr.msk.f32.gmra.mxu1 %vm1809_vm1, %v15127_v58 }
 0x1e5   :  { %15305 = vmatpush3.msra.mxu0 %v17994_v11  ;;  %15326 = vmatpush3.msra.mxu1 %v17994_v11 }
 0x1e6   :  { %v15142_v3 = vpop.f32.mrf.mxu0  ;;  %v15163_v4 = vpop.f32.mrf.mxu1  ;;  %15306 = vmatprep.subr.mxu0 %v18003_v12  ;;  %15327 = vmatprep.subr.mxu1 %v18003_v12 }
 0x1e7   :  { %15307 = vmatpush3.msra.mxu0 %v18003_v12  ;;  %15328 = vmatpush3.msra.mxu1 %v18003_v12 }
 0x1e8   :  { %v2274_v5 = vpop.f32.mrf.mxu0  ;;  %v2369_v6 = vpop.f32.mrf.mxu1  ;;  %15338 = vmatprep.subr.mxu0 %v17942_v7  ;;  %15359 = vmatprep.subr.mxu1 %v17942_v7 }
 0x1e9   :  { %15308 = vmatprep.mubr.msk.f32.mxu0 %vm1809_vm1, %v2274_v5  ;;  %15329 = vmatprep.mubr.msk.f32.mxu1 %vm1809_vm1, %v2369_v6 }
 0x1ea   :  { %15309 = vmatmul.mubr.msk.f32.vlgmr.msra.gmra.mxu0 %vm1809_vm1, %v15142_v3  ;;  %15330 = vmatmul.mubr.msk.f32.vlgmr.msra.gmra.mxu1 %vm1809_vm1, %v15163_v4 }
 0x1eb   :  { %15339 = vmatpush3.msra.mxu0 %v17942_v7  ;;  %15360 = vmatpush3.msra.mxu1 %v17942_v7 }
 0x1ec   :  { %v15145_v57 = vpop.f32.mrf.mxu0  ;;  %v15166_v58 = vpop.f32.mrf.mxu1  ;;  %15340 = vmatprep.subr.mxu0 %v17959_v8  ;;  %15361 = vmatprep.subr.mxu1 %v17959_v8 }
 0x1ed   :  { %15341 = vmatpush3.msra.mxu0 %v17959_v8  ;;  %15362 = vmatpush3.msra.mxu1 %v17959_v8 }
 0x1ee   :  { %v2284_v5 = vpop.f32.mrf.mxu0  ;;  %v2379_v6 = vpop.f32.mrf.mxu1  ;;  %15342 = vmatprep.subr.mxu0 %v17974_v9  ;;  %15363 = vmatprep.subr.mxu1 %v17974_v9 }
 0x1ef   :  { %15311 = vmatprep.mubr.msk.f32.mxu0 %vm1809_vm1, %v2284_v5  ;;  %15332 = vmatprep.mubr.msk.f32.mxu1 %vm1809_vm1, %v2379_v6 }
 0x1f0   :  { %15312 = vmatmul.mubr.msk.f32.gmra.mxu0 %vm1809_vm1, %v15145_v57  ;;  %15333 = vmatmul.mubr.msk.f32.gmra.mxu1 %vm1809_vm1, %v15166_v58 }
 0x1f1   :  { %15343 = vmatpush3.msra.mxu0 %v17974_v9  ;;  %15364 = vmatpush3.msra.mxu1 %v17974_v9 }
 0x1f2   :  { %v15148_v3 = vpop.f32.mrf.mxu0  ;;  %v15169_v4 = vpop.f32.mrf.mxu1  ;;  %15344 = vmatprep.subr.mxu0 %v17985_v10  ;;  %15365 = vmatprep.subr.mxu1 %v17985_v10 }
 0x1f3   :  { %15345 = vmatpush3.msra.mxu0 %v17985_v10  ;;  %15366 = vmatpush3.msra.mxu1 %v17985_v10 }
 0x1f4   :  { %v2294_v5 = vpop.f32.mrf.mxu0  ;;  %v2389_v6 = vpop.f32.mrf.mxu1  ;;  %15346 = vmatprep.subr.mxu0 %v17994_v11  ;;  %15367 = vmatprep.subr.mxu1 %v17994_v11 }
 0x1f5   :  { %15314 = vmatprep.mubr.msk.f32.mxu0 %vm1809_vm1, %v2294_v5  ;;  %15335 = vmatprep.mubr.msk.f32.mxu1 %vm1809_vm1, %v2389_v6 }
 0x1f6   :  { %15315 = vmatmul.mubr.msk.f32.gmra.mxu0 %vm1809_vm1, %v15148_v3  ;;  %15336 = vmatmul.mubr.msk.f32.gmra.mxu1 %vm1809_vm1, %v15169_v4 }
 0x1f7   :  { %15347 = vmatpush3.msra.mxu0 %v17994_v11  ;;  %15368 = vmatpush3.msra.mxu1 %v17994_v11 }
 0x1f8   :  { %v15184_v57 = vpop.f32.mrf.mxu0  ;;  %v15205_v58 = vpop.f32.mrf.mxu1  ;;  %15348 = vmatprep.subr.mxu0 %v18003_v12  ;;  %15369 = vmatprep.subr.mxu1 %v18003_v12 }
 0x1f9   :  { %15349 = vmatpush3.msra.mxu0 %v18003_v12  ;;  %15370 = vmatpush3.msra.mxu1 %v18003_v12 }
 0x1fa   :  { %v2464_v5 = vpop.f32.mrf.mxu0  ;;  %v2559_v6 = vpop.f32.mrf.mxu1  ;;  %15380 = vmatprep.subr.mxu0 %v18031_v21  ;;  %15401 = vmatprep.subr.mxu1 %v18033_v22 }
 0x1fb   :  { %15350 = vmatprep.mubr.msk.f32.mxu0 %vm1809_vm1, %v2464_v5  ;;  %15371 = vmatprep.mubr.msk.f32.mxu1 %vm1809_vm1, %v2559_v6 }
 0x1fc   :  { %v15187_v3 = vpop.f32.mrf.mxu0  ;;  %v15208_v4 = vpop.f32.mrf.mxu1  ;;  %15351 = vmatmul.mubr.msk.f32.vlgmr.msra.gmra.mxu0 %vm1809_vm1, %v15184_v57  ;;  %15372 = vmatmul.mubr.msk.f32.vlgmr.msra.gmra.mxu1 %vm1809_vm1, %v15205_v58 }
 0x1fd   :  { %15381 = vmatpush3.msra.mxu0 %v18031_v21  ;;  %15402 = vmatpush3.msra.mxu1 %v18033_v22 }
 0x1fe   :  { %15382 = vmatprep.subr.mxu0 %v18035_v23  ;;  %15403 = vmatprep.subr.mxu1 %v18037_v24  ;;  %v2474_v12 = vpop.f32.mrf.mxu0  ;;  %v2569_v11 = vpop.f32.mrf.mxu1 }
 0x1ff   :  { %15383 = vmatpush3.msra.mxu0 %v18035_v23  ;;  %15404 = vmatpush3.msra.mxu1 %v18037_v24 }
 0x200   :  { %15353 = vmatprep.mubr.msk.f32.mxu0 %vm1809_vm1, %v2474_v12  ;;  %15374 = vmatprep.mubr.msk.f32.mxu1 %vm1809_vm1, %v2569_v11  ;;  %v15190_v57 = vpop.f32.mrf.mxu0  ;;  %v15211_v58 = vpop.f32.mrf.mxu1  ;;  %v18354_v11 = vld [vmem:[%s22565_s4] sm:$0xff]  ;;  %v18453_v12 = vld [vmem:[%s22565_s4 + $0x28] sm:$0xff] }
 0x201   :  { %15384 = vmatprep.subr.mxu0 %v18023_v17  ;;  %15405 = vmatprep.subr.mxu1 %v18025_v18 }
 0x202   :  { %15354 = vmatmul.mubr.msk.f32.gmra.mxu0 %vm1809_vm1, %v15187_v3  ;;  %15375 = vmatmul.mubr.msk.f32.gmra.mxu1 %vm1809_vm1, %v15208_v4  ;;  %v2484_v5 = vpop.f32.mrf.mxu0  ;;  %v2579_v6 = vpop.f32.mrf.mxu1  ;;  %v22747_v3 = vld [vmem:[#allocation5_spill] sm:$0xff]  ;;  %v22748_v4 = vld [vmem:[#allocation6_spill] sm:$0xff] }
 0x203   :  { %15385 = vmatpush3.msra.mxu0 %v18023_v17  ;;  %15406 = vmatpush3.msra.mxu1 %v18025_v18 }
 0x204   :  { %15386 = vmatprep.subr.mxu0 %v18027_v19  ;;  %15407 = vmatprep.subr.mxu1 %v18029_v20 }
 0x205   :  { %15387 = vmatpush3.msra.mxu0 %v18027_v19  ;;  %15408 = vmatpush3.msra.mxu1 %v18029_v20 }
 0x206   :  { %15356 = vmatprep.mubr.msk.f32.mxu0 %vm1809_vm1, %v2484_v5  ;;  %15377 = vmatprep.mubr.msk.f32.mxu1 %vm1809_vm1, %v2579_v6 }
 0x207   :  { %15388 = vmatprep.subr.mxu0 %v18015_v13  ;;  %15409 = vmatprep.subr.mxu1 %v18017_v14 }
 0x208   :  { %15357 = vmatmul.mubr.msk.f32.gmra.mxu0 %vm1809_vm1, %v15190_v57  ;;  %15378 = vmatmul.mubr.msk.f32.gmra.mxu1 %vm1809_vm1, %v15211_v58 }
 0x209   :  { %15389 = vmatpush3.msra.mxu0 %v18015_v13  ;;  %15410 = vmatpush3.msra.mxu1 %v18017_v14 }
 0x20a   :  { %15390 = vmatprep.subr.mxu0 %v18019_v15  ;;  %15411 = vmatprep.subr.mxu1 %v18021_v16 }
 0x20b   :  { %15391 = vmatpush3.msra.mxu0 %v18019_v15  ;;  %15412 = vmatpush3.msra.mxu1 %v18021_v16 }
 0x20c   :  { %15392 = vmatprep.mubr.msk.f32.mxu0 %vm1809_vm1, %v17728_v29  ;;  %15413 = vmatprep.mubr.msk.f32.mxu1 %vm1809_vm1, %v17728_v29 }
 0x20d   :  { %15422 = vmatprep.subr.mxu0 %v18055_v37  ;;  %15443 = vmatprep.subr.mxu1 %v18057_v38 }
 0x20e   :  { %15393 = vmatmul.mubr.msk.f32.vlgmr.msra.gmra.mxu0 %vm1809_vm1, %v17733_v30  ;;  %15414 = vmatmul.mubr.msk.f32.vlgmr.msra.gmra.mxu1 %vm1809_vm1, %v17733_v30 }
 0x20f   :  { %15423 = vmatpush3.msra.mxu0 %v18055_v37  ;;  %15444 = vmatpush3.msra.mxu1 %v18057_v38 }
 0x210   :  { %15424 = vmatprep.subr.mxu0 %v18059_v39  ;;  %15445 = vmatprep.subr.mxu1 %v18061_v40 }
 0x211   :  { %15425 = vmatpush3.msra.mxu0 %v18059_v39  ;;  %15446 = vmatpush3.msra.mxu1 %v18061_v40 }
 0x212   :  { %15395 = vmatprep.mubr.msk.f32.mxu0 %vm1809_vm1, %v17758_v35  ;;  %15416 = vmatprep.mubr.msk.f32.mxu1 %vm1809_vm1, %v17758_v35 }
 0x213   :  { %15426 = vmatprep.subr.mxu0 %v18047_v31  ;;  %15447 = vmatprep.subr.mxu1 %v18049_v32 }
 0x214   :  { %15396 = vmatmul.mubr.msk.f32.gmra.mxu0 %vm1809_vm1, %v17763_v36  ;;  %15417 = vmatmul.mubr.msk.f32.gmra.mxu1 %vm1809_vm1, %v17763_v36 }
 0x215   :  { %15427 = vmatpush3.msra.mxu0 %v18047_v31  ;;  %15448 = vmatpush3.msra.mxu1 %v18049_v32 }
 0x216   :  { %15428 = vmatprep.subr.mxu0 %v18051_v33  ;;  %15449 = vmatprep.subr.mxu1 %v18053_v34 }
 0x217   :  { %15429 = vmatpush3.msra.mxu0 %v18051_v33  ;;  %15450 = vmatpush3.msra.mxu1 %v18053_v34 }
 0x218   :  { %15398 = vmatprep.mubr.msk.f32.mxu0 %vm1809_vm1, %v17788_v41  ;;  %15419 = vmatprep.mubr.msk.f32.mxu1 %vm1809_vm1, %v17788_v41 }
 0x219   :  { %15430 = vmatprep.subr.mxu0 %v18039_v25  ;;  %15451 = vmatprep.subr.mxu1 %v18041_v26 }
 0x21a   :  { %15399 = vmatmul.mubr.msk.f32.gmra.mxu0 %vm1809_vm1, %v17793_v42  ;;  %15420 = vmatmul.mubr.msk.f32.gmra.mxu1 %vm1809_vm1, %v17793_v42 }
 0x21b   :  { %15431 = vmatpush3.msra.mxu0 %v18039_v25  ;;  %15452 = vmatpush3.msra.mxu1 %v18041_v26 }
 0x21c   :  { %15432 = vmatprep.subr.mxu0 %v18043_v27  ;;  %15453 = vmatprep.subr.mxu1 %v18045_v28 }
 0x21d   :  { %15433 = vmatpush3.msra.mxu0 %v18043_v27  ;;  %15454 = vmatpush3.msra.mxu1 %v18045_v28 }
 0x21e   :  { %15434 = vmatprep.mubr.msk.f32.mxu0 %vm1809_vm1, %v17728_v29  ;;  %15455 = vmatprep.mubr.msk.f32.mxu1 %vm1809_vm1, %v17728_v29 }
 0x21f   :  { %15464 = vmatprep.subr.mxu0 %v18079_v51  ;;  %15485 = vmatprep.subr.mxu1 %v18081_v52 }
 0x220   :  { %15435 = vmatmul.mubr.msk.f32.vlgmr.msra.gmra.mxu0 %vm1809_vm1, %v17733_v30  ;;  %15456 = vmatmul.mubr.msk.f32.vlgmr.msra.gmra.mxu1 %vm1809_vm1, %v17733_v30 }
 0x221   :  { %15465 = vmatpush3.msra.mxu0 %v18079_v51  ;;  %15486 = vmatpush3.msra.mxu1 %v18081_v52 }
 0x222   :  { %15466 = vmatprep.subr.mxu0 %v18083_v53  ;;  %15487 = vmatprep.subr.mxu1 %v18085_v54 }
 0x223   :  { %15467 = vmatpush3.msra.mxu0 %v18083_v53  ;;  %15488 = vmatpush3.msra.mxu1 %v18085_v54 }
 0x224   :  { %15437 = vmatprep.mubr.msk.f32.mxu0 %vm1809_vm1, %v17758_v35  ;;  %15458 = vmatprep.mubr.msk.f32.mxu1 %vm1809_vm1, %v17758_v35 }
 0x225   :  { %15468 = vmatprep.subr.mxu0 %v18071_v47  ;;  %15489 = vmatprep.subr.mxu1 %v18073_v48 }
 0x226   :  { %15438 = vmatmul.mubr.msk.f32.gmra.mxu0 %vm1809_vm1, %v17763_v36  ;;  %15459 = vmatmul.mubr.msk.f32.gmra.mxu1 %vm1809_vm1, %v17763_v36 }
 0x227   :  { %15469 = vmatpush3.msra.mxu0 %v18071_v47  ;;  %15490 = vmatpush3.msra.mxu1 %v18073_v48 }
 0x228   :  { %15470 = vmatprep.subr.mxu0 %v18075_v49  ;;  %15491 = vmatprep.subr.mxu1 %v18077_v50 }
 0x229   :  { %15471 = vmatpush3.msra.mxu0 %v18075_v49  ;;  %15492 = vmatpush3.msra.mxu1 %v18077_v50 }
 0x22a   :  { %15440 = vmatprep.mubr.msk.f32.mxu0 %vm1809_vm1, %v17788_v41  ;;  %15461 = vmatprep.mubr.msk.f32.mxu1 %vm1809_vm1, %v17788_v41 }
 0x22b   :  { %15472 = vmatprep.subr.mxu0 %v18063_v43  ;;  %15493 = vmatprep.subr.mxu1 %v18065_v44 }
 0x22c   :  { %15441 = vmatmul.mubr.msk.f32.gmra.mxu0 %vm1809_vm1, %v17793_v42  ;;  %15462 = vmatmul.mubr.msk.f32.gmra.mxu1 %vm1809_vm1, %v17793_v42 }
 0x22d   :  { %15473 = vmatpush3.msra.mxu0 %v18063_v43  ;;  %15494 = vmatpush3.msra.mxu1 %v18065_v44 }
 0x22e   :  { %15474 = vmatprep.subr.mxu0 %v18067_v45  ;;  %15495 = vmatprep.subr.mxu1 %v18069_v46 }
 0x22f   :  { %15475 = vmatpush3.msra.mxu0 %v18067_v45  ;;  %15496 = vmatpush3.msra.mxu1 %v18069_v46 }
 0x230   :  { %15476 = vmatprep.mubr.msk.f32.mxu0 %vm1809_vm1, %v17728_v29  ;;  %15497 = vmatprep.mubr.msk.f32.mxu1 %vm1809_vm1, %v18354_v11  ;;  %v22745_v29 = vld [vmem:[#allocation9_spill] sm:$0xff] }
 0x231   :  { %15506 = vmatprep.subr.mxu0 %v18103_v63  ;;  %15527 = vmatprep.subr.mxu1 %v18105_v0 }
 0x232   :  { %15477 = vmatmul.mubr.msk.f32.vlgmr.msra.gmra.mxu0 %vm1809_vm1, %v17733_v30  ;;  %15498 = vmatmul.mubr.msk.f32.vlgmr.msra.gmra.mxu1 %vm1809_vm1, %v17733_v30  ;;  %v22746_v30 = vld [vmem:[#allocation10_spill] sm:$0xff] }
 0x233   :  { %15507 = vmatpush3.msra.mxu0 %v18103_v63  ;;  %15528 = vmatpush3.msra.mxu1 %v18105_v0 }
 0x234   :  { %15508 = vmatprep.subr.mxu0 %v18107_v1  ;;  %15529 = vmatprep.subr.mxu1 %v18109_v2 }
 0x235   :  { %15509 = vmatpush3.msra.mxu0 %v18107_v1  ;;  %15530 = vmatpush3.msra.mxu1 %v18109_v2 }
 0x236   :  { %15479 = vmatprep.mubr.msk.f32.mxu0 %vm1809_vm1, %v17758_v35  ;;  %15500 = vmatprep.mubr.msk.f32.mxu1 %vm1809_vm1, %v17758_v35  ;;  %v18409_v35 = vld [vmem:[%s22565_s4 + $0x8] sm:$0xff] }
 0x237   :  { %15510 = vmatprep.subr.mxu0 %v18095_v59  ;;  %15531 = vmatprep.subr.mxu1 %v18097_v60 }
 0x238   :  { %15480 = vmatmul.mubr.msk.f32.gmra.mxu0 %vm1809_vm1, %v17763_v36  ;;  %15501 = vmatmul.mubr.msk.f32.gmra.mxu1 %vm1809_vm1, %v17763_v36  ;;  %v18418_v36 = vld [vmem:[%s22565_s4 + $0x10] sm:$0xff] }
 0x239   :  { %15511 = vmatpush3.msra.mxu0 %v18095_v59  ;;  %15532 = vmatpush3.msra.mxu1 %v18097_v60 }
 0x23a   :  { %15512 = vmatprep.subr.mxu0 %v18099_v61  ;;  %15533 = vmatprep.subr.mxu1 %v18101_v62 }
 0x23b   :  { %15513 = vmatpush3.msra.mxu0 %v18099_v61  ;;  %15534 = vmatpush3.msra.mxu1 %v18101_v62 }
 0x23c   :  { %15482 = vmatprep.mubr.msk.f32.mxu0 %vm1809_vm1, %v17788_v41  ;;  %15503 = vmatprep.mubr.msk.f32.mxu1 %vm1809_vm1, %v17788_v41  ;;  %v18431_v41 = vld [vmem:[%s22565_s4 + $0x18] sm:$0xff] }
 0x23d   :  { %15514 = vmatprep.subr.mxu0 %v18087_v55  ;;  %15535 = vmatprep.subr.mxu1 %v18089_v56 }
 0x23e   :  { %15483 = vmatmul.mubr.msk.f32.gmra.mxu0 %vm1809_vm1, %v17793_v42  ;;  %15504 = vmatmul.mubr.msk.f32.gmra.mxu1 %vm1809_vm1, %v17793_v42  ;;  %v18440_v42 = vld [vmem:[%s22565_s4 + $0x20] sm:$0xff] }
 0x23f   :  { %15515 = vmatpush3.msra.mxu0 %v18087_v55  ;;  %15536 = vmatpush3.msra.mxu1 %v18089_v56 }
 0x240   :  { %15516 = vmatprep.subr.mxu0 %v22745_v29  ;;  %15537 = vmatprep.subr.mxu1 %v22746_v30 }
 0x241   :  { %15517 = vmatpush3.msra.mxu0 %v22745_v29  ;;  %15538 = vmatpush3.msra.mxu1 %v22746_v30 }
 0x242   :  { %15518 = vmatprep.mubr.msk.f32.mxu0 %vm1809_vm1, %v18354_v11  ;;  %15539 = vmatprep.mubr.msk.f32.mxu1 %vm1809_vm1, %v18354_v11 }
 0x243   :  { %15519 = vmatmul.mubr.msk.f32.vlgmr.msra.gmra.mxu0 %vm1809_vm1, %v18409_v35  ;;  %15540 = vmatmul.mubr.msk.f32.vlgmr.msra.gmra.mxu1 %vm1809_vm1, %v18409_v35 }
 0x244   :  { %15521 = vmatprep.mubr.msk.f32.mxu0 %vm1809_vm1, %v18418_v36  ;;  %15542 = vmatprep.mubr.msk.f32.mxu1 %vm1809_vm1, %v18418_v36 }
 0x245   :  { %15548 = vmatprep.subr.mxu0 %v17942_v7  ;;  %15569 = vmatprep.subr.mxu1 %v17942_v7 }
 0x246   :  { %15549 = vmatpush3.msra.mxu0 %v17942_v7  ;;  %15570 = vmatpush3.msra.mxu1 %v17942_v7 }
 0x247   :  { %15522 = vmatmul.mubr.msk.f32.gmra.mxu0 %vm1809_vm1, %v18431_v41  ;;  %15543 = vmatmul.mubr.msk.f32.gmra.mxu1 %vm1809_vm1, %v18431_v41 }
 0x248   :  { %15524 = vmatprep.mubr.msk.f32.mxu0 %vm1809_vm1, %v18440_v42  ;;  %15545 = vmatprep.mubr.msk.f32.mxu1 %vm1809_vm1, %v18440_v42 }
 0x249   :  { %15550 = vmatprep.subr.mxu0 %v17959_v8  ;;  %15571 = vmatprep.subr.mxu1 %v17959_v8 }
 0x24a   :  { %15551 = vmatpush3.msra.mxu0 %v17959_v8  ;;  %15572 = vmatpush3.msra.mxu1 %v17959_v8 }
 0x24b   :  { %15525 = vmatmul.mubr.msk.f32.gmra.mxu0 %vm1809_vm1, %v18453_v12  ;;  %15546 = vmatmul.mubr.msk.f32.gmra.mxu1 %vm1809_vm1, %v18453_v12 }
 0x24c   :  { %15552 = vmatprep.subr.mxu0 %v17974_v9  ;;  %15573 = vmatprep.subr.mxu1 %v17974_v9 }
 0x24d   :  { %15553 = vmatpush3.msra.mxu0 %v17974_v9  ;;  %15574 = vmatpush3.msra.mxu1 %v17974_v9 }
 0x24e   :  { %15554 = vmatprep.subr.mxu0 %v17985_v10  ;;  %15575 = vmatprep.subr.mxu1 %v17985_v10 }
 0x24f   :  { %15555 = vmatpush3.msra.mxu0 %v17985_v10  ;;  %15576 = vmatpush3.msra.mxu1 %v17985_v10 }
 0x250   :  { %15556 = vmatprep.subr.mxu0 %v22747_v3  ;;  %15577 = vmatprep.subr.mxu1 %v22747_v3 }
 0x251   :  { %15557 = vmatpush3.msra.mxu0 %v22747_v3  ;;  %15578 = vmatpush3.msra.mxu1 %v22747_v3 }
 0x252   :  { %15558 = vmatprep.subr.mxu0 %v22748_v4  ;;  %15579 = vmatprep.subr.mxu1 %v22748_v4 }
 0x253   :  { %15559 = vmatpush3.msra.mxu0 %v22748_v4  ;;  %15580 = vmatpush3.msra.mxu1 %v22748_v4 }
 0x254   :  { %15590 = vmatprep.subr.mxu0 %v17942_v7  ;;  %15611 = vmatprep.subr.mxu1 %v17942_v7 }
 0x286   :  { %v18477_v57 = vpop.f32.mrf.mxu0  ;;  %v18479_v58 = vpop.f32.mrf.mxu1 }
 0x287   :  { %22749 = vst [vmem:[#allocation5_spill] sm:$0xff] %v18477_v57  ;;  %22750 = vst [vmem:[#allocation6_spill] sm:$0xff] %v18479_v58 }
 0x288   :  { %v18481_v5 = vpop.f32.mrf.mxu0  ;;  %v18483_v6 = vpop.f32.mrf.mxu1 }
 0x289   :  { %22751 = vst [vmem:[#allocation15_spill] sm:$0xff] %v18481_v5  ;;  %22752 = vst [vmem:[#allocation16_spill] sm:$0xff] %v18483_v6 }
 0x28c   :  { %v18485_v30 = vpop.f32.mrf.mxu0  ;;  %v18487_v29 = vpop.f32.mrf.mxu1 }
 0x28d   :  { %22753 = vst [vmem:[#allocation17_spill] sm:$0xff] %v18485_v30  ;;  %22754 = vst [vmem:[#allocation18_spill] sm:$0xff] %v18487_v29 }
 0x28e   :  { %v18489_v56 = vpop.f32.mrf.mxu0  ;;  %v18491_v55 = vpop.f32.mrf.mxu1 }
 0x28f   :  { %22755 = vst [vmem:[#allocation19_spill] sm:$0xff] %v18489_v56  ;;  %22756 = vst [vmem:[#allocation20_spill] sm:$0xff] %v18491_v55 }
 0x292   :  { %v18493_v62 = vpop.f32.mrf.mxu0  ;;  %v18495_v61 = vpop.f32.mrf.mxu1 }
 0x293   :  { %22757 = vst [vmem:[#allocation21_spill] sm:$0xff] %v18493_v62  ;;  %22758 = vst [vmem:[#allocation22_spill] sm:$0xff] %v18495_v61 }
 0x294   :  { %v18497_v60 = vpop.f32.mrf.mxu0  ;;  %v18499_v57 = vpop.f32.mrf.mxu1 }
 0x295   :  { %22759 = vst [vmem:[#allocation23_spill] sm:$0xff] %v18497_v60  ;;  %22760 = vst [vmem:[#allocation24_spill] sm:$0xff] %v18499_v57 }
 0x298   :  { %v18501_v58 = vpop.f32.mrf.mxu0  ;;  %v18503_v5 = vpop.f32.mrf.mxu1 }
 0x299   :  { %22761 = vst [vmem:[#allocation25_spill] sm:$0xff] %v18501_v58  ;;  %22762 = vst [vmem:[#allocation26_spill] sm:$0xff] %v18503_v5 }
 0x29a   :  { %v18505_v6 = vpop.f32.mrf.mxu0  ;;  %v18507_v30 = vpop.f32.mrf.mxu1 }
 0x29b   :  { %22763 = vst [vmem:[#allocation27_spill] sm:$0xff] %v18505_v6  ;;  %22764 = vst [vmem:[#allocation28_spill] sm:$0xff] %v18507_v30 }
 0x29e   :  { %v18509_v29 = vpop.f32.mrf.mxu0  ;;  %v18511_v56 = vpop.f32.mrf.mxu1 }
 0x29f   :  { %22765 = vst [vmem:[#allocation29_spill] sm:$0xff] %v18509_v29  ;;  %22766 = vst [vmem:[#allocation30_spill] sm:$0xff] %v18511_v56 }
 0x2a0   :  { %v18513_v55 = vpop.f32.mrf.mxu0  ;;  %v18515_v62 = vpop.f32.mrf.mxu1 }
 0x2a1   :  { %22767 = vst [vmem:[#allocation31_spill] sm:$0xff] %v18513_v55  ;;  %22768 = vst [vmem:[#allocation32_spill] sm:$0xff] %v18515_v62 }
 0x2a4   :  { %v18517_v61 = vpop.f32.mrf.mxu0  ;;  %v18519_v60 = vpop.f32.mrf.mxu1 }
 0x2a5   :  { %22769 = vst [vmem:[#allocation33_spill] sm:$0xff] %v18517_v61  ;;  %22770 = vst [vmem:[#allocation34_spill] sm:$0xff] %v18519_v60 }
 0x2a6   :  { %v18521_v57 = vpop.f32.mrf.mxu0  ;;  %v18523_v58 = vpop.f32.mrf.mxu1 }
 0x2a7   :  { %22771 = vst [vmem:[#allocation35_spill] sm:$0xff] %v18521_v57  ;;  %22772 = vst [vmem:[#allocation36_spill] sm:$0xff] %v18523_v58 }
 0x2aa   :  { %v18525_v5 = vpop.f32.mrf.mxu0  ;;  %v18527_v6 = vpop.f32.mrf.mxu1 }
 0x2ab   :  { %22773 = vst [vmem:[#allocation37_spill] sm:$0xff] %v18525_v5  ;;  %22774 = vst [vmem:[#allocation38_spill] sm:$0xff] %v18527_v6 }
 0x2ac   :  { %v18529_v30 = vpop.f32.mrf.mxu0  ;;  %v18531_v29 = vpop.f32.mrf.mxu1 }
 0x2ad   :  { %22775 = vst [vmem:[#allocation39_spill] sm:$0xff] %v18529_v30  ;;  %22776 = vst [vmem:[#allocation40_spill] sm:$0xff] %v18531_v29 }
 0x2b0   :  { %v18533_v56 = vpop.f32.mrf.mxu0  ;;  %v18535_v55 = vpop.f32.mrf.mxu1 }
 0x2b1   :  { %22777 = vst [vmem:[#allocation41_spill] sm:$0xff] %v18533_v56  ;;  %22778 = vst [vmem:[#allocation42_spill] sm:$0xff] %v18535_v55 }
 0x2b2   :  { %v18537_v62 = vpop.f32.mrf.mxu0  ;;  %v18539_v61 = vpop.f32.mrf.mxu1 }
 0x2b3   :  { %22779 = vst [vmem:[#allocation43_spill] sm:$0xff] %v18537_v62  ;;  %22780 = vst [vmem:[#allocation44_spill] sm:$0xff] %v18539_v61 }
 0x2b6   :  { %v18541_v60 = vpop.f32.mrf.mxu0  ;;  %v18543_v57 = vpop.f32.mrf.mxu1 }
 0x2b7   :  { %22781 = vst [vmem:[#allocation45_spill] sm:$0xff] %v18541_v60  ;;  %22782 = vst [vmem:[#allocation46_spill] sm:$0xff] %v18543_v57 }
 0x2b8   :  { %v18545_v58 = vpop.f32.mrf.mxu0  ;;  %v18547_v5 = vpop.f32.mrf.mxu1 }
 0x2b9   :  { %22783 = vst [vmem:[#allocation47_spill] sm:$0xff] %v18545_v58  ;;  %22784 = vst [vmem:[#allocation48_spill] sm:$0xff] %v18547_v5 }
 0x2bc   :  { %v18549_v6 = vpop.f32.mrf.mxu0  ;;  %v18551_v30 = vpop.f32.mrf.mxu1 }
 0x2bd   :  { %22785 = vst [vmem:[#allocation49_spill] sm:$0xff] %v18549_v6  ;;  %22786 = vst [vmem:[#allocation50_spill] sm:$0xff] %v18551_v30 }
 0x2be   :  { %v18553_v29 = vpop.f32.mrf.mxu0  ;;  %v18555_v56 = vpop.f32.mrf.mxu1 }
 0x2bf   :  { %22787 = vst [vmem:[#allocation51_spill] sm:$0xff] %v18553_v29  ;;  %22788 = vst [vmem:[#allocation52_spill] sm:$0xff] %v18555_v56 }
 0x2c2   :  { %v18557_v55 = vpop.f32.mrf.mxu0  ;;  %v18559_v62 = vpop.f32.mrf.mxu1 }
 0x2c3   :  { %22789 = vst [vmem:[#allocation53_spill] sm:$0xff] %v18557_v55  ;;  %22790 = vst [vmem:[#allocation54_spill] sm:$0xff] %v18559_v62  ;;  %v18744_v62 = vld [vmem:[%s22561_s0 + $0x18] sm:$0xff]  ;;  %v18751_v55 = vld [vmem:[%s22561_s0 + $0x48] sm:$0xff] }
 0x2c4   :  { %v18561_v61 = vpop.f32.mrf.mxu0  ;;  %v18563_v60 = vpop.f32.mrf.mxu1 }
 0x2c5   :  { %22791 = vst [vmem:[#allocation55_spill] sm:$0xff] %v18561_v61  ;;  %22792 = vst [vmem:[#allocation56_spill] sm:$0xff] %v18563_v60 }
 0x2c8   :  { %v18565_v57 = vpop.f32.mrf.mxu0  ;;  %v18567_v58 = vpop.f32.mrf.mxu1 }
 0x2c9   :  { %22793 = vst [vmem:[#allocation57_spill] sm:$0xff] %v18565_v57  ;;  %22794 = vst [vmem:[#allocation58_spill] sm:$0xff] %v18567_v58 }
 0x2ca   :  { %v18569_v5 = vpop.f32.mrf.mxu0  ;;  %v18571_v6 = vpop.f32.mrf.mxu1 }
 0x2cb   :  { %22795 = vst [vmem:[#allocation59_spill] sm:$0xff] %v18569_v5  ;;  %22796 = vst [vmem:[#allocation60_spill] sm:$0xff] %v18571_v6 }
 0x2ce   :  { %v15394_v30 = vpop.f32.mrf.mxu0  ;;  %v15415_v29 = vpop.f32.mrf.mxu1 }
 0x2d0   :  { %v3606_v59 = vpop.f32.mrf.mxu0  ;;  %v3701_v56 = vpop.f32.mrf.mxu1 }
 0x2d1   :  { %15560 = vmatprep.mubr.msk.f32.mxu0 %vm1809_vm1, %v3606_v59  ;;  %15581 = vmatprep.mubr.msk.f32.mxu1 %vm1809_vm1, %v3701_v56 }
 0x2d2   :  { %15561 = vmatmul.mubr.msk.f32.vlgmr.msra.gmra.mxu0 %vm1809_vm1, %v15394_v30  ;;  %15582 = vmatmul.mubr.msk.f32.vlgmr.msra.gmra.mxu1 %vm1809_vm1, %v15415_v29 }
 0x2d3   :  { %15591 = vmatpush3.msra.mxu0 %v17942_v7  ;;  %15612 = vmatpush3.msra.mxu1 %v17942_v7 }
 0x2d4   :  { %v15397_v58 = vpop.f32.mrf.mxu0  ;;  %v15418_v5 = vpop.f32.mrf.mxu1  ;;  %15592 = vmatprep.subr.mxu0 %v17959_v8  ;;  %15613 = vmatprep.subr.mxu1 %v17959_v8 }
 0x2d5   :  { %15593 = vmatpush3.msra.mxu0 %v17959_v8  ;;  %15614 = vmatpush3.msra.mxu1 %v17959_v8 }
 0x2d6   :  { %v3616_v59 = vpop.f32.mrf.mxu0  ;;  %v3711_v56 = vpop.f32.mrf.mxu1  ;;  %15594 = vmatprep.subr.mxu0 %v17974_v9  ;;  %15615 = vmatprep.subr.mxu1 %v17974_v9 }
 0x2d7   :  { %15563 = vmatprep.mubr.msk.f32.mxu0 %vm1809_vm1, %v3616_v59  ;;  %15584 = vmatprep.mubr.msk.f32.mxu1 %vm1809_vm1, %v3711_v56  ;;  %v18610_v59 = vld [vmem:[%s22566_s5 + $0x28] sm:$0xff]  ;;  %v18623_v56 = vld [vmem:[%s22566_s5 + $0x20] sm:$0xff] }
 0x2d8   :  { %15564 = vmatmul.mubr.msk.f32.gmra.mxu0 %vm1809_vm1, %v15397_v58  ;;  %15585 = vmatmul.mubr.msk.f32.gmra.mxu1 %vm1809_vm1, %v15418_v5 }
 0x2d9   :  { %15595 = vmatpush3.msra.mxu0 %v17974_v9  ;;  %15616 = vmatpush3.msra.mxu1 %v17974_v9 }
 0x2da   :  { %v15400_v7 = vpop.f32.mrf.mxu0  ;;  %v15421_v8 = vpop.f32.mrf.mxu1  ;;  %15596 = vmatprep.subr.mxu0 %v17985_v10  ;;  %15617 = vmatprep.subr.mxu1 %v17985_v10 }
 0x2db   :  { %15597 = vmatpush3.msra.mxu0 %v17985_v10  ;;  %15618 = vmatpush3.msra.mxu1 %v17985_v10 }
 0x2dc   :  { %v3626_v29 = vpop.f32.mrf.mxu0  ;;  %v3721_v30 = vpop.f32.mrf.mxu1  ;;  %15598 = vmatprep.subr.mxu0 %v22747_v3  ;;  %15619 = vmatprep.subr.mxu1 %v22747_v3 }
 0x2dd   :  { %15566 = vmatprep.mubr.msk.f32.mxu0 %vm1809_vm1, %v3626_v29  ;;  %15587 = vmatprep.mubr.msk.f32.mxu1 %vm1809_vm1, %v3721_v30  ;;  %v18632_v29 = vld [vmem:[%s22566_s5 + $0x18] sm:$0xff] }
 0x2de   :  { %15567 = vmatmul.mubr.msk.f32.gmra.mxu0 %vm1809_vm1, %v15400_v7  ;;  %15588 = vmatmul.mubr.msk.f32.gmra.mxu1 %vm1809_vm1, %v15421_v8 }
 0x2df   :  { %15599 = vmatpush3.msra.mxu0 %v22747_v3  ;;  %15620 = vmatpush3.msra.mxu1 %v22747_v3 }
 0x2e0   :  { %v15436_v9 = vpop.f32.mrf.mxu0  ;;  %v15457_v10 = vpop.f32.mrf.mxu1  ;;  %15600 = vmatprep.subr.mxu0 %v22748_v4  ;;  %15621 = vmatprep.subr.mxu1 %v22748_v4 }
 0x2e1   :  { %15601 = vmatpush3.msra.mxu0 %v22748_v4  ;;  %15622 = vmatpush3.msra.mxu1 %v22748_v4 }
 0x2e2   :  { %v3796_v58 = vpop.f32.mrf.mxu0  ;;  %v3891_v5 = vpop.f32.mrf.mxu1  ;;  %15632 = vmatprep.subr.mxu0 %v18610_v59  ;;  %15653 = vmatprep.subr.mxu1 %v18610_v59 }
 0x2e3   :  { %15602 = vmatprep.mubr.msk.f32.mxu0 %vm1809_vm1, %v3796_v58  ;;  %15623 = vmatprep.mubr.msk.f32.mxu1 %vm1809_vm1, %v3891_v5 }
 0x2e4   :  { %15603 = vmatmul.mubr.msk.f32.vlgmr.msra.gmra.mxu0 %vm1809_vm1, %v15436_v9  ;;  %15624 = vmatmul.mubr.msk.f32.vlgmr.msra.gmra.mxu1 %vm1809_vm1, %v15457_v10  ;;  %v18645_v10 = vld [vmem:[%s22566_s5 + $0x10] sm:$0xff] }
 0x2e5   :  { %15633 = vmatpush3.msra.mxu0 %v18610_v59  ;;  %15654 = vmatpush3.msra.mxu1 %v18610_v59 }
 0x2e6   :  { %v15439_v3 = vpop.f32.mrf.mxu0  ;;  %v15460_v4 = vpop.f32.mrf.mxu1  ;;  %15634 = vmatprep.subr.mxu0 %v18623_v56  ;;  %15655 = vmatprep.subr.mxu1 %v18623_v56 }
 0x2e7   :  { %15635 = vmatpush3.msra.mxu0 %v18623_v56  ;;  %15656 = vmatpush3.msra.mxu1 %v18623_v56 }
 0x2e8   :  { %v3806_v7 = vpop.f32.mrf.mxu0  ;;  %v3901_v8 = vpop.f32.mrf.mxu1  ;;  %15636 = vmatprep.subr.mxu0 %v18632_v29  ;;  %15657 = vmatprep.subr.mxu1 %v18632_v29 }
 0x2e9   :  { %15605 = vmatprep.mubr.msk.f32.mxu0 %vm1809_vm1, %v3806_v7  ;;  %15626 = vmatprep.mubr.msk.f32.mxu1 %vm1809_vm1, %v3901_v8  ;;  %v18667_v8 = vld [vmem:[%s22566_s5] sm:$0xff] }
 0x2ea   :  { %15606 = vmatmul.mubr.msk.f32.gmra.mxu0 %vm1809_vm1, %v15439_v3  ;;  %15627 = vmatmul.mubr.msk.f32.gmra.mxu1 %vm1809_vm1, %v15460_v4  ;;  %v18654_v3 = vld [vmem:[%s22566_s5 + $0x8] sm:$0xff] }
 0x2eb   :  { %15637 = vmatpush3.msra.mxu0 %v18632_v29  ;;  %15658 = vmatpush3.msra.mxu1 %v18632_v29 }
 0x2ec   :  { %v15442_v30 = vpop.f32.mrf.mxu0  ;;  %v15463_v9 = vpop.f32.mrf.mxu1  ;;  %15638 = vmatprep.subr.mxu0 %v18645_v10  ;;  %15659 = vmatprep.subr.mxu1 %v18645_v10 }
 0x2ed   :  { %15639 = vmatpush3.msra.mxu0 %v18645_v10  ;;  %15660 = vmatpush3.msra.mxu1 %v18645_v10 }
 0x2ee   :  { %v3816_v58 = vpop.f32.mrf.mxu0  ;;  %v3911_v5 = vpop.f32.mrf.mxu1  ;;  %15640 = vmatprep.subr.mxu0 %v18654_v3  ;;  %15661 = vmatprep.subr.mxu1 %v18654_v3 }
 0x2ef   :  { %15608 = vmatprep.mubr.msk.f32.mxu0 %vm1809_vm1, %v3816_v58  ;;  %15629 = vmatprep.mubr.msk.f32.mxu1 %vm1809_vm1, %v3911_v5 }
 0x2f0   :  { %15609 = vmatmul.mubr.msk.f32.gmra.mxu0 %vm1809_vm1, %v15442_v30  ;;  %15630 = vmatmul.mubr.msk.f32.gmra.mxu1 %vm1809_vm1, %v15463_v9 }
 0x2f1   :  { %15641 = vmatpush3.msra.mxu0 %v18654_v3  ;;  %15662 = vmatpush3.msra.mxu1 %v18654_v3 }
 0x2f2   :  { %v15478_v4 = vpop.f32.mrf.mxu0  ;;  %v15499_v7 = vpop.f32.mrf.mxu1  ;;  %15642 = vmatprep.subr.mxu0 %v18667_v8  ;;  %15663 = vmatprep.subr.mxu1 %v18667_v8 }
 0x2f3   :  { %15643 = vmatpush3.msra.mxu0 %v18667_v8  ;;  %15664 = vmatpush3.msra.mxu1 %v18667_v8 }
 0x2f4   :  { %v3986_v30 = vpop.f32.mrf.mxu0  ;;  %v4081_v9 = vpop.f32.mrf.mxu1  ;;  %15674 = vmatprep.subr.mxu0 %v18610_v59  ;;  %15695 = vmatprep.subr.mxu1 %v18610_v59 }
 0x2f5   :  { %15644 = vmatprep.mubr.msk.f32.mxu0 %vm1809_vm1, %v3986_v30  ;;  %15665 = vmatprep.mubr.msk.f32.mxu1 %vm1809_vm1, %v4081_v9 }
 0x2f6   :  { %15645 = vmatmul.mubr.msk.f32.vlgmr.msra.gmra.mxu0 %vm1809_vm1, %v15478_v4  ;;  %15666 = vmatmul.mubr.msk.f32.vlgmr.msra.gmra.mxu1 %vm1809_vm1, %v15499_v7 }
 0x2f7   :  { %15675 = vmatpush3.msra.mxu0 %v18610_v59  ;;  %15696 = vmatpush3.msra.mxu1 %v18610_v59 }
 0x2f8   :  { %v15481_v58 = vpop.f32.mrf.mxu0  ;;  %v15502_v5 = vpop.f32.mrf.mxu1  ;;  %15676 = vmatprep.subr.mxu0 %v18623_v56  ;;  %15697 = vmatprep.subr.mxu1 %v18623_v56 }
 0x2f9   :  { %15677 = vmatpush3.msra.mxu0 %v18623_v56  ;;  %15698 = vmatpush3.msra.mxu1 %v18623_v56 }
 0x2fa   :  { %v3996_v30 = vpop.f32.mrf.mxu0  ;;  %v4091_v9 = vpop.f32.mrf.mxu1  ;;  %15678 = vmatprep.subr.mxu0 %v18632_v29  ;;  %15699 = vmatprep.subr.mxu1 %v18632_v29 }
 0x2fb   :  { %15647 = vmatprep.mubr.msk.f32.mxu0 %vm1809_vm1, %v3996_v30  ;;  %15668 = vmatprep.mubr.msk.f32.mxu1 %vm1809_vm1, %v4091_v9 }
 0x2fc   :  { %15648 = vmatmul.mubr.msk.f32.gmra.mxu0 %vm1809_vm1, %v15481_v58  ;;  %15669 = vmatmul.mubr.msk.f32.gmra.mxu1 %vm1809_vm1, %v15502_v5 }
 0x2fd   :  { %15679 = vmatpush3.msra.mxu0 %v18632_v29  ;;  %15700 = vmatpush3.msra.mxu1 %v18632_v29 }
 0x2fe   :  { %v15484_v4 = vpop.f32.mrf.mxu0  ;;  %v15505_v7 = vpop.f32.mrf.mxu1  ;;  %15680 = vmatprep.subr.mxu0 %v18645_v10  ;;  %15701 = vmatprep.subr.mxu1 %v18645_v10 }
 0x2ff   :  { %15681 = vmatpush3.msra.mxu0 %v18645_v10  ;;  %15702 = vmatpush3.msra.mxu1 %v18645_v10 }
 0x300   :  { %v4006_v30 = vpop.f32.mrf.mxu0  ;;  %v4101_v9 = vpop.f32.mrf.mxu1  ;;  %15682 = vmatprep.subr.mxu0 %v18654_v3  ;;  %15703 = vmatprep.subr.mxu1 %v18654_v3 }
 0x301   :  { %15650 = vmatprep.mubr.msk.f32.mxu0 %vm1809_vm1, %v4006_v30  ;;  %15671 = vmatprep.mubr.msk.f32.mxu1 %vm1809_vm1, %v4101_v9  ;;  %v18710_v30 = vld [vmem:[%s22561_s0 + $0x28] sm:$0xff] }
 0x302   :  { %15651 = vmatmul.mubr.msk.f32.gmra.mxu0 %vm1809_vm1, %v15484_v4  ;;  %15672 = vmatmul.mubr.msk.f32.gmra.mxu1 %vm1809_vm1, %v15505_v7  ;;  %v5257_v4 = vmul.f32 %v18710_v30, %v18031_v21  ;;  %v18717_v7 = vld [vmem:[%s22561_s0 + $0x58] sm:$0xff] }
 0x303   :  { %v15520_v58 = vpop.f32.mrf.mxu0  ;;  %v15541_v5 = vpop.f32.mrf.mxu1  ;;  %15683 = vmatpush3.msra.mxu0 %v18654_v3  ;;  %15704 = vmatpush3.msra.mxu1 %v18654_v3  ;;  %v5263_v9 = vmul.f32 %v18717_v7, %v18033_v22  ;;  %v18730_v22 = vld [vmem:[%s22561_s0 + $0x20] sm:$0xff] }
 0x304   :  { %15684 = vmatprep.subr.mxu0 %v18667_v8  ;;  %15705 = vmatprep.subr.mxu1 %v18667_v8  ;;  %v5256_v61 = vmul.f32 %v18730_v22, %v18035_v23  ;;  %v5255_v23 = vmul.f32 %v18744_v62, %v18023_v17  ;;  %v18762_v17 = vld [vmem:[%s22561_s0 + $0x10] sm:$0xff] }
 0x305   :  { %v4176_v6 = vpop.f32.mrf.mxu0  ;;  %v4271_v57 = vpop.f32.mrf.mxu1  ;;  %15685 = vmatpush3.msra.mxu0 %v18667_v8  ;;  %15706 = vmatpush3.msra.mxu1 %v18667_v8 }
 0x306   :  { %15686 = vmatprep.mubr.msk.f32.mxu0 %vm1809_vm1, %v4176_v6  ;;  %15707 = vmatprep.mubr.msk.f32.mxu1 %vm1809_vm1, %v4271_v57  ;;  %v18737_v57 = vld [vmem:[%s22561_s0 + $0x50] sm:$0xff] }
 0x307   :  { %15716 = vmatprep.subr.mxu0 %v5257_v4  ;;  %15737 = vmatprep.subr.mxu1 %v5263_v9  ;;  %v15523_v21 = vpop.f32.mrf.mxu0  ;;  %v15544_v60 = vpop.f32.mrf.mxu1  ;;  %v5262_v6 = vmul.f32 %v18737_v57, %v18037_v24  ;;  %v5261_v24 = vmul.f32 %v18751_v55, %v18025_v18  ;;  %v5254_v18 = vmul.f32 %v18762_v17, %v18027_v19 }
 0x308   :  { %15687 = vmatmul.mubr.msk.f32.vlgmr.msra.gmra.mxu0 %vm1809_vm1, %v15520_v58  ;;  %15708 = vmatmul.mubr.msk.f32.vlgmr.msra.gmra.mxu1 %vm1809_vm1, %v15541_v5 }
 0x309   :  { %15717 = vmatpush3.msra.mxu0 %v5257_v4  ;;  %15738 = vmatpush3.msra.mxu1 %v5263_v9  ;;  %v4186_v58 = vpop.f32.mrf.mxu0  ;;  %v4281_v5 = vpop.f32.mrf.mxu1 }
 0x30a   :  { %15718 = vmatprep.subr.mxu0 %v5256_v61  ;;  %15739 = vmatprep.subr.mxu1 %v5262_v6 }
 0x30b   :  { %15719 = vmatpush3.msra.mxu0 %v5256_v61  ;;  %15740 = vmatpush3.msra.mxu1 %v5262_v6  ;;  %v15526_v4 = vpop.f32.mrf.mxu0  ;;  %v15547_v9 = vpop.f32.mrf.mxu1  ;;  %v18769_v61 = vld [vmem:[%s22561_s0 + $0x40] sm:$0xff] }
 0x30c   :  { %15689 = vmatprep.mubr.msk.f32.mxu0 %vm1809_vm1, %v4186_v58  ;;  %15710 = vmatprep.mubr.msk.f32.mxu1 %vm1809_vm1, %v4281_v5  ;;  %v5260_v6 = vmul.f32 %v18769_v61, %v18029_v20  ;;  %v18776_v58 = vld [vmem:[%s22561_s0 + $0x8] sm:$0xff]  ;;  %v18783_v5 = vld [vmem:[%s22561_s0 + $0x38] sm:$0xff] }
 0x30d   :  { %15720 = vmatprep.subr.mxu0 %v5255_v23  ;;  %15741 = vmatprep.subr.mxu1 %v5261_v24  ;;  %v5253_v19 = vmul.f32 %v18776_v58, %v18015_v13  ;;  %v5259_v20 = vmul.f32 %v18783_v5, %v18017_v14  ;;  %v18794_v13 = vld [vmem:[%s22561_s0] sm:$0xff] }
 0x30e   :  { %15690 = vmatmul.mubr.msk.f32.gmra.mxu0 %vm1809_vm1, %v15523_v21  ;;  %15711 = vmatmul.mubr.msk.f32.gmra.mxu1 %vm1809_vm1, %v15544_v60  ;;  %v4196_v21 = vpop.f32.mrf.mxu0  ;;  %v4291_v60 = vpop.f32.mrf.mxu1  ;;  %v5252_v14 = vmul.f32 %v18794_v13, %v18019_v15 }
 0x30f   :  { %15721 = vmatpush3.msra.mxu0 %v5255_v23  ;;  %15742 = vmatpush3.msra.mxu1 %v5261_v24  ;;  %v18801_v23 = vld [vmem:[%s22561_s0 + $0x30] sm:$0xff] }
 0x310   :  { %15722 = vmatprep.subr.mxu0 %v5254_v18  ;;  %15743 = vmatprep.subr.mxu1 %v5260_v6  ;;  %v5258_v24 = vmul.f32 %v18801_v23, %v18021_v16 }
 0x311   :  { %15723 = vmatpush3.msra.mxu0 %v5254_v18  ;;  %15744 = vmatpush3.msra.mxu1 %v5260_v6  ;;  %v18837_v18 = vld [vmem:[%s22561_s0 + $0xb0] sm:$0xff] }
 0x312   :  { %15692 = vmatprep.mubr.msk.f32.mxu0 %vm1809_vm1, %v4196_v21  ;;  %15713 = vmatprep.mubr.msk.f32.mxu1 %vm1809_vm1, %v4291_v60  ;;  %v5274_v6 = vmul.f32 %v18837_v18, %v18061_v40  ;;  %v18844_v21 = vld [vmem:[%s22561_s0 + $0x78] sm:$0xff]  ;;  %v18851_v60 = vld [vmem:[%s22561_s0 + $0xa8] sm:$0xff] }
 0x313   :  { %15724 = vmatprep.subr.mxu0 %v5253_v19  ;;  %15745 = vmatprep.subr.mxu1 %v5259_v20  ;;  %v5273_v40 = vmul.f32 %v18851_v60, %v18049_v32 }
 0x314   :  { %15693 = vmatmul.mubr.msk.f32.gmra.mxu0 %vm1809_vm1, %v15526_v4  ;;  %15714 = vmatmul.mubr.msk.f32.gmra.mxu1 %vm1809_vm1, %v15547_v9  ;;  %v18808_v4 = vld [vmem:[%s22561_s0 + $0x88] sm:$0xff]  ;;  %v18815_v9 = vld [vmem:[%s22561_s0 + $0xb8] sm:$0xff] }
 0x315   :  { %15725 = vmatpush3.msra.mxu0 %v5253_v19  ;;  %15746 = vmatpush3.msra.mxu1 %v5259_v20  ;;  %v5269_v15 = vmul.f32 %v18808_v4, %v18055_v37  ;;  %v5275_v16 = vmul.f32 %v18815_v9, %v18057_v38  ;;  %v18830_v37 = vld [vmem:[%s22561_s0 + $0x80] sm:$0xff] }
 0x316   :  { %15726 = vmatprep.subr.mxu0 %v5252_v14  ;;  %15747 = vmatprep.subr.mxu1 %v5258_v24  ;;  %v5268_v38 = vmul.f32 %v18830_v37, %v18059_v39  ;;  %v5267_v39 = vmul.f32 %v18844_v21, %v18047_v31  ;;  %v18866_v31 = vld [vmem:[%s22561_s0 + $0x70] sm:$0xff]  ;;  %v18873_v19 = vld [vmem:[%s22561_s0 + $0xa0] sm:$0xff] }
 0x317   :  { %15727 = vmatpush3.msra.mxu0 %v5252_v14  ;;  %15748 = vmatpush3.msra.mxu1 %v5258_v24  ;;  %v5266_v32 = vmul.f32 %v18866_v31, %v18051_v33  ;;  %v5272_v20 = vmul.f32 %v18873_v19, %v18053_v34  ;;  %v18880_v14 = vld [vmem:[%s22561_s0 + $0x68] sm:$0xff]  ;;  %v18887_v24 = vld [vmem:[%s22561_s0 + $0x98] sm:$0xff] }
 0x318   :  { %15728 = vmatprep.mubr.msk.f32.mxu0 %vm1809_vm1, %v18354_v11  ;;  %15749 = vmatprep.mubr.msk.f32.mxu1 %vm1809_vm1, %v18354_v11  ;;  %v5265_v33 = vmul.f32 %v18880_v14, %v18039_v25  ;;  %v5271_v34 = vmul.f32 %v18887_v24, %v18041_v26  ;;  %v18902_v25 = vld [vmem:[%s22561_s0 + $0x60] sm:$0xff] }
 0x319   :  { %15758 = vmatprep.subr.mxu0 %v5269_v15  ;;  %15779 = vmatprep.subr.mxu1 %v5275_v16  ;;  %v5264_v26 = vmul.f32 %v18902_v25, %v18043_v27 }
 0x31a   :  { %15729 = vmatmul.mubr.msk.f32.vlgmr.msra.gmra.mxu0 %vm1809_vm1, %v18409_v35  ;;  %15750 = vmatmul.mubr.msk.f32.vlgmr.msra.gmra.mxu1 %vm1809_vm1, %v18409_v35 }
 0x31b   :  { %15759 = vmatpush3.msra.mxu0 %v5269_v15  ;;  %15780 = vmatpush3.msra.mxu1 %v5275_v16  ;;  %v18909_v15 = vld [vmem:[%s22561_s0 + $0x90] sm:$0xff] }
 0x31c   :  { %15760 = vmatprep.subr.mxu0 %v5268_v38  ;;  %15781 = vmatprep.subr.mxu1 %v5274_v6  ;;  %v5270_v16 = vmul.f32 %v18909_v15, %v18045_v28 }
 0x31d   :  { %15761 = vmatpush3.msra.mxu0 %v5268_v38  ;;  %15782 = vmatpush3.msra.mxu1 %v5274_v6  ;;  %v18916_v38 = vld [vmem:[%s22561_s0 + $0xe8] sm:$0xff]  ;;  %v18923_v6 = vld [vmem:[%s22561_s0 + $0x118] sm:$0xff] }
 0x31e   :  { %15731 = vmatprep.mubr.msk.f32.mxu0 %vm1809_vm1, %v18418_v36  ;;  %15752 = vmatprep.mubr.msk.f32.mxu1 %vm1809_vm1, %v18418_v36  ;;  %v5281_v27 = vmul.f32 %v18916_v38, %v18079_v51  ;;  %v5287_v28 = vmul.f32 %v18923_v6, %v18081_v52  ;;  %v18938_v51 = vld [vmem:[%s22561_s0 + $0xe0] sm:$0xff] }
 0x31f   :  { %15762 = vmatprep.subr.mxu0 %v5267_v39  ;;  %15783 = vmatprep.subr.mxu1 %v5273_v40  ;;  %v5280_v52 = vmul.f32 %v18938_v51, %v18083_v53 }
 0x320   :  { %15732 = vmatmul.mubr.msk.f32.gmra.mxu0 %vm1809_vm1, %v18431_v41  ;;  %15753 = vmatmul.mubr.msk.f32.gmra.mxu1 %vm1809_vm1, %v18431_v41 }
 0x321   :  { %15763 = vmatpush3.msra.mxu0 %v5267_v39  ;;  %15784 = vmatpush3.msra.mxu1 %v5273_v40  ;;  %v18945_v39 = vld [vmem:[%s22561_s0 + $0x110] sm:$0xff] }
 0x322   :  { %15764 = vmatprep.subr.mxu0 %v5266_v32  ;;  %15785 = vmatprep.subr.mxu1 %v5272_v20  ;;  %v5286_v40 = vmul.f32 %v18945_v39, %v18085_v54 }
 0x323   :  { %15765 = vmatpush3.msra.mxu0 %v5266_v32  ;;  %15786 = vmatpush3.msra.mxu1 %v5272_v20  ;;  %v18952_v32 = vld [vmem:[%s22561_s0 + $0xd8] sm:$0xff]  ;;  %v18959_v20 = vld [vmem:[%s22561_s0 + $0x108] sm:$0xff] }
 0x324   :  { %15734 = vmatprep.mubr.msk.f32.mxu0 %vm1809_vm1, %v18440_v42  ;;  %15755 = vmatprep.mubr.msk.f32.mxu1 %vm1809_vm1, %v18440_v42  ;;  %v5279_v53 = vmul.f32 %v18952_v32, %v18071_v47  ;;  %v5285_v54 = vmul.f32 %v18959_v20, %v18073_v48  ;;  %v18974_v47 = vld [vmem:[%s22561_s0 + $0xd0] sm:$0xff] }
 0x325   :  { %15766 = vmatprep.subr.mxu0 %v5265_v33  ;;  %15787 = vmatprep.subr.mxu1 %v5271_v34  ;;  %v5278_v48 = vmul.f32 %v18974_v47, %v18075_v49 }
 0x326   :  { %15735 = vmatmul.mubr.msk.f32.gmra.mxu0 %vm1809_vm1, %v18453_v12  ;;  %15756 = vmatmul.mubr.msk.f32.gmra.mxu1 %vm1809_vm1, %v18453_v12 }
 0x327   :  { %15767 = vmatpush3.msra.mxu0 %v5265_v33  ;;  %15788 = vmatpush3.msra.mxu1 %v5271_v34  ;;  %v18981_v33 = vld [vmem:[%s22561_s0 + $0x100] sm:$0xff] }
 0x328   :  { %15768 = vmatprep.subr.mxu0 %v5264_v26  ;;  %15789 = vmatprep.subr.mxu1 %v5270_v16  ;;  %v5284_v34 = vmul.f32 %v18981_v33, %v18077_v50 }
 0x329   :  { %15769 = vmatpush3.msra.mxu0 %v5264_v26  ;;  %15790 = vmatpush3.msra.mxu1 %v5270_v16  ;;  %v18988_v26 = vld [vmem:[%s22561_s0 + $0xc8] sm:$0xff]  ;;  %v18995_v16 = vld [vmem:[%s22561_s0 + $0xf8] sm:$0xff] }
 0x32a   :  { %15770 = vmatprep.mubr.msk.f32.mxu0 %vm1809_vm1, %v18354_v11  ;;  %15791 = vmatprep.mubr.msk.f32.mxu1 %vm1809_vm1, %v18354_v11  ;;  %v5277_v49 = vmul.f32 %v18988_v26, %v18063_v43  ;;  %v5283_v50 = vmul.f32 %v18995_v16, %v18065_v44  ;;  %v19010_v43 = vld [vmem:[%s22561_s0 + $0xc0] sm:$0xff] }
 0x32b   :  { %15800 = vmatprep.subr.mxu0 %v5281_v27  ;;  %15821 = vmatprep.subr.mxu1 %v5287_v28  ;;  %v5276_v44 = vmul.f32 %v19010_v43, %v18067_v45 }
 0x32c   :  { %15771 = vmatmul.mubr.msk.f32.vlgmr.msra.gmra.mxu0 %vm1809_vm1, %v18409_v35  ;;  %15792 = vmatmul.mubr.msk.f32.vlgmr.msra.gmra.mxu1 %vm1809_vm1, %v18409_v35 }
 0x32d   :  { %15801 = vmatpush3.msra.mxu0 %v5281_v27  ;;  %15822 = vmatpush3.msra.mxu1 %v5287_v28  ;;  %v19017_v27 = vld [vmem:[%s22561_s0 + $0xf0] sm:$0xff] }
 0x32e   :  { %15802 = vmatprep.subr.mxu0 %v5280_v52  ;;  %15823 = vmatprep.subr.mxu1 %v5286_v40  ;;  %v5282_v28 = vmul.f32 %v19017_v27, %v18069_v46 }
 0x32f   :  { %15803 = vmatpush3.msra.mxu0 %v5280_v52  ;;  %15824 = vmatpush3.msra.mxu1 %v5286_v40  ;;  %v19024_v52 = vld [vmem:[%s22561_s0 + $0x148] sm:$0xff]  ;;  %v19031_v40 = vld [vmem:[%s22561_s0 + $0x178] sm:$0xff] }
 0x330   :  { %15773 = vmatprep.mubr.msk.f32.mxu0 %vm1809_vm1, %v18418_v36  ;;  %15794 = vmatprep.mubr.msk.f32.mxu1 %vm1809_vm1, %v18418_v36  ;;  %v5293_v45 = vmul.f32 %v19024_v52, %v18103_v63  ;;  %v5299_v46 = vmul.f32 %v19031_v40, %v18105_v0  ;;  %v19046_v63 = vld [vmem:[%s22561_s0 + $0x140] sm:$0xff] }
 0x331   :  { %15804 = vmatprep.subr.mxu0 %v5279_v53  ;;  %15825 = vmatprep.subr.mxu1 %v5285_v54  ;;  %v5292_v0 = vmul.f32 %v19046_v63, %v18107_v1 }
 0x332   :  { %15774 = vmatmul.mubr.msk.f32.gmra.mxu0 %vm1809_vm1, %v18431_v41  ;;  %15795 = vmatmul.mubr.msk.f32.gmra.mxu1 %vm1809_vm1, %v18431_v41 }
 0x333   :  { %15805 = vmatpush3.msra.mxu0 %v5279_v53  ;;  %15826 = vmatpush3.msra.mxu1 %v5285_v54  ;;  %v19053_v53 = vld [vmem:[%s22561_s0 + $0x170] sm:$0xff] }
 0x334   :  { %15806 = vmatprep.subr.mxu0 %v5278_v48  ;;  %15827 = vmatprep.subr.mxu1 %v5284_v34  ;;  %v5298_v54 = vmul.f32 %v19053_v53, %v18109_v2 }
 0x335   :  { %15807 = vmatpush3.msra.mxu0 %v5278_v48  ;;  %15828 = vmatpush3.msra.mxu1 %v5284_v34  ;;  %v19060_v48 = vld [vmem:[%s22561_s0 + $0x138] sm:$0xff]  ;;  %v22797_v34 = vld [vmem:[#allocation11_spill] sm:$0xff] }
 0x336   :  { %15776 = vmatprep.mubr.msk.f32.mxu0 %vm1809_vm1, %v18440_v42  ;;  %15797 = vmatprep.mubr.msk.f32.mxu1 %vm1809_vm1, %v18440_v42  ;;  %v5291_v1 = vmul.f32 %v19060_v48, %v22797_v34  ;;  %v19096_v34 = vld [vmem:[%s22561_s0 + $0x128] sm:$0xff] }
 0x337   :  { %15808 = vmatprep.subr.mxu0 %v5277_v49  ;;  %15829 = vmatprep.subr.mxu1 %v5283_v50 }
 0x338   :  { %15777 = vmatmul.mubr.msk.f32.gmra.mxu0 %vm1809_vm1, %v18453_v12  ;;  %15798 = vmatmul.mubr.msk.f32.gmra.mxu1 %vm1809_vm1, %v18453_v12 }
 0x339   :  { %15809 = vmatpush3.msra.mxu0 %v5277_v49  ;;  %15830 = vmatpush3.msra.mxu1 %v5283_v50  ;;  %v19067_v49 = vld [vmem:[%s22561_s0 + $0x168] sm:$0xff]  ;;  %v22799_v50 = vld [vmem:[#allocation12_spill] sm:$0xff] }
 0x33a   :  { %15810 = vmatprep.subr.mxu0 %v5276_v44  ;;  %15831 = vmatprep.subr.mxu1 %v5282_v28  ;;  %22798 = vst [vmem:[#allocation11_spill] sm:$0xff] %v19067_v49  ;;  %v5297_v2 = vmul.f32 %v19067_v49, %v22799_v50  ;;  %v22803_v50 = vld [vmem:[#allocation7_spill] sm:$0xff]  ;;  %v22804_v49 = vld [vmem:[#allocation8_spill] sm:$0xff] }
 0x33b   :  { %15811 = vmatpush3.msra.mxu0 %v5276_v44  ;;  %15832 = vmatpush3.msra.mxu1 %v5282_v28  ;;  %v19082_v44 = vld [vmem:[%s22561_s0 + $0x130] sm:$0xff]  ;;  %v22801_v28 = vld [vmem:[#allocation13_spill] sm:$0xff] }
 0x33c   :  { %15812 = vmatprep.mubr.msk.f32.mxu0 %vm1809_vm1, %v18354_v11  ;;  %15833 = vmatprep.mubr.msk.f32.mxu1 %vm1809_vm1, %v18354_v11  ;;  %22800 = vst [vmem:[#allocation12_spill] sm:$0xff] %v19082_v44 }
 0x33d   :  { %15842 = vmatprep.subr.mxu0 %v5293_v45  ;;  %15863 = vmatprep.subr.mxu1 %v5299_v46 }
 0x33e   :  { %15813 = vmatmul.mubr.msk.f32.vlgmr.msra.gmra.mxu0 %vm1809_vm1, %v18409_v35  ;;  %15834 = vmatmul.mubr.msk.f32.vlgmr.msra.gmra.mxu1 %vm1809_vm1, %v18409_v35 }
 0x33f   :  { %15843 = vmatpush3.msra.mxu0 %v5293_v45  ;;  %15864 = vmatpush3.msra.mxu1 %v5299_v46  ;;  %v5290_v45 = vmul.f32 %v19082_v44, %v22801_v28  ;;  %v19089_v46 = vld [vmem:[%s22561_s0 + $0x160] sm:$0xff]  ;;  %v5289_v28 = vmul.f32 %v19096_v34, %v22803_v50  ;;  %v19103_v44 = vld [vmem:[%s22561_s0 + $0x158] sm:$0xff] }
 0x340   :  { %15844 = vmatprep.subr.mxu0 %v5292_v0  ;;  %15865 = vmatprep.subr.mxu1 %v5298_v54 }
 0x341   :  { %15845 = vmatpush3.msra.mxu0 %v5292_v0  ;;  %15866 = vmatpush3.msra.mxu1 %v5298_v54  ;;  %v22802_v0 = vld [vmem:[#allocation14_spill] sm:$0xff] }
 0x342   :  { %15815 = vmatprep.mubr.msk.f32.mxu0 %vm1809_vm1, %v18418_v36  ;;  %15836 = vmatprep.mubr.msk.f32.mxu1 %vm1809_vm1, %v18418_v36  ;;  %v5296_v54 = vmul.f32 %v19089_v46, %v22802_v0  ;;  %v5295_v0 = vmul.f32 %v19103_v44, %v22804_v49  ;;  %v22805_v49 = vld [vmem:[#allocation9_spill] sm:$0xff] }
 0x343   :  { %15846 = vmatprep.subr.mxu0 %v5291_v1  ;;  %15867 = vmatprep.subr.mxu1 %v5297_v2 }
 0x344   :  { %15816 = vmatmul.mubr.msk.f32.gmra.mxu0 %vm1809_vm1, %v18431_v41  ;;  %15837 = vmatmul.mubr.msk.f32.gmra.mxu1 %vm1809_vm1, %v18431_v41 }
 0x345   :  { %15847 = vmatpush3.msra.mxu0 %v5291_v1  ;;  %15868 = vmatpush3.msra.mxu1 %v5297_v2  ;;  %v19118_v1 = vld [vmem:[%s22561_s0 + $0x120] sm:$0xff] }
 0x346   :  { %15848 = vmatprep.subr.mxu0 %v5290_v45  ;;  %15869 = vmatprep.subr.mxu1 %v5296_v54  ;;  %v5288_v2 = vmul.f32 %v19118_v1, %v22805_v49 }
 0x347   :  { %15849 = vmatpush3.msra.mxu0 %v5290_v45  ;;  %15870 = vmatpush3.msra.mxu1 %v5296_v54  ;;  %v19125_v45 = vld [vmem:[%s22561_s0 + $0x150] sm:$0xff]  ;;  %v22806_v54 = vld [vmem:[#allocation10_spill] sm:$0xff] }
 0x348   :  { %15818 = vmatprep.mubr.msk.f32.mxu0 %vm1809_vm1, %v18440_v42  ;;  %15839 = vmatprep.mubr.msk.f32.mxu1 %vm1809_vm1, %v18440_v42  ;;  %v5294_v50 = vmul.f32 %v19125_v45, %v22806_v54 }
 0x349   :  { %15850 = vmatprep.subr.mxu0 %v5289_v28  ;;  %15871 = vmatprep.subr.mxu1 %v5295_v0 }
 0x34a   :  { %15819 = vmatmul.mubr.msk.f32.gmra.mxu0 %vm1809_vm1, %v18453_v12  ;;  %15840 = vmatmul.mubr.msk.f32.gmra.mxu1 %vm1809_vm1, %v18453_v12 }
 0x34b   :  { %15851 = vmatpush3.msra.mxu0 %v5289_v28  ;;  %15872 = vmatpush3.msra.mxu1 %v5295_v0 }
 0x34c   :  { %15852 = vmatprep.subr.mxu0 %v5288_v2  ;;  %15873 = vmatprep.subr.mxu1 %v5294_v50 }
 0x34d   :  { %15853 = vmatpush3.msra.mxu0 %v5288_v2  ;;  %15874 = vmatpush3.msra.mxu1 %v5294_v50 }
 0x34e   :  { %15854 = vmatprep.mubr.msk.f32.mxu0 %vm1809_vm1, %v18354_v11  ;;  %15875 = vmatprep.mubr.msk.f32.mxu1 %vm1809_vm1, %v18354_v11 }
 0x34f   :  { %15855 = vmatmul.mubr.msk.f32.vlgmr.msra.gmra.mxu0 %vm1809_vm1, %v18409_v35  ;;  %15876 = vmatmul.mubr.msk.f32.vlgmr.msra.gmra.mxu1 %vm1809_vm1, %v18409_v35 }
 0x350   :  { %15857 = vmatprep.mubr.msk.f32.mxu0 %vm1809_vm1, %v18418_v36  ;;  %15878 = vmatprep.mubr.msk.f32.mxu1 %vm1809_vm1, %v18418_v36 }
 0x351   :  { %15884 = vmatprep.subr.mxu0 %v18610_v59  ;;  %15905 = vmatprep.subr.mxu1 %v18610_v59 }
 0x352   :  { %15885 = vmatpush3.msra.mxu0 %v18610_v59  ;;  %15906 = vmatpush3.msra.mxu1 %v18610_v59 }
 0x353   :  { %15858 = vmatmul.mubr.msk.f32.gmra.mxu0 %vm1809_vm1, %v18431_v41  ;;  %15879 = vmatmul.mubr.msk.f32.gmra.mxu1 %vm1809_vm1, %v18431_v41 }
 0x354   :  { %15860 = vmatprep.mubr.msk.f32.mxu0 %vm1809_vm1, %v18440_v42  ;;  %15881 = vmatprep.mubr.msk.f32.mxu1 %vm1809_vm1, %v18440_v42 }
 0x355   :  { %15886 = vmatprep.subr.mxu0 %v18623_v56  ;;  %15907 = vmatprep.subr.mxu1 %v18623_v56 }
 0x356   :  { %15887 = vmatpush3.msra.mxu0 %v18623_v56  ;;  %15908 = vmatpush3.msra.mxu1 %v18623_v56 }
 0x357   :  { %15861 = vmatmul.mubr.msk.f32.gmra.mxu0 %vm1809_vm1, %v18453_v12  ;;  %15882 = vmatmul.mubr.msk.f32.gmra.mxu1 %vm1809_vm1, %v18453_v12 }
 0x358   :  { %15888 = vmatprep.subr.mxu0 %v18632_v29  ;;  %15909 = vmatprep.subr.mxu1 %v18632_v29 }
 0x359   :  { %15889 = vmatpush3.msra.mxu0 %v18632_v29  ;;  %15910 = vmatpush3.msra.mxu1 %v18632_v29 }
 0x35a   :  { %15890 = vmatprep.subr.mxu0 %v18645_v10  ;;  %15911 = vmatprep.subr.mxu1 %v18645_v10 }
 0x35b   :  { %15891 = vmatpush3.msra.mxu0 %v18645_v10  ;;  %15912 = vmatpush3.msra.mxu1 %v18645_v10 }
 0x35c   :  { %15892 = vmatprep.subr.mxu0 %v18654_v3  ;;  %15913 = vmatprep.subr.mxu1 %v18654_v3 }
 0x35d   :  { %15893 = vmatpush3.msra.mxu0 %v18654_v3  ;;  %15914 = vmatpush3.msra.mxu1 %v18654_v3 }
 0x35e   :  { %15894 = vmatprep.subr.mxu0 %v18667_v8  ;;  %15915 = vmatprep.subr.mxu1 %v18667_v8 }
 0x35f   :  { %15895 = vmatpush3.msra.mxu0 %v18667_v8  ;;  %15916 = vmatpush3.msra.mxu1 %v18667_v8 }
 0x360   :  { %15926 = vmatprep.subr.mxu0 %v18610_v59  ;;  %15947 = vmatprep.subr.mxu1 %v18610_v59 }
 0x392   :  { %v19179_v11 = vpop.f32.mrf.mxu0  ;;  %v19181_v35 = vpop.f32.mrf.mxu1 }
 0x393   :  { %22807 = vst [vmem:[#allocation13_spill] sm:$0xff] %v19179_v11  ;;  %22808 = vst [vmem:[#allocation14_spill] sm:$0xff] %v19181_v35 }
 0x394   :  { %v19183_v36 = vpop.f32.mrf.mxu0  ;;  %v19185_v41 = vpop.f32.mrf.mxu1 }
 0x395   :  { %22809 = vst [vmem:[#allocation7_spill] sm:$0xff] %v19183_v36  ;;  %22810 = vst [vmem:[#allocation8_spill] sm:$0xff] %v19185_v41 }
 0x398   :  { %v19187_v42 = vpop.f32.mrf.mxu0  ;;  %v19189_v12 = vpop.f32.mrf.mxu1 }
 0x399   :  { %22811 = vst [vmem:[#allocation9_spill] sm:$0xff] %v19187_v42  ;;  %22812 = vst [vmem:[#allocation10_spill] sm:$0xff] %v19189_v12 }
 0x39a   :  { %v19191_v28 = vpop.f32.mrf.mxu0  ;;  %v19193_v0 = vpop.f32.mrf.mxu1 }
 0x39b   :  { %22813 = vst [vmem:[#allocation61_spill] sm:$0xff] %v19191_v28  ;;  %22814 = vst [vmem:[#allocation62_spill] sm:$0xff] %v19193_v0 }
 0x39e   :  { %v19195_v49 = vpop.f32.mrf.mxu0  ;;  %v19197_v2 = vpop.f32.mrf.mxu1 }
 0x39f   :  { %22815 = vst [vmem:[#allocation63_spill] sm:$0xff] %v19195_v49  ;;  %22816 = vst [vmem:[#allocation64_spill] sm:$0xff] %v19197_v2 }
 0x3a0   :  { %v19199_v54 = vpop.f32.mrf.mxu0  ;;  %v19201_v50 = vpop.f32.mrf.mxu1 }
 0x3a1   :  { %22817 = vst [vmem:[#allocation65_spill] sm:$0xff] %v19199_v54  ;;  %22818 = vst [vmem:[#allocation66_spill] sm:$0xff] %v19201_v50 }
 0x3a4   :  { %v19203_v35 = vpop.f32.mrf.mxu0  ;;  %v19205_v36 = vpop.f32.mrf.mxu1 }
 0x3a5   :  { %22819 = vst [vmem:[#allocation67_spill] sm:$0xff] %v19203_v35  ;;  %22820 = vst [vmem:[#allocation68_spill] sm:$0xff] %v19205_v36 }
 0x3a6   :  { %v19207_v41 = vpop.f32.mrf.mxu0  ;;  %v19209_v42 = vpop.f32.mrf.mxu1 }
 0x3a7   :  { %22821 = vst [vmem:[#allocation69_spill] sm:$0xff] %v19207_v41  ;;  %22822 = vst [vmem:[#allocation70_spill] sm:$0xff] %v19209_v42 }
 0x3aa   :  { %v19211_v12 = vpop.f32.mrf.mxu0  ;;  %v19213_v28 = vpop.f32.mrf.mxu1 }
 0x3ab   :  { %22823 = vst [vmem:[#allocation71_spill] sm:$0xff] %v19211_v12  ;;  %22824 = vst [vmem:[#allocation72_spill] sm:$0xff] %v19213_v28 }
 0x3ac   :  { %v19215_v0 = vpop.f32.mrf.mxu0  ;;  %v19217_v49 = vpop.f32.mrf.mxu1 }
 0x3ad   :  { %22825 = vst [vmem:[#allocation73_spill] sm:$0xff] %v19215_v0  ;;  %22826 = vst [vmem:[#allocation74_spill] sm:$0xff] %v19217_v49 }
 0x3b0   :  { %v19219_v2 = vpop.f32.mrf.mxu0  ;;  %v19221_v54 = vpop.f32.mrf.mxu1 }
 0x3b1   :  { %22827 = vst [vmem:[#allocation75_spill] sm:$0xff] %v19219_v2  ;;  %22828 = vst [vmem:[#allocation76_spill] sm:$0xff] %v19221_v54 }
 0x3b2   :  { %v19223_v50 = vpop.f32.mrf.mxu0  ;;  %v19225_v35 = vpop.f32.mrf.mxu1 }
 0x3b3   :  { %22829 = vst [vmem:[#allocation77_spill] sm:$0xff] %v19223_v50  ;;  %22830 = vst [vmem:[#allocation78_spill] sm:$0xff] %v19225_v35 }
 0x3b6   :  { %v19227_v36 = vpop.f32.mrf.mxu0  ;;  %v19229_v41 = vpop.f32.mrf.mxu1 }
 0x3b7   :  { %22831 = vst [vmem:[#allocation79_spill] sm:$0xff] %v19227_v36  ;;  %22832 = vst [vmem:[#allocation80_spill] sm:$0xff] %v19229_v41 }
 0x3b8   :  { %v19231_v42 = vpop.f32.mrf.mxu0  ;;  %v19233_v12 = vpop.f32.mrf.mxu1 }
 0x3b9   :  { %22833 = vst [vmem:[#allocation81_spill] sm:$0xff] %v19231_v42  ;;  %22834 = vst [vmem:[#allocation82_spill] sm:$0xff] %v19233_v12 }
 0x3bc   :  { %v19235_v28 = vpop.f32.mrf.mxu0  ;;  %v19237_v0 = vpop.f32.mrf.mxu1 }
 0x3bd   :  { %22835 = vst [vmem:[#allocation83_spill] sm:$0xff] %v19235_v28  ;;  %22836 = vst [vmem:[#allocation84_spill] sm:$0xff] %v19237_v0 }
 0x3be   :  { %v19239_v49 = vpop.f32.mrf.mxu0  ;;  %v19241_v2 = vpop.f32.mrf.mxu1 }
 0x3bf   :  { %22837 = vst [vmem:[#allocation85_spill] sm:$0xff] %v19239_v49  ;;  %22838 = vst [vmem:[#allocation86_spill] sm:$0xff] %v19241_v2 }
 0x3c2   :  { %v19243_v54 = vpop.f32.mrf.mxu0  ;;  %v19245_v50 = vpop.f32.mrf.mxu1 }
 0x3c3   :  { %22839 = vst [vmem:[#allocation87_spill] sm:$0xff] %v19243_v54  ;;  %22840 = vst [vmem:[#allocation88_spill] sm:$0xff] %v19245_v50 }
 0x3c4   :  { %v19247_v35 = vpop.f32.mrf.mxu0  ;;  %v19249_v36 = vpop.f32.mrf.mxu1 }
 0x3c5   :  { %22841 = vst [vmem:[#allocation89_spill] sm:$0xff] %v19247_v35  ;;  %22842 = vst [vmem:[#allocation90_spill] sm:$0xff] %v19249_v36 }
 0x3c8   :  { %v19251_v41 = vpop.f32.mrf.mxu0  ;;  %v19253_v42 = vpop.f32.mrf.mxu1 }
 0x3c9   :  { %22843 = vst [vmem:[#allocation91_spill] sm:$0xff] %v19251_v41  ;;  %22844 = vst [vmem:[#allocation92_spill] sm:$0xff] %v19253_v42 }
 0x3ca   :  { %v19255_v12 = vpop.f32.mrf.mxu0  ;;  %v19257_v28 = vpop.f32.mrf.mxu1 }
 0x3cb   :  { %22845 = vst [vmem:[#allocation93_spill] sm:$0xff] %v19255_v12  ;;  %22846 = vst [vmem:[#allocation94_spill] sm:$0xff] %v19257_v28 }
 0x3ce   :  { %v19259_v0 = vpop.f32.mrf.mxu0  ;;  %v19261_v49 = vpop.f32.mrf.mxu1 }
 0x3cf   :  { %22847 = vst [vmem:[#allocation95_spill] sm:$0xff] %v19259_v0  ;;  %22848 = vst [vmem:[#allocation96_spill] sm:$0xff] %v19261_v49  ;;  %v22920_v49 = vld [vmem:[#allocation21_spill] sm:$0xff] }
 0x3d0   :  { %v19263_v2 = vpop.f32.mrf.mxu0  ;;  %v19265_v54 = vpop.f32.mrf.mxu1 }
 0x3d1   :  { %22849 = vst [vmem:[#allocation97_spill] sm:$0xff] %v19263_v2  ;;  %22850 = vst [vmem:[#allocation98_spill] sm:$0xff] %v19265_v54 }
 0x3d4   :  { %v19267_v50 = vpop.f32.mrf.mxu0  ;;  %v19269_v35 = vpop.f32.mrf.mxu1 }
 0x3d6   :  { %v19271_v36 = vpop.f32.mrf.mxu0  ;;  %v19273_v41 = vpop.f32.mrf.mxu1 }
 0x3d7   :  { %22851 = vst [vmem:[#allocation99_spill] sm:$0xff] %v19271_v36  ;;  %22852 = vst [vmem:[#allocation100_spill] sm:$0xff] %v19273_v41 }
 0x3da   :  { %v15730_v42 = vpop.f32.mrf.mxu0  ;;  %v15751_v12 = vpop.f32.mrf.mxu1 }
 0x3dc   :  { %v5366_v11 = vpop.f32.mrf.mxu0  ;;  %v5461_v28 = vpop.f32.mrf.mxu1 }
 0x3dd   :  { %15896 = vmatprep.mubr.msk.f32.mxu0 %vm1809_vm1, %v5366_v11  ;;  %15917 = vmatprep.mubr.msk.f32.mxu1 %vm1809_vm1, %v5461_v28 }
 0x3de   :  { %15897 = vmatmul.mubr.msk.f32.vlgmr.msra.gmra.mxu0 %vm1809_vm1, %v15730_v42  ;;  %15918 = vmatmul.mubr.msk.f32.vlgmr.msra.gmra.mxu1 %vm1809_vm1, %v15751_v12 }
 0x3df   :  { %15927 = vmatpush3.msra.mxu0 %v18610_v59  ;;  %15948 = vmatpush3.msra.mxu1 %v18610_v59 }
 0x3e0   :  { %v15733_v54 = vpop.f32.mrf.mxu0  ;;  %v15754_v2 = vpop.f32.mrf.mxu1  ;;  %15928 = vmatprep.subr.mxu0 %v18623_v56  ;;  %15949 = vmatprep.subr.mxu1 %v18623_v56 }
 0x3e1   :  { %15929 = vmatpush3.msra.mxu0 %v18623_v56  ;;  %15950 = vmatpush3.msra.mxu1 %v18623_v56 }
 0x3e2   :  { %v5376_v11 = vpop.f32.mrf.mxu0  ;;  %v5471_v28 = vpop.f32.mrf.mxu1  ;;  %15930 = vmatprep.subr.mxu0 %v18632_v29  ;;  %15951 = vmatprep.subr.mxu1 %v18632_v29 }
 0x3e3   :  { %15899 = vmatprep.mubr.msk.f32.mxu0 %vm1809_vm1, %v5376_v11  ;;  %15920 = vmatprep.mubr.msk.f32.mxu1 %vm1809_vm1, %v5471_v28 }
 0x3e4   :  { %15900 = vmatmul.mubr.msk.f32.gmra.mxu0 %vm1809_vm1, %v15733_v54  ;;  %15921 = vmatmul.mubr.msk.f32.gmra.mxu1 %vm1809_vm1, %v15754_v2 }
 0x3e5   :  { %15931 = vmatpush3.msra.mxu0 %v18632_v29  ;;  %15952 = vmatpush3.msra.mxu1 %v18632_v29 }
 0x3e6   :  { %v15736_v42 = vpop.f32.mrf.mxu0  ;;  %v15757_v12 = vpop.f32.mrf.mxu1  ;;  %15932 = vmatprep.subr.mxu0 %v18645_v10  ;;  %15953 = vmatprep.subr.mxu1 %v18645_v10 }
 0x3e7   :  { %15933 = vmatpush3.msra.mxu0 %v18645_v10  ;;  %15954 = vmatpush3.msra.mxu1 %v18645_v10 }
 0x3e8   :  { %v5386_v11 = vpop.f32.mrf.mxu0  ;;  %v5481_v28 = vpop.f32.mrf.mxu1  ;;  %15934 = vmatprep.subr.mxu0 %v18654_v3  ;;  %15955 = vmatprep.subr.mxu1 %v18654_v3 }
 0x3e9   :  { %15902 = vmatprep.mubr.msk.f32.mxu0 %vm1809_vm1, %v5386_v11  ;;  %15923 = vmatprep.mubr.msk.f32.mxu1 %vm1809_vm1, %v5481_v28 }
 0x3ea   :  { %15903 = vmatmul.mubr.msk.f32.gmra.mxu0 %vm1809_vm1, %v15736_v42  ;;  %15924 = vmatmul.mubr.msk.f32.gmra.mxu1 %vm1809_vm1, %v15757_v12 }
 0x3eb   :  { %15935 = vmatpush3.msra.mxu0 %v18654_v3  ;;  %15956 = vmatpush3.msra.mxu1 %v18654_v3 }
 0x3ec   :  { %v15772_v2 = vpop.f32.mrf.mxu0  ;;  %v15793_v54 = vpop.f32.mrf.mxu1  ;;  %15936 = vmatprep.subr.mxu0 %v18667_v8  ;;  %15957 = vmatprep.subr.mxu1 %v18667_v8 }
 0x3ed   :  { %15937 = vmatpush3.msra.mxu0 %v18667_v8  ;;  %15958 = vmatpush3.msra.mxu1 %v18667_v8 }
 0x3ee   :  { %v5556_v11 = vpop.f32.mrf.mxu0  ;;  %v5651_v28 = vpop.f32.mrf.mxu1  ;;  %15968 = vmatprep.subr.mxu0 %v18610_v59  ;;  %15989 = vmatprep.subr.mxu1 %v18610_v59 }
 0x3ef   :  { %15938 = vmatprep.mubr.msk.f32.mxu0 %vm1809_vm1, %v5556_v11  ;;  %15959 = vmatprep.mubr.msk.f32.mxu1 %vm1809_vm1, %v5651_v28 }
 0x3f0   :  { %15939 = vmatmul.mubr.msk.f32.vlgmr.msra.gmra.mxu0 %vm1809_vm1, %v15772_v2  ;;  %15960 = vmatmul.mubr.msk.f32.vlgmr.msra.gmra.mxu1 %vm1809_vm1, %v15793_v54 }
 0x3f1   :  { %15969 = vmatpush3.msra.mxu0 %v18610_v59  ;;  %15990 = vmatpush3.msra.mxu1 %v18610_v59 }
 0x3f2   :  { %v15775_v42 = vpop.f32.mrf.mxu0  ;;  %v15796_v12 = vpop.f32.mrf.mxu1  ;;  %15970 = vmatprep.subr.mxu0 %v18623_v56  ;;  %15991 = vmatprep.subr.mxu1 %v18623_v56 }
 0x3f3   :  { %15971 = vmatpush3.msra.mxu0 %v18623_v56  ;;  %15992 = vmatpush3.msra.mxu1 %v18623_v56 }
 0x3f4   :  { %v5566_v11 = vpop.f32.mrf.mxu0  ;;  %v5661_v28 = vpop.f32.mrf.mxu1  ;;  %15972 = vmatprep.subr.mxu0 %v18632_v29  ;;  %15993 = vmatprep.subr.mxu1 %v18632_v29 }
 0x3f5   :  { %15941 = vmatprep.mubr.msk.f32.mxu0 %vm1809_vm1, %v5566_v11  ;;  %15962 = vmatprep.mubr.msk.f32.mxu1 %vm1809_vm1, %v5661_v28 }
 0x3f6   :  { %15942 = vmatmul.mubr.msk.f32.gmra.mxu0 %vm1809_vm1, %v15775_v42  ;;  %15963 = vmatmul.mubr.msk.f32.gmra.mxu1 %vm1809_vm1, %v15796_v12 }
 0x3f7   :  { %15973 = vmatpush3.msra.mxu0 %v18632_v29  ;;  %15994 = vmatpush3.msra.mxu1 %v18632_v29 }
 0x3f8   :  { %v15778_v2 = vpop.f32.mrf.mxu0  ;;  %v15799_v54 = vpop.f32.mrf.mxu1  ;;  %15974 = vmatprep.subr.mxu0 %v18645_v10  ;;  %15995 = vmatprep.subr.mxu1 %v18645_v10 }
 0x3f9   :  { %15975 = vmatpush3.msra.mxu0 %v18645_v10  ;;  %15996 = vmatpush3.msra.mxu1 %v18645_v10 }
 0x3fa   :  { %v5576_v11 = vpop.f32.mrf.mxu0  ;;  %v5671_v28 = vpop.f32.mrf.mxu1  ;;  %15976 = vmatprep.subr.mxu0 %v18654_v3  ;;  %15997 = vmatprep.subr.mxu1 %v18654_v3 }
 0x3fb   :  { %15944 = vmatprep.mubr.msk.f32.mxu0 %vm1809_vm1, %v5576_v11  ;;  %15965 = vmatprep.mubr.msk.f32.mxu1 %vm1809_vm1, %v5671_v28 }
 0x3fc   :  { %15945 = vmatmul.mubr.msk.f32.gmra.mxu0 %vm1809_vm1, %v15778_v2  ;;  %15966 = vmatmul.mubr.msk.f32.gmra.mxu1 %vm1809_vm1, %v15799_v54 }
 0x3fd   :  { %15977 = vmatpush3.msra.mxu0 %v18654_v3  ;;  %15998 = vmatpush3.msra.mxu1 %v18654_v3 }
 0x3fe   :  { %v15814_v42 = vpop.f32.mrf.mxu0  ;;  %v15835_v12 = vpop.f32.mrf.mxu1  ;;  %15978 = vmatprep.subr.mxu0 %v18667_v8  ;;  %15999 = vmatprep.subr.mxu1 %v18667_v8 }
 0x3ff   :  { %15979 = vmatpush3.msra.mxu0 %v18667_v8  ;;  %16000 = vmatpush3.msra.mxu1 %v18667_v8 }
 0x400   :  { %v5746_v11 = vpop.f32.mrf.mxu0  ;;  %v5841_v28 = vpop.f32.mrf.mxu1  ;;  %16010 = vmatprep.subr.mxu0 %v18610_v59  ;;  %16031 = vmatprep.subr.mxu1 %v18610_v59 }
 0x401   :  { %15980 = vmatprep.mubr.msk.f32.mxu0 %vm1809_vm1, %v5746_v11  ;;  %16001 = vmatprep.mubr.msk.f32.mxu1 %vm1809_vm1, %v5841_v28 }
 0x402   :  { %15981 = vmatmul.mubr.msk.f32.vlgmr.msra.gmra.mxu0 %vm1809_vm1, %v15814_v42  ;;  %16002 = vmatmul.mubr.msk.f32.vlgmr.msra.gmra.mxu1 %vm1809_vm1, %v15835_v12 }
 0x403   :  { %16011 = vmatpush3.msra.mxu0 %v18610_v59  ;;  %16032 = vmatpush3.msra.mxu1 %v18610_v59 }
 0x404   :  { %v15817_v2 = vpop.f32.mrf.mxu0  ;;  %v15838_v54 = vpop.f32.mrf.mxu1  ;;  %16012 = vmatprep.subr.mxu0 %v18623_v56  ;;  %16033 = vmatprep.subr.mxu1 %v18623_v56 }
 0x405   :  { %16013 = vmatpush3.msra.mxu0 %v18623_v56  ;;  %16034 = vmatpush3.msra.mxu1 %v18623_v56 }
 0x406   :  { %v5756_v11 = vpop.f32.mrf.mxu0  ;;  %v5851_v28 = vpop.f32.mrf.mxu1  ;;  %16014 = vmatprep.subr.mxu0 %v18632_v29  ;;  %16035 = vmatprep.subr.mxu1 %v18632_v29 }
 0x407   :  { %15983 = vmatprep.mubr.msk.f32.mxu0 %vm1809_vm1, %v5756_v11  ;;  %16004 = vmatprep.mubr.msk.f32.mxu1 %vm1809_vm1, %v5851_v28 }
 0x408   :  { %15984 = vmatmul.mubr.msk.f32.gmra.mxu0 %vm1809_vm1, %v15817_v2  ;;  %16005 = vmatmul.mubr.msk.f32.gmra.mxu1 %vm1809_vm1, %v15838_v54  ;;  %v7119_v54 = vmul.f32 %v18717_v7, %v18717_v7 }
 0x409   :  { %16015 = vmatpush3.msra.mxu0 %v18632_v29  ;;  %16036 = vmatpush3.msra.mxu1 %v18632_v29 }
 0x40a   :  { %v15820_v59 = vpop.f32.mrf.mxu0  ;;  %v15841_v56 = vpop.f32.mrf.mxu1  ;;  %16016 = vmatprep.subr.mxu0 %v18645_v10  ;;  %16037 = vmatprep.subr.mxu1 %v18645_v10 }
 0x40b   :  { %16017 = vmatpush3.msra.mxu0 %v18645_v10  ;;  %16038 = vmatpush3.msra.mxu1 %v18645_v10  ;;  %v7113_v10 = vmul.f32 %v18710_v30, %v18710_v30 }
 0x40c   :  { %v5766_v42 = vpop.f32.mrf.mxu0  ;;  %v5861_v12 = vpop.f32.mrf.mxu1  ;;  %16018 = vmatprep.subr.mxu0 %v18654_v3  ;;  %16039 = vmatprep.subr.mxu1 %v18654_v3 }
 0x40d   :  { %15986 = vmatprep.mubr.msk.f32.mxu0 %vm1809_vm1, %v5766_v42  ;;  %16007 = vmatprep.mubr.msk.f32.mxu1 %vm1809_vm1, %v5861_v12 }
 0x40e   :  { %15987 = vmatmul.mubr.msk.f32.gmra.mxu0 %vm1809_vm1, %v15820_v59  ;;  %16008 = vmatmul.mubr.msk.f32.gmra.mxu1 %vm1809_vm1, %v15841_v56  ;;  %v7118_v59 = vmul.f32 %v18737_v57, %v18737_v57  ;;  %v7117_v57 = vmul.f32 %v18751_v55, %v18751_v55 }
 0x40f   :  { %v15856_v29 = vpop.f32.mrf.mxu0  ;;  %v15877_v2 = vpop.f32.mrf.mxu1  ;;  %16019 = vmatpush3.msra.mxu0 %v18654_v3  ;;  %16040 = vmatpush3.msra.mxu1 %v18654_v3  ;;  %v7112_v3 = vmul.f32 %v18730_v22, %v18730_v22  ;;  %v7111_v22 = vmul.f32 %v18744_v62, %v18744_v62 }
 0x410   :  { %16020 = vmatprep.subr.mxu0 %v18667_v8  ;;  %16041 = vmatprep.subr.mxu1 %v18667_v8 }
 0x411   :  { %v5936_v11 = vpop.f32.mrf.mxu0  ;;  %v6031_v28 = vpop.f32.mrf.mxu1  ;;  %16021 = vmatpush3.msra.mxu0 %v18667_v8  ;;  %16042 = vmatpush3.msra.mxu1 %v18667_v8 }
 0x412   :  { %16022 = vmatprep.mubr.msk.f32.mxu0 %vm1809_vm1, %v5936_v11  ;;  %16043 = vmatprep.mubr.msk.f32.mxu1 %vm1809_vm1, %v6031_v28  ;;  %v19450_v11 = vld [vmem:[%s22565_s4 + $0x10] sm:$0xff]  ;;  %v7122_v28 = vmul.f32 %v18866_v31, %v18866_v31  ;;  %v7121_v31 = vmul.f32 %v18880_v14, %v18880_v14  ;;  %v7126_v14 = vmul.f32 %v18909_v15, %v18909_v15 }
 0x413   :  { %v15859_v30 = vpop.f32.mrf.mxu0  ;;  %v15880_v56 = vpop.f32.mrf.mxu1  ;;  %16023 = vmatmul.mubr.msk.f32.vlgmr.msra.gmra.mxu0 %vm1809_vm1, %v15856_v29  ;;  %16044 = vmatmul.mubr.msk.f32.vlgmr.msra.gmra.mxu1 %vm1809_vm1, %v15877_v2  ;;  %v7110_v29 = vmul.f32 %v18762_v17, %v18762_v17  ;;  %v7116_v2 = vmul.f32 %v18769_v61, %v18769_v61  ;;  %v7115_v17 = vmul.f32 %v18783_v5, %v18783_v5 }
 0x414   :  { %16052 = vmatprep.subr.mxu0 %v7113_v10  ;;  %16073 = vmatprep.subr.mxu1 %v7119_v54  ;;  %v7108_v61 = vmul.f32 %v18794_v13, %v18794_v13  ;;  %v7131_v5 = vmul.f32 %v18815_v9, %v18815_v9  ;;  %v19424_v13 = vld [vmem:[%s22565_s4] sm:$0xff]  ;;  %v19437_v9 = vld [vmem:[%s22565_s4 + $0x8] sm:$0xff]  ;;  %v7143_v15 = vmul.f32 %v18923_v6, %v18923_v6 }
 0x415   :  { %16053 = vmatpush3.msra.mxu0 %v7113_v10  ;;  %16074 = vmatpush3.msra.mxu1 %v7119_v54  ;;  %v5946_v8 = vpop.f32.mrf.mxu0  ;;  %v6041_v7 = vpop.f32.mrf.mxu1  ;;  %v7109_v10 = vmul.f32 %v18776_v58, %v18776_v58  ;;  %v7114_v54 = vmul.f32 %v18801_v23, %v18801_v23  ;;  %v7125_v58 = vmul.f32 %v18808_v4, %v18808_v4 }
 0x416   :  { %16054 = vmatprep.subr.mxu0 %v7112_v3  ;;  %16075 = vmatprep.subr.mxu1 %v7118_v59  ;;  %v7124_v23 = vmul.f32 %v18830_v37, %v18830_v37  ;;  %v7130_v4 = vmul.f32 %v18837_v18, %v18837_v18  ;;  %v7123_v37 = vmul.f32 %v18844_v21, %v18844_v21 }
 0x417   :  { %16025 = vmatprep.mubr.msk.f32.mxu0 %vm1809_vm1, %v5946_v8  ;;  %16046 = vmatprep.mubr.msk.f32.mxu1 %vm1809_vm1, %v6041_v7  ;;  %v15862_v42 = vpop.f32.mrf.mxu0  ;;  %v15883_v12 = vpop.f32.mrf.mxu1  ;;  %v7129_v18 = vmul.f32 %v18851_v60, %v18851_v60  ;;  %v7128_v21 = vmul.f32 %v18873_v19, %v18873_v19  ;;  %v19463_v60 = vld [vmem:[%s22565_s4 + $0x18] sm:$0xff]  ;;  %v7127_v19 = vmul.f32 %v18887_v24, %v18887_v24  ;;  %v19489_v24 = vld [vmem:[%s22565_s4 + $0x28] sm:$0xff] }
 0x418   :  { %16055 = vmatpush3.msra.mxu0 %v7112_v3  ;;  %16076 = vmatpush3.msra.mxu1 %v7118_v59  ;;  %v19476_v3 = vld [vmem:[%s22565_s4 + $0x20] sm:$0xff]  ;;  %v7120_v59 = vmul.f32 %v18902_v25, %v18902_v25  ;;  %v7137_v25 = vmul.f32 %v18916_v38, %v18916_v38  ;;  %v7135_v38 = vmul.f32 %v18952_v32, %v18952_v32 }
 0x419   :  { %16026 = vmatmul.mubr.msk.f32.gmra.mxu0 %vm1809_vm1, %v15859_v30  ;;  %16047 = vmatmul.mubr.msk.f32.gmra.mxu1 %vm1809_vm1, %v15880_v56  ;;  %v5956_v55 = vpop.f32.mrf.mxu0  ;;  %v6051_v62 = vpop.f32.mrf.mxu1  ;;  %v7136_v30 = vmul.f32 %v18938_v51, %v18938_v51  ;;  %v7142_v56 = vmul.f32 %v18945_v39, %v18945_v39  ;;  %v7141_v6 = vmul.f32 %v18959_v20, %v18959_v20 }
 0x41a   :  { %16056 = vmatprep.subr.mxu0 %v7111_v22  ;;  %16077 = vmatprep.subr.mxu1 %v7117_v57  ;;  %v7134_v51 = vmul.f32 %v18974_v47, %v18974_v47  ;;  %v7140_v39 = vmul.f32 %v18981_v33, %v18981_v33  ;;  %v7133_v32 = vmul.f32 %v18988_v26, %v18988_v26 }
 0x41b   :  { %16057 = vmatpush3.msra.mxu0 %v7111_v22  ;;  %16078 = vmatpush3.msra.mxu1 %v7117_v57  ;;  %v7139_v20 = vmul.f32 %v18995_v16, %v18995_v16  ;;  %v7132_v47 = vmul.f32 %v19010_v43, %v19010_v43  ;;  %v7138_v33 = vmul.f32 %v19017_v27, %v19017_v27 }
 0x41c   :  { %16058 = vmatprep.subr.mxu0 %v7110_v29  ;;  %16079 = vmatprep.subr.mxu1 %v7116_v2  ;;  %v7149_v26 = vmul.f32 %v19024_v52, %v19024_v52  ;;  %v7155_v16 = vmul.f32 %v19031_v40, %v19031_v40  ;;  %v7148_v43 = vmul.f32 %v19046_v63, %v19046_v63  ;;  %v22853_v40 = vld [vmem:[#allocation11_spill] sm:$0xff] }
 0x41d   :  { %16028 = vmatprep.mubr.msk.f32.mxu0 %vm1809_vm1, %v5956_v55  ;;  %16049 = vmatprep.mubr.msk.f32.mxu1 %vm1809_vm1, %v6051_v62  ;;  %v7154_v27 = vmul.f32 %v19053_v53, %v19053_v53  ;;  %v7147_v52 = vmul.f32 %v19060_v48, %v19060_v48  ;;  %v7153_v63 = vmul.f32 %v22853_v40, %v22853_v40  ;;  %v22854_v53 = vld [vmem:[#allocation12_spill] sm:$0xff] }
 0x41e   :  { %16059 = vmatpush3.msra.mxu0 %v7110_v29  ;;  %16080 = vmatpush3.msra.mxu1 %v7116_v2  ;;  %v7146_v8 = vmul.f32 %v22854_v53, %v22854_v53  ;;  %v7152_v7 = vmul.f32 %v19089_v46, %v19089_v46  ;;  %v7145_v48 = vmul.f32 %v19096_v34, %v19096_v34  ;;  %v19623_v34 = vld [vmem:[%s22566_s5 + $0x20] sm:$0xff] }
 0x41f   :  { %16029 = vmatmul.mubr.msk.f32.gmra.mxu0 %vm1809_vm1, %v15862_v42  ;;  %16050 = vmatmul.mubr.msk.f32.gmra.mxu1 %vm1809_vm1, %v15883_v12  ;;  %v7151_v22 = vmul.f32 %v19103_v44, %v19103_v44  ;;  %v7144_v46 = vmul.f32 %v19118_v1, %v19118_v1  ;;  %v7150_v57 = vmul.f32 %v19125_v45, %v19125_v45  ;;  %v19606_v44 = vld [vmem:[%s22566_s5 + $0x28] sm:$0xff]  ;;  %v19636_v1 = vld [vmem:[%s22566_s5 + $0x18] sm:$0xff]  ;;  %v19645_v45 = vld [vmem:[%s22566_s5 + $0x10] sm:$0xff] }
 0x420   :  { %16060 = vmatprep.subr.mxu0 %v7109_v10  ;;  %16081 = vmatprep.subr.mxu1 %v7115_v17  ;;  %v19654_v42 = vld [vmem:[%s22566_s5 + $0x8] sm:$0xff]  ;;  %v19663_v12 = vld [vmem:[%s22566_s5] sm:$0xff] }
 0x421   :  { %16061 = vmatpush3.msra.mxu0 %v7109_v10  ;;  %16082 = vmatpush3.msra.mxu1 %v7115_v17 }
 0x422   :  { %16062 = vmatprep.subr.mxu0 %v7108_v61  ;;  %16083 = vmatprep.subr.mxu1 %v7114_v54 }
 0x423   :  { %16063 = vmatpush3.msra.mxu0 %v7108_v61  ;;  %16064 = vmatprep.mubr.msk.f32.mxu0 %vm1809_vm1, %v19424_v13 }
 0x424   :  { %16084 = vmatpush3.msra.mxu1 %v7114_v54  ;;  %16085 = vmatprep.mubr.msk.f32.mxu1 %vm1809_vm1, %v19424_v13 }
 0x425   :  { %16065 = vmatmul.mubr.msk.f32.vlgmr.msra.gmra.mxu0 %vm1809_vm1, %v19437_v9  ;;  %16086 = vmatmul.mubr.msk.f32.vlgmr.msra.gmra.mxu1 %vm1809_vm1, %v19437_v9 }
 0x426   :  { %16094 = vmatprep.subr.mxu0 %v7125_v58  ;;  %16115 = vmatprep.subr.mxu1 %v7131_v5 }
 0x427   :  { %16095 = vmatpush3.msra.mxu0 %v7125_v58  ;;  %16116 = vmatpush3.msra.mxu1 %v7131_v5 }
 0x428   :  { %16096 = vmatprep.subr.mxu0 %v7124_v23  ;;  %16117 = vmatprep.subr.mxu1 %v7130_v4 }
 0x429   :  { %16067 = vmatprep.mubr.msk.f32.mxu0 %vm1809_vm1, %v19450_v11  ;;  %16088 = vmatprep.mubr.msk.f32.mxu1 %vm1809_vm1, %v19450_v11 }
 0x42a   :  { %16097 = vmatpush3.msra.mxu0 %v7124_v23  ;;  %16118 = vmatpush3.msra.mxu1 %v7130_v4 }
 0x42b   :  { %16068 = vmatmul.mubr.msk.f32.gmra.mxu0 %vm1809_vm1, %v19463_v60  ;;  %16089 = vmatmul.mubr.msk.f32.gmra.mxu1 %vm1809_vm1, %v19463_v60 }
 0x42c   :  { %16098 = vmatprep.subr.mxu0 %v7123_v37  ;;  %16119 = vmatprep.subr.mxu1 %v7129_v18 }
 0x42d   :  { %16099 = vmatpush3.msra.mxu0 %v7123_v37  ;;  %16120 = vmatpush3.msra.mxu1 %v7129_v18 }
 0x42e   :  { %16100 = vmatprep.subr.mxu0 %v7122_v28  ;;  %16121 = vmatprep.subr.mxu1 %v7128_v21 }
 0x42f   :  { %16070 = vmatprep.mubr.msk.f32.mxu0 %vm1809_vm1, %v19476_v3  ;;  %16091 = vmatprep.mubr.msk.f32.mxu1 %vm1809_vm1, %v19476_v3 }
 0x430   :  { %16101 = vmatpush3.msra.mxu0 %v7122_v28  ;;  %16122 = vmatpush3.msra.mxu1 %v7128_v21 }
 0x431   :  { %16071 = vmatmul.mubr.msk.f32.gmra.mxu0 %vm1809_vm1, %v19489_v24  ;;  %16092 = vmatmul.mubr.msk.f32.gmra.mxu1 %vm1809_vm1, %v19489_v24 }
 0x432   :  { %16102 = vmatprep.subr.mxu0 %v7121_v31  ;;  %16123 = vmatprep.subr.mxu1 %v7127_v19 }
 0x433   :  { %16103 = vmatpush3.msra.mxu0 %v7121_v31  ;;  %16124 = vmatpush3.msra.mxu1 %v7127_v19 }
 0x434   :  { %16104 = vmatprep.subr.mxu0 %v7120_v59  ;;  %16125 = vmatprep.subr.mxu1 %v7126_v14 }
 0x435   :  { %16105 = vmatpush3.msra.mxu0 %v7120_v59  ;;  %16106 = vmatprep.mubr.msk.f32.mxu0 %vm1809_vm1, %v19424_v13 }
 0x436   :  { %16126 = vmatpush3.msra.mxu1 %v7126_v14  ;;  %16127 = vmatprep.mubr.msk.f32.mxu1 %vm1809_vm1, %v19424_v13 }
 0x437   :  { %16107 = vmatmul.mubr.msk.f32.vlgmr.msra.gmra.mxu0 %vm1809_vm1, %v19437_v9  ;;  %16128 = vmatmul.mubr.msk.f32.vlgmr.msra.gmra.mxu1 %vm1809_vm1, %v19437_v9 }
 0x438   :  { %16136 = vmatprep.subr.mxu0 %v7137_v25  ;;  %16157 = vmatprep.subr.mxu1 %v7143_v15 }
 0x439   :  { %16137 = vmatpush3.msra.mxu0 %v7137_v25  ;;  %16158 = vmatpush3.msra.mxu1 %v7143_v15 }
 0x43a   :  { %16138 = vmatprep.subr.mxu0 %v7136_v30  ;;  %16159 = vmatprep.subr.mxu1 %v7142_v56 }
 0x43b   :  { %16109 = vmatprep.mubr.msk.f32.mxu0 %vm1809_vm1, %v19450_v11  ;;  %16130 = vmatprep.mubr.msk.f32.mxu1 %vm1809_vm1, %v19450_v11 }
 0x43c   :  { %16139 = vmatpush3.msra.mxu0 %v7136_v30  ;;  %16160 = vmatpush3.msra.mxu1 %v7142_v56 }
 0x43d   :  { %16110 = vmatmul.mubr.msk.f32.gmra.mxu0 %vm1809_vm1, %v19463_v60  ;;  %16131 = vmatmul.mubr.msk.f32.gmra.mxu1 %vm1809_vm1, %v19463_v60 }
 0x43e   :  { %16140 = vmatprep.subr.mxu0 %v7135_v38  ;;  %16161 = vmatprep.subr.mxu1 %v7141_v6 }
 0x43f   :  { %16141 = vmatpush3.msra.mxu0 %v7135_v38  ;;  %16162 = vmatpush3.msra.mxu1 %v7141_v6 }
 0x440   :  { %16142 = vmatprep.subr.mxu0 %v7134_v51  ;;  %16163 = vmatprep.subr.mxu1 %v7140_v39 }
 0x441   :  { %16112 = vmatprep.mubr.msk.f32.mxu0 %vm1809_vm1, %v19476_v3  ;;  %16133 = vmatprep.mubr.msk.f32.mxu1 %vm1809_vm1, %v19476_v3 }
 0x442   :  { %16143 = vmatpush3.msra.mxu0 %v7134_v51  ;;  %16164 = vmatpush3.msra.mxu1 %v7140_v39 }
 0x443   :  { %16113 = vmatmul.mubr.msk.f32.gmra.mxu0 %vm1809_vm1, %v19489_v24  ;;  %16134 = vmatmul.mubr.msk.f32.gmra.mxu1 %vm1809_vm1, %v19489_v24 }
 0x444   :  { %16144 = vmatprep.subr.mxu0 %v7133_v32  ;;  %16165 = vmatprep.subr.mxu1 %v7139_v20 }
 0x445   :  { %16145 = vmatpush3.msra.mxu0 %v7133_v32  ;;  %16166 = vmatpush3.msra.mxu1 %v7139_v20 }
 0x446   :  { %16146 = vmatprep.subr.mxu0 %v7132_v47  ;;  %16167 = vmatprep.subr.mxu1 %v7138_v33 }
 0x447   :  { %16147 = vmatpush3.msra.mxu0 %v7132_v47  ;;  %16148 = vmatprep.mubr.msk.f32.mxu0 %vm1809_vm1, %v19424_v13 }
 0x448   :  { %16168 = vmatpush3.msra.mxu1 %v7138_v33  ;;  %16169 = vmatprep.mubr.msk.f32.mxu1 %vm1809_vm1, %v19424_v13 }
 0x449   :  { %16149 = vmatmul.mubr.msk.f32.vlgmr.msra.gmra.mxu0 %vm1809_vm1, %v19437_v9  ;;  %16170 = vmatmul.mubr.msk.f32.vlgmr.msra.gmra.mxu1 %vm1809_vm1, %v19437_v9 }
 0x44a   :  { %16178 = vmatprep.subr.mxu0 %v7149_v26  ;;  %16199 = vmatprep.subr.mxu1 %v7155_v16 }
 0x44b   :  { %16179 = vmatpush3.msra.mxu0 %v7149_v26  ;;  %16200 = vmatpush3.msra.mxu1 %v7155_v16 }
 0x44c   :  { %16180 = vmatprep.subr.mxu0 %v7148_v43  ;;  %16201 = vmatprep.subr.mxu1 %v7154_v27 }
 0x44d   :  { %16151 = vmatprep.mubr.msk.f32.mxu0 %vm1809_vm1, %v19450_v11  ;;  %16172 = vmatprep.mubr.msk.f32.mxu1 %vm1809_vm1, %v19450_v11 }
 0x44e   :  { %16181 = vmatpush3.msra.mxu0 %v7148_v43  ;;  %16202 = vmatpush3.msra.mxu1 %v7154_v27 }
 0x44f   :  { %16152 = vmatmul.mubr.msk.f32.gmra.mxu0 %vm1809_vm1, %v19463_v60  ;;  %16173 = vmatmul.mubr.msk.f32.gmra.mxu1 %vm1809_vm1, %v19463_v60 }
 0x450   :  { %16182 = vmatprep.subr.mxu0 %v7147_v52  ;;  %16203 = vmatprep.subr.mxu1 %v7153_v63 }
 0x451   :  { %16183 = vmatpush3.msra.mxu0 %v7147_v52  ;;  %16204 = vmatpush3.msra.mxu1 %v7153_v63 }
 0x452   :  { %16184 = vmatprep.subr.mxu0 %v7146_v8  ;;  %16205 = vmatprep.subr.mxu1 %v7152_v7 }
 0x453   :  { %16154 = vmatprep.mubr.msk.f32.mxu0 %vm1809_vm1, %v19476_v3  ;;  %16175 = vmatprep.mubr.msk.f32.mxu1 %vm1809_vm1, %v19476_v3 }
 0x454   :  { %16185 = vmatpush3.msra.mxu0 %v7146_v8  ;;  %16206 = vmatpush3.msra.mxu1 %v7152_v7 }
 0x455   :  { %16155 = vmatmul.mubr.msk.f32.gmra.mxu0 %vm1809_vm1, %v19489_v24  ;;  %16176 = vmatmul.mubr.msk.f32.gmra.mxu1 %vm1809_vm1, %v19489_v24 }
 0x456   :  { %16186 = vmatprep.subr.mxu0 %v7145_v48  ;;  %16207 = vmatprep.subr.mxu1 %v7151_v22 }
 0x457   :  { %16187 = vmatpush3.msra.mxu0 %v7145_v48  ;;  %16208 = vmatpush3.msra.mxu1 %v7151_v22 }
 0x458   :  { %16188 = vmatprep.subr.mxu0 %v7144_v46  ;;  %16209 = vmatprep.subr.mxu1 %v7150_v57 }
 0x459   :  { %16189 = vmatpush3.msra.mxu0 %v7144_v46  ;;  %16190 = vmatprep.mubr.msk.f32.mxu0 %vm1809_vm1, %v19424_v13 }
 0x45a   :  { %16210 = vmatpush3.msra.mxu1 %v7150_v57  ;;  %16211 = vmatprep.mubr.msk.f32.mxu1 %vm1809_vm1, %v19424_v13 }
 0x45b   :  { %16191 = vmatmul.mubr.msk.f32.vlgmr.msra.gmra.mxu0 %vm1809_vm1, %v19437_v9  ;;  %16212 = vmatmul.mubr.msk.f32.vlgmr.msra.gmra.mxu1 %vm1809_vm1, %v19437_v9 }
 0x45c   :  { %16193 = vmatprep.mubr.msk.f32.mxu0 %vm1809_vm1, %v19450_v11  ;;  %16214 = vmatprep.mubr.msk.f32.mxu1 %vm1809_vm1, %v19450_v11 }
 0x45d   :  { %16220 = vmatprep.subr.mxu0 %v19606_v44  ;;  %16241 = vmatprep.subr.mxu1 %v19606_v44 }
 0x45e   :  { %16221 = vmatpush3.msra.mxu0 %v19606_v44  ;;  %16242 = vmatpush3.msra.mxu1 %v19606_v44 }
 0x45f   :  { %16194 = vmatmul.mubr.msk.f32.gmra.mxu0 %vm1809_vm1, %v19463_v60  ;;  %16215 = vmatmul.mubr.msk.f32.gmra.mxu1 %vm1809_vm1, %v19463_v60 }
 0x460   :  { %16196 = vmatprep.mubr.msk.f32.mxu0 %vm1809_vm1, %v19476_v3  ;;  %16217 = vmatprep.mubr.msk.f32.mxu1 %vm1809_vm1, %v19476_v3 }
 0x461   :  { %16222 = vmatprep.subr.mxu0 %v19623_v34  ;;  %16243 = vmatprep.subr.mxu1 %v19623_v34 }
 0x462   :  { %16223 = vmatpush3.msra.mxu0 %v19623_v34  ;;  %16244 = vmatpush3.msra.mxu1 %v19623_v34 }
 0x463   :  { %16197 = vmatmul.mubr.msk.f32.gmra.mxu0 %vm1809_vm1, %v19489_v24  ;;  %16218 = vmatmul.mubr.msk.f32.gmra.mxu1 %vm1809_vm1, %v19489_v24 }
 0x464   :  { %16224 = vmatprep.subr.mxu0 %v19636_v1  ;;  %16245 = vmatprep.subr.mxu1 %v19636_v1 }
 0x465   :  { %16225 = vmatpush3.msra.mxu0 %v19636_v1  ;;  %16246 = vmatpush3.msra.mxu1 %v19636_v1 }
 0x466   :  { %16226 = vmatprep.subr.mxu0 %v19645_v45  ;;  %16247 = vmatprep.subr.mxu1 %v19645_v45 }
 0x467   :  { %16227 = vmatpush3.msra.mxu0 %v19645_v45  ;;  %16248 = vmatpush3.msra.mxu1 %v19645_v45 }
 0x468   :  { %16228 = vmatprep.subr.mxu0 %v19654_v42  ;;  %16249 = vmatprep.subr.mxu1 %v19654_v42 }
 0x469   :  { %16229 = vmatpush3.msra.mxu0 %v19654_v42  ;;  %16250 = vmatpush3.msra.mxu1 %v19654_v42 }
 0x46a   :  { %16230 = vmatprep.subr.mxu0 %v19663_v12  ;;  %16251 = vmatprep.subr.mxu1 %v19663_v12 }
 0x46b   :  { %16231 = vmatpush3.msra.mxu0 %v19663_v12  ;;  %16252 = vmatpush3.msra.mxu1 %v19663_v12 }
 0x46c   :  { %16262 = vmatprep.subr.mxu0 %v19606_v44  ;;  %16283 = vmatprep.subr.mxu1 %v19606_v44 }
 0x49e   :  { %v19671_v29 = vpop.f32.mrf.mxu0  ;;  %v19673_v2 = vpop.f32.mrf.mxu1 }
 0x49f   :  { %22855 = vst [vmem:[#allocation11_spill] sm:$0xff] %v19673_v2  ;;  %v23047_v2 = vld [vmem:[#allocation9_spill] sm:$0xff] }
 0x4a0   :  { %v19675_v55 = vpop.f32.mrf.mxu0  ;;  %v19677_v62 = vpop.f32.mrf.mxu1 }
 0x4a1   :  { %22856 = vst [vmem:[#allocation12_spill] sm:$0xff] %v19675_v55  ;;  %22857 = vst [vmem:[#allocation101_spill] sm:$0xff] %v19677_v62  ;;  %v23036_v62 = vld [vmem:[#allocation13_spill] sm:$0xff]  ;;  %v23040_v55 = vld [vmem:[#allocation7_spill] sm:$0xff] }
 0x4a4   :  { %v19679_v10 = vpop.f32.mrf.mxu0  ;;  %v19681_v17 = vpop.f32.mrf.mxu1 }
 0x4a5   :  { %22858 = vst [vmem:[#allocation102_spill] sm:$0xff] %v19679_v10  ;;  %22859 = vst [vmem:[#allocation103_spill] sm:$0xff] %v19681_v17  ;;  %v23029_v17 = vld [vmem:[#allocation58_spill] sm:$0xff] }
 0x4a6   :  { %v19683_v61 = vpop.f32.mrf.mxu0  ;;  %v19685_v54 = vpop.f32.mrf.mxu1 }
 0x4a7   :  { %22860 = vst [vmem:[#allocation104_spill] sm:$0xff] %v19683_v61  ;;  %22861 = vst [vmem:[#allocation105_spill] sm:$0xff] %v19685_v54  ;;  %v23025_v54 = vld [vmem:[#allocation56_spill] sm:$0xff] }
 0x4aa   :  { %v19687_v58 = vpop.f32.mrf.mxu0  ;;  %v19689_v5 = vpop.f32.mrf.mxu1 }
 0x4ab   :  { %22862 = vst [vmem:[#allocation106_spill] sm:$0xff] %v19687_v58  ;;  %22863 = vst [vmem:[#allocation107_spill] sm:$0xff] %v19689_v5 }
 0x4ac   :  { %v19691_v23 = vpop.f32.mrf.mxu0  ;;  %v19693_v4 = vpop.f32.mrf.mxu1 }
 0x4ad   :  { %22864 = vst [vmem:[#allocation108_spill] sm:$0xff] %v19691_v23  ;;  %22865 = vst [vmem:[#allocation109_spill] sm:$0xff] %v19693_v4 }
 0x4b0   :  { %v19695_v9 = vpop.f32.mrf.mxu0  ;;  %v19697_v37 = vpop.f32.mrf.mxu1 }
 0x4b1   :  { %22866 = vst [vmem:[#allocation110_spill] sm:$0xff] %v19695_v9  ;;  %22867 = vst [vmem:[#allocation111_spill] sm:$0xff] %v19697_v37  ;;  %v22999_v9 = vld [vmem:[#allocation49_spill] sm:$0xff] }
 0x4b2   :  { %v19699_v18 = vpop.f32.mrf.mxu0  ;;  %v19701_v11 = vpop.f32.mrf.mxu1 }
 0x4b3   :  { %22868 = vst [vmem:[#allocation112_spill] sm:$0xff] %v19699_v18  ;;  %22869 = vst [vmem:[#allocation113_spill] sm:$0xff] %v19701_v11  ;;  %v22988_v11 = vld [vmem:[#allocation45_spill] sm:$0xff]  ;;  %v22990_v18 = vld [vmem:[#allocation46_spill] sm:$0xff] }
 0x4b6   :  { %v19703_v28 = vpop.f32.mrf.mxu0  ;;  %v19705_v21 = vpop.f32.mrf.mxu1 }
 0x4b7   :  { %22870 = vst [vmem:[#allocation114_spill] sm:$0xff] %v19703_v28  ;;  %22871 = vst [vmem:[#allocation115_spill] sm:$0xff] %v19705_v21 }
 0x4b8   :  { %v19707_v60 = vpop.f32.mrf.mxu0  ;;  %v19709_v31 = vpop.f32.mrf.mxu1 }
 0x4b9   :  { %22872 = vst [vmem:[#allocation116_spill] sm:$0xff] %v19707_v60  ;;  %22873 = vst [vmem:[#allocation117_spill] sm:$0xff] %v19709_v31  ;;  %v22981_v60 = vld [vmem:[#allocation42_spill] sm:$0xff] }
 0x4bc   :  { %v19711_v19 = vpop.f32.mrf.mxu0  ;;  %v19713_v3 = vpop.f32.mrf.mxu1 }
 0x4bd   :  { %22874 = vst [vmem:[#allocation118_spill] sm:$0xff] %v19711_v19  ;;  %22875 = vst [vmem:[#allocation119_spill] sm:$0xff] %v19713_v3  ;;  %v22977_v19 = vld [vmem:[#allocation40_spill] sm:$0xff] }
 0x4be   :  { %v19715_v59 = vpop.f32.mrf.mxu0  ;;  %v19717_v14 = vpop.f32.mrf.mxu1 }
 0x4bf   :  { %22876 = vst [vmem:[#allocation120_spill] sm:$0xff] %v19715_v59  ;;  %22877 = vst [vmem:[#allocation121_spill] sm:$0xff] %v19717_v14 }
 0x4c2   :  { %v19719_v24 = vpop.f32.mrf.mxu0  ;;  %v19721_v25 = vpop.f32.mrf.mxu1 }
 0x4c3   :  { %22878 = vst [vmem:[#allocation122_spill] sm:$0xff] %v19719_v24  ;;  %22879 = vst [vmem:[#allocation123_spill] sm:$0xff] %v19721_v25 }
 0x4c4   :  { %v19723_v15 = vpop.f32.mrf.mxu0  ;;  %v19725_v30 = vpop.f32.mrf.mxu1 }
 0x4c5   :  { %22880 = vst [vmem:[#allocation124_spill] sm:$0xff] %v19723_v15  ;;  %22881 = vst [vmem:[#allocation125_spill] sm:$0xff] %v19725_v30  ;;  %v22929_v30 = vld [vmem:[#allocation24_spill] sm:$0xff] }
 0x4c8   :  { %v19727_v56 = vpop.f32.mrf.mxu0  ;;  %v19729_v38 = vpop.f32.mrf.mxu1 }
 0x4c9   :  { %22882 = vst [vmem:[#allocation126_spill] sm:$0xff] %v19727_v56  ;;  %22883 = vst [vmem:[#allocation127_spill] sm:$0xff] %v19729_v38  ;;  %v22940_v38 = vld [vmem:[#allocation29_spill] sm:$0xff]  ;;  %v22944_v56 = vld [vmem:[#allocation31_spill] sm:$0xff] }
 0x4ca   :  { %v19731_v6 = vpop.f32.mrf.mxu0  ;;  %v19733_v51 = vpop.f32.mrf.mxu1 }
 0x4cb   :  { %22884 = vst [vmem:[#allocation128_spill] sm:$0xff] %v19731_v6  ;;  %22885 = vst [vmem:[#allocation129_spill] sm:$0xff] %v19733_v51  ;;  %v22938_v6 = vld [vmem:[#allocation28_spill] sm:$0xff] }
 0x4ce   :  { %v19735_v39 = vpop.f32.mrf.mxu0  ;;  %v19737_v32 = vpop.f32.mrf.mxu1 }
 0x4cf   :  { %22886 = vst [vmem:[#allocation130_spill] sm:$0xff] %v19735_v39  ;;  %22887 = vst [vmem:[#allocation131_spill] sm:$0xff] %v19737_v32  ;;  %v22936_v39 = vld [vmem:[#allocation27_spill] sm:$0xff] }
 0x4d0   :  { %v19739_v20 = vpop.f32.mrf.mxu0  ;;  %v19741_v47 = vpop.f32.mrf.mxu1 }
 0x4d1   :  { %22888 = vst [vmem:[#allocation132_spill] sm:$0xff] %v19739_v20  ;;  %22889 = vst [vmem:[#allocation133_spill] sm:$0xff] %v19741_v47  ;;  %v22931_v47 = vld [vmem:[#allocation25_spill] sm:$0xff]  ;;  %v22933_v20 = vld [vmem:[#allocation26_spill] sm:$0xff] }
 0x4d3   :  { %v19743_v33 = vpop.f32.mrf.mxu0  ;;  %v19745_v26 = vpop.f32.mrf.mxu1 }
 0x4d4   :  { %22890 = vst [vmem:[#allocation134_spill] sm:$0xff] %v19743_v33  ;;  %22891 = vst [vmem:[#allocation135_spill] sm:$0xff] %v19745_v26 }
 0x4d5   :  { %v19747_v16 = vpop.f32.mrf.mxu0  ;;  %v19749_v43 = vpop.f32.mrf.mxu1 }
 0x4d6   :  { %22892 = vst [vmem:[#allocation136_spill] sm:$0xff] %v19747_v16  ;;  %22893 = vst [vmem:[#allocation137_spill] sm:$0xff] %v19749_v43 }
 0x4d9   :  { %v19751_v27 = vpop.f32.mrf.mxu0  ;;  %v19753_v52 = vpop.f32.mrf.mxu1 }
 0x4da   :  { %22894 = vst [vmem:[#allocation138_spill] sm:$0xff] %v19751_v27  ;;  %22895 = vst [vmem:[#allocation139_spill] sm:$0xff] %v19753_v52 }
 0x4db   :  { %v19755_v40 = vpop.f32.mrf.mxu0  ;;  %v19757_v63 = vpop.f32.mrf.mxu1 }
 0x4dc   :  { %22896 = vst [vmem:[#allocation140_spill] sm:$0xff] %v19755_v40  ;;  %22897 = vst [vmem:[#allocation141_spill] sm:$0xff] %v19757_v63  ;;  %v22916_v40 = vld [vmem:[#allocation19_spill] sm:$0xff] }
 0x4df   :  { %v19759_v53 = vpop.f32.mrf.mxu0  ;;  %v19761_v8 = vpop.f32.mrf.mxu1 }
 0x4e0   :  { %22898 = vst [vmem:[#allocation142_spill] sm:$0xff] %v19759_v53  ;;  %22899 = vst [vmem:[#allocation143_spill] sm:$0xff] %v19761_v8  ;;  %v22925_v53 = vld [vmem:[#allocation23_spill] sm:$0xff] }
 0x4e1   :  { %v19763_v7 = vpop.f32.mrf.mxu0  ;;  %v19765_v48 = vpop.f32.mrf.mxu1 }
 0x4e2   :  { %22900 = vst [vmem:[#allocation144_spill] sm:$0xff] %v19763_v7  ;;  %22901 = vst [vmem:[#allocation145_spill] sm:$0xff] %v19765_v48  ;;  %v22923_v7 = vld [vmem:[#allocation22_spill] sm:$0xff] }
 0x4e5   :  { %v16066_v22 = vpop.f32.mrf.mxu0  ;;  %v16087_v46 = vpop.f32.mrf.mxu1 }
 0x4e7   :  { %v7222_v57 = vpop.f32.mrf.mxu0  ;;  %v7317_v43 = vpop.f32.mrf.mxu1 }
 0x4e8   :  { %16232 = vmatprep.mubr.msk.f32.mxu0 %vm1809_vm1, %v7222_v57  ;;  %16253 = vmatprep.mubr.msk.f32.mxu1 %vm1809_vm1, %v7317_v43 }
 0x4e9   :  { %16233 = vmatmul.mubr.msk.f32.vlgmr.msra.gmra.mxu0 %vm1809_vm1, %v16066_v22  ;;  %16254 = vmatmul.mubr.msk.f32.vlgmr.msra.gmra.mxu1 %vm1809_vm1, %v16087_v46 }
 0x4ea   :  { %16263 = vmatpush3.msra.mxu0 %v19606_v44  ;;  %16284 = vmatpush3.msra.mxu1 %v19606_v44 }
 0x4eb   :  { %v16069_v16 = vpop.f32.mrf.mxu0  ;;  %v16090_v26 = vpop.f32.mrf.mxu1  ;;  %16264 = vmatprep.subr.mxu0 %v19623_v34  ;;  %16285 = vmatprep.subr.mxu1 %v19623_v34 }
 0x4ec   :  { %16265 = vmatpush3.msra.mxu0 %v19623_v34  ;;  %16286 = vmatpush3.msra.mxu1 %v19623_v34 }
 0x4ed   :  { %v7232_v57 = vpop.f32.mrf.mxu0  ;;  %v7327_v43 = vpop.f32.mrf.mxu1  ;;  %16266 = vmatprep.subr.mxu0 %v19636_v1  ;;  %16287 = vmatprep.subr.mxu1 %v19636_v1 }
 0x4ee   :  { %16235 = vmatprep.mubr.msk.f32.mxu0 %vm1809_vm1, %v7232_v57  ;;  %16256 = vmatprep.mubr.msk.f32.mxu1 %vm1809_vm1, %v7327_v43 }
 0x4ef   :  { %16236 = vmatmul.mubr.msk.f32.gmra.mxu0 %vm1809_vm1, %v16069_v16  ;;  %16257 = vmatmul.mubr.msk.f32.gmra.mxu1 %vm1809_vm1, %v16090_v26 }
 0x4f0   :  { %16267 = vmatpush3.msra.mxu0 %v19636_v1  ;;  %16288 = vmatpush3.msra.mxu1 %v19636_v1 }
 0x4f1   :  { %v16072_v22 = vpop.f32.mrf.mxu0  ;;  %v16093_v46 = vpop.f32.mrf.mxu1  ;;  %16268 = vmatprep.subr.mxu0 %v19645_v45  ;;  %16289 = vmatprep.subr.mxu1 %v19645_v45 }
 0x4f2   :  { %16269 = vmatpush3.msra.mxu0 %v19645_v45  ;;  %16290 = vmatpush3.msra.mxu1 %v19645_v45 }
 0x4f3   :  { %v7242_v57 = vpop.f32.mrf.mxu0  ;;  %v7337_v43 = vpop.f32.mrf.mxu1  ;;  %16270 = vmatprep.subr.mxu0 %v19654_v42  ;;  %16291 = vmatprep.subr.mxu1 %v19654_v42 }
 0x4f4   :  { %16238 = vmatprep.mubr.msk.f32.mxu0 %vm1809_vm1, %v7242_v57  ;;  %16259 = vmatprep.mubr.msk.f32.mxu1 %vm1809_vm1, %v7337_v43 }
 0x4f5   :  { %16239 = vmatmul.mubr.msk.f32.gmra.mxu0 %vm1809_vm1, %v16072_v22  ;;  %16260 = vmatmul.mubr.msk.f32.gmra.mxu1 %vm1809_vm1, %v16093_v46 }
 0x4f6   :  { %16271 = vmatpush3.msra.mxu0 %v19654_v42  ;;  %16292 = vmatpush3.msra.mxu1 %v19654_v42 }
 0x4f7   :  { %v16108_v26 = vpop.f32.mrf.mxu0  ;;  %v16129_v16 = vpop.f32.mrf.mxu1  ;;  %16272 = vmatprep.subr.mxu0 %v19663_v12  ;;  %16293 = vmatprep.subr.mxu1 %v19663_v12 }
 0x4f8   :  { %16273 = vmatpush3.msra.mxu0 %v19663_v12  ;;  %16294 = vmatpush3.msra.mxu1 %v19663_v12 }
 0x4f9   :  { %v7412_v57 = vpop.f32.mrf.mxu0  ;;  %v7507_v43 = vpop.f32.mrf.mxu1  ;;  %16304 = vmatprep.subr.mxu0 %v19606_v44  ;;  %16325 = vmatprep.subr.mxu1 %v19606_v44 }
 0x4fa   :  { %16274 = vmatprep.mubr.msk.f32.mxu0 %vm1809_vm1, %v7412_v57  ;;  %16295 = vmatprep.mubr.msk.f32.mxu1 %vm1809_vm1, %v7507_v43 }
 0x4fb   :  { %16275 = vmatmul.mubr.msk.f32.vlgmr.msra.gmra.mxu0 %vm1809_vm1, %v16108_v26  ;;  %16296 = vmatmul.mubr.msk.f32.vlgmr.msra.gmra.mxu1 %vm1809_vm1, %v16129_v16 }
 0x4fc   :  { %16305 = vmatpush3.msra.mxu0 %v19606_v44  ;;  %16326 = vmatpush3.msra.mxu1 %v19606_v44 }
 0x4fd   :  { %v16111_v22 = vpop.f32.mrf.mxu0  ;;  %v16132_v46 = vpop.f32.mrf.mxu1  ;;  %16306 = vmatprep.subr.mxu0 %v19623_v34  ;;  %16327 = vmatprep.subr.mxu1 %v19623_v34 }
 0x4fe   :  { %16307 = vmatpush3.msra.mxu0 %v19623_v34  ;;  %16328 = vmatpush3.msra.mxu1 %v19623_v34 }
 0x4ff   :  { %v7422_v57 = vpop.f32.mrf.mxu0  ;;  %v7517_v43 = vpop.f32.mrf.mxu1  ;;  %16308 = vmatprep.subr.mxu0 %v19636_v1  ;;  %16329 = vmatprep.subr.mxu1 %v19636_v1 }
 0x500   :  { %16277 = vmatprep.mubr.msk.f32.mxu0 %vm1809_vm1, %v7422_v57  ;;  %16298 = vmatprep.mubr.msk.f32.mxu1 %vm1809_vm1, %v7517_v43 }
 0x501   :  { %16278 = vmatmul.mubr.msk.f32.gmra.mxu0 %vm1809_vm1, %v16111_v22  ;;  %16299 = vmatmul.mubr.msk.f32.gmra.mxu1 %vm1809_vm1, %v16132_v46 }
 0x502   :  { %16309 = vmatpush3.msra.mxu0 %v19636_v1  ;;  %16330 = vmatpush3.msra.mxu1 %v19636_v1 }
 0x503   :  { %v16114_v26 = vpop.f32.mrf.mxu0  ;;  %v16135_v16 = vpop.f32.mrf.mxu1  ;;  %16310 = vmatprep.subr.mxu0 %v19645_v45  ;;  %16331 = vmatprep.subr.mxu1 %v19645_v45 }
 0x504   :  { %16311 = vmatpush3.msra.mxu0 %v19645_v45  ;;  %16332 = vmatpush3.msra.mxu1 %v19645_v45 }
 0x505   :  { %v7432_v57 = vpop.f32.mrf.mxu0  ;;  %v7527_v43 = vpop.f32.mrf.mxu1  ;;  %16312 = vmatprep.subr.mxu0 %v19654_v42  ;;  %16333 = vmatprep.subr.mxu1 %v19654_v42 }
 0x506   :  { %16280 = vmatprep.mubr.msk.f32.mxu0 %vm1809_vm1, %v7432_v57  ;;  %16301 = vmatprep.mubr.msk.f32.mxu1 %vm1809_vm1, %v7527_v43 }
 0x507   :  { %16281 = vmatmul.mubr.msk.f32.gmra.mxu0 %vm1809_vm1, %v16114_v26  ;;  %16302 = vmatmul.mubr.msk.f32.gmra.mxu1 %vm1809_vm1, %v16135_v16 }
 0x508   :  { %16313 = vmatpush3.msra.mxu0 %v19654_v42  ;;  %16334 = vmatpush3.msra.mxu1 %v19654_v42 }
 0x509   :  { %v16150_v22 = vpop.f32.mrf.mxu0  ;;  %v16171_v46 = vpop.f32.mrf.mxu1  ;;  %16314 = vmatprep.subr.mxu0 %v19663_v12  ;;  %16335 = vmatprep.subr.mxu1 %v19663_v12 }
 0x50a   :  { %16315 = vmatpush3.msra.mxu0 %v19663_v12  ;;  %16336 = vmatpush3.msra.mxu1 %v19663_v12 }
 0x50b   :  { %v7602_v57 = vpop.f32.mrf.mxu0  ;;  %v7697_v43 = vpop.f32.mrf.mxu1  ;;  %16346 = vmatprep.subr.mxu0 %v19606_v44  ;;  %16367 = vmatprep.subr.mxu1 %v19606_v44 }
 0x50c   :  { %16316 = vmatprep.mubr.msk.f32.mxu0 %vm1809_vm1, %v7602_v57  ;;  %16337 = vmatprep.mubr.msk.f32.mxu1 %vm1809_vm1, %v7697_v43 }
 0x50d   :  { %16317 = vmatmul.mubr.msk.f32.vlgmr.msra.gmra.mxu0 %vm1809_vm1, %v16150_v22  ;;  %16338 = vmatmul.mubr.msk.f32.vlgmr.msra.gmra.mxu1 %vm1809_vm1, %v16171_v46 }
 0x50e   :  { %16347 = vmatpush3.msra.mxu0 %v19606_v44  ;;  %16368 = vmatpush3.msra.mxu1 %v19606_v44 }
 0x50f   :  { %v16153_v26 = vpop.f32.mrf.mxu0  ;;  %v16174_v16 = vpop.f32.mrf.mxu1  ;;  %16348 = vmatprep.subr.mxu0 %v19623_v34  ;;  %16369 = vmatprep.subr.mxu1 %v19623_v34 }
 0x510   :  { %16349 = vmatpush3.msra.mxu0 %v19623_v34  ;;  %16370 = vmatpush3.msra.mxu1 %v19623_v34 }
 0x511   :  { %v7612_v57 = vpop.f32.mrf.mxu0  ;;  %v7707_v43 = vpop.f32.mrf.mxu1  ;;  %16350 = vmatprep.subr.mxu0 %v19636_v1  ;;  %16371 = vmatprep.subr.mxu1 %v19636_v1 }
 0x512   :  { %16319 = vmatprep.mubr.msk.f32.mxu0 %vm1809_vm1, %v7612_v57  ;;  %16340 = vmatprep.mubr.msk.f32.mxu1 %vm1809_vm1, %v7707_v43 }
 0x513   :  { %16320 = vmatmul.mubr.msk.f32.gmra.mxu0 %vm1809_vm1, %v16153_v26  ;;  %16341 = vmatmul.mubr.msk.f32.gmra.mxu1 %vm1809_vm1, %v16174_v16 }
 0x514   :  { %16351 = vmatpush3.msra.mxu0 %v19636_v1  ;;  %16372 = vmatpush3.msra.mxu1 %v19636_v1 }
 0x515   :  { %v16156_v44 = vpop.f32.mrf.mxu0  ;;  %v16177_v34 = vpop.f32.mrf.mxu1  ;;  %16352 = vmatprep.subr.mxu0 %v19645_v45  ;;  %16373 = vmatprep.subr.mxu1 %v19645_v45 }
 0x516   :  { %16353 = vmatpush3.msra.mxu0 %v19645_v45  ;;  %16374 = vmatpush3.msra.mxu1 %v19645_v45 }
 0x517   :  { %v7622_v22 = vpop.f32.mrf.mxu0  ;;  %v7717_v46 = vpop.f32.mrf.mxu1  ;;  %16354 = vmatprep.subr.mxu0 %v19654_v42  ;;  %16375 = vmatprep.subr.mxu1 %v19654_v42 }
 0x518   :  { %16322 = vmatprep.mubr.msk.f32.mxu0 %vm1809_vm1, %v7622_v22  ;;  %16343 = vmatprep.mubr.msk.f32.mxu1 %vm1809_vm1, %v7717_v46 }
 0x519   :  { %16323 = vmatmul.mubr.msk.f32.gmra.mxu0 %vm1809_vm1, %v16156_v44  ;;  %16344 = vmatmul.mubr.msk.f32.gmra.mxu1 %vm1809_vm1, %v16177_v34 }
 0x51a   :  { %16355 = vmatpush3.msra.mxu0 %v19654_v42  ;;  %16376 = vmatpush3.msra.mxu1 %v19654_v42 }
 0x51b   :  { %v16192_v1 = vpop.f32.mrf.mxu0  ;;  %v16213_v45 = vpop.f32.mrf.mxu1  ;;  %16356 = vmatprep.subr.mxu0 %v19663_v12  ;;  %16377 = vmatprep.subr.mxu1 %v19663_v12 }
 0x51c   :  { %16357 = vmatpush3.msra.mxu0 %v19663_v12  ;;  %16378 = vmatpush3.msra.mxu1 %v19663_v12 }
 0x51d   :  { %v7792_v26 = vpop.f32.mrf.mxu0  ;;  %v7887_v16 = vpop.f32.mrf.mxu1 }
 0x51e   :  { %16358 = vmatprep.mubr.msk.f32.mxu0 %vm1809_vm1, %v7792_v26  ;;  %16379 = vmatprep.mubr.msk.f32.mxu1 %vm1809_vm1, %v7887_v16  ;;  %v19902_v26 = vld [vmem:[%s22567_s6 + $0x18] sm:$0xff]  ;;  %v22902_v16 = vld [vmem:[#allocation5_spill] sm:$0xff] }
 0x51f   :  { %v16195_v57 = vpop.f32.mrf.mxu0  ;;  %v16216_v43 = vpop.f32.mrf.mxu1  ;;  %16359 = vmatmul.mubr.msk.f32.vlgmr.msra.gmra.mxu0 %vm1809_vm1, %v16192_v1  ;;  %16380 = vmatmul.mubr.msk.f32.vlgmr.msra.gmra.mxu1 %vm1809_vm1, %v16213_v45  ;;  %v19892_v1 = vld [vmem:[%s22567_s6 + $0x8] sm:$0xff]  ;;  %v19897_v45 = vld [vmem:[%s22567_s6] sm:$0xff] }
 0x520   :  { %v20001_v51 = vmul.f32 %v22936_v39, %v19897_v45  ;;  %v20113_v31 = vmul.f32 %v22977_v19, %v19897_v45 }
 0x521   :  { %v7802_v42 = vpop.f32.mrf.mxu0  ;;  %v7897_v44 = vpop.f32.mrf.mxu1 }
 0x522   :  { %16361 = vmatprep.mubr.msk.f32.mxu0 %vm1809_vm1, %v7802_v42  ;;  %16382 = vmatprep.mubr.msk.f32.mxu1 %vm1809_vm1, %v7897_v44  ;;  %v22906_v42 = vld [vmem:[#allocation15_spill] sm:$0xff]  ;;  %22937 = vst [vmem:[#allocation27_spill] sm:$0xff] %v20001_v51  ;;  %22978 = vst [vmem:[#allocation40_spill] sm:$0xff] %v20113_v31 }
 0x523   :  { %v16198_v34 = vpop.f32.mrf.mxu0  ;;  %v16219_v12 = vpop.f32.mrf.mxu1  ;;  %16362 = vmatmul.mubr.msk.f32.gmra.mxu0 %vm1809_vm1, %v16195_v57  ;;  %16383 = vmatmul.mubr.msk.f32.gmra.mxu1 %vm1809_vm1, %v16216_v43  ;;  %v19906_v57 = vmul.f32 %v22902_v16, %v19892_v1  ;;  %v19914_v44 = vmul.f32 %v22906_v42, %v19897_v45  ;;  %v19927_v16 = vld [vmem:[%s22567_s6 + $0x10] sm:$0xff]  ;;  %v22912_v42 = vld [vmem:[#allocation18_spill] sm:$0xff] }
 0x524   :  { %v19936_v33 = vmul.f32 %v22912_v42, %v19902_v26  ;;  %v19953_v52 = vmul.f32 %v22916_v40, %v19927_v16  ;;  %v22918_v42 = vld [vmem:[#allocation20_spill] sm:$0xff]  ;;  %v20241_v61 = vmul.f32 %v23025_v54, %v19927_v16 }
 0x525   :  { %v7812_v22 = vpop.f32.mrf.mxu0  ;;  %v7907_v46 = vpop.f32.mrf.mxu1  ;;  %22903 = vst [vmem:[#allocation5_spill] sm:$0xff] %v19906_v57  ;;  %22907 = vst [vmem:[#allocation15_spill] sm:$0xff] %v19914_v44  ;;  %v19957_v27 = vmul.f32 %v22918_v42, %v19927_v16  ;;  %v19965_v48 = vmul.f32 %v19914_v44, %v19914_v44 }
 0x526   :  { %16364 = vmatprep.mubr.msk.f32.mxu0 %vm1809_vm1, %v7812_v22  ;;  %16385 = vmatprep.mubr.msk.f32.mxu1 %vm1809_vm1, %v7907_v46  ;;  %v22910_v22 = vld [vmem:[#allocation17_spill] sm:$0xff]  ;;  %22913 = vst [vmem:[#allocation18_spill] sm:$0xff] %v19936_v33  ;;  %22917 = vst [vmem:[#allocation19_spill] sm:$0xff] %v19953_v52  ;;  %v19997_v32 = vmul.f32 %v19936_v33, %v19936_v33  ;;  %v20021_v39 = vmul.f32 %v19953_v52, %v19953_v52 }
 0x527   :  { %16365 = vmatmul.mubr.msk.f32.gmra.mxu0 %vm1809_vm1, %v16198_v34  ;;  %16386 = vmatmul.mubr.msk.f32.gmra.mxu1 %vm1809_vm1, %v16219_v12  ;;  %v22908_v34 = vld [vmem:[#allocation16_spill] sm:$0xff]  ;;  %v19922_v46 = vmul.f32 %v22910_v22, %v19902_v26  ;;  %v19945_v22 = vmul.f32 %v19906_v57, %v19906_v57  ;;  %22919 = vst [vmem:[#allocation20_spill] sm:$0xff] %v19957_v27  ;;  %22922 = vst [vmem:[#allocation148_spill] sm:$0xff] %v19965_v48 }
 0x528   :  { %16400 = vmatprep.mubr.msk.f32.mxu0 %vm1809_vm1, %v19424_v13  ;;  %16421 = vmatprep.mubr.msk.f32.mxu1 %vm1809_vm1, %v19424_v13  ;;  %v22904_v13 = vld [vmem:[#allocation6_spill] sm:$0xff]  ;;  %v19918_v12 = vmul.f32 %v22908_v34, %v19897_v45  ;;  %v19941_v34 = vld [vmem:[%s22567_s6 + $0x20] sm:$0xff]  ;;  %22935 = vst [vmem:[#allocation151_spill] sm:$0xff] %v19997_v32  ;;  %v20017_v48 = vmul.f32 %v22944_v56, %v19927_v16  ;;  %22946 = vst [vmem:[#allocation152_spill] sm:$0xff] %v20021_v39 }
 0x529   :  { %v19910_v43 = vmul.f32 %v22904_v13, %v19892_v1  ;;  %22911 = vst [vmem:[#allocation17_spill] sm:$0xff] %v19922_v46  ;;  %v19932_v13 = vld [vmem:[%s22567_s6 + $0x28] sm:$0xff]  ;;  %22914 = vst [vmem:[#allocation146_spill] sm:$0xff] %v19945_v22  ;;  %v19973_v40 = vmul.f32 %v22925_v53, %v19941_v34  ;;  %v19985_v15 = vmul.f32 %v22929_v30, %v19941_v34  ;;  %v22949_v32 = vld [vmem:[#allocation32_spill] sm:$0xff] }
 0x52a   :  { %22909 = vst [vmem:[#allocation16_spill] sm:$0xff] %v19918_v12  ;;  %v19961_v0 = vmul.f32 %v22920_v49, %v19932_v13  ;;  %v19969_v8 = vmul.f32 %v22923_v7, %v19932_v13  ;;  %v19977_v42 = vmul.f32 %v19918_v12, %v19918_v12  ;;  %v19981_v49 = vmul.f32 %v19922_v46, %v19922_v46  ;;  %v22992_v22 = vld [vmem:[#allocation47_spill] sm:$0xff] }
 0x52b   :  { %22905 = vst [vmem:[#allocation6_spill] sm:$0xff] %v19910_v43  ;;  %v19949_v63 = vmul.f32 %v19910_v43, %v19910_v43  ;;  %22926 = vst [vmem:[#allocation23_spill] sm:$0xff] %v19973_v40  ;;  %v19989_v7 = vmul.f32 %v22931_v47, %v19892_v1  ;;  %v19993_v53 = vmul.f32 %v22933_v20, %v19892_v1 }
 0x52c   :  { %22921 = vst [vmem:[#allocation21_spill] sm:$0xff] %v19961_v0  ;;  %22924 = vst [vmem:[#allocation22_spill] sm:$0xff] %v19969_v8  ;;  %v20005_v30 = vmul.f32 %v22938_v6, %v19897_v45  ;;  %v20009_v47 = vmul.f32 %v22940_v38, %v19902_v26  ;;  %v20025_v6 = vmul.f32 %v19957_v27, %v19957_v27 }
 0x52d   :  { %22915 = vst [vmem:[#allocation147_spill] sm:$0xff] %v19949_v63  ;;  %22927 = vst [vmem:[#allocation149_spill] sm:$0xff] %v19977_v42  ;;  %v22942_v42 = vld [vmem:[#allocation30_spill] sm:$0xff]  ;;  %v20029_v38 = vmul.f32 %v19961_v0, %v19961_v0  ;;  %v22951_v63 = vld [vmem:[#allocation33_spill] sm:$0xff]  ;;  %v20041_v25 = vmul.f32 %v19969_v8, %v19969_v8  ;;  %v20045_v39 = vmul.f32 %v19973_v40, %v19973_v40 }
 0x52e   :  { %22928 = vst [vmem:[#allocation150_spill] sm:$0xff] %v19981_v49  ;;  %22930 = vst [vmem:[#allocation24_spill] sm:$0xff] %v19985_v15  ;;  %v20013_v20 = vmul.f32 %v22942_v42, %v19902_v26  ;;  %v20033_v42 = vmul.f32 %v22949_v32, %v19927_v16  ;;  %v20037_v56 = vmul.f32 %v22951_v63, %v19932_v13 }
 0x52f   :  { %22932 = vst [vmem:[#allocation25_spill] sm:$0xff] %v19989_v7  ;;  %22934 = vst [vmem:[#allocation26_spill] sm:$0xff] %v19993_v53  ;;  %v20053_v32 = vmul.f32 %v19985_v15, %v19985_v15  ;;  %v20057_v63 = vmul.f32 %v19989_v7, %v19989_v7  ;;  %v20145_v37 = vmul.f32 %v22992_v22, %v19941_v34 }
 0x530   :  { %22939 = vst [vmem:[#allocation28_spill] sm:$0xff] %v20005_v30  ;;  %22941 = vst [vmem:[#allocation29_spill] sm:$0xff] %v20009_v47  ;;  %v20165_v22 = vmul.f32 %v22999_v9, %v19892_v1 }
 0x531   :  { %22943 = vst [vmem:[#allocation30_spill] sm:$0xff] %v20013_v20  ;;  %22945 = vst [vmem:[#allocation31_spill] sm:$0xff] %v20017_v48 }
 0x532   :  { %22947 = vst [vmem:[#allocation153_spill] sm:$0xff] %v20025_v6  ;;  %22948 = vst [vmem:[#allocation154_spill] sm:$0xff] %v20029_v38  ;;  %v22955_v6 = vld [vmem:[#allocation34_spill] sm:$0xff]  ;;  %v20061_v38 = vmul.f32 %v19993_v53, %v19993_v53 }
 0x533   :  { %22950 = vst [vmem:[#allocation32_spill] sm:$0xff] %v20033_v42  ;;  %22952 = vst [vmem:[#allocation33_spill] sm:$0xff] %v20037_v56  ;;  %v20049_v24 = vmul.f32 %v22955_v6, %v19932_v13  ;;  %v20069_v6 = vmul.f32 %v20005_v30, %v20005_v30 }
 0x534   :  { %22953 = vst [vmem:[#allocation155_spill] sm:$0xff] %v20041_v25  ;;  %22954 = vst [vmem:[#allocation156_spill] sm:$0xff] %v20045_v39  ;;  %v20065_v25 = vmul.f32 %v20001_v51, %v20001_v51  ;;  %v20073_v39 = vmul.f32 %v20009_v47, %v20009_v47 }
 0x535   :  { %22956 = vst [vmem:[#allocation34_spill] sm:$0xff] %v20049_v24  ;;  %22957 = vst [vmem:[#allocation157_spill] sm:$0xff] %v20053_v32  ;;  %v20077_v32 = vmul.f32 %v20013_v20, %v20013_v20  ;;  %v20125_v21 = vmul.f32 %v20049_v24, %v20049_v24 }
 0x536   :  { %22958 = vst [vmem:[#allocation158_spill] sm:$0xff] %v20057_v63  ;;  %22959 = vst [vmem:[#allocation159_spill] sm:$0xff] %v20061_v38  ;;  %v22964_v63 = vld [vmem:[#allocation35_spill] sm:$0xff]  ;;  %v22966_v38 = vld [vmem:[#allocation36_spill] sm:$0xff] }
 0x537   :  { %22960 = vst [vmem:[#allocation160_spill] sm:$0xff] %v20065_v25  ;;  %22961 = vst [vmem:[#allocation161_spill] sm:$0xff] %v20069_v6  ;;  %v20081_v49 = vmul.f32 %v22964_v63, %v19941_v34  ;;  %v20085_v14 = vmul.f32 %v22966_v38, %v19941_v34  ;;  %v22968_v25 = vld [vmem:[#allocation37_spill] sm:$0xff]  ;;  %v20093_v6 = vmul.f32 %v20017_v48, %v20017_v48 }
 0x538   :  { %22962 = vst [vmem:[#allocation162_spill] sm:$0xff] %v20073_v39  ;;  %22963 = vst [vmem:[#allocation163_spill] sm:$0xff] %v20077_v32  ;;  %v20089_v59 = vmul.f32 %v22968_v25, %v19892_v1  ;;  %v22971_v39 = vld [vmem:[#allocation38_spill] sm:$0xff]  ;;  %v22973_v32 = vld [vmem:[#allocation39_spill] sm:$0xff]  ;;  %v20105_v38 = vmul.f32 %v20033_v42, %v20033_v42  ;;  %v20109_v25 = vmul.f32 %v20037_v56, %v20037_v56 }
 0x539   :  { %22965 = vst [vmem:[#allocation35_spill] sm:$0xff] %v20081_v49  ;;  %22967 = vst [vmem:[#allocation36_spill] sm:$0xff] %v20085_v14  ;;  %v20097_v3 = vmul.f32 %v22971_v39, %v19892_v1  ;;  %v20101_v63 = vmul.f32 %v22973_v32, %v19897_v45  ;;  %v20121_v32 = vmul.f32 %v22981_v60, %v19902_v26 }
 0x53a   :  { %22969 = vst [vmem:[#allocation37_spill] sm:$0xff] %v20089_v59  ;;  %22970 = vst [vmem:[#allocation164_spill] sm:$0xff] %v20093_v6  ;;  %v22979_v6 = vld [vmem:[#allocation41_spill] sm:$0xff]  ;;  %v20141_v60 = vmul.f32 %v22990_v18, %v19932_v13 }
 0x53b   :  { %22972 = vst [vmem:[#allocation38_spill] sm:$0xff] %v20097_v3  ;;  %22974 = vst [vmem:[#allocation39_spill] sm:$0xff] %v20101_v63  ;;  %v20117_v39 = vmul.f32 %v22979_v6, %v19902_v26  ;;  %v20137_v6 = vmul.f32 %v22988_v11, %v19932_v13  ;;  %v20157_v11 = vmul.f32 %v20089_v59, %v20089_v59 }
 0x53c   :  { %22975 = vst [vmem:[#allocation165_spill] sm:$0xff] %v20105_v38  ;;  %22976 = vst [vmem:[#allocation166_spill] sm:$0xff] %v20109_v25  ;;  %v22984_v38 = vld [vmem:[#allocation43_spill] sm:$0xff]  ;;  %v22986_v25 = vld [vmem:[#allocation44_spill] sm:$0xff]  ;;  %v20169_v4 = vmul.f32 %v20097_v3, %v20097_v3 }
 0x53d   :  { %22980 = vst [vmem:[#allocation41_spill] sm:$0xff] %v20117_v39  ;;  %22982 = vst [vmem:[#allocation42_spill] sm:$0xff] %v20121_v32  ;;  %v20129_v28 = vmul.f32 %v22984_v38, %v19927_v16  ;;  %v20133_v19 = vmul.f32 %v22986_v25, %v19927_v16  ;;  %v20149_v38 = vmul.f32 %v20081_v49, %v20081_v49 }
 0x53e   :  { %22983 = vst [vmem:[#allocation167_spill] sm:$0xff] %v20125_v21  ;;  %22989 = vst [vmem:[#allocation45_spill] sm:$0xff] %v20137_v6  ;;  %v20153_v25 = vmul.f32 %v20085_v14, %v20085_v14  ;;  %v22997_v21 = vld [vmem:[#allocation48_spill] sm:$0xff]  ;;  %v20185_v9 = vmul.f32 %v20117_v39, %v20117_v39 }
 0x53f   :  { %22985 = vst [vmem:[#allocation43_spill] sm:$0xff] %v20129_v28  ;;  %22987 = vst [vmem:[#allocation44_spill] sm:$0xff] %v20133_v19  ;;  %v20161_v18 = vmul.f32 %v22997_v21, %v19941_v34  ;;  %v20181_v21 = vmul.f32 %v20113_v31, %v20113_v31 }
 0x540   :  { %22991 = vst [vmem:[#allocation46_spill] sm:$0xff] %v20141_v60  ;;  %22993 = vst [vmem:[#allocation47_spill] sm:$0xff] %v20145_v37 }
 0x541   :  { %22994 = vst [vmem:[#allocation168_spill] sm:$0xff] %v20149_v38  ;;  %22995 = vst [vmem:[#allocation169_spill] sm:$0xff] %v20153_v25  ;;  %v20173_v38 = vmul.f32 %v20101_v63, %v20101_v63  ;;  %v23003_v25 = vld [vmem:[#allocation50_spill] sm:$0xff] }
 0x542   :  { %22996 = vst [vmem:[#allocation170_spill] sm:$0xff] %v20157_v11  ;;  %22998 = vst [vmem:[#allocation48_spill] sm:$0xff] %v20161_v18  ;;  %v20177_v23 = vmul.f32 %v23003_v25, %v19892_v1  ;;  %v20189_v11 = vmul.f32 %v20121_v32, %v20121_v32  ;;  %v20197_v25 = vmul.f32 %v20133_v19, %v20133_v19 }
 0x543   :  { %23000 = vst [vmem:[#allocation49_spill] sm:$0xff] %v20165_v22  ;;  %23001 = vst [vmem:[#allocation171_spill] sm:$0xff] %v20169_v4  ;;  %v20193_v4 = vmul.f32 %v20129_v28, %v20129_v28 }
 0x544   :  { %23002 = vst [vmem:[#allocation172_spill] sm:$0xff] %v20173_v38  ;;  %23004 = vst [vmem:[#allocation50_spill] sm:$0xff] %v20177_v23  ;;  %v20201_v38 = vmul.f32 %v20137_v6, %v20137_v6  ;;  %v20253_v10 = vmul.f32 %v20177_v23, %v20177_v23  ;;  %v20273_v23 = vmul.f32 %v23040_v55, %v19897_v45 }
 0x545   :  { %23005 = vst [vmem:[#allocation173_spill] sm:$0xff] %v20181_v21  ;;  %23006 = vst [vmem:[#allocation174_spill] sm:$0xff] %v20185_v9  ;;  %v20205_v21 = vmul.f32 %v20141_v60, %v20141_v60  ;;  %v23012_v9 = vld [vmem:[#allocation51_spill] sm:$0xff]  ;;  %v20293_v55 = vmul.f32 %v23047_v2, %v19902_v26 }
 0x546   :  { %23007 = vst [vmem:[#allocation175_spill] sm:$0xff] %v20189_v11  ;;  %23008 = vst [vmem:[#allocation176_spill] sm:$0xff] %v20193_v4  ;;  %v20209_v5 = vmul.f32 %v23012_v9, %v19897_v45  ;;  %v23014_v11 = vld [vmem:[#allocation52_spill] sm:$0xff]  ;;  %v23016_v4 = vld [vmem:[#allocation53_spill] sm:$0xff] }
 0x547   :  { %23009 = vst [vmem:[#allocation177_spill] sm:$0xff] %v20197_v25  ;;  %23010 = vst [vmem:[#allocation178_spill] sm:$0xff] %v20201_v38  ;;  %v20213_v58 = vmul.f32 %v23014_v11, %v19897_v45  ;;  %v20217_v41 = vmul.f32 %v23016_v4, %v19902_v26  ;;  %v20221_v25 = vmul.f32 %v20145_v37, %v20145_v37  ;;  %v23019_v38 = vld [vmem:[#allocation54_spill] sm:$0xff] }
 0x548   :  { %23011 = vst [vmem:[#allocation179_spill] sm:$0xff] %v20205_v21  ;;  %23013 = vst [vmem:[#allocation51_spill] sm:$0xff] %v20209_v5  ;;  %v20225_v36 = vmul.f32 %v23019_v38, %v19902_v26  ;;  %v23021_v21 = vld [vmem:[#allocation55_spill] sm:$0xff]  ;;  %v20233_v11 = vmul.f32 %v20161_v18, %v20161_v18  ;;  %v20237_v4 = vmul.f32 %v20165_v22, %v20165_v22  ;;  %v23038_v18 = vld [vmem:[#allocation14_spill] sm:$0xff] }
 0x549   :  { %23015 = vst [vmem:[#allocation52_spill] sm:$0xff] %v20213_v58  ;;  %23017 = vst [vmem:[#allocation53_spill] sm:$0xff] %v20217_v41  ;;  %v20229_v9 = vmul.f32 %v23021_v21, %v19927_v16  ;;  %v20249_v21 = vmul.f32 %v23029_v17, %v19932_v13  ;;  %v20269_v17 = vmul.f32 %v23038_v18, %v19892_v1 }
 0x54a   :  { %23018 = vst [vmem:[#allocation180_spill] sm:$0xff] %v20221_v25  ;;  %23020 = vst [vmem:[#allocation54_spill] sm:$0xff] %v20225_v36  ;;  %v23027_v25 = vld [vmem:[#allocation57_spill] sm:$0xff] }
 0x54b   :  { %23022 = vst [vmem:[#allocation55_spill] sm:$0xff] %v20229_v9  ;;  %23023 = vst [vmem:[#allocation181_spill] sm:$0xff] %v20233_v11  ;;  %v20245_v38 = vmul.f32 %v23027_v25, %v19932_v13  ;;  %v23032_v11 = vld [vmem:[#allocation59_spill] sm:$0xff]  ;;  %v20265_v25 = vmul.f32 %v23036_v62, %v19892_v1  ;;  %v20285_v62 = vmul.f32 %v20217_v41, %v20217_v41 }
 0x54c   :  { %23024 = vst [vmem:[#allocation182_spill] sm:$0xff] %v20237_v4  ;;  %23026 = vst [vmem:[#allocation56_spill] sm:$0xff] %v20241_v61  ;;  %v20257_v22 = vmul.f32 %v23032_v11, %v19941_v34  ;;  %v23034_v4 = vld [vmem:[#allocation60_spill] sm:$0xff]  ;;  %v20277_v11 = vmul.f32 %v20209_v5, %v20209_v5  ;;  %v20297_v5 = vmul.f32 %v20225_v36, %v20225_v36 }
 0x54d   :  { %23028 = vst [vmem:[#allocation57_spill] sm:$0xff] %v20245_v38  ;;  %23030 = vst [vmem:[#allocation58_spill] sm:$0xff] %v20249_v21  ;;  %v20261_v54 = vmul.f32 %v23034_v4, %v19941_v34  ;;  %v20281_v4 = vmul.f32 %v20213_v58, %v20213_v58  ;;  %v20301_v58 = vmul.f32 %v20229_v9, %v20229_v9 }
 0x54e   :  { %23031 = vst [vmem:[#allocation183_spill] sm:$0xff] %v20253_v10  ;;  %23033 = vst [vmem:[#allocation59_spill] sm:$0xff] %v20257_v22  ;;  %v23045_v10 = vld [vmem:[#allocation8_spill] sm:$0xff]  ;;  %v20313_v2 = vmul.f32 %v20245_v38, %v20245_v38  ;;  %v20317_v36 = vmul.f32 %v20249_v21, %v20249_v21  ;;  %v20321_v9 = vmul.f32 %v20265_v25, %v19906_v57  ;;  %v23062_v57 = vld [vmem:[#allocation62_spill] sm:$0xff] }
 0x54f   :  { %23035 = vst [vmem:[#allocation60_spill] sm:$0xff] %v20261_v54  ;;  %23037 = vst [vmem:[#allocation13_spill] sm:$0xff] %v20265_v25  ;;  %v20289_v18 = vmul.f32 %v23045_v10, %v19897_v45  ;;  %v20309_v10 = vmul.f32 %v20241_v61, %v20241_v61  ;;  %v20329_v61 = vmul.f32 %v20257_v22, %v20257_v22 }
 0x550   :  { %23039 = vst [vmem:[#allocation14_spill] sm:$0xff] %v20269_v17  ;;  %23041 = vst [vmem:[#allocation7_spill] sm:$0xff] %v20273_v23 }
 0x551   :  { %23042 = vst [vmem:[#allocation184_spill] sm:$0xff] %v20277_v11  ;;  %23043 = vst [vmem:[#allocation185_spill] sm:$0xff] %v20281_v4  ;;  %v23051_v4 = vld [vmem:[#allocation10_spill] sm:$0xff]  ;;  %v20333_v11 = vmul.f32 %v20261_v54, %v20261_v54  ;;  %v20353_v54 = vmul.f32 %v20289_v18, %v19918_v12  ;;  %v23073_v12 = vld [vmem:[#allocation67_spill] sm:$0xff] }
 0x552   :  { %23044 = vst [vmem:[#allocation186_spill] sm:$0xff] %v20285_v62  ;;  %23046 = vst [vmem:[#allocation8_spill] sm:$0xff] %v20289_v18  ;;  %v20305_v41 = vmul.f32 %v23051_v4, %v19902_v26  ;;  %v20325_v4 = vmul.f32 %v20269_v17, %v19910_v43  ;;  %v20345_v17 = vmul.f32 %v23062_v57, %v19927_v16  ;;  %v23064_v43 = vld [vmem:[#allocation63_spill] sm:$0xff]  ;;  %v23083_v62 = vld [vmem:[#allocation72_spill] sm:$0xff] }
 0x553   :  { %23048 = vst [vmem:[#allocation9_spill] sm:$0xff] %v20293_v55  ;;  %23049 = vst [vmem:[#allocation187_spill] sm:$0xff] %v20297_v5  ;;  %v20349_v22 = vmul.f32 %v23064_v43, %v19932_v13  ;;  %v23079_v5 = vld [vmem:[#allocation70_spill] sm:$0xff] }
 0x554   :  { %23050 = vst [vmem:[#allocation188_spill] sm:$0xff] %v20301_v58  ;;  %23052 = vst [vmem:[#allocation10_spill] sm:$0xff] %v20305_v41  ;;  %v23060_v58 = vld [vmem:[#allocation61_spill] sm:$0xff]  ;;  %v20369_v43 = vmul.f32 %v20305_v41, %v19936_v33  ;;  %v20389_v41 = vmul.f32 %v23079_v5, %v19897_v45  ;;  %v23081_v33 = vld [vmem:[#allocation71_spill] sm:$0xff] }
 0x555   :  { %23053 = vst [vmem:[#allocation189_spill] sm:$0xff] %v20309_v10  ;;  %23054 = vst [vmem:[#allocation190_spill] sm:$0xff] %v20313_v2  ;;  %v20337_v10 = vmul.f32 %v20273_v23, %v19914_v44  ;;  %v20341_v25 = vmul.f32 %v23060_v58, %v19927_v16  ;;  %v20357_v23 = vmul.f32 %v20293_v55, %v19922_v46  ;;  %v23067_v44 = vld [vmem:[#allocation64_spill] sm:$0xff]  ;;  %v23085_v2 = vld [vmem:[#allocation73_spill] sm:$0xff] }
 0x556   :  { %23055 = vst [vmem:[#allocation191_spill] sm:$0xff] %v20317_v36  ;;  %23056 = vst [vmem:[#allocation192_spill] sm:$0xff] %v20325_v4  ;;  %v20361_v58 = vmul.f32 %v23067_v44, %v19932_v13  ;;  %v20377_v55 = vmul.f32 %v23073_v12, %v19892_v1  ;;  %v23075_v46 = vld [vmem:[#allocation68_spill] sm:$0xff]  ;;  %v23077_v36 = vld [vmem:[#allocation69_spill] sm:$0xff]  ;;  %v20397_v12 = vmul.f32 %v23083_v62, %v19902_v26 }
 0x557   :  { %23057 = vst [vmem:[#allocation193_spill] sm:$0xff] %v20329_v61  ;;  %23058 = vst [vmem:[#allocation194_spill] sm:$0xff] %v20333_v11  ;;  %v23069_v11 = vld [vmem:[#allocation65_spill] sm:$0xff]  ;;  %v23071_v61 = vld [vmem:[#allocation66_spill] sm:$0xff]  ;;  %v20381_v44 = vmul.f32 %v23075_v46, %v19892_v1  ;;  %v20401_v46 = vmul.f32 %v20341_v25, %v19953_v52  ;;  %v20409_v5 = vmul.f32 %v20349_v22, %v19961_v0 }
 0x558   :  { %23059 = vst [vmem:[#allocation195_spill] sm:$0xff] %v20337_v10  ;;  %23061 = vst [vmem:[#allocation61_spill] sm:$0xff] %v20341_v25  ;;  %v20365_v57 = vmul.f32 %v23069_v11, %v19941_v34  ;;  %v20373_v18 = vmul.f32 %v23071_v61, %v19941_v34  ;;  %v20385_v11 = vmul.f32 %v23077_v36, %v19897_v45  ;;  %v23087_v52 = vld [vmem:[#allocation74_spill] sm:$0xff]  ;;  %v23127_v0 = vld [vmem:[#allocation89_spill] sm:$0xff] }
 0x559   :  { %23063 = vst [vmem:[#allocation62_spill] sm:$0xff] %v20345_v17  ;;  %23065 = vst [vmem:[#allocation63_spill] sm:$0xff] %v20349_v22  ;;  %v20393_v61 = vmul.f32 %v23081_v33, %v19902_v26  ;;  %v20405_v36 = vmul.f32 %v20345_v17, %v19957_v27  ;;  %v20413_v33 = vmul.f32 %v23085_v2, %v19927_v16  ;;  %v23089_v27 = vld [vmem:[#allocation75_spill] sm:$0xff]  ;;  %v23184_v4 = vld [vmem:[#allocation121_spill] sm:$0xff] }
 0x55a   :  { %23066 = vst [vmem:[#allocation196_spill] sm:$0xff] %v20353_v54  ;;  %23068 = vst [vmem:[#allocation64_spill] sm:$0xff] %v20361_v58  ;;  %v20417_v62 = vmul.f32 %v20361_v58, %v19969_v8  ;;  %v20421_v25 = vmul.f32 %v20365_v57, %v19973_v40  ;;  %v20425_v17 = vmul.f32 %v23087_v52, %v19927_v16  ;;  %v23093_v40 = vld [vmem:[#allocation76_spill] sm:$0xff] }
 0x55b   :  { %23070 = vst [vmem:[#allocation65_spill] sm:$0xff] %v20365_v57  ;;  %23072 = vst [vmem:[#allocation66_spill] sm:$0xff] %v20373_v18  ;;  %v20429_v22 = vmul.f32 %v23089_v27, %v19932_v13  ;;  %v20433_v2 = vmul.f32 %v20373_v18, %v19985_v15  ;;  %v20437_v58 = vmul.f32 %v20377_v55, %v19989_v7  ;;  %v23119_v15 = vld [vmem:[#allocation86_spill] sm:$0xff]  ;;  %v23123_v8 = vld [vmem:[#allocation88_spill] sm:$0xff] }
 0x55c   :  { %23074 = vst [vmem:[#allocation67_spill] sm:$0xff] %v20377_v55  ;;  %23076 = vst [vmem:[#allocation68_spill] sm:$0xff] %v20381_v44  ;;  %v20441_v57 = vmul.f32 %v20381_v44, %v19993_v53  ;;  %v20445_v52 = vmul.f32 %v23093_v40, %v19932_v13  ;;  %v20449_v27 = vmul.f32 %v20385_v11, %v20001_v51  ;;  %v23100_v53 = vld [vmem:[#allocation77_spill] sm:$0xff]  ;;  %v23102_v51 = vld [vmem:[#allocation78_spill] sm:$0xff] }
 0x55d   :  { %23078 = vst [vmem:[#allocation69_spill] sm:$0xff] %v20385_v11  ;;  %23080 = vst [vmem:[#allocation70_spill] sm:$0xff] %v20389_v41  ;;  %v20453_v18 = vmul.f32 %v20389_v41, %v20005_v30  ;;  %v20457_v55 = vmul.f32 %v20393_v61, %v20009_v47  ;;  %v20461_v44 = vmul.f32 %v20397_v12, %v20013_v20  ;;  %v23104_v30 = vld [vmem:[#allocation79_spill] sm:$0xff]  ;;  %v23111_v20 = vld [vmem:[#allocation82_spill] sm:$0xff] }
 0x55e   :  { %23082 = vst [vmem:[#allocation71_spill] sm:$0xff] %v20393_v61  ;;  %23084 = vst [vmem:[#allocation72_spill] sm:$0xff] %v20397_v12  ;;  %v20465_v40 = vmul.f32 %v20413_v33, %v20017_v48  ;;  %v20469_v11 = vmul.f32 %v23100_v53, %v19941_v34  ;;  %v20473_v41 = vmul.f32 %v23102_v51, %v19941_v34  ;;  %v23107_v61 = vld [vmem:[#allocation80_spill] sm:$0xff]  ;;  %v23109_v48 = vld [vmem:[#allocation81_spill] sm:$0xff] }
 0x55f   :  { %23086 = vst [vmem:[#allocation73_spill] sm:$0xff] %v20413_v33  ;;  %23088 = vst [vmem:[#allocation74_spill] sm:$0xff] %v20425_v17  ;;  %v20477_v7 = vmul.f32 %v23104_v30, %v19892_v1  ;;  %v20481_v12 = vmul.f32 %v20425_v17, %v20033_v42  ;;  %v20485_v33 = vmul.f32 %v20429_v22, %v20037_v56  ;;  %v23113_v42 = vld [vmem:[#allocation83_spill] sm:$0xff]  ;;  %v23117_v56 = vld [vmem:[#allocation85_spill] sm:$0xff] }
 0x560   :  { %23090 = vst [vmem:[#allocation75_spill] sm:$0xff] %v20429_v22  ;;  %23091 = vst [vmem:[#allocation197_spill] sm:$0xff] %v20437_v58  ;;  %v20489_v53 = vmul.f32 %v23107_v61, %v19892_v1  ;;  %v20493_v51 = vmul.f32 %v23109_v48, %v19897_v45  ;;  %v20497_v30 = vmul.f32 %v20445_v52, %v20049_v24  ;;  %v23115_v22 = vld [vmem:[#allocation84_spill] sm:$0xff]  ;;  %v23121_v24 = vld [vmem:[#allocation87_spill] sm:$0xff] }
 0x561   :  { %23092 = vst [vmem:[#allocation198_spill] sm:$0xff] %v20441_v57  ;;  %23094 = vst [vmem:[#allocation76_spill] sm:$0xff] %v20445_v52  ;;  %v20501_v17 = vmul.f32 %v23111_v20, %v19897_v45  ;;  %v20505_v47 = vmul.f32 %v23113_v42, %v19902_v26  ;;  %v20509_v61 = vmul.f32 %v23115_v22, %v19902_v26 }
 0x562   :  { %23095 = vst [vmem:[#allocation199_spill] sm:$0xff] %v20449_v27  ;;  %23096 = vst [vmem:[#allocation200_spill] sm:$0xff] %v20453_v18  ;;  %v20513_v48 = vmul.f32 %v23117_v56, %v19927_v16  ;;  %v20517_v52 = vmul.f32 %v23119_v15, %v19927_v16  ;;  %v20521_v20 = vmul.f32 %v23121_v24, %v19932_v13 }
 0x563   :  { %23097 = vst [vmem:[#allocation201_spill] sm:$0xff] %v20457_v55  ;;  %23098 = vst [vmem:[#allocation202_spill] sm:$0xff] %v20461_v44  ;;  %v20525_v42 = vmul.f32 %v23123_v8, %v19932_v13  ;;  %v20529_v22 = vmul.f32 %v20469_v11, %v20081_v49  ;;  %v20533_v56 = vmul.f32 %v20473_v41, %v20085_v14  ;;  %v23131_v49 = vld [vmem:[#allocation90_spill] sm:$0xff]  ;;  %v23195_v44 = vld [vmem:[#allocation155_spill] sm:$0xff] }
 0x564   :  { %23099 = vst [vmem:[#allocation203_spill] sm:$0xff] %v20465_v40  ;;  %23101 = vst [vmem:[#allocation77_spill] sm:$0xff] %v20469_v11  ;;  %v20537_v15 = vmul.f32 %v20477_v7, %v20089_v59  ;;  %v20541_v24 = vmul.f32 %v23127_v0, %v19941_v34  ;;  %v20545_v8 = vmul.f32 %v20489_v53, %v20097_v3  ;;  %v23143_v3 = vld [vmem:[#allocation11_spill] sm:$0xff]  ;;  %v23145_v59 = vld [vmem:[#allocation12_spill] sm:$0xff] }
 0x565   :  { %23103 = vst [vmem:[#allocation78_spill] sm:$0xff] %v20473_v41  ;;  %23105 = vst [vmem:[#allocation79_spill] sm:$0xff] %v20477_v7  ;;  %v20549_v11 = vmul.f32 %v20493_v51, %v20101_v63  ;;  %v20553_v41 = vmul.f32 %v23131_v49, %v19941_v34  ;;  %v20557_v7 = vmul.f32 %v19267_v50, %v19932_v13 }
 0x566   :  { %23106 = vst [vmem:[#allocation204_spill] sm:$0xff] %v20481_v12  ;;  %23108 = vst [vmem:[#allocation80_spill] sm:$0xff] %v20489_v53  ;;  %v20561_v0 = vmul.f32 %v20501_v17, %v20113_v31  ;;  %v20565_v53 = vmul.f32 %v20505_v47, %v20117_v39  ;;  %v20573_v49 = vmul.f32 %v19269_v35, %v19932_v13  ;;  %v23153_v39 = vld [vmem:[#allocation103_spill] sm:$0xff] }
 0x567   :  { %23110 = vst [vmem:[#allocation81_spill] sm:$0xff] %v20493_v51  ;;  %23112 = vst [vmem:[#allocation82_spill] sm:$0xff] %v20501_v17  ;;  %v20569_v51 = vmul.f32 %v20509_v61, %v20121_v32  ;;  %v20577_v50 = vmul.f32 %v20513_v48, %v20129_v28  ;;  %v20581_v17 = vmul.f32 %v20517_v52, %v20133_v19  ;;  %v23151_v32 = vld [vmem:[#allocation102_spill] sm:$0xff] }
 0x568   :  { %23114 = vst [vmem:[#allocation83_spill] sm:$0xff] %v20505_v47  ;;  %23116 = vst [vmem:[#allocation84_spill] sm:$0xff] %v20509_v61  ;;  %v20585_v31 = vmul.f32 %v20521_v20, %v20137_v6  ;;  %v20589_v63 = vmul.f32 %v20525_v42, %v20141_v60  ;;  %v20593_v35 = vmul.f32 %v20541_v24, %v20145_v37  ;;  %v23146_v47 = vld [vmem:[#allocation48_spill] sm:$0xff]  ;;  %v23161_v37 = vld [vmem:[#allocation107_spill] sm:$0xff] }
 0x569   :  { %23118 = vst [vmem:[#allocation85_spill] sm:$0xff] %v20513_v48  ;;  %23120 = vst [vmem:[#allocation86_spill] sm:$0xff] %v20517_v52  ;;  %v20597_v48 = vmul.f32 %v19671_v29, %v19892_v1  ;;  %v20601_v52 = vmul.f32 %v23143_v3, %v19892_v1  ;;  %v20605_v61 = vmul.f32 %v23145_v59, %v19897_v45 }
 0x56a   :  { %23122 = vst [vmem:[#allocation87_spill] sm:$0xff] %v20521_v20  ;;  %23124 = vst [vmem:[#allocation88_spill] sm:$0xff] %v20525_v42  ;;  %v20609_v19 = vmul.f32 %v20553_v41, %v23146_v47  ;;  %v20613_v28 = vmul.f32 %v20557_v7, %v20245_v38  ;;  %v20621_v3 = vmul.f32 %v23151_v32, %v19902_v26  ;;  %v23154_v42 = vld [vmem:[#allocation104_spill] sm:$0xff]  ;;  %v23155_v38 = vld [vmem:[#allocation105_spill] sm:$0xff] }
 0x56b   :  { %23125 = vst [vmem:[#allocation205_spill] sm:$0xff] %v20533_v56  ;;  %23126 = vst [vmem:[#allocation206_spill] sm:$0xff] %v20537_v15  ;;  %v20625_v59 = vmul.f32 %v20573_v49, %v20249_v21  ;;  %v23156_v20 = vld [vmem:[#allocation99_spill] sm:$0xff]  ;;  %v23158_v47 = vld [vmem:[#allocation100_spill] sm:$0xff] }
 0x56c   :  { %23128 = vst [vmem:[#allocation89_spill] sm:$0xff] %v20541_v24  ;;  %23129 = vst [vmem:[#allocation207_spill] sm:$0xff] %v20545_v8  ;;  %v23149_v24 = vld [vmem:[#allocation101_spill] sm:$0xff]  ;;  %v20641_v32 = vmul.f32 %v23156_v20, %v19941_v34  ;;  %v23160_v21 = vld [vmem:[#allocation106_spill] sm:$0xff] }
 0x56d   :  { %23130 = vst [vmem:[#allocation208_spill] sm:$0xff] %v20549_v11  ;;  %23132 = vst [vmem:[#allocation90_spill] sm:$0xff] %v20553_v41  ;;  %v20617_v29 = vmul.f32 %v23149_v24, %v19897_v45  ;;  %v20629_v41 = vmul.f32 %v23153_v39, %v19902_v26  ;;  %v20637_v24 = vmul.f32 %v23155_v38, %v19927_v16  ;;  %v23163_v38 = vld [vmem:[#allocation109_spill] sm:$0xff]  ;;  %v23166_v11 = vld [vmem:[#allocation111_spill] sm:$0xff] }
 0x56e   :  { %23133 = vst [vmem:[#allocation209_spill] sm:$0xff] %v20557_v7  ;;  %23134 = vst [vmem:[#allocation210_spill] sm:$0xff] %v20561_v0  ;;  %v20633_v7 = vmul.f32 %v23154_v42, %v19927_v16  ;;  %v20649_v39 = vmul.f32 %v23160_v21, %v19932_v13  ;;  %v20653_v42 = vmul.f32 %v23161_v37, %v19932_v13  ;;  %v23164_v37 = vld [vmem:[#allocation110_spill] sm:$0xff]  ;;  %v23171_v21 = vld [vmem:[#allocation113_spill] sm:$0xff] }
 0x56f   :  { %23135 = vst [vmem:[#allocation211_spill] sm:$0xff] %v20565_v53  ;;  %23136 = vst [vmem:[#allocation212_spill] sm:$0xff] %v20569_v51  ;;  %v20682_v0 = vmul.f32 %v23164_v37, %v19892_v1  ;;  %v20690_v8 = vmul.f32 %v23166_v11, %v19892_v1  ;;  %v20699_v37 = vmul.f32 %v23171_v21, %v19897_v45  ;;  %v23179_v21 = vld [vmem:[#allocation117_spill] sm:$0xff]  ;;  %v23182_v11 = vld [vmem:[#allocation119_spill] sm:$0xff] }
 0x570   :  { %23137 = vst [vmem:[#allocation213_spill] sm:$0xff] %v20573_v49  ;;  %23138 = vst [vmem:[#allocation214_spill] sm:$0xff] %v20577_v50  ;;  %v20645_v49 = vmul.f32 %v23158_v47, %v19941_v34  ;;  %v23168_v47 = vld [vmem:[#allocation146_spill] sm:$0xff]  ;;  %v23217_v53 = vld [vmem:[#allocation161_spill] sm:$0xff] }
 0x571   :  { %23139 = vst [vmem:[#allocation215_spill] sm:$0xff] %v20581_v17  ;;  %23140 = vst [vmem:[#allocation216_spill] sm:$0xff] %v20585_v31  ;;  %v23173_v50 = vld [vmem:[#allocation114_spill] sm:$0xff]  ;;  %v23223_v31 = vld [vmem:[#allocation168_spill] sm:$0xff] }
 0x572   :  { %23141 = vst [vmem:[#allocation217_spill] sm:$0xff] %v20589_v63  ;;  %23142 = vst [vmem:[#allocation218_spill] sm:$0xff] %v20593_v35  ;;  %v23181_v63 = vld [vmem:[#allocation118_spill] sm:$0xff] }
 0x573   :  { %23144 = vst [vmem:[#allocation11_spill] sm:$0xff] %v20601_v52  ;;  %23147 = vst [vmem:[#allocation12_spill] sm:$0xff] %v20609_v19  ;;  %v20719_v19 = vmul.f32 %v23179_v21, %v19927_v16  ;;  %v20725_v54 = vmul.f32 %v23181_v63, %v19932_v13  ;;  %v20739_v52 = vmul.f32 %v23184_v4, %v19941_v34 }
 0x574   :  { %23148 = vst [vmem:[#allocation219_spill] sm:$0xff] %v20613_v28  ;;  %23150 = vst [vmem:[#allocation101_spill] sm:$0xff] %v20617_v29 }
 0x575   :  { %23152 = vst [vmem:[#allocation102_spill] sm:$0xff] %v20625_v59  ;;  %23157 = vst [vmem:[#allocation103_spill] sm:$0xff] %v20641_v32  ;;  %v23162_v59 = vld [vmem:[#allocation108_spill] sm:$0xff] }
 0x576   :  { %23159 = vst [vmem:[#allocation104_spill] sm:$0xff] %v20645_v49  ;;  %v20668_v28 = vmul.f32 %v23162_v59, %v19941_v34  ;;  %v20672_v49 = vmul.f32 %v23163_v38, %v19941_v34  ;;  %23165 = vst [vmem:[#allocation105_spill] sm:$0xff] %v20682_v0  ;;  %v20703_v59 = vmul.f32 %v23173_v50, %v19902_v26  ;;  %v23175_v38 = vld [vmem:[#allocation115_spill] sm:$0xff] }
 0x577   :  { %23167 = vst [vmem:[#allocation99_spill] sm:$0xff] %v20690_v8  ;;  %23172 = vst [vmem:[#allocation106_spill] sm:$0xff] %v20699_v37  ;;  %v20707_v51 = vmul.f32 %v23175_v38, %v19902_v26  ;;  %v23189_v8 = vld [vmem:[#allocation123_spill] sm:$0xff] }
 0x578   :  { %23174 = vst [vmem:[#allocation107_spill] sm:$0xff] %v20703_v59  ;;  %23180 = vst [vmem:[#allocation110_spill] sm:$0xff] %v20719_v19  ;;  %v20776_v4 = vmul.f32 %v23189_v8, %v19892_v1 }
 0x579   :  { %23176 = vst [vmem:[#allocation108_spill] sm:$0xff] %v20707_v51  ;;  %23185 = vst [vmem:[#allocation111_spill] sm:$0xff] %v20739_v52  ;;  %v23196_v51 = vld [vmem:[#allocation148_spill] sm:$0xff] }
 0x5a9   :  { %v16234_v60 = vpop.f32.mrf.mxu0  ;;  %v16255_v6 = vpop.f32.mrf.mxu1 }
 0x5aa   :  { %v8821_v14 = vmul.f32 %v16234_v60, %v19892_v1  ;;  %v23169_v60 = vld [vmem:[#allocation112_spill] sm:$0xff] }
 0x5ab   :  { %v8000_v20 = vpop.f32.mrf.mxu0  ;;  %v8113_v32 = vpop.f32.mrf.mxu1  ;;  %v20695_v17 = vmul.f32 %v23169_v60, %v19897_v45  ;;  %23190 = vst [vmem:[#allocation112_spill] sm:$0xff] %v20776_v4 }
 0x5ac   :  { %v8917_v15 = vsub.f32 %v8821_v14, %v23168_v47  ;;  %v23177_v47 = vld [vmem:[#allocation116_spill] sm:$0xff]  ;;  %v20729_v14 = vmul.f32 %v23182_v11, %v19932_v13  ;;  %v23187_v11 = vld [vmem:[#allocation122_spill] sm:$0xff] }
 0x5ad   :  { %23170 = vst [vmem:[#allocation100_spill] sm:$0xff] %v20695_v17  ;;  %v20715_v60 = vmul.f32 %v23177_v47, %v19927_v16  ;;  %v23183_v47 = vld [vmem:[#allocation120_spill] sm:$0xff]  ;;  %v20769_v17 = vmul.f32 %v23187_v11, %v19892_v1  ;;  %v23193_v11 = vld [vmem:[#allocation151_spill] sm:$0xff] }
 0x5ae   :  { %v20733_v29 = vmul.f32 %v23183_v47, %v19941_v34  ;;  %v8965_v38 = vmax.f32 %v8917_v15, 0.0  ;;  %v8820_v15 = vmul.f32 %v8000_v20, %v19897_v45 }
 0x5af   :  { %23178 = vst [vmem:[#allocation109_spill] sm:$0xff] %v20715_v60  ;;  %v16237_v50 = vpop.f32.mrf.mxu0  ;;  %v16258_v35 = vpop.f32.mrf.mxu1  ;;  %23188 = vst [vmem:[#allocation146_spill] sm:$0xff] %v20769_v17  ;;  %v23194_v60 = vld [vmem:[#allocation154_spill] sm:$0xff] }
 0x5b0   :  { %v8823_v58 = vmul.f32 %v16237_v50, %v19902_v26  ;;  %v8827_v50 = vmul.f32 %v16255_v6, %v19892_v1  ;;  %v8829_v21 = vmul.f32 %v16258_v35, %v19902_v26  ;;  %v9013_v18 = vadd.f32 0.01, %v8965_v38  ;;  %v23186_v6 = vld [vmem:[#allocation150_spill] sm:$0xff]  ;;  %v23191_v38 = vld [vmem:[#allocation147_spill] sm:$0xff] }
 0x5b1   :  { %v8010_v63 = vpop.f32.mrf.mxu0  ;;  %v8123_v0 = vpop.f32.mrf.mxu1  ;;  %v8916_v8 = vsub.f32 %v8820_v15, %v23196_v51 }
 0x5b2   :  { %v8822_v57 = vmul.f32 %v8010_v63, %v19927_v16  ;;  %v8919_v37 = vsub.f32 %v8823_v58, %v23186_v6  ;;  %v8828_v10 = vmul.f32 %v8123_v0, %v19927_v16  ;;  %v8923_v20 = vsub.f32 %v8827_v50, %v23191_v38  ;;  %v23192_v6 = vld [vmem:[#allocation152_spill] sm:$0xff]  ;;  %v23197_v38 = vld [vmem:[#allocation153_spill] sm:$0xff] }
 0x5b3   :  { %v8826_v58 = vmul.f32 %v8113_v32, %v19897_v45  ;;  %v8925_v17 = vsub.f32 %v8829_v21, %v23193_v11  ;;  %17063 = vrcp.f32 %v9013_v18  ;;  %v23199_v21 = vld [vmem:[#allocation126_spill] sm:$0xff]  ;;  %v8964_v52 = vmax.f32 %v8916_v8, 0.0 }
 0x5b4   :  { %v8918_v12 = vsub.f32 %v8822_v57, %v23192_v6  ;;  %v8967_v4 = vmax.f32 %v8919_v37, 0.0  ;;  %v8924_v32 = vsub.f32 %v8828_v10, %v23197_v38  ;;  %v23198_v6 = vld [vmem:[#allocation156_spill] sm:$0xff]  ;;  %v20791_v11 = vmul.f32 %v23199_v21, %v19902_v26  ;;  %v23203_v10 = vld [vmem:[#allocation127_spill] sm:$0xff]  ;;  %v23209_v8 = vld [vmem:[#allocation130_spill] sm:$0xff] }
 0x5b5   :  { %v16240_v63 = vpop.f32.mrf.mxu0  ;;  %v16261_v27 = vpop.f32.mrf.mxu1  ;;  %v8973_v37 = vmax.f32 %v8925_v17, 0.0 }
 0x5b6   :  { %v8825_v47 = vmul.f32 %v16240_v63, %v19932_v13  ;;  %v8831_v35 = vmul.f32 %v16261_v27, %v19932_v13  ;;  %23200 = vst [vmem:[#allocation113_spill] sm:$0xff] %v20791_v11 }
 0x5b7   :  { %v8020_v19 = vpop.f32.mrf.mxu0  ;;  %v8133_v40 = vpop.f32.mrf.mxu1 }
 0x5b8   :  { %v8921_v0 = vsub.f32 %v8825_v47, %v23194_v60  ;;  %v8927_v63 = vsub.f32 %v8831_v35, %v23195_v44  ;;  %v8824_v27 = vmul.f32 %v8020_v19, %v19941_v34  ;;  %v8830_v50 = vmul.f32 %v8133_v40, %v19941_v34  ;;  %v23201_v60 = vld [vmem:[#allocation149_spill] sm:$0xff] }
 0x5b9   :  { %v8922_v44 = vsub.f32 %v8826_v58, %v23201_v60  ;;  %v8966_v47 = vmax.f32 %v8918_v12, 0.0  ;;  %v23202_v19 = vld [vmem:[#allocation157_spill] sm:$0xff]  ;;  %v8972_v58 = vmax.f32 %v8924_v32, 0.0 }
 0x5ba   :  { %v8969_v55 = vmax.f32 %v8921_v0, 0.0  ;;  %v8975_v57 = vmax.f32 %v8927_v63, 0.0  ;;  %v8920_v59 = vsub.f32 %v8824_v27, %v23198_v6  ;;  %v8926_v18 = vsub.f32 %v8830_v50, %v23202_v19 }
 0x5bb   :  { %v16276_v35 = vpop.f32.mrf.mxu0  ;;  %v16297_v51 = vpop.f32.mrf.mxu1  ;;  %v20797_v0 = vmul.f32 %v23203_v10, %v19902_v26  ;;  %v8971_v63 = vmax.f32 %v8923_v20, 0.0  ;;  %v9015_v27 = vadd.f32 0.01, %v8967_v4  ;;  %v8970_v50 = vmax.f32 %v8922_v44, 0.0  ;;  %v23207_v4 = vld [vmem:[#allocation129_spill] sm:$0xff] }
 0x5bc   :  { %v9017_v15 = vadd.f32 0.01, %v8969_v55  ;;  %v9023_v40 = vadd.f32 0.01, %v8975_v57  ;;  %v8968_v56 = vmax.f32 %v8920_v59, 0.0  ;;  %v8974_v38 = vmax.f32 %v8926_v18, 0.0 }
 0x5bd   :  { %23204 = vst [vmem:[#allocation114_spill] sm:$0xff] %v20797_v0  ;;  %v8226_v6 = vpop.f32.mrf.mxu0  ;;  %v8339_v21 = vpop.f32.mrf.mxu1  ;;  %v9014_v60 = vadd.f32 0.01, %v8966_v47  ;;  %v23205_v59 = vld [vmem:[#allocation128_spill] sm:$0xff]  ;;  %v9021_v20 = vadd.f32 0.01, %v8973_v37  ;;  %v20807_v19 = vmul.f32 %v23207_v4, %v19927_v16  ;;  %v8833_v37 = vmul.f32 %v16276_v35, %v19892_v1 }
 0x5be   :  { %17065 = vrcp.f32 %v9017_v15  ;;  %v9016_v12 = vadd.f32 0.01, %v8968_v56  ;;  %v9022_v17 = vadd.f32 0.01, %v8974_v38  ;;  %v20803_v57 = vmul.f32 %v23205_v59, %v19927_v16 }
 0x5bf   :  { %17067 = vrcp.f32 %v9023_v40  ;;  %23208 = vst [vmem:[#allocation116_spill] sm:$0xff] %v20807_v19  ;;  %v20811_v56 = vmul.f32 %v23209_v8, %v19932_v13  ;;  %v9019_v32 = vadd.f32 0.01, %v8971_v63  ;;  %v9012_v18 = vadd.f32 0.01, %v8964_v52  ;;  %v23216_v19 = vld [vmem:[#allocation160_spill] sm:$0xff] }
 0x5c0   :  { %23206 = vst [vmem:[#allocation115_spill] sm:$0xff] %v20803_v57  ;;  %17069 = vrcp.f32 %v9016_v12  ;;  %v9020_v15 = vadd.f32 0.01, %v8972_v58  ;;  %v9018_v10 = vadd.f32 0.01, %v8970_v50  ;;  %v8839_v4 = vmul.f32 %v16297_v51, %v19892_v1  ;;  %v23211_v58 = vld [vmem:[#allocation131_spill] sm:$0xff] }
 0x5c1   :  { %17071 = vrcp.f32 %v9015_v27  ;;  %v16279_v44 = vpop.f32.mrf.mxu0  ;;  %v16300_v47 = vpop.f32.mrf.mxu1  ;;  %v20818_v63 = vmul.f32 %v8226_v6, %v19897_v45  ;;  %v23210_v27 = vld [vmem:[#allocation162_spill] sm:$0xff]  ;;  %v20826_v50 = vmul.f32 %v8339_v21, %v19897_v45  ;;  %v23212_v51 = vld [vmem:[#allocation132_spill] sm:$0xff] }
 0x5c2   :  { %17073 = vrcp.f32 %v9022_v17  ;;  %v8835_v40 = vmul.f32 %v16279_v44, %v19902_v26  ;;  %v8841_v38 = vmul.f32 %v16300_v47, %v19902_v26  ;;  %v20823_v17 = vmul.f32 %v23211_v58, %v19932_v13  ;;  %v23213_v44 = vld [vmem:[#allocation158_spill] sm:$0xff] }
 0x5c3   :  { %17075 = vrcp.f32 %v9014_v60  ;;  %v8236_v12 = vpop.f32.mrf.mxu0  ;;  %v8349_v59 = vpop.f32.mrf.mxu1  ;;  %v20833_v6 = vmul.f32 %v23212_v51, %v19941_v34  ;;  %v8929_v47 = vsub.f32 %v8833_v37, %v23213_v44 }
 0x5c4   :  { %17077 = vrcp.f32 %v9021_v20  ;;  %v8931_v52 = vsub.f32 %v8835_v40, %v23210_v27  ;;  %v8834_v35 = vmul.f32 %v8236_v12, %v19927_v16  ;;  %v17064_v60 = vpop.eup %17063  ;;  %v8840_v8 = vmul.f32 %v8349_v59, %v19927_v16  ;;  %v23214_v40 = vld [vmem:[#allocation163_spill] sm:$0xff]  ;;  %v23218_v59 = vld [vmem:[#allocation164_spill] sm:$0xff] }
 0x5c5   :  { %17079 = vrcp.f32 %v9019_v32  ;;  %v8937_v21 = vsub.f32 %v8841_v38, %v23214_v40  ;;  %v23215_v12 = vld [vmem:[#allocation159_spill] sm:$0xff]  ;;  %v8928_v20 = vsub.f32 %v20818_v63, %v23216_v19  ;;  %v23219_v38 = vsub.f32 %v20597_v48, %v20321_v9  ;;  %v23224_v48 = vld [vmem:[#allocation169_spill] sm:$0xff] }
 0x5c6   :  { %17081 = vrcp.f32 %v9020_v15  ;;  %v8979_v32 = vmax.f32 %v8931_v52, 0.0  ;;  %v8935_v55 = vsub.f32 %v8839_v4, %v23215_v12  ;;  %v8934_v15 = vsub.f32 %v20826_v50, %v23217_v53  ;;  %v23220_v4 = vld [vmem:[#allocation165_spill] sm:$0xff]  ;;  %v23221_v12 = vld [vmem:[#allocation166_spill] sm:$0xff] }
 0x5c7   :  { %17083 = vrcp.f32 %v9012_v18  ;;  %v16282_v27 = vpop.f32.mrf.mxu0  ;;  %v16303_v58 = vpop.f32.mrf.mxu1  ;;  %v8930_v18 = vsub.f32 %v8834_v35, %v23218_v59  ;;  %v8936_v40 = vsub.f32 %v8840_v8, %v23220_v4  ;;  %v8977_v50 = vmax.f32 %v8929_v47, 0.0 }
 0x5c8   :  { %17085 = vrcp.f32 %v9018_v10  ;;  %v8837_v51 = vmul.f32 %v16282_v27, %v19932_v13  ;;  %v8843_v37 = vmul.f32 %v16303_v58, %v19932_v13  ;;  %v20849_v10 = vmul.f32 %v17064_v60, %v23219_v38  ;;  %v23222_v58 = vld [vmem:[#allocation167_spill] sm:$0xff] }
 0x5c9   :  { %v8246_v52 = vpop.f32.mrf.mxu0  ;;  %v8359_v44 = vpop.f32.mrf.mxu1  ;;  %v9027_v35 = vadd.f32 0.01, %v8979_v32  ;;  %v8985_v59 = vmax.f32 %v8937_v21, 0.0  ;;  %v23225_v8 = vsub.f32 %v20649_v39, %v20409_v5  ;;  %v8983_v38 = vmax.f32 %v8935_v55, 0.0 }
 0x5ca   :  { %v8933_v19 = vsub.f32 %v8837_v51, %v23221_v12  ;;  %v8836_v63 = vmul.f32 %v8246_v52, %v19941_v34  ;;  %v8842_v27 = vmul.f32 %v8359_v44, %v19941_v34  ;;  %v8939_v11 = vsub.f32 %v8843_v37, %v23222_v58 }
 0x5cb   :  { %v17066_v53 = vpop.eup %17065  ;;  %v8978_v44 = vmax.f32 %v8930_v18, 0.0  ;;  %v23226_v21 = vsub.f32 %v20653_v42, %v20417_v62  ;;  %17087 = vrcp.f32 %v9027_v35  ;;  %v23227_v62 = vsub.f32 %v20668_v28, %v20421_v25 }
 0x5cc   :  { %v17068_v57 = vpop.eup %17067  ;;  %v8981_v0 = vmax.f32 %v8933_v19, 0.0  ;;  %v8932_v9 = vsub.f32 %v8836_v63, %v23223_v31  ;;  %v8938_v60 = vsub.f32 %v8842_v27, %v23224_v48  ;;  %v20861_v51 = vmul.f32 %v17066_v53, %v23225_v8 }
 0x5cd   :  { %v17070_v52 = vpop.eup %17069  ;;  %v8987_v4 = vmax.f32 %v8939_v11, 0.0  ;;  %v16318_v47 = vpop.f32.mrf.mxu0  ;;  %v20866_v37 = vmul.f32 %v17068_v57, %v23226_v21  ;;  %v8984_v31 = vmax.f32 %v8936_v40, 0.0  ;;  %v9033_v57 = vadd.f32 0.01, %v8985_v59 }
 0x5ce   :  { %v16339_v32 = vpop.f32.mrf.mxu1  ;;  %v17072_v12 = vpop.eup %17071  ;;  %v9029_v19 = vadd.f32 0.01, %v8981_v0  ;;  %v8980_v63 = vmax.f32 %v8932_v9, 0.0  ;;  %v8986_v27 = vmax.f32 %v8938_v60, 0.0  ;;  %16388 = vmatprep.subr.mxu0 %v20861_v51  ;;  %v8845_v55 = vmul.f32 %v16318_v47, %v19892_v1  ;;  %v23228_v9 = vld [vmem:[#allocation170_spill] sm:$0xff] }
 0x5cf   :  { %v17074_v5 = vpop.eup %17073  ;;  %v9035_v39 = vadd.f32 0.01, %v8987_v4  ;;  %v8452_v11 = vpop.f32.mrf.mxu0  ;;  %16409 = vmatprep.subr.mxu1 %v20866_v37  ;;  %16389 = vmatpush3.msra.mxu0 %v20861_v51  ;;  %v20877_v42 = vmul.f32 %v17070_v52, %v23227_v62  ;;  %v9026_v58 = vadd.f32 0.01, %v8978_v44  ;;  %v23229_v60 = vsub.f32 %v20621_v3, %v20357_v23 }
 0x5d0   :  { %v20870_v18 = vpop.f32.mrf.mxu1  ;;  %v17076_v0 = vpop.eup %17075  ;;  %17089 = vrcp.f32 %v9029_v19  ;;  %v9028_v40 = vadd.f32 0.01, %v8980_v63  ;;  %v9034_v53 = vadd.f32 0.01, %v8986_v27  ;;  %16410 = vmatpush3.msra.mxu1 %v20866_v37  ;;  %v8941_v48 = vsub.f32 %v8845_v55, %v23228_v9 }
 0x5d1   :  { %v17078_v35 = vpop.eup %17077  ;;  %17091 = vrcp.f32 %v9035_v39  ;;  %16390 = vmatprep.subr.mxu0 %v20877_v42  ;;  %v20885_v28 = vmul.f32 %v17072_v12, %v23229_v60  ;;  %v8976_v8 = vmax.f32 %v8928_v20, 0.0  ;;  %v9032_v59 = vadd.f32 0.01, %v8984_v31 }
 0x5d2   :  { %v17080_v25 = vpop.eup %17079  ;;  %17093 = vrcp.f32 %v9028_v40  ;;  %v23230_v52 = vsub.f32 %v20672_v49, %v20433_v2  ;;  %16391 = vmatpush3.msra.mxu0 %v20877_v42  ;;  %v9025_v47 = vadd.f32 0.01, %v8977_v50  ;;  %v8982_v21 = vmax.f32 %v8934_v15, 0.0  ;;  %v23238_v40 = vld [vmem:[#allocation11_spill] sm:$0xff] }
 0x5d3   :  { %v17082_v44 = vpop.eup %17081  ;;  %17095 = vrcp.f32 %v9034_v53  ;;  %v16321_v19 = vpop.f32.mrf.mxu0  ;;  %16392 = vmatprep.subr.mxu0 %v20885_v28  ;;  %v23231_v23 = vsub.f32 %v20633_v7, %v20401_v46  ;;  %v9031_v12 = vadd.f32 0.01, %v8983_v38  ;;  %v23232_v49 = vsub.f32 %v20629_v41, %v20369_v43  ;;  %v23233_v41 = vld [vmem:[#allocation174_spill] sm:$0xff]  ;;  %v23239_v53 = vld [vmem:[#allocation192_spill] sm:$0xff] }
 0x5d4   :  { %v20890_v4 = vmul.f32 %v17074_v5, %v23230_v52  ;;  %v16342_v63 = vpop.f32.mrf.mxu1  ;;  %v17084_v20 = vpop.eup %17083  ;;  %17097 = vrcp.f32 %v9033_v57  ;;  %v8847_v2 = vmul.f32 %v16321_v19, %v19902_v26  ;;  %16393 = vmatpush3.msra.mxu0 %v20885_v28  ;;  %v8989_v31 = vmax.f32 %v8941_v48, 0.0 }
 0x5d5   :  { %v20897_v3 = vmul.f32 %v17076_v0, %v23231_v23  ;;  %v20904_v15 = vmul.f32 %v17078_v35, %v23232_v49  ;;  %v17086_v50 = vpop.eup %17085  ;;  %17099 = vrcp.f32 %v9026_v58  ;;  %v20908_v7 = vmul.f32 %v16339_v32, %v19892_v1  ;;  %v8462_v38 = vpop.f32.mrf.mxu0 }
 0x5d6   :  { %16411 = vmatprep.subr.mxu1 %v20890_v4  ;;  %v20911_v46 = vmul.f32 %v8452_v11, %v19897_v45  ;;  %v8575_v27 = vpop.f32.mrf.mxu1  ;;  %17101 = vrcp.f32 %v9032_v59  ;;  %v8943_v43 = vsub.f32 %v8847_v2, %v23233_v41  ;;  %v8853_v5 = vmul.f32 %v16342_v63, %v19902_v26  ;;  %v23235_v26 = vld [vmem:[#allocation195_spill] sm:$0xff]  ;;  %v23247_v63 = vld [vmem:[#allocation176_spill] sm:$0xff] }
 0x5d7   :  { %16412 = vmatpush3.msra.mxu1 %v20890_v4  ;;  %16394 = vmatprep.subr.mxu0 %v20897_v3  ;;  %v23234_v1 = vsub.f32 %v20637_v24, %v20405_v36  ;;  %17103 = vrcp.f32 %v9025_v47  ;;  %v9024_v39 = vadd.f32 0.01, %v8976_v8  ;;  %v20925_v55 = vmul.f32 %v8462_v38, %v19927_v16  ;;  %v23237_v36 = vld [vmem:[#allocation133_spill] sm:$0xff]  ;;  %v23242_v8 = vld [vmem:[#allocation196_spill] sm:$0xff]  ;;  %v20983_v41 = vld [vmem:[%s22565_s4 + $0x10] sm:$0xff] }
 0x5d8   :  { %16413 = vmatprep.subr.mxu1 %v20904_v15  ;;  %16395 = vmatpush3.msra.mxu0 %v20897_v3  ;;  %v23236_v11 = vsub.f32 %v20605_v61, %v23235_v26  ;;  %v20936_v24 = vmul.f32 %v23237_v36, %v19941_v34  ;;  %v9030_v0 = vadd.f32 0.01, %v8982_v21  ;;  %v8852_v57 = vmul.f32 %v8575_v27, %v19927_v16  ;;  %v23241_v16 = vld [vmem:[#allocation101_spill] sm:$0xff]  ;;  %v23245_v47 = vld [vmem:[#allocation172_spill] sm:$0xff]  ;;  %v23251_v26 = vld [vmem:[#allocation179_spill] sm:$0xff] }
 0x5d9   :  { %v20921_v32 = vmul.f32 %v17082_v44, %v23234_v1  ;;  %16414 = vmatpush3.msra.mxu1 %v20904_v15  ;;  %16396 = vmatprep.subr.mxu0 %v20849_v10  ;;  %v23240_v35 = vsub.f32 %v23238_v40, %v23239_v53  ;;  %17105 = vrcp.f32 %v9031_v12  ;;  %v9037_v61 = vadd.f32 0.01, %v8989_v31  ;;  %v16324_v48 = vpop.f32.mrf.mxu0  ;;  %v16345_v60 = vpop.f32.mrf.mxu1  ;;  %v23253_v40 = vld [vmem:[#allocation181_spill] sm:$0xff] }
 0x5da   :  { %v20932_v62 = vmul.f32 %v17084_v20, %v23236_v11  ;;  %16397 = vmatpush3.msra.mxu0 %v20849_v10  ;;  %v20948_v9 = vmul.f32 %v20870_v18, %v19897_v45  ;;  %v23243_v59 = vsub.f32 %v23241_v16, %v23242_v8  ;;  %v8940_v21 = vsub.f32 %v20911_v46, %v23245_v47  ;;  %v23246_v45 = vld [vmem:[#allocation175_spill] sm:$0xff]  ;;  %v17088_v31 = vpop.eup %17087  ;;  %v23266_v46 = vld [vmem:[#allocation108_spill] sm:$0xff]  ;;  %v23267_v47 = vld [vmem:[#allocation202_spill] sm:$0xff] }
 0x5db   :  { %16415 = vmatprep.subr.mxu1 %v20921_v32  ;;  %v20943_v58 = vmul.f32 %v17080_v25, %v23240_v35  ;;  %v23244_v25 = vld [vmem:[#allocation171_spill] sm:$0xff]  ;;  %v8991_v19 = vmax.f32 %v8943_v43, 0.0  ;;  %v8949_v18 = vsub.f32 %v8853_v5, %v23246_v45  ;;  %17107 = vrcp.f32 %v9024_v39  ;;  %v8472_v2 = vpop.f32.mrf.mxu0  ;;  %v8585_v49 = vpop.f32.mrf.mxu1  ;;  %v23249_v5 = vld [vmem:[#allocation173_spill] sm:$0xff]  ;;  %v23250_v39 = vld [vmem:[#allocation178_spill] sm:$0xff] }
 0x5dc   :  { %16416 = vmatpush3.msra.mxu1 %v20921_v32  ;;  %16398 = vmatprep.subr.mxu0 %v20932_v62  ;;  %v20955_v52 = vmul.f32 %v17086_v50, %v23243_v59  ;;  %v8947_v44 = vsub.f32 %v20908_v7, %v23244_v25  ;;  %v8942_v23 = vsub.f32 %v20925_v55, %v23247_v63  ;;  %v20972_v50 = vld [vmem:[%s22565_s4 + $0x8] sm:$0xff]  ;;  %17109 = vrcp.f32 %v9030_v0  ;;  %v23248_v7 = vld [vmem:[#allocation177_spill] sm:$0xff]  ;;  %v23252_v0 = vld [vmem:[#allocation180_spill] sm:$0xff] }
 0x5dd   :  { %16417 = vmatprep.subr.mxu1 %v20943_v58  ;;  %16399 = vmatpush3.msra.mxu0 %v20932_v62  ;;  %v8849_v20 = vmul.f32 %v16324_v48, %v19932_v13  ;;  %v8855_v12 = vmul.f32 %v16345_v60, %v19932_v13  ;;  %v8948_v38 = vsub.f32 %v8852_v57, %v23248_v7  ;;  %v17090_v43 = vpop.eup %17089  ;;  %17111 = vrcp.f32 %v9037_v61 }
 0x5de   :  { %16418 = vmatpush3.msra.mxu1 %v20943_v58  ;;  %16401 = vmatmul.mubr.msk.f32.vlgmr.msra.gmra.mxu0 %vm1809_vm1, %v20972_v50  ;;  %v8848_v27 = vmul.f32 %v8472_v2, %v19941_v34  ;;  %v8854_v13 = vmul.f32 %v8585_v49, %v19941_v34  ;;  %v8946_v1 = vsub.f32 %v20948_v9, %v23249_v5  ;;  %v17092_v34 = vpop.eup %17091  ;;  %v9039_v36 = vadd.f32 0.01, %v8991_v19 }
 0x5df   :  { %16419 = vmatprep.subr.mxu1 %v20955_v52  ;;  %16403 = vmatprep.mubr.msk.f32.mxu0 %vm1809_vm1, %v20983_v41  ;;  %v8945_v55 = vsub.f32 %v8849_v20, %v23250_v39  ;;  %v8951_v11 = vsub.f32 %v8855_v12, %v23251_v26  ;;  %v23254_v35 = vsub.f32 %v20725_v54, %v20485_v33  ;;  %v17094_v9 = vpop.eup %17093  ;;  %v8997_v48 = vmax.f32 %v8949_v18, 0.0  ;;  %v21001_v8 = vpop.f32.mrf.mxu0  ;;  %v21015_v54 = vld [vmem:[%s22565_s4 + $0x18] sm:$0xff] }
 0x5e0   :  { %16420 = vmatpush3.msra.mxu1 %v20955_v52  ;;  %v8944_v57 = vsub.f32 %v8848_v27, %v23252_v0  ;;  %v8950_v53 = vsub.f32 %v8854_v13, %v23253_v40  ;;  %v21003_v59 = vpop.f32.mrf.mxu1  ;;  %v23255_v25 = vsub.f32 %v20729_v14, %v20497_v30  ;;  %v17096_v33 = vpop.eup %17095  ;;  %v8990_v45 = vmax.f32 %v8942_v23, 0.0  ;;  %v21023_v30 = vld [vmem:[%s22565_s4 + $0x20] sm:$0xff]  ;;  %v23257_v27 = vld [vmem:[#allocation111_spill] sm:$0xff] }
 0x5e1   :  { %16422 = vmatmul.mubr.msk.f32.vlgmr.msra.gmra.mxu1 %vm1809_vm1, %v20972_v50  ;;  %v20999_v61 = vmul.f32 %v17090_v43, %v23254_v35  ;;  %v8993_v60 = vmax.f32 %v8945_v55, 0.0  ;;  %v8999_v16 = vmax.f32 %v8951_v11, 0.0  ;;  %v8996_v18 = vmax.f32 %v8948_v38, 0.0  ;;  %v17098_v14 = vpop.eup %17097  ;;  %v21027_v49 = vpop.f32.mrf.mxu0  ;;  %v23258_v13 = vld [vmem:[#allocation205_spill] sm:$0xff]  ;;  %v23261_v40 = vld [vmem:[#allocation107_spill] sm:$0xff] }
 0x5e2   :  { %v21008_v19 = vmul.f32 %v17092_v34, %v23255_v25  ;;  %16424 = vmatprep.mubr.msk.f32.mxu1 %vm1809_vm1, %v20983_v41  ;;  %16404 = vmatmul.mubr.msk.f32.gmra.mxu0 %vm1809_vm1, %v21015_v54  ;;  %v8992_v63 = vmax.f32 %v8944_v57, 0.0  ;;  %v8998_v20 = vmax.f32 %v8950_v53, 0.0  ;;  %v21029_v7 = vpop.f32.mrf.mxu1  ;;  %v23256_v23 = vsub.f32 %v20733_v29, %v20529_v22  ;;  %v17100_v39 = vpop.eup %17099 }
 0x5e3   :  { %16430 = vmatprep.subr.mxu0 %v20999_v61  ;;  %16406 = vmatprep.mubr.msk.f32.mxu0 %vm1809_vm1, %v21023_v30  ;;  %v9041_v12 = vadd.f32 0.01, %v8993_v60  ;;  %v9047_v2 = vadd.f32 0.01, %v8999_v16  ;;  %v23259_v43 = vsub.f32 %v23257_v27, %v23258_v13  ;;  %v8995_v55 = vmax.f32 %v8947_v44, 0.0  ;;  %v17102_v34 = vpop.eup %17101  ;;  %v16363_v29 = vpop.f32.mrf.mxu0  ;;  %v23262_v44 = vld [vmem:[#allocation201_spill] sm:$0xff] }
 0x5e4   :  { %16451 = vmatprep.subr.mxu1 %v21008_v19  ;;  %16431 = vmatpush3.msra.mxu0 %v20999_v61  ;;  %v21036_v38 = vmul.f32 %v17094_v9, %v23256_v23  ;;  %17113 = vrcp.f32 %v9039_v36  ;;  %v9040_v26 = vadd.f32 0.01, %v8992_v63  ;;  %v9046_v11 = vadd.f32 0.01, %v8998_v20  ;;  %v16384_v57 = vpop.f32.mrf.mxu1  ;;  %v17104_v35 = vpop.eup %17103  ;;  %v23265_v9 = vld [vmem:[#allocation217_spill] sm:$0xff]  ;;  %v23271_v20 = vld [vmem:[#allocation203_spill] sm:$0xff] }
 0x5e5   :  { %v21041_v5 = vmul.f32 %v17096_v33, %v23259_v43  ;;  %16452 = vmatpush3.msra.mxu1 %v21008_v19  ;;  %v8988_v0 = vmax.f32 %v8940_v21, 0.0  ;;  %v9045_v22 = vadd.f32 0.01, %v8997_v48  ;;  %17115 = vrcp.f32 %v9041_v12  ;;  %v23274_v27 = vld [vmem:[#allocation218_spill] sm:$0xff]  ;;  %v23293_v60 = vld [vmem:[#allocation187_spill] sm:$0xff] }
 0x5e6   :  { %16432 = vmatprep.subr.mxu0 %v21036_v38  ;;  %v23263_v36 = vsub.f32 %v23261_v40, %v23262_v44  ;;  %v9038_v16 = vadd.f32 0.01, %v8990_v45  ;;  %17117 = vrcp.f32 %v9047_v2  ;;  %v23268_v21 = vsub.f32 %v23266_v46, %v23267_v47  ;;  %v8801_v63 = vpop.f32.mrf.mxu1  ;;  %16425 = vmatmul.mubr.msk.f32.gmra.mxu1 %vm1809_vm1, %v21015_v54  ;;  %v23270_v45 = vld [vmem:[#allocation109_spill] sm:$0xff]  ;;  %v17106_v23 = vpop.eup %17105  ;;  %v23279_v40 = vld [vmem:[#allocation12_spill] sm:$0xff] }
 0x5e7   :  { %23260 = vst [vmem:[#allocation117_spill] sm:$0xff] %v21041_v5  ;;  %16453 = vmatprep.subr.mxu1 %v21041_v5  ;;  %16433 = vmatpush3.msra.mxu0 %v21036_v38  ;;  %v8994_v25 = vmax.f32 %v8946_v1, 0.0  ;;  %v9044_v33 = vadd.f32 0.01, %v8996_v18  ;;  %17119 = vrcp.f32 %v9040_v26  ;;  %v23272_v12 = vsub.f32 %v23270_v45, %v23271_v20  ;;  %v23275_v1 = vld [vmem:[#allocation110_spill] sm:$0xff]  ;;  %v23276_v18 = vld [vmem:[#allocation204_spill] sm:$0xff] }
 0x5e8   :  { %v21052_v53 = vmul.f32 %v17088_v31, %v23263_v36  ;;  %16454 = vmatpush3.msra.mxu1 %v21041_v5  ;;  %v21061_v48 = vmul.f32 %v17098_v14, %v23268_v21  ;;  %v8688_v31 = vpop.f32.mrf.mxu0  ;;  %v9043_v13 = vadd.f32 0.01, %v8995_v55  ;;  %17121 = vrcp.f32 %v9046_v11  ;;  %v16387_v46 = vpop.f32.mrf.mxu1  ;;  %v23280_v55 = vld [vmem:[#allocation105_spill] sm:$0xff]  ;;  %v21101_v20 = vld [vmem:[%s22567_s6 + $0x28] sm:$0xff]  ;;  %16427 = vmatprep.mubr.msk.f32.mxu1 %vm1809_vm1, %v21023_v30 }
 0x5e9   :  { %v21069_v2 = vmul.f32 %v17100_v39, %v23272_v12  ;;  %v23277_v43 = vsub.f32 %v23275_v1, %v23276_v18  ;;  %v9036_v39 = vadd.f32 0.01, %v8988_v0  ;;  %17123 = vrcp.f32 %v9045_v22  ;;  %v23281_v11 = vld [vmem:[#allocation197_spill] sm:$0xff]  ;;  %v17108_v45 = vpop.eup %17107  ;;  %v23284_v18 = vld [vmem:[#allocation99_spill] sm:$0xff] }
 0x5ea   :  { %23264 = vst [vmem:[#allocation118_spill] sm:$0xff] %v21052_v53  ;;  %23269 = vst [vmem:[#allocation119_spill] sm:$0xff] %v21061_v48  ;;  %16434 = vmatprep.subr.mxu0 %v21052_v53  ;;  %16455 = vmatprep.subr.mxu1 %v21061_v48  ;;  %v16366_v36 = vpop.f32.mrf.mxu0  ;;  %v23282_v47 = vsub.f32 %v23280_v55, %v23281_v11  ;;  %17125 = vrcp.f32 %v9038_v16  ;;  %v17110_v16 = vpop.eup %17109  ;;  %v9042_v12 = vadd.f32 0.01, %v8994_v25 }
 0x5eb   :  { %23273 = vst [vmem:[#allocation120_spill] sm:$0xff] %v21069_v2  ;;  %16435 = vmatpush3.msra.mxu0 %v21052_v53  ;;  %v21078_v26 = vmul.f32 %v17102_v34, %v23277_v43  ;;  %16456 = vmatpush3.msra.mxu1 %v21061_v48  ;;  %v21092_v34 = vld [vmem:[%s22567_s6 + $0x18] sm:$0xff]  ;;  %17127 = vrcp.f32 %v9044_v33  ;;  %v23285_v43 = vld [vmem:[#allocation198_spill] sm:$0xff]  ;;  %v21123_v25 = vpop.eup %17111  ;;  %v21128_v33 = vld [vmem:[%s22567_s6 + $0x10] sm:$0xff]  ;;  %v8811_v14 = vpop.f32.mrf.mxu1 }
 0x5ec   :  { %16436 = vmatprep.subr.mxu0 %v21069_v2  ;;  %v21087_v21 = vmul.f32 %v17104_v35, %v23282_v47  ;;  %v8859_v0 = vmul.f32 %v21092_v34, %v16363_v29  ;;  %v21096_v22 = vmul.f32 %v21092_v34, %v16384_v57  ;;  %v8861_v35 = vmul.f32 %v21101_v20, %v16366_v36  ;;  %v21110_v29 = vld [vmem:[%s22567_s6 + $0x8] sm:$0xff]  ;;  %v8698_v1 = vpop.f32.mrf.mxu0 }
 0x5ed   :  { %23278 = vst [vmem:[#allocation121_spill] sm:$0xff] %v21078_v26  ;;  %16457 = vmatprep.subr.mxu1 %v21078_v26  ;;  %v21114_v57 = vmul.f32 %v21110_v29, %v21001_v8  ;;  %16437 = vmatpush3.msra.mxu0 %v21069_v2  ;;  %v23286_v36 = vsub.f32 %v23284_v18, %v23285_v43  ;;  %17129 = vrcp.f32 %v9043_v13  ;;  %v23288_v47 = vld [vmem:[#allocation190_spill] sm:$0xff]  ;;  %v23290_v18 = vld [vmem:[#allocation199_spill] sm:$0xff] }
 0x5ee   :  { %23283 = vst [vmem:[#allocation150_spill] sm:$0xff] %v21087_v21  ;;  %16458 = vmatpush3.msra.mxu1 %v21078_v26  ;;  %v8858_v8 = vmul.f32 %v21128_v33, %v8688_v31  ;;  %v8864_v11 = vmul.f32 %v21128_v33, %v8801_v63  ;;  %v8957_v44 = vsub.f32 %v8861_v35, %v23288_v47  ;;  %17131 = vrcp.f32 %v9036_v39  ;;  %v21146_v31 = vld [vmem:[%s22567_s6 + $0x20] sm:$0xff]  ;;  %v23289_v35 = vld [vmem:[#allocation100_spill] sm:$0xff] }
 0x5ef   :  { %v21121_v55 = vmul.f32 %v17106_v23, %v23286_v36  ;;  %v21136_v23 = vld [vmem:[%s22565_s4 + $0x28] sm:$0xff]  ;;  %v8867_v13 = vmul.f32 %v21101_v20, %v16387_v46  ;;  %v8860_v63 = vmul.f32 %v21146_v31, %v8698_v1  ;;  %16438 = vmatprep.subr.mxu0 %v21087_v21  ;;  %v23291_v43 = vsub.f32 %v23289_v35, %v23290_v18  ;;  %v23294_v1 = vld [vmem:[#allocation191_spill] sm:$0xff]  ;;  %v23295_v35 = vld [vmem:[#allocation193_spill] sm:$0xff] }
 0x5f0   :  { %16407 = vmatmul.mubr.msk.f32.gmra.mxu0 %vm1809_vm1, %v21136_v23  ;;  %16428 = vmatmul.mubr.msk.f32.gmra.mxu1 %vm1809_vm1, %v21136_v23  ;;  %v21158_v39 = vmul.f32 %v21110_v29, %v21003_v59  ;;  %v23292_v46 = vld [vmem:[#allocation186_spill] sm:$0xff]  ;;  %v8961_v26 = vsub.f32 %v21096_v22, %v23293_v60  ;;  %v9005_v2 = vmax.f32 %v8957_v44, 0.0  ;;  %17133 = vrcp.f32 %v9042_v12  ;;  %v21172_v59 = vld [vmem:[%s22565_s4] sm:$0xff] }
 0x5f1   :  { %23287 = vst [vmem:[#allocation122_spill] sm:$0xff] %v21121_v55  ;;  %16459 = vmatprep.subr.mxu1 %v21121_v55  ;;  %v21154_v36 = vmul.f32 %v17108_v45, %v23291_v43  ;;  %v8955_v47 = vsub.f32 %v8859_v0, %v23292_v46  ;;  %16439 = vmatpush3.msra.mxu0 %v21087_v21  ;;  %v23296_v60 = vld [vmem:[#allocation182_spill] sm:$0xff]  ;;  %v23297_v0 = vld [vmem:[#allocation188_spill] sm:$0xff]  ;;  %v23298_v12 = vld [vmem:[#allocation189_spill] sm:$0xff] }
 0x5f2   :  { %16460 = vmatpush3.msra.mxu1 %v21121_v55  ;;  %v8963_v48 = vsub.f32 %v8867_v13, %v23294_v1  ;;  %v8956_v45 = vsub.f32 %v8860_v63, %v23295_v35  ;;  %v8866_v18 = vmul.f32 %v21146_v31, %v8811_v14  ;;  %16442 = vmatprep.mubr.msk.f32.mxu0 %vm1809_vm1, %v21172_v59  ;;  %v9053_v63 = vadd.f32 0.01, %v9005_v2  ;;  %v17114_v14 = vpop.eup %17113  ;;  %v23299_v1 = vld [vmem:[#allocation194_spill] sm:$0xff]  ;;  %v23301_v21 = vld [vmem:[#allocation200_spill] sm:$0xff]  ;;  %v23303_v2 = vld [vmem:[#allocation183_spill] sm:$0xff] }
 0x5f3   :  { %16440 = vmatprep.subr.mxu0 %v21154_v36  ;;  %v8953_v44 = vsub.f32 %v21114_v57, %v23296_v60  ;;  %v8954_v22 = vsub.f32 %v8858_v8, %v23297_v0  ;;  %v8960_v13 = vsub.f32 %v8864_v11, %v23298_v12  ;;  %16463 = vmatprep.mubr.msk.f32.mxu1 %vm1809_vm1, %v21172_v59  ;;  %v23300_v55 = vld [vmem:[#allocation106_spill] sm:$0xff]  ;;  %v17116_v57 = vpop.eup %17115  ;;  %v21196_v11 = vld [vmem:[%s22567_s6] sm:$0xff] }
 0x5f4   :  { %16441 = vmatpush3.msra.mxu0 %v21154_v36  ;;  %v9011_v43 = vmax.f32 %v8963_v48, 0.0  ;;  %v9004_v46 = vmax.f32 %v8956_v45, 0.0  ;;  %v8962_v35 = vsub.f32 %v8866_v18, %v23299_v1  ;;  %v23302_v53 = vsub.f32 %v23300_v55, %v23301_v21 }
 0x5f5   :  { %16443 = vmatmul.mubr.msk.f32.vlgmr.msra.gmra.mxu0 %vm1809_vm1, %v20972_v50  ;;  %v8959_v8 = vsub.f32 %v21158_v39, %v23303_v2  ;;  %v8856_v48 = vmul.f32 %v21196_v11, %v21027_v49  ;;  %v8862_v21 = vmul.f32 %v21196_v11, %v21029_v7  ;;  %v9009_v55 = vmax.f32 %v8961_v26, 0.0  ;;  %v23304_v49 = vld [vmem:[#allocation216_spill] sm:$0xff]  ;;  %v23311_v2 = vld [vmem:[#allocation114_spill] sm:$0xff] }
 0x5f6   :  { %v21187_v5 = vmul.f32 %v17110_v16, %v23302_v53  ;;  %v9003_v53 = vmax.f32 %v8955_v47, 0.0  ;;  %16445 = vmatprep.mubr.msk.f32.mxu0 %vm1809_vm1, %v20983_v41  ;;  %v17118_v16 = vpop.eup %17117  ;;  %v9059_v45 = vadd.f32 0.01, %v9011_v43  ;;  %v9052_v18 = vadd.f32 0.01, %v9004_v46 }
 0x5f7   :  { %v9010_v39 = vmax.f32 %v8962_v35, 0.0  ;;  %v17120_v60 = vpop.eup %17119  ;;  %v9002_v0 = vmax.f32 %v8954_v22, 0.0  ;;  %17135 = vrcp.f32 %v9053_v63  ;;  %v23305_v12 = vsub.f32 %v20811_v56, %v23304_v49  ;;  %v23308_v35 = vld [vmem:[#allocation184_spill] sm:$0xff] }
 0x5f8   :  { %16461 = vmatprep.subr.mxu1 %v21187_v5  ;;  %v23306_v47 = vsub.f32 %v20823_v17, %v23265_v9  ;;  %v17122_v26 = vpop.eup %17121  ;;  %v9008_v43 = vmax.f32 %v8960_v13, 0.0  ;;  %17137 = vrcp.f32 %v9059_v45  ;;  %v23307_v22 = vsub.f32 %v20833_v6, %v23274_v27  ;;  %v23310_v27 = vld [vmem:[#allocation212_spill] sm:$0xff]  ;;  %v23312_v45 = vld [vmem:[#allocation185_spill] sm:$0xff] }
 0x5f9   :  { %16462 = vmatpush3.msra.mxu1 %v21187_v5  ;;  %v21209_v7 = vmul.f32 %v17116_v57, %v23305_v12  ;;  %v9058_v46 = vadd.f32 0.01, %v9010_v39  ;;  %16446 = vmatmul.mubr.msk.f32.gmra.mxu0 %vm1809_vm1, %v21015_v54  ;;  %v17124_v56 = vpop.eup %17123  ;;  %v8952_v17 = vsub.f32 %v8856_v48, %v23308_v35  ;;  %v9051_v9 = vadd.f32 0.01, %v9003_v53  ;;  %v23313_v53 = vld [vmem:[#allocation214_spill] sm:$0xff] }
 0x5fa   :  { %v21214_v1 = vmul.f32 %v17118_v16, %v23306_v47  ;;  %16464 = vmatmul.mubr.msk.f32.vlgmr.msra.gmra.mxu1 %vm1809_vm1, %v20972_v50  ;;  %v21221_v63 = vmul.f32 %v17120_v60, %v23307_v22  ;;  %17139 = vrcp.f32 %v9052_v18  ;;  %v23309_v13 = vsub.f32 %v20936_v24, %v23279_v40  ;;  %v17126_v6 = vpop.eup %17125  ;;  %v23314_v18 = vld [vmem:[#allocation115_spill] sm:$0xff]  ;;  %v23315_v40 = vld [vmem:[#allocation113_spill] sm:$0xff]  ;;  %v23319_v22 = vld [vmem:[#allocation116_spill] sm:$0xff]  ;;  %16448 = vmatprep.mubr.msk.f32.mxu0 %vm1809_vm1, %v21023_v30 }
 0x5fb   :  { %16472 = vmatprep.subr.mxu0 %v21209_v7  ;;  %v7093_v16 = vsub.f32 %v23311_v2, %v23310_v27  ;;  %v8958_v39 = vsub.f32 %v8862_v21, %v23312_v45  ;;  %v9057_v60 = vadd.f32 0.01, %v9009_v55  ;;  %17141 = vrcp.f32 %v9058_v46  ;;  %v17128_v48 = vpop.eup %17127  ;;  %v23316_v47 = vld [vmem:[#allocation211_spill] sm:$0xff]  ;;  %16466 = vmatprep.mubr.msk.f32.mxu1 %vm1809_vm1, %v20983_v41  ;;  %v23320_v2 = vld [vmem:[#allocation124_spill] sm:$0xff] }
 0x5fc   :  { %16493 = vmatprep.subr.mxu1 %v21214_v1  ;;  %v21231_v57 = vmul.f32 %v17122_v26, %v23309_v13  ;;  %16473 = vmatpush3.msra.mxu0 %v21209_v7  ;;  %v7086_v49 = vsub.f32 %v23314_v18, %v23313_v53  ;;  %v9001_v12 = vmax.f32 %v8953_v44, 0.0  ;;  %v9050_v24 = vadd.f32 0.01, %v9002_v0  ;;  %v17130_v55 = vpop.eup %17129  ;;  %v23318_v46 = vld [vmem:[#allocation215_spill] sm:$0xff]  ;;  %v23321_v53 = vld [vmem:[#allocation125_spill] sm:$0xff] }
 0x5fd   :  { %16494 = vmatpush3.msra.mxu1 %v21214_v1  ;;  %16474 = vmatprep.subr.mxu0 %v21221_v63  ;;  %v23317_v26 = vsub.f32 %v23315_v40, %v23316_v47  ;;  %v7092_v35 = vsub.f32 %v23319_v22, %v23318_v46  ;;  %v9007_v13 = vmax.f32 %v8959_v8, 0.0  ;;  %v9056_v27 = vadd.f32 0.01, %v9008_v43  ;;  %v17132_v0 = vpop.eup %17131  ;;  %v23322_v40 = vld [vmem:[#allocation206_spill] sm:$0xff] }
 0x5fe   :  { %16495 = vmatprep.subr.mxu1 %v21231_v57  ;;  %16475 = vmatpush3.msra.mxu0 %v21221_v63  ;;  %v21252_v44 = vmul.f32 %v17124_v56, %v7093_v16  ;;  %v6988_v45 = vmul.f32 %v21196_v11, %v23320_v2  ;;  %v9000_v18 = vmax.f32 %v8952_v17, 0.0  ;;  %17143 = vrcp.f32 %v9051_v9  ;;  %v17134_v16 = vpop.eup %17133  ;;  %v23323_v47 = vld [vmem:[#allocation146_spill] sm:$0xff] }
 0x5ff   :  { %v21245_v21 = vmul.f32 %v17114_v14, %v23317_v26  ;;  %v6994_v14 = vmul.f32 %v21196_v11, %v23321_v53  ;;  %16496 = vmatpush3.msra.mxu1 %v21231_v57  ;;  %v9006_v8 = vmax.f32 %v8958_v39, 0.0  ;;  %17145 = vrcp.f32 %v9057_v60  ;;  %v23324_v9 = vld [vmem:[#allocation142_spill] sm:$0xff]  ;;  %v23325_v39 = vld [vmem:[#allocation207_spill] sm:$0xff]  ;;  %v23326_v60 = vld [vmem:[#allocation112_spill] sm:$0xff]  ;;  %16449 = vmatmul.mubr.msk.f32.gmra.mxu0 %vm1809_vm1, %v21136_v23 }
 0x600   :  { %16467 = vmatmul.mubr.msk.f32.gmra.mxu1 %vm1809_vm1, %v21015_v54  ;;  %16497 = vmatprep.subr.mxu1 %v21252_v44  ;;  %v21263_v43 = vmul.f32 %v17126_v6, %v7086_v49  ;;  %v21265_v56 = vmul.f32 %v17128_v48, %v7092_v35  ;;  %v7085_v17 = vsub.f32 %v23323_v47, %v23322_v40  ;;  %v9049_v46 = vadd.f32 0.01, %v9001_v12  ;;  %v23327_v6 = vld [vmem:[#allocation143_spill] sm:$0xff]  ;;  %v23328_v35 = vld [vmem:[#allocation208_spill] sm:$0xff]  ;;  %v23329_v12 = vld [vmem:[#allocation210_spill] sm:$0xff] }
 0x601   :  { %16476 = vmatprep.subr.mxu0 %v21245_v21  ;;  %v7005_v26 = vmul.f32 %v21101_v20, %v23324_v9  ;;  %17147 = vrcp.f32 %v9050_v24  ;;  %16498 = vmatpush3.msra.mxu1 %v21252_v44  ;;  %v7091_v22 = vsub.f32 %v23326_v60, %v23325_v39  ;;  %v7011_v48 = vmul.f32 %v21101_v20, %v23327_v6  ;;  %v23330_v53 = vld [vmem:[#allocation144_spill] sm:$0xff]  ;;  %v23331_v20 = vld [vmem:[#allocation145_spill] sm:$0xff]  ;;  %v23333_v9 = vld [vmem:[#allocation103_spill] sm:$0xff] }
 0x602   :  { %16477 = vmatpush3.msra.mxu0 %v21245_v21  ;;  %v9055_v49 = vadd.f32 0.01, %v9007_v13  ;;  %17149 = vrcp.f32 %v9056_v27  ;;  %16499 = vmatprep.subr.mxu1 %v21265_v56  ;;  %v7084_v2 = vsub.f32 %v6988_v45, %v23328_v35  ;;  %v7090_v24 = vsub.f32 %v6994_v14, %v23329_v12  ;;  %v23334_v60 = vld [vmem:[#allocation60_spill] sm:$0xff]  ;;  %v23336_v12 = vld [vmem:[#allocation219_spill] sm:$0xff] }
 0x603   :  { %16478 = vmatprep.subr.mxu0 %v21263_v43  ;;  %v7004_v40 = vmul.f32 %v21146_v31, %v23330_v53  ;;  %v9048_v47 = vadd.f32 0.01, %v9000_v18  ;;  %16469 = vmatprep.mubr.msk.f32.mxu1 %vm1809_vm1, %v21023_v30  ;;  %v7010_v13 = vmul.f32 %v21146_v31, %v23331_v20  ;;  %v9054_v27 = vadd.f32 0.01, %v9006_v8  ;;  %v23332_v18 = vld [vmem:[#allocation59_spill] sm:$0xff]  ;;  %v23335_v6 = vld [vmem:[#allocation104_spill] sm:$0xff] }
 0x604   :  { %16479 = vmatpush3.msra.mxu0 %v21263_v43  ;;  %16500 = vmatpush3.msra.mxu1 %v21265_v56  ;;  %v21292_v45 = vmul.f32 %v21123_v25, %v7085_v17  ;;  %v21294_v14 = vmul.f32 %v17130_v55, %v7091_v22  ;;  %v7052_v39 = vmul.f32 %v23333_v9, %v23332_v18  ;;  %17151 = vrcp.f32 %v9049_v46  ;;  %v17136_v31 = vpop.eup %17135  ;;  %v23337_v25 = vld [vmem:[#allocation102_spill] sm:$0xff]  ;;  %v23340_v46 = vld [vmem:[#allocation95_spill] sm:$0xff]  ;;  %v23342_v20 = vld [vmem:[#allocation96_spill] sm:$0xff] }
 0x605   :  { %v7058_v35 = vmul.f32 %v23335_v6, %v23334_v60  ;;  %v7101_v53 = vsub.f32 %v7005_v26, %v23336_v12  ;;  %16470 = vmatmul.mubr.msk.f32.gmra.mxu1 %vm1809_vm1, %v21136_v23  ;;  %v7107_v8 = vsub.f32 %v7011_v48, %v23337_v25  ;;  %17153 = vrcp.f32 %v9055_v49  ;;  %v17138_v26 = vpop.eup %17137  ;;  %v23348_v25 = vld [vmem:[#allocation138_spill] sm:$0xff]  ;;  %16484 = vmatprep.mubr.msk.f32.mxu0 %vm1809_vm1, %v21172_v59 }
 0x606   :  { %16480 = vmatprep.subr.mxu0 %v21292_v45  ;;  %16501 = vmatprep.subr.mxu1 %v21294_v14  ;;  %v21308_v55 = vmul.f32 %v17132_v0, %v7084_v2  ;;  %v21310_v17 = vmul.f32 %v17134_v16, %v7090_v24  ;;  %v21314_v22 = vmul.f32 %v21092_v34, %v23340_v46  ;;  %17155 = vrcp.f32 %v9048_v47  ;;  %v23344_v24 = vld [vmem:[#allocation97_spill] sm:$0xff]  ;;  %v23346_v47 = vld [vmem:[#allocation98_spill] sm:$0xff]  ;;  %v23352_v46 = vld [vmem:[#allocation92_spill] sm:$0xff] }
 0x607   :  { %v21318_v12 = vmul.f32 %v21092_v34, %v23342_v20  ;;  %v7100_v6 = vsub.f32 %v7004_v40, %v7052_v39  ;;  %16481 = vmatpush3.msra.mxu0 %v21292_v45  ;;  %16502 = vmatpush3.msra.mxu1 %v21294_v14  ;;  %v17140_v48 = vpop.eup %17139  ;;  %v7106_v0 = vsub.f32 %v7010_v13, %v7058_v35  ;;  %17157 = vrcp.f32 %v9054_v27  ;;  %v23349_v27 = vld [vmem:[#allocation139_spill] sm:$0xff]  ;;  %v23359_v9 = vld [vmem:[#allocation94_spill] sm:$0xff] }
 0x608   :  { %23338 = vst [vmem:[#allocation123_spill] sm:$0xff] %v21308_v55  ;;  %23339 = vst [vmem:[#allocation147_spill] sm:$0xff] %v21310_v17  ;;  %16482 = vmatprep.subr.mxu0 %v21308_v55  ;;  %16503 = vmatprep.subr.mxu1 %v21310_v17  ;;  %v21324_v16 = vmul.f32 %v17136_v31, %v7101_v53  ;;  %v21326_v49 = vmul.f32 %v17138_v26, %v7107_v8  ;;  %v17142_v2 = vpop.eup %17141  ;;  %v23350_v8 = vld [vmem:[#allocation91_spill] sm:$0xff] }
 0x609   :  { %23341 = vst [vmem:[#allocation152_spill] sm:$0xff] %v21314_v22  ;;  %23343 = vst [vmem:[#allocation151_spill] sm:$0xff] %v21318_v12  ;;  %v21330_v40 = vmul.f32 %v21128_v33, %v23344_v24  ;;  %v21334_v39 = vmul.f32 %v21128_v33, %v23346_v47  ;;  %v7003_v13 = vmul.f32 %v21092_v34, %v23348_v25  ;;  %16483 = vmatpush3.msra.mxu0 %v21308_v55  ;;  %v23354_v24 = vld [vmem:[#allocation140_spill] sm:$0xff]  ;;  %v23357_v25 = vld [vmem:[#allocation141_spill] sm:$0xff] }
 0x60a   :  { %v7009_v35 = vmul.f32 %v21092_v34, %v23349_v27  ;;  %16504 = vmatpush3.msra.mxu1 %v21310_v17  ;;  %16505 = vmatprep.mubr.msk.f32.mxu1 %vm1809_vm1, %v21172_v59  ;;  %v21346_v53 = vmul.f32 %v17140_v48, %v7100_v6  ;;  %v21348_v31 = vmul.f32 %v17142_v2, %v7106_v0  ;;  %v23355_v48 = vld [vmem:[#allocation53_spill] sm:$0xff]  ;;  %v23356_v2 = vld [vmem:[#allocation54_spill] sm:$0xff]  ;;  %v23363_v55 = vld [vmem:[#allocation135_spill] sm:$0xff] }
 0x60b   :  { %23345 = vst [vmem:[#allocation154_spill] sm:$0xff] %v21330_v40  ;;  %23347 = vst [vmem:[#allocation155_spill] sm:$0xff] %v21334_v39  ;;  %v21352_v26 = vmul.f32 %v21110_v29, %v23350_v8  ;;  %v21356_v20 = vmul.f32 %v21110_v29, %v23352_v46  ;;  %v7002_v34 = vmul.f32 %v21128_v33, %v23354_v24  ;;  %16485 = vmatmul.mubr.msk.f32.vlgmr.msra.gmra.mxu0 %vm1809_vm1, %v20972_v50  ;;  %v17144_v6 = vpop.eup %17143  ;;  %v23358_v46 = vld [vmem:[#allocation93_spill] sm:$0xff] }
 0x60c   :  { %16506 = vmatmul.mubr.msk.f32.vlgmr.msra.gmra.mxu1 %vm1809_vm1, %v20972_v50  ;;  %v7051_v0 = vmul.f32 %v21314_v22, %v23355_v48  ;;  %v7057_v47 = vmul.f32 %v21318_v12, %v23356_v2  ;;  %v7008_v27 = vmul.f32 %v21128_v33, %v23357_v25  ;;  %16514 = vmatprep.subr.mxu0 %v21324_v16  ;;  %v17146_v8 = vpop.eup %17145  ;;  %v23360_v22 = vld [vmem:[#allocation55_spill] sm:$0xff]  ;;  %v23361_v25 = vld [vmem:[#allocation56_spill] sm:$0xff] }
 0x60d   :  { %23351 = vst [vmem:[#allocation148_spill] sm:$0xff] %v21352_v26  ;;  %23353 = vst [vmem:[#allocation153_spill] sm:$0xff] %v21356_v20  ;;  %16535 = vmatprep.subr.mxu1 %v21326_v49  ;;  %v21374_v24 = vmul.f32 %v21196_v11, %v23358_v46  ;;  %v21378_v60 = vmul.f32 %v21196_v11, %v23359_v9  ;;  %v7050_v48 = vmul.f32 %v21330_v40, %v23360_v22  ;;  %v23362_v9 = vld [vmem:[#allocation134_spill] sm:$0xff] }
 0x60e   :  { %16515 = vmatpush3.msra.mxu0 %v21324_v16  ;;  %16536 = vmatpush3.msra.mxu1 %v21326_v49  ;;  %v17148_v33 = vpop.eup %17147  ;;  %v7056_v12 = vmul.f32 %v21334_v39, %v23361_v25  ;;  %v7099_v2 = vsub.f32 %v7003_v13, %v7051_v0  ;;  %v7105_v18 = vsub.f32 %v7009_v35, %v7057_v47  ;;  %v23364_v47 = vld [vmem:[#allocation49_spill] sm:$0xff]  ;;  %v23369_v39 = vld [vmem:[#allocation52_spill] sm:$0xff] }
 0x60f   :  { %16516 = vmatprep.subr.mxu0 %v21346_v53  ;;  %16537 = vmatprep.subr.mxu1 %v21348_v31  ;;  %v17150_v46 = vpop.eup %17149  ;;  %v7001_v17 = vmul.f32 %v21110_v29, %v23362_v9  ;;  %v7007_v40 = vmul.f32 %v21110_v29, %v23363_v55  ;;  %v7098_v22 = vsub.f32 %v7002_v34, %v7050_v48  ;;  %v23365_v29 = vld [vmem:[#allocation50_spill] sm:$0xff]  ;;  %v23366_v34 = vld [vmem:[#allocation136_spill] sm:$0xff] }
 0x610   :  { %16487 = vmatprep.mubr.msk.f32.mxu0 %vm1809_vm1, %v20983_v41  ;;  %16508 = vmatprep.mubr.msk.f32.mxu1 %vm1809_vm1, %v20983_v41  ;;  %v7104_v13 = vsub.f32 %v7008_v27, %v7056_v12  ;;  %v21398_v35 = vmul.f32 %v17144_v6, %v7099_v2  ;;  %v21400_v0 = vmul.f32 %v17146_v8, %v7105_v18  ;;  %v23367_v6 = vld [vmem:[#allocation137_spill] sm:$0xff] }
 0x611   :  { %16517 = vmatpush3.msra.mxu0 %v21346_v53  ;;  %16538 = vmatpush3.msra.mxu1 %v21348_v31  ;;  %v7049_v9 = vmul.f32 %v21352_v26, %v23364_v47  ;;  %v7055_v55 = vmul.f32 %v21356_v20, %v23365_v29  ;;  %v7000_v48 = vmul.f32 %v21196_v11, %v23366_v34  ;;  %v17152_v12 = vpop.eup %17151  ;;  %v23368_v34 = vld [vmem:[#allocation51_spill] sm:$0xff] }
 0x612   :  { %16488 = vmatmul.mubr.msk.f32.gmra.mxu0 %vm1809_vm1, %v21015_v54  ;;  %16509 = vmatmul.mubr.msk.f32.gmra.mxu1 %vm1809_vm1, %v21015_v54  ;;  %v7006_v18 = vmul.f32 %v21196_v11, %v23367_v6  ;;  %v21416_v2 = vmul.f32 %v17148_v33, %v7098_v22  ;;  %v21418_v27 = vmul.f32 %v17150_v46, %v7104_v13  ;;  %v17154_v8 = vpop.eup %17153 }
 0x613   :  { %16518 = vmatprep.subr.mxu0 %v21398_v35  ;;  %16539 = vmatprep.subr.mxu1 %v21400_v0  ;;  %v7048_v20 = vmul.f32 %v21374_v24, %v23368_v34  ;;  %v17156_v26 = vpop.eup %17155  ;;  %v7054_v11 = vmul.f32 %v21378_v60, %v23369_v39  ;;  %v7097_v6 = vsub.f32 %v7001_v17, %v7049_v9 }
 0x614   :  { %16519 = vmatpush3.msra.mxu0 %v21398_v35  ;;  %16540 = vmatpush3.msra.mxu1 %v21400_v0  ;;  %v7103_v29 = vsub.f32 %v7007_v40, %v7055_v55  ;;  %v17158_v22 = vpop.eup %17157 }
 0x615   :  { %16520 = vmatprep.subr.mxu0 %v21416_v2  ;;  %16541 = vmatprep.subr.mxu1 %v21418_v27  ;;  %v7096_v33 = vsub.f32 %v7000_v48, %v7048_v20  ;;  %v7102_v46 = vsub.f32 %v7006_v18, %v7054_v11  ;;  %v21434_v13 = vmul.f32 %v17152_v12, %v7097_v6 }
 0x616   :  { %16490 = vmatprep.mubr.msk.f32.mxu0 %vm1809_vm1, %v21023_v30  ;;  %16511 = vmatprep.mubr.msk.f32.mxu1 %vm1809_vm1, %v21023_v30  ;;  %v21436_v17 = vmul.f32 %v17154_v8, %v7103_v29 }
 0x617   :  { %16521 = vmatpush3.msra.mxu0 %v21416_v2  ;;  %16542 = vmatpush3.msra.mxu1 %v21418_v27  ;;  %v21444_v40 = vmul.f32 %v17156_v26, %v7096_v33  ;;  %v21446_v20 = vmul.f32 %v17158_v22, %v7102_v46  ;;  %v21469_v26 = vld [vmem:[%s22566_s5 + $0x28] sm:$0xff] }
 0x618   :  { %16491 = vmatmul.mubr.msk.f32.gmra.mxu0 %vm1809_vm1, %v21136_v23  ;;  %16512 = vmatmul.mubr.msk.f32.gmra.mxu1 %vm1809_vm1, %v21136_v23 }
 0x619   :  { %16522 = vmatprep.subr.mxu0 %v21434_v13  ;;  %16543 = vmatprep.subr.mxu1 %v21436_v17 }
 0x61a   :  { %16523 = vmatpush3.msra.mxu0 %v21434_v13  ;;  %16544 = vmatpush3.msra.mxu1 %v21436_v17 }
 0x61b   :  { %16524 = vmatprep.subr.mxu0 %v21444_v40  ;;  %16545 = vmatprep.subr.mxu1 %v21446_v20 }
 0x61c   :  { %16525 = vmatpush3.msra.mxu0 %v21444_v40  ;;  %16526 = vmatprep.mubr.msk.f32.mxu0 %vm1809_vm1, %v21172_v59 }
 0x61d   :  { %16546 = vmatpush3.msra.mxu1 %v21446_v20  ;;  %16547 = vmatprep.mubr.msk.f32.mxu1 %vm1809_vm1, %v21172_v59 }
 0x61e   :  { %16527 = vmatmul.mubr.msk.f32.vlgmr.msra.gmra.mxu0 %vm1809_vm1, %v20972_v50  ;;  %16548 = vmatmul.mubr.msk.f32.vlgmr.msra.gmra.mxu1 %vm1809_vm1, %v20972_v50  ;;  %v21486_v50 = vld [vmem:[%s22566_s5 + $0x20] sm:$0xff] }
 0x61f   :  { %16529 = vmatprep.mubr.msk.f32.mxu0 %vm1809_vm1, %v20983_v41  ;;  %16550 = vmatprep.mubr.msk.f32.mxu1 %vm1809_vm1, %v20983_v41  ;;  %v21499_v41 = vld [vmem:[%s22566_s5 + $0x18] sm:$0xff] }
 0x620   :  { %16556 = vmatprep.subr.mxu0 %v21469_v26  ;;  %16577 = vmatprep.subr.mxu1 %v21469_v26 }
 0x621   :  { %16557 = vmatpush3.msra.mxu0 %v21469_v26  ;;  %16578 = vmatpush3.msra.mxu1 %v21469_v26 }
 0x622   :  { %16530 = vmatmul.mubr.msk.f32.gmra.mxu0 %vm1809_vm1, %v21015_v54  ;;  %16551 = vmatmul.mubr.msk.f32.gmra.mxu1 %vm1809_vm1, %v21015_v54  ;;  %v21508_v54 = vld [vmem:[%s22566_s5 + $0x10] sm:$0xff] }
 0x623   :  { %16532 = vmatprep.mubr.msk.f32.mxu0 %vm1809_vm1, %v21023_v30  ;;  %16553 = vmatprep.mubr.msk.f32.mxu1 %vm1809_vm1, %v21023_v30  ;;  %23370 = vst [vmem:[#allocation156_spill] sm:$0xff] %v21508_v54  ;;  %v21517_v30 = vld [vmem:[%s22566_s5 + $0x8] sm:$0xff] }
 0x624   :  { %16558 = vmatprep.subr.mxu0 %v21486_v50  ;;  %16579 = vmatprep.subr.mxu1 %v21486_v50  ;;  %23371 = vst [vmem:[#allocation126_spill] sm:$0xff] %v21517_v30 }
 0x625   :  { %16559 = vmatpush3.msra.mxu0 %v21486_v50  ;;  %16580 = vmatpush3.msra.mxu1 %v21486_v50 }
 0x626   :  { %16533 = vmatmul.mubr.msk.f32.gmra.mxu0 %vm1809_vm1, %v21136_v23  ;;  %16554 = vmatmul.mubr.msk.f32.gmra.mxu1 %vm1809_vm1, %v21136_v23  ;;  %v21526_v23 = vld [vmem:[%s22566_s5] sm:$0xff] }
 0x627   :  { %16560 = vmatprep.subr.mxu0 %v21499_v41  ;;  %16581 = vmatprep.subr.mxu1 %v21499_v41  ;;  %23372 = vst [vmem:[#allocation149_spill] sm:$0xff] %v21526_v23 }
 0x628   :  { %16561 = vmatpush3.msra.mxu0 %v21499_v41  ;;  %16582 = vmatpush3.msra.mxu1 %v21499_v41 }
 0x629   :  { %16562 = vmatprep.subr.mxu0 %v21508_v54  ;;  %16583 = vmatprep.subr.mxu1 %v21508_v54 }
 0x62a   :  { %16563 = vmatpush3.msra.mxu0 %v21508_v54  ;;  %16584 = vmatpush3.msra.mxu1 %v21508_v54 }
 0x62b   :  { %16564 = vmatprep.subr.mxu0 %v21517_v30  ;;  %16585 = vmatprep.subr.mxu1 %v21517_v30 }
 0x62c   :  { %16565 = vmatpush3.msra.mxu0 %v21517_v30  ;;  %16586 = vmatpush3.msra.mxu1 %v21517_v30 }
 0x62d   :  { %16566 = vmatprep.subr.mxu0 %v21526_v23  ;;  %16587 = vmatprep.subr.mxu1 %v21526_v23 }
 0x62e   :  { %16567 = vmatpush3.msra.mxu0 %v21526_v23  ;;  %16588 = vmatpush3.msra.mxu1 %v21526_v23 }
 0x62f   :  { %16598 = vmatprep.subr.mxu0 %v21469_v26  ;;  %16619 = vmatprep.subr.mxu1 %v21469_v26 }
 0x69e   :  { %v16402_v9 = vpop.f32.mrf.mxu0 }
 0x6a0   :  { %v9318_v29 = vpop.f32.mrf.mxu0 }
 0x6a1   :  { %v16423_v55 = vpop.f32.mrf.mxu1  ;;  %16568 = vmatprep.mubr.msk.f32.mxu0 %vm1809_vm1, %v9318_v29 }
 0x6a2   :  { %v16405_v48 = vpop.f32.mrf.mxu0  ;;  %16569 = vmatmul.mubr.msk.f32.vlgmr.msra.gmra.mxu0 %vm1809_vm1, %v16402_v9 }
 0x6a3   :  { %v9413_v12 = vpop.f32.mrf.mxu1  ;;  %16599 = vmatpush3.msra.mxu0 %v21469_v26 }
 0x6a4   :  { %16589 = vmatprep.mubr.msk.f32.mxu1 %vm1809_vm1, %v9413_v12  ;;  %16600 = vmatprep.subr.mxu0 %v21486_v50  ;;  %v9328_v18 = vpop.f32.mrf.mxu0 }
 0x6a5   :  { %16590 = vmatmul.mubr.msk.f32.vlgmr.msra.gmra.mxu1 %vm1809_vm1, %v16423_v55  ;;  %16601 = vmatpush3.msra.mxu0 %v21486_v50 }
 0x6a6   :  { %16620 = vmatpush3.msra.mxu1 %v21469_v26  ;;  %16571 = vmatprep.mubr.msk.f32.mxu0 %vm1809_vm1, %v9328_v18  ;;  %v16426_v8 = vpop.f32.mrf.mxu1 }
 0x6a7   :  { %16621 = vmatprep.subr.mxu1 %v21486_v50  ;;  %16602 = vmatprep.subr.mxu0 %v21499_v41 }
 0x6a8   :  { %16622 = vmatpush3.msra.mxu1 %v21486_v50  ;;  %16572 = vmatmul.mubr.msk.f32.gmra.mxu0 %vm1809_vm1, %v16405_v48  ;;  %v9423_v11 = vpop.f32.mrf.mxu1 }
 0x6a9   :  { %16623 = vmatprep.subr.mxu1 %v21499_v41  ;;  %16603 = vmatpush3.msra.mxu0 %v21499_v41 }
 0x6aa   :  { %16624 = vmatpush3.msra.mxu1 %v21499_v41  ;;  %16604 = vmatprep.subr.mxu0 %v21508_v54 }
 0x6ab   :  { %16592 = vmatprep.mubr.msk.f32.mxu1 %vm1809_vm1, %v9423_v11  ;;  %16625 = vmatprep.subr.mxu1 %v21508_v54 }
 0x6ac   :  { %16593 = vmatmul.mubr.msk.f32.gmra.mxu1 %vm1809_vm1, %v16426_v8  ;;  %16605 = vmatpush3.msra.mxu0 %v21508_v54 }
 0x6ad   :  { %16626 = vmatpush3.msra.mxu1 %v21508_v54  ;;  %16606 = vmatprep.subr.mxu0 %v21517_v30 }
 0x6ae   :  { %16627 = vmatprep.subr.mxu1 %v21517_v30  ;;  %16607 = vmatpush3.msra.mxu0 %v21517_v30 }
 0x6af   :  { %16628 = vmatpush3.msra.mxu1 %v21517_v30  ;;  %16608 = vmatprep.subr.mxu0 %v21526_v23 }
 0x6b0   :  { %v16408_v6 = vpop.f32.mrf.mxu0  ;;  %v16429_v22 = vpop.f32.mrf.mxu1  ;;  %16629 = vmatprep.subr.mxu1 %v21526_v23  ;;  %16609 = vmatpush3.msra.mxu0 %v21526_v23 }
 0x6b1   :  { %16630 = vmatpush3.msra.mxu1 %v21526_v23  ;;  %16640 = vmatprep.subr.mxu0 %v21469_v26 }
 0x6b2   :  { %v9338_v33 = vpop.f32.mrf.mxu0  ;;  %v9433_v46 = vpop.f32.mrf.mxu1  ;;  %16661 = vmatprep.subr.mxu1 %v21469_v26 }
 0x6b3   :  { %16574 = vmatprep.mubr.msk.f32.mxu0 %vm1809_vm1, %v9338_v33  ;;  %16595 = vmatprep.mubr.msk.f32.mxu1 %vm1809_vm1, %v9433_v46 }
 0x6b4   :  { %16575 = vmatmul.mubr.msk.f32.gmra.mxu0 %vm1809_vm1, %v16408_v6  ;;  %16596 = vmatmul.mubr.msk.f32.gmra.mxu1 %vm1809_vm1, %v16429_v22 }
 0x6b5   :  { %v16444_v9 = vpop.f32.mrf.mxu0 }
 0x6b7   :  { %v9508_v29 = vpop.f32.mrf.mxu0 }
 0x6b8   :  { %16610 = vmatprep.mubr.msk.f32.mxu0 %vm1809_vm1, %v9508_v29 }
 0x6b9   :  { %v16447_v48 = vpop.f32.mrf.mxu0  ;;  %16611 = vmatmul.mubr.msk.f32.vlgmr.msra.gmra.mxu0 %vm1809_vm1, %v16444_v9 }
 0x6ba   :  { %v16465_v55 = vpop.f32.mrf.mxu1  ;;  %16641 = vmatpush3.msra.mxu0 %v21469_v26 }
 0x6bb   :  { %16642 = vmatprep.subr.mxu0 %v21486_v50  ;;  %v9518_v18 = vpop.f32.mrf.mxu0 }
 0x6bc   :  { %v9603_v12 = vpop.f32.mrf.mxu1  ;;  %16643 = vmatpush3.msra.mxu0 %v21486_v50  ;;  %16613 = vmatprep.mubr.msk.f32.mxu0 %vm1809_vm1, %v9518_v18 }
 0x6bd   :  { %16631 = vmatprep.mubr.msk.f32.mxu1 %vm1809_vm1, %v9603_v12  ;;  %16644 = vmatprep.subr.mxu0 %v21499_v41 }
 0x6be   :  { %16632 = vmatmul.mubr.msk.f32.vlgmr.msra.gmra.mxu1 %vm1809_vm1, %v16465_v55  ;;  %16614 = vmatmul.mubr.msk.f32.gmra.mxu0 %vm1809_vm1, %v16447_v48 }
 0x6bf   :  { %16662 = vmatpush3.msra.mxu1 %v21469_v26  ;;  %16645 = vmatpush3.msra.mxu0 %v21499_v41  ;;  %v16450_v6 = vpop.f32.mrf.mxu0 }
 0x6c0   :  { %v16468_v8 = vpop.f32.mrf.mxu1  ;;  %16663 = vmatprep.subr.mxu1 %v21486_v50  ;;  %16646 = vmatprep.subr.mxu0 %v21508_v54 }
 0x6c1   :  { %16664 = vmatpush3.msra.mxu1 %v21486_v50  ;;  %16647 = vmatpush3.msra.mxu0 %v21508_v54  ;;  %v9528_v33 = vpop.f32.mrf.mxu0 }
 0x6c2   :  { %v9613_v11 = vpop.f32.mrf.mxu1  ;;  %16665 = vmatprep.subr.mxu1 %v21499_v41  ;;  %16648 = vmatprep.subr.mxu0 %v21517_v30 }
 0x6c3   :  { %16634 = vmatprep.mubr.msk.f32.mxu1 %vm1809_vm1, %v9613_v11  ;;  %16666 = vmatpush3.msra.mxu1 %v21499_v41 }
 0x6c4   :  { %16635 = vmatmul.mubr.msk.f32.gmra.mxu1 %vm1809_vm1, %v16468_v8  ;;  %16667 = vmatprep.subr.mxu1 %v21508_v54 }
 0x6c5   :  { %v16471_v22 = vpop.f32.mrf.mxu1  ;;  %16668 = vmatpush3.msra.mxu1 %v21508_v54  ;;  %16649 = vmatpush3.msra.mxu0 %v21517_v30 }
 0x6c6   :  { %16669 = vmatprep.subr.mxu1 %v21517_v30  ;;  %16616 = vmatprep.mubr.msk.f32.mxu0 %vm1809_vm1, %v9528_v33 }
 0x6c7   :  { %v9623_v46 = vpop.f32.mrf.mxu1  ;;  %16670 = vmatpush3.msra.mxu1 %v21517_v30  ;;  %16617 = vmatmul.mubr.msk.f32.gmra.mxu0 %vm1809_vm1, %v16450_v6 }
 0x6c8   :  { %16637 = vmatprep.mubr.msk.f32.mxu1 %vm1809_vm1, %v9623_v46  ;;  %16650 = vmatprep.subr.mxu0 %v21526_v23 }
 0x6c9   :  { %16638 = vmatmul.mubr.msk.f32.gmra.mxu1 %vm1809_vm1, %v16471_v22  ;;  %16671 = vmatprep.subr.mxu1 %v21526_v23 }
 0x6ca   :  { %16651 = vmatpush3.msra.mxu0 %v21526_v23  ;;  %16672 = vmatpush3.msra.mxu1 %v21526_v23 }
 0x6cb   :  { %v16486_v9 = vpop.f32.mrf.mxu0  ;;  %16682 = vmatprep.subr.mxu0 %v21469_v26  ;;  %16703 = vmatprep.subr.mxu1 %v21469_v26 }
 0x6cc   :  { %v16507_v29 = vpop.f32.mrf.mxu1 }
 0x6cd   :  { %v9698_v55 = vpop.f32.mrf.mxu0 }
 0x6ce   :  { %v9793_v48 = vpop.f32.mrf.mxu1  ;;  %16652 = vmatprep.mubr.msk.f32.mxu0 %vm1809_vm1, %v9698_v55  ;;  %v23374_v55 = vld [vmem:[#allocation22_spill] sm:$0xff] }
 0x6cf   :  { %16673 = vmatprep.mubr.msk.f32.mxu1 %vm1809_vm1, %v9793_v48  ;;  %16653 = vmatmul.mubr.msk.f32.vlgmr.msra.gmra.mxu0 %vm1809_vm1, %v16486_v9  ;;  %v23373_v9 = vld [vmem:[#allocation21_spill] sm:$0xff]  ;;  %v9167_v48 = vmul.f32 %v20866_v37, %v23374_v55  ;;  %v23376_v37 = vld [vmem:[#allocation63_spill] sm:$0xff] }
 0x6d0   :  { %16674 = vmatmul.mubr.msk.f32.vlgmr.msra.gmra.mxu1 %vm1809_vm1, %v16507_v29  ;;  %16683 = vmatpush3.msra.mxu0 %v21469_v26  ;;  %v9161_v29 = vmul.f32 %v20861_v51, %v23373_v9 }
 0x6d1   :  { %16704 = vmatpush3.msra.mxu1 %v21469_v26  ;;  %16684 = vmatprep.subr.mxu0 %v21486_v50 }
 0x6d2   :  { %v16489_v12 = vpop.f32.mrf.mxu0  ;;  %v16510_v18 = vpop.f32.mrf.mxu1  ;;  %16705 = vmatprep.subr.mxu1 %v21486_v50  ;;  %16685 = vmatpush3.msra.mxu0 %v21486_v50 }
 0x6d3   :  { %16706 = vmatpush3.msra.mxu1 %v21486_v50  ;;  %16686 = vmatprep.subr.mxu0 %v21499_v41 }
 0x6d4   :  { %v9708_v8 = vpop.f32.mrf.mxu0  ;;  %v9803_v11 = vpop.f32.mrf.mxu1  ;;  %16707 = vmatprep.subr.mxu1 %v21499_v41  ;;  %16687 = vmatpush3.msra.mxu0 %v21499_v41 }
 0x6d5   :  { %16655 = vmatprep.mubr.msk.f32.mxu0 %vm1809_vm1, %v9708_v8  ;;  %16676 = vmatprep.mubr.msk.f32.mxu1 %vm1809_vm1, %v9803_v11  ;;  %v9209_v11 = vsub.f32 %v23376_v37, %v9161_v29 }
 0x6d6   :  { %16656 = vmatmul.mubr.msk.f32.gmra.mxu0 %vm1809_vm1, %v16489_v12  ;;  %16677 = vmatmul.mubr.msk.f32.gmra.mxu1 %vm1809_vm1, %v16510_v18  ;;  %v23375_v12 = vld [vmem:[#allocation23_spill] sm:$0xff] }
 0x6d7   :  { %16708 = vmatpush3.msra.mxu1 %v21499_v41  ;;  %16688 = vmatprep.subr.mxu0 %v21508_v54  ;;  %v9160_v18 = vmul.f32 %v20877_v42, %v23375_v12  ;;  %v23379_v42 = vld [vmem:[#allocation17_spill] sm:$0xff]  ;;  %v23380_v12 = vld [vmem:[#allocation18_spill] sm:$0xff] }
 0x6d8   :  { %v16492_v6 = vpop.f32.mrf.mxu0  ;;  %v16513_v22 = vpop.f32.mrf.mxu1  ;;  %16709 = vmatprep.subr.mxu1 %v21508_v54  ;;  %16689 = vmatpush3.msra.mxu0 %v21508_v54  ;;  %v9159_v29 = vmul.f32 %v20885_v28, %v23379_v42  ;;  %v23383_v28 = vld [vmem:[#allocation19_spill] sm:$0xff] }
 0x6d9   :  { %16710 = vmatpush3.msra.mxu1 %v21508_v54  ;;  %16690 = vmatprep.subr.mxu0 %v21517_v30  ;;  %v9158_v42 = vmul.f32 %v20897_v3, %v23383_v28  ;;  %v23386_v54 = vld [vmem:[#allocation10_spill] sm:$0xff] }
 0x6da   :  { %v9718_v33 = vpop.f32.mrf.mxu0  ;;  %v9813_v46 = vpop.f32.mrf.mxu1  ;;  %16711 = vmatprep.subr.mxu1 %v21517_v30  ;;  %16691 = vmatpush3.msra.mxu0 %v21517_v30  ;;  %v23394_v28 = vld [vmem:[#allocation14_spill] sm:$0xff] }
 0x6db   :  { %16658 = vmatprep.mubr.msk.f32.mxu0 %vm1809_vm1, %v9718_v33  ;;  %16679 = vmatprep.mubr.msk.f32.mxu1 %vm1809_vm1, %v9813_v46  ;;  %v23377_v33 = vld [vmem:[#allocation64_spill] sm:$0xff] }
 0x6dc   :  { %16659 = vmatmul.mubr.msk.f32.gmra.mxu0 %vm1809_vm1, %v16492_v6  ;;  %16680 = vmatmul.mubr.msk.f32.gmra.mxu1 %vm1809_vm1, %v16513_v22  ;;  %v9215_v46 = vsub.f32 %v23377_v33, %v9167_v48  ;;  %v23378_v6 = vld [vmem:[#allocation24_spill] sm:$0xff]  ;;  %v9165_v48 = vmul.f32 %v20904_v15, %v23380_v12  ;;  %v23381_v33 = vld [vmem:[#allocation65_spill] sm:$0xff] }
 0x6dd   :  { %16712 = vmatpush3.msra.mxu1 %v21517_v30  ;;  %16692 = vmatprep.subr.mxu0 %v21526_v23  ;;  %v9166_v22 = vmul.f32 %v20890_v4, %v23378_v6  ;;  %v9208_v6 = vsub.f32 %v23381_v33, %v9160_v18  ;;  %v23384_v15 = vld [vmem:[#allocation20_spill] sm:$0xff] }
 0x6de   :  { %v16528_v8 = vpop.f32.mrf.mxu0  ;;  %v16549_v51 = vpop.f32.mrf.mxu1  ;;  %16713 = vmatprep.subr.mxu1 %v21526_v23  ;;  %16693 = vmatpush3.msra.mxu0 %v21526_v23  ;;  %v9164_v12 = vmul.f32 %v20921_v32, %v23384_v15  ;;  %v9213_v18 = vsub.f32 %v23386_v54, %v9165_v48  ;;  %v23395_v15 = vld [vmem:[#allocation33_spill] sm:$0xff] }
 0x6df   :  { %16714 = vmatpush3.msra.mxu1 %v21526_v23  ;;  %16724 = vmatprep.subr.mxu0 %v9209_v11  ;;  %v23382_v23 = vld [vmem:[#allocation66_spill] sm:$0xff] }
 0x6e0   :  { %v9888_v9 = vpop.f32.mrf.mxu0  ;;  %v9983_v55 = vpop.f32.mrf.mxu1  ;;  %16745 = vmatprep.subr.mxu1 %v9215_v46  ;;  %v9214_v30 = vsub.f32 %v23382_v23, %v9166_v22  ;;  %v23388_v22 = vld [vmem:[#allocation6_spill] sm:$0xff] }
 0x6e1   :  { %16694 = vmatprep.mubr.msk.f32.mxu0 %vm1809_vm1, %v9888_v9  ;;  %16715 = vmatprep.mubr.msk.f32.mxu1 %vm1809_vm1, %v9983_v55  ;;  %v9163_v32 = vmul.f32 %v20943_v58, %v23388_v22 }
 0x6e2   :  { %v16531_v37 = vpop.f32.mrf.mxu0  ;;  %v16552_v4 = vpop.f32.mrf.mxu1  ;;  %16695 = vmatmul.mubr.msk.f32.vlgmr.msra.gmra.mxu0 %vm1809_vm1, %v16528_v8  ;;  %16716 = vmatmul.mubr.msk.f32.vlgmr.msra.gmra.mxu1 %vm1809_vm1, %v16549_v51  ;;  %v23385_v8 = vld [vmem:[#allocation9_spill] sm:$0xff] }
 0x6e3   :  { %16725 = vmatpush3.msra.mxu0 %v9209_v11  ;;  %16746 = vmatpush3.msra.mxu1 %v9215_v46  ;;  %v9207_v51 = vsub.f32 %v23385_v8, %v9159_v29  ;;  %v23387_v46 = vld [vmem:[#allocation5_spill] sm:$0xff]  ;;  %v23390_v29 = vld [vmem:[#allocation62_spill] sm:$0xff] }
 0x6e4   :  { %16726 = vmatprep.subr.mxu0 %v9208_v6  ;;  %16747 = vmatprep.subr.mxu1 %v9214_v30  ;;  %v9898_v9 = vpop.f32.mrf.mxu0  ;;  %v9993_v55 = vpop.f32.mrf.mxu1  ;;  %v9157_v3 = vmul.f32 %v20849_v10, %v23387_v46  ;;  %v9212_v48 = vsub.f32 %v23390_v29, %v9164_v12  ;;  %v9173_v12 = vmul.f32 %v20999_v61, %v23395_v15  ;;  %v23396_v8 = vld [vmem:[#allocation34_spill] sm:$0xff]  ;;  %v23401_v61 = vld [vmem:[#allocation117_spill] sm:$0xff]  ;;  %v23412_v15 = vld [vmem:[#allocation32_spill] sm:$0xff] }
 0x6e5   :  { %16727 = vmatpush3.msra.mxu0 %v9208_v6  ;;  %16748 = vmatpush3.msra.mxu1 %v9214_v30  ;;  %v23389_v30 = vld [vmem:[#allocation61_spill] sm:$0xff] }
 0x6e6   :  { %16697 = vmatprep.mubr.msk.f32.mxu0 %vm1809_vm1, %v9898_v9  ;;  %16718 = vmatprep.mubr.msk.f32.mxu1 %vm1809_vm1, %v9993_v55  ;;  %v16534_v23 = vpop.f32.mrf.mxu0  ;;  %v16555_v11 = vpop.f32.mrf.mxu1  ;;  %v9206_v54 = vsub.f32 %v23389_v30, %v9158_v42  ;;  %v23391_v9 = vld [vmem:[#allocation15_spill] sm:$0xff]  ;;  %v23392_v55 = vld [vmem:[#allocation16_spill] sm:$0xff]  ;;  %v9211_v42 = vsub.f32 %v23394_v28, %v9163_v32  ;;  %v23404_v29 = vld [vmem:[#allocation29_spill] sm:$0xff] }
 0x6e7   :  { %16728 = vmatprep.subr.mxu0 %v9207_v51  ;;  %16749 = vmatprep.subr.mxu1 %v9213_v18  ;;  %v9156_v10 = vmul.f32 %v20932_v62, %v23391_v9  ;;  %v9162_v58 = vmul.f32 %v20955_v52, %v23392_v55  ;;  %v9179_v62 = vmul.f32 %v21008_v19, %v23396_v8  ;;  %v23397_v52 = vld [vmem:[#allocation7_spill] sm:$0xff]  ;;  %v23400_v32 = vld [vmem:[#allocation36_spill] sm:$0xff] }
 0x6e8   :  { %16698 = vmatmul.mubr.msk.f32.gmra.mxu0 %vm1809_vm1, %v16531_v37  ;;  %16719 = vmatmul.mubr.msk.f32.gmra.mxu1 %vm1809_vm1, %v16552_v4  ;;  %v9908_v33 = vpop.f32.mrf.mxu0  ;;  %v10003_v6 = vpop.f32.mrf.mxu1  ;;  %v23393_v37 = vld [vmem:[#allocation13_spill] sm:$0xff]  ;;  %v9178_v30 = vmul.f32 %v23401_v61, %v23400_v32  ;;  %v23402_v19 = vld [vmem:[#allocation75_spill] sm:$0xff]  ;;  %v23411_v28 = vld [vmem:[#allocation120_spill] sm:$0xff] }
 0x6e9   :  { %16729 = vmatpush3.msra.mxu0 %v9207_v51  ;;  %16750 = vmatpush3.msra.mxu1 %v9213_v18  ;;  %v9205_v4 = vsub.f32 %v23393_v37, %v9157_v3  ;;  %v9204_v51 = vsub.f32 %v23397_v52, %v9156_v10  ;;  %v23398_v18 = vld [vmem:[#allocation8_spill] sm:$0xff]  ;;  %v23399_v3 = vld [vmem:[#allocation35_spill] sm:$0xff]  ;;  %v21709_v10 = vld [vmem:[%s22565_s4 + $0x8] sm:$0xff] }
 0x6ea   :  { %16730 = vmatprep.subr.mxu0 %v9206_v54  ;;  %16751 = vmatprep.subr.mxu1 %v9212_v48  ;;  %v9210_v46 = vsub.f32 %v23398_v18, %v9162_v58  ;;  %v9172_v22 = vmul.f32 %v21036_v38, %v23399_v3  ;;  %v23409_v58 = vld [vmem:[#allocation78_spill] sm:$0xff]  ;;  %v23416_v3 = vld [vmem:[#allocation25_spill] sm:$0xff] }
 0x6eb   :  { %16731 = vmatpush3.msra.mxu0 %v9206_v54  ;;  %16752 = vmatpush3.msra.mxu1 %v9212_v48  ;;  %v23403_v54 = vld [vmem:[#allocation76_spill] sm:$0xff]  ;;  %v23405_v48 = vld [vmem:[#allocation118_spill] sm:$0xff]  ;;  %v9226_v37 = vsub.f32 %v23409_v58, %v9178_v30 }
 0x6ec   :  { %16700 = vmatprep.mubr.msk.f32.mxu0 %vm1809_vm1, %v9908_v33  ;;  %16721 = vmatprep.mubr.msk.f32.mxu1 %vm1809_vm1, %v10003_v6  ;;  %v9171_v38 = vmul.f32 %v23405_v48, %v23404_v29  ;;  %v23406_v33 = vld [vmem:[#allocation30_spill] sm:$0xff]  ;;  %v23407_v6 = vld [vmem:[#allocation119_spill] sm:$0xff]  ;;  %v23425_v58 = vld [vmem:[#allocation68_spill] sm:$0xff] }
 0x6ed   :  { %16732 = vmatprep.subr.mxu0 %v9205_v4  ;;  %16753 = vmatprep.subr.mxu1 %v9211_v42  ;;  %v9177_v9 = vmul.f32 %v23407_v6, %v23406_v33  ;;  %v23418_v61 = vld [vmem:[#allocation26_spill] sm:$0xff]  ;;  %v23423_v6 = vld [vmem:[#allocation28_spill] sm:$0xff] }
 0x6ee   :  { %16701 = vmatmul.mubr.msk.f32.gmra.mxu0 %vm1809_vm1, %v16534_v23  ;;  %16722 = vmatmul.mubr.msk.f32.gmra.mxu1 %vm1809_vm1, %v16555_v11  ;;  %v9221_v23 = vsub.f32 %v23402_v19, %v9173_v12  ;;  %v9227_v11 = vsub.f32 %v23403_v54, %v9179_v62  ;;  %v23413_v12 = vld [vmem:[#allocation121_spill] sm:$0xff]  ;;  %v23414_v62 = vld [vmem:[#allocation71_spill] sm:$0xff]  ;;  %v23419_v30 = vld [vmem:[#allocation122_spill] sm:$0xff] }
 0x6ef   :  { %16733 = vmatpush3.msra.mxu0 %v9205_v4  ;;  %16754 = vmatpush3.msra.mxu1 %v9211_v42  ;;  %v23410_v4 = vld [vmem:[#allocation31_spill] sm:$0xff]  ;;  %v9176_v8 = vmul.f32 %v23413_v12, %v23412_v15  ;;  %v9219_v52 = vsub.f32 %v23414_v62, %v9171_v38  ;;  %v9175_v19 = vmul.f32 %v23419_v30, %v23418_v61  ;;  %v23420_v54 = vld [vmem:[#allocation73_spill] sm:$0xff]  ;;  %v23421_v29 = vld [vmem:[#allocation74_spill] sm:$0xff] }
 0x6f0   :  { %16734 = vmatprep.subr.mxu0 %v9204_v51  ;;  %16755 = vmatprep.subr.mxu1 %v9210_v46  ;;  %v9170_v42 = vmul.f32 %v23411_v28, %v23410_v4  ;;  %v23422_v38 = vld [vmem:[#allocation27_spill] sm:$0xff]  ;;  %v21756_v4 = vld [vmem:[%s22565_s4 + $0x20] sm:$0xff]  ;;  %v23427_v28 = vld [vmem:[#allocation46_spill] sm:$0xff] }
 0x6f1   :  { %16735 = vmatpush3.msra.mxu0 %v9204_v51  ;;  %16756 = vmatpush3.msra.mxu1 %v9210_v46  ;;  %v23415_v51 = vld [vmem:[#allocation72_spill] sm:$0xff]  ;;  %v21726_v46 = vld [vmem:[%s22565_s4 + $0x10] sm:$0xff]  ;;  %v9224_v48 = vsub.f32 %v23421_v29, %v9176_v8  ;;  %v9168_v33 = vmul.f32 %v21154_v36, %v23422_v38  ;;  %v21769_v15 = vld [vmem:[%s22565_s4 + $0x28] sm:$0xff] }
 0x6f2   :  { %16736 = vmatprep.mubr.msk.f32.mxu0 %vm1809_vm1, %v21172_v59  ;;  %16757 = vmatprep.mubr.msk.f32.mxu1 %vm1809_vm1, %v21172_v59  ;;  %v23408_v59 = vld [vmem:[#allocation77_spill] sm:$0xff]  ;;  %v9225_v18 = vsub.f32 %v23415_v51, %v9177_v9  ;;  %v9174_v9 = vmul.f32 %v21187_v5, %v23423_v6  ;;  %v23429_v62 = vld [vmem:[#allocation70_spill] sm:$0xff]  ;;  %v23431_v51 = vld [vmem:[#allocation48_spill] sm:$0xff] }
 0x6f3   :  { %16766 = vmatprep.subr.mxu0 %v9221_v23  ;;  %16787 = vmatprep.subr.mxu1 %v9227_v11  ;;  %v9220_v55 = vsub.f32 %v23408_v59, %v9172_v22  ;;  %v23417_v22 = vld [vmem:[#allocation150_spill] sm:$0xff]  ;;  %v23424_v59 = vld [vmem:[#allocation67_spill] sm:$0xff]  ;;  %v23426_v5 = vld [vmem:[#allocation45_spill] sm:$0xff] }
 0x6f4   :  { %16737 = vmatmul.mubr.msk.f32.vlgmr.msra.gmra.mxu0 %vm1809_vm1, %v21709_v10  ;;  %16758 = vmatmul.mubr.msk.f32.vlgmr.msra.gmra.mxu1 %vm1809_vm1, %v21709_v10  ;;  %v9169_v32 = vmul.f32 %v23417_v22, %v23416_v3  ;;  %v9185_v36 = vmul.f32 %v21209_v7, %v23426_v5  ;;  %v23428_v12 = vld [vmem:[#allocation69_spill] sm:$0xff]  ;;  %v23430_v7 = vld [vmem:[#allocation47_spill] sm:$0xff]  ;;  %v23439_v6 = vld [vmem:[#allocation44_spill] sm:$0xff] }
 0x6f5   :  { %16767 = vmatpush3.msra.mxu0 %v9221_v23  ;;  %16788 = vmatpush3.msra.mxu1 %v9227_v11  ;;  %v21739_v23 = vld [vmem:[%s22565_s4 + $0x18] sm:$0xff]  ;;  %v9218_v11 = vsub.f32 %v23420_v54, %v9170_v42  ;;  %v9191_v42 = vmul.f32 %v21214_v1, %v23427_v28  ;;  %v9216_v8 = vsub.f32 %v23428_v12, %v9168_v33  ;;  %v23432_v3 = vld [vmem:[#allocation87_spill] sm:$0xff]  ;;  %v21786_v30 = vld [vmem:[%s22565_s4] sm:$0xff] }
 0x6f6   :  { %16768 = vmatprep.subr.mxu0 %v9220_v55  ;;  %16789 = vmatprep.subr.mxu1 %v9226_v37  ;;  %v9184_v1 = vmul.f32 %v21221_v63, %v23430_v7  ;;  %v9233_v22 = vsub.f32 %v23432_v3, %v9185_v36  ;;  %v23434_v63 = vld [vmem:[#allocation41_spill] sm:$0xff]  ;;  %v23438_v33 = vld [vmem:[#allocation43_spill] sm:$0xff]  ;;  %v23443_v5 = vld [vmem:[#allocation38_spill] sm:$0xff] }
 0x6f7   :  { %16769 = vmatpush3.msra.mxu0 %v9220_v55  ;;  %16790 = vmatpush3.msra.mxu1 %v9226_v37  ;;  %v9217_v55 = vsub.f32 %v23424_v59, %v9169_v32  ;;  %v9223_v37 = vsub.f32 %v23425_v58, %v9175_v19  ;;  %v23433_v32 = vld [vmem:[#allocation88_spill] sm:$0xff]  ;;  %v23435_v19 = vld [vmem:[#allocation42_spill] sm:$0xff]  ;;  %v23444_v36 = vld [vmem:[#allocation85_spill] sm:$0xff] }
 0x6f8   :  { %16739 = vmatprep.mubr.msk.f32.mxu0 %vm1809_vm1, %v21726_v46  ;;  %16760 = vmatprep.mubr.msk.f32.mxu1 %vm1809_vm1, %v21726_v46  ;;  %v9239_v61 = vsub.f32 %v23433_v32, %v9191_v42  ;;  %v9189_v54 = vmul.f32 %v21252_v44, %v23435_v19  ;;  %v9188_v44 = vmul.f32 %v21265_v56, %v23439_v6  ;;  %v23445_v42 = vld [vmem:[#allocation86_spill] sm:$0xff]  ;;  %v23449_v7 = vld [vmem:[#allocation147_spill] sm:$0xff] }
 0x6f9   :  { %16770 = vmatprep.subr.mxu0 %v9219_v52  ;;  %16791 = vmatprep.subr.mxu1 %v9225_v18  ;;  %v9187_v56 = vmul.f32 %v21294_v14, %v23443_v5  ;;  %v23465_v5 = vld [vmem:[#allocation152_spill] sm:$0xff] }
 0x6fa   :  { %16740 = vmatmul.mubr.msk.f32.gmra.mxu0 %vm1809_vm1, %v21739_v23  ;;  %16761 = vmatmul.mubr.msk.f32.gmra.mxu1 %vm1809_vm1, %v21739_v23  ;;  %v9236_v12 = vsub.f32 %v23445_v42, %v9188_v44  ;;  %v23460_v44 = vld [vmem:[#allocation53_spill] sm:$0xff]  ;;  %v23467_v42 = vld [vmem:[#allocation50_spill] sm:$0xff] }
 0x6fb   :  { %16771 = vmatpush3.msra.mxu0 %v9219_v52  ;;  %16792 = vmatpush3.msra.mxu1 %v9225_v18  ;;  %v9222_v52 = vsub.f32 %v23429_v62, %v9174_v9  ;;  %v9190_v18 = vmul.f32 %v21231_v57, %v23431_v51  ;;  %v9183_v57 = vmul.f32 %v21245_v21, %v23434_v63  ;;  %v23440_v9 = vld [vmem:[#allocation83_spill] sm:$0xff] }
 0x6fc   :  { %16772 = vmatprep.subr.mxu0 %v9218_v11  ;;  %16793 = vmatprep.subr.mxu1 %v9224_v48  ;;  %v9182_v21 = vmul.f32 %v21263_v43, %v23438_v33  ;;  %v23447_v62 = vld [vmem:[#allocation123_spill] sm:$0xff] }
 0x6fd   :  { %16773 = vmatpush3.msra.mxu0 %v9218_v11  ;;  %16794 = vmatpush3.msra.mxu1 %v9224_v48  ;;  %v23436_v11 = vld [vmem:[#allocation89_spill] sm:$0xff]  ;;  %v23437_v48 = vld [vmem:[#allocation90_spill] sm:$0xff]  ;;  %v9231_v59 = vsub.f32 %v23440_v9, %v9183_v57 }
 0x6fe   :  { %16742 = vmatprep.mubr.msk.f32.mxu0 %vm1809_vm1, %v21756_v4  ;;  %16763 = vmatprep.mubr.msk.f32.mxu1 %vm1809_vm1, %v21756_v4  ;;  %v9232_v29 = vsub.f32 %v23436_v11, %v9184_v1  ;;  %v9238_v38 = vsub.f32 %v23437_v48, %v9190_v18  ;;  %v9230_v28 = vsub.f32 %v23444_v36, %v9182_v21  ;;  %v23450_v1 = vld [vmem:[#allocation79_spill] sm:$0xff]  ;;  %v23451_v18 = vld [vmem:[#allocation80_spill] sm:$0xff]  ;;  %v23454_v57 = vld [vmem:[#allocation81_spill] sm:$0xff] }
 0x6ff   :  { %16774 = vmatprep.subr.mxu0 %v9217_v55  ;;  %16795 = vmatprep.subr.mxu1 %v9223_v37  ;;  %v9235_v3 = vsub.f32 %v23451_v18, %v9187_v56  ;;  %v23457_v48 = vld [vmem:[#allocation60_spill] sm:$0xff]  ;;  %v23459_v21 = vld [vmem:[#allocation213_spill] sm:$0xff]  ;;  %v23461_v9 = vld [vmem:[#allocation54_spill] sm:$0xff] }
 0x700   :  { %16743 = vmatmul.mubr.msk.f32.gmra.mxu0 %vm1809_vm1, %v21769_v15  ;;  %16764 = vmatmul.mubr.msk.f32.gmra.mxu1 %vm1809_vm1, %v21769_v15  ;;  %v23466_v36 = vld [vmem:[#allocation151_spill] sm:$0xff] }
 0x701   :  { %16775 = vmatpush3.msra.mxu0 %v9217_v55  ;;  %16796 = vmatpush3.msra.mxu1 %v9223_v37  ;;  %v23441_v55 = vld [vmem:[#allocation84_spill] sm:$0xff]  ;;  %v23442_v37 = vld [vmem:[#allocation37_spill] sm:$0xff] }
 0x702   :  { %16776 = vmatprep.subr.mxu0 %v9216_v8  ;;  %16797 = vmatprep.subr.mxu1 %v9222_v52  ;;  %v9237_v58 = vsub.f32 %v23441_v55, %v9189_v54  ;;  %v9181_v43 = vmul.f32 %v21292_v45, %v23442_v37  ;;  %v23455_v54 = vld [vmem:[#allocation82_spill] sm:$0xff] }
 0x703   :  { %16777 = vmatpush3.msra.mxu0 %v9216_v8  ;;  %16798 = vmatpush3.msra.mxu1 %v9222_v52  ;;  %v23446_v8 = vld [vmem:[#allocation39_spill] sm:$0xff]  ;;  %v23448_v52 = vld [vmem:[#allocation40_spill] sm:$0xff] }
 0x704   :  { %16778 = vmatprep.mubr.msk.f32.mxu0 %vm1809_vm1, %v21786_v30  ;;  %16799 = vmatprep.mubr.msk.f32.mxu1 %vm1809_vm1, %v21786_v30  ;;  %v9180_v45 = vmul.f32 %v23447_v62, %v23446_v8  ;;  %v9186_v14 = vmul.f32 %v23449_v7, %v23448_v52  ;;  %v9229_v51 = vsub.f32 %v23450_v1, %v9181_v43  ;;  %v23464_v43 = vld [vmem:[#allocation55_spill] sm:$0xff]  ;;  %v23471_v52 = vld [vmem:[#allocation153_spill] sm:$0xff] }
 0x705   :  { %16808 = vmatprep.subr.mxu0 %v9233_v22  ;;  %16829 = vmatprep.subr.mxu1 %v9239_v61  ;;  %v23469_v8 = vld [vmem:[#allocation155_spill] sm:$0xff] }
 0x706   :  { %16779 = vmatmul.mubr.msk.f32.vlgmr.msra.gmra.mxu0 %vm1809_vm1, %v21709_v10  ;;  %16800 = vmatmul.mubr.msk.f32.vlgmr.msra.gmra.mxu1 %vm1809_vm1, %v21709_v10  ;;  %v9228_v19 = vsub.f32 %v23454_v57, %v9180_v45  ;;  %v9234_v11 = vsub.f32 %v23455_v54, %v9186_v14 }
 0x707   :  { %16809 = vmatpush3.msra.mxu0 %v9233_v22  ;;  %16830 = vmatpush3.msra.mxu1 %v9239_v61  ;;  %v23452_v22 = vld [vmem:[#allocation57_spill] sm:$0xff]  ;;  %v23453_v61 = vld [vmem:[#allocation58_spill] sm:$0xff] }
 0x708   :  { %16810 = vmatprep.subr.mxu0 %v9232_v29  ;;  %16831 = vmatprep.subr.mxu1 %v9238_v38  ;;  %v9197_v32 = vmul.f32 %v21324_v16, %v23452_v22  ;;  %v9203_v63 = vmul.f32 %v21326_v49, %v23453_v61  ;;  %v9202_v49 = vmul.f32 %v21348_v31, %v23457_v48 }
 0x709   :  { %16811 = vmatpush3.msra.mxu0 %v9232_v29  ;;  %16832 = vmatpush3.msra.mxu1 %v9238_v38  ;;  %v23456_v29 = vld [vmem:[#allocation59_spill] sm:$0xff]  ;;  %v23458_v38 = vld [vmem:[#allocation209_spill] sm:$0xff]  ;;  %v9201_v31 = vmul.f32 %v21400_v0, %v23461_v9  ;;  %v9200_v0 = vmul.f32 %v21418_v27, %v23361_v25  ;;  %v9199_v25 = vmul.f32 %v21436_v17, %v23467_v42  ;;  %v23468_v27 = vld [vmem:[#allocation154_spill] sm:$0xff] }
 0x70a   :  { %16781 = vmatprep.mubr.msk.f32.mxu0 %vm1809_vm1, %v21726_v46  ;;  %16802 = vmatprep.mubr.msk.f32.mxu1 %vm1809_vm1, %v21726_v46  ;;  %v9196_v16 = vmul.f32 %v21346_v53, %v23456_v29  ;;  %v9245_v33 = vsub.f32 %v23458_v38, %v9197_v32  ;;  %v9251_v6 = vsub.f32 %v23459_v21, %v9203_v63  ;;  %v23470_v17 = vld [vmem:[#allocation148_spill] sm:$0xff] }
 0x70b   :  { %16812 = vmatprep.subr.mxu0 %v9231_v59  ;;  %16833 = vmatprep.subr.mxu1 %v9237_v58  ;;  %v9195_v53 = vmul.f32 %v21398_v35, %v23460_v44  ;;  %v9194_v35 = vmul.f32 %v21416_v2, %v23464_v43  ;;  %v9193_v2 = vmul.f32 %v21434_v13, %v23364_v47 }
 0x70c   :  { %16782 = vmatmul.mubr.msk.f32.gmra.mxu0 %vm1809_vm1, %v21739_v23  ;;  %16803 = vmatmul.mubr.msk.f32.gmra.mxu1 %vm1809_vm1, %v21739_v23  ;;  %v9248_v62 = vsub.f32 %v23469_v8, %v9200_v0  ;;  %v9192_v47 = vmul.f32 %v21444_v40, %v23368_v34  ;;  %v9198_v13 = vmul.f32 %v21446_v20, %v23369_v39  ;;  %v23474_v40 = vld [vmem:[#allocation149_spill] sm:$0xff] }
 0x70d   :  { %16813 = vmatpush3.msra.mxu0 %v9231_v59  ;;  %16834 = vmatpush3.msra.mxu1 %v9237_v58  ;;  %v23462_v59 = vld [vmem:[#allocation103_spill] sm:$0xff]  ;;  %v23463_v58 = vld [vmem:[#allocation104_spill] sm:$0xff]  ;;  %v9243_v56 = vsub.f32 %v23465_v5, %v9195_v53  ;;  %v9241_v45 = vsub.f32 %v23470_v17, %v9193_v2  ;;  %v9247_v7 = vsub.f32 %v23471_v52, %v9199_v25  ;;  %v22058_v17 = vld [vmem:[%s22566_s5 + $0x20] sm:$0xff] }
 0x70e   :  { %16814 = vmatprep.subr.mxu0 %v9230_v28  ;;  %16835 = vmatprep.subr.mxu1 %v9236_v12  ;;  %v9244_v55 = vsub.f32 %v23462_v59, %v9196_v16  ;;  %v9250_v37 = vsub.f32 %v23463_v58, %v9202_v49  ;;  %v9240_v39 = vsub.f32 %v21374_v24, %v9192_v47  ;;  %v23473_v24 = vld [vmem:[#allocation126_spill] sm:$0xff] }
 0x70f   :  { %16815 = vmatpush3.msra.mxu0 %v9230_v28  ;;  %16836 = vmatpush3.msra.mxu1 %v9236_v12  ;;  %v9249_v28 = vsub.f32 %v23466_v36, %v9201_v31  ;;  %v9242_v12 = vsub.f32 %v23468_v27, %v9194_v35  ;;  %v9246_v34 = vsub.f32 %v21378_v60, %v9198_v13  ;;  %v23472_v60 = vld [vmem:[#allocation156_spill] sm:$0xff] }
 0x710   :  { %16784 = vmatprep.mubr.msk.f32.mxu0 %vm1809_vm1, %v21756_v4  ;;  %16805 = vmatprep.mubr.msk.f32.mxu1 %vm1809_vm1, %v21756_v4 }
 0x711   :  { %16816 = vmatprep.subr.mxu0 %v9229_v51  ;;  %16837 = vmatprep.subr.mxu1 %v9235_v3 }
 0x712   :  { %16785 = vmatmul.mubr.msk.f32.gmra.mxu0 %vm1809_vm1, %v21769_v15  ;;  %16806 = vmatmul.mubr.msk.f32.gmra.mxu1 %vm1809_vm1, %v21769_v15 }
 0x713   :  { %16817 = vmatpush3.msra.mxu0 %v9229_v51  ;;  %16838 = vmatpush3.msra.mxu1 %v9235_v3 }
 0x714   :  { %16818 = vmatprep.subr.mxu0 %v9228_v19  ;;  %16839 = vmatprep.subr.mxu1 %v9234_v11 }
 0x715   :  { %16819 = vmatpush3.msra.mxu0 %v9228_v19  ;;  %16840 = vmatpush3.msra.mxu1 %v9234_v11 }
 0x716   :  { %16820 = vmatprep.mubr.msk.f32.mxu0 %vm1809_vm1, %v21786_v30  ;;  %16841 = vmatprep.mubr.msk.f32.mxu1 %vm1809_vm1, %v21786_v30 }
 0x717   :  { %16850 = vmatprep.subr.mxu0 %v9245_v33  ;;  %16871 = vmatprep.subr.mxu1 %v9251_v6 }
 0x718   :  { %16821 = vmatmul.mubr.msk.f32.vlgmr.msra.gmra.mxu0 %vm1809_vm1, %v21709_v10  ;;  %16842 = vmatmul.mubr.msk.f32.vlgmr.msra.gmra.mxu1 %vm1809_vm1, %v21709_v10 }
 0x719   :  { %16851 = vmatpush3.msra.mxu0 %v9245_v33  ;;  %16872 = vmatpush3.msra.mxu1 %v9251_v6 }
 0x71a   :  { %16852 = vmatprep.subr.mxu0 %v9244_v55  ;;  %16873 = vmatprep.subr.mxu1 %v9250_v37 }
 0x71b   :  { %16853 = vmatpush3.msra.mxu0 %v9244_v55  ;;  %16874 = vmatpush3.msra.mxu1 %v9250_v37 }
 0x71c   :  { %16823 = vmatprep.mubr.msk.f32.mxu0 %vm1809_vm1, %v21726_v46  ;;  %16844 = vmatprep.mubr.msk.f32.mxu1 %vm1809_vm1, %v21726_v46 }
 0x71d   :  { %16854 = vmatprep.subr.mxu0 %v9243_v56  ;;  %16875 = vmatprep.subr.mxu1 %v9249_v28 }
 0x71e   :  { %16824 = vmatmul.mubr.msk.f32.gmra.mxu0 %vm1809_vm1, %v21739_v23  ;;  %16845 = vmatmul.mubr.msk.f32.gmra.mxu1 %vm1809_vm1, %v21739_v23 }
 0x71f   :  { %16855 = vmatpush3.msra.mxu0 %v9243_v56  ;;  %16876 = vmatpush3.msra.mxu1 %v9249_v28 }
 0x720   :  { %16856 = vmatprep.subr.mxu0 %v9242_v12  ;;  %16877 = vmatprep.subr.mxu1 %v9248_v62 }
 0x721   :  { %16857 = vmatpush3.msra.mxu0 %v9242_v12  ;;  %16878 = vmatpush3.msra.mxu1 %v9248_v62  ;;  %v22051_v62 = vld [vmem:[%s22566_s5 + $0x28] sm:$0xff] }
 0x722   :  { %16826 = vmatprep.mubr.msk.f32.mxu0 %vm1809_vm1, %v21756_v4  ;;  %16847 = vmatprep.mubr.msk.f32.mxu1 %vm1809_vm1, %v21756_v4 }
 0x723   :  { %16858 = vmatprep.subr.mxu0 %v9241_v45  ;;  %16879 = vmatprep.subr.mxu1 %v9247_v7 }
 0x724   :  { %16827 = vmatmul.mubr.msk.f32.gmra.mxu0 %vm1809_vm1, %v21769_v15  ;;  %16848 = vmatmul.mubr.msk.f32.gmra.mxu1 %vm1809_vm1, %v21769_v15 }
 0x725   :  { %16859 = vmatpush3.msra.mxu0 %v9241_v45  ;;  %16880 = vmatpush3.msra.mxu1 %v9247_v7  ;;  %v22067_v7 = vld [vmem:[%s22566_s5 + $0x18] sm:$0xff] }
 0x726   :  { %16860 = vmatprep.subr.mxu0 %v9240_v39  ;;  %16881 = vmatprep.subr.mxu1 %v9246_v34 }
 0x727   :  { %16861 = vmatpush3.msra.mxu0 %v9240_v39  ;;  %16882 = vmatpush3.msra.mxu1 %v9246_v34 }
 0x728   :  { %16862 = vmatprep.mubr.msk.f32.mxu0 %vm1809_vm1, %v21786_v30  ;;  %16883 = vmatprep.mubr.msk.f32.mxu1 %vm1809_vm1, %v21786_v30 }
 0x729   :  { %16863 = vmatmul.mubr.msk.f32.vlgmr.msra.gmra.mxu0 %vm1809_vm1, %v21709_v10  ;;  %16884 = vmatmul.mubr.msk.f32.vlgmr.msra.gmra.mxu1 %vm1809_vm1, %v21709_v10 }
 0x72a   :  { %16865 = vmatprep.mubr.msk.f32.mxu0 %vm1809_vm1, %v21726_v46  ;;  %16886 = vmatprep.mubr.msk.f32.mxu1 %vm1809_vm1, %v21726_v46 }
 0x72b   :  { %16892 = vmatprep.subr.mxu0 %v21469_v26  ;;  %16913 = vmatprep.subr.mxu1 %v21469_v26 }
 0x72c   :  { %16893 = vmatpush3.msra.mxu0 %v21469_v26  ;;  %16914 = vmatpush3.msra.mxu1 %v21469_v26 }
 0x72d   :  { %16866 = vmatmul.mubr.msk.f32.gmra.mxu0 %vm1809_vm1, %v21739_v23  ;;  %16887 = vmatmul.mubr.msk.f32.gmra.mxu1 %vm1809_vm1, %v21739_v23 }
 0x72e   :  { %16868 = vmatprep.mubr.msk.f32.mxu0 %vm1809_vm1, %v21756_v4  ;;  %16889 = vmatprep.mubr.msk.f32.mxu1 %vm1809_vm1, %v21756_v4 }
 0x72f   :  { %16894 = vmatprep.subr.mxu0 %v21486_v50  ;;  %16915 = vmatprep.subr.mxu1 %v21486_v50 }
 0x730   :  { %16895 = vmatpush3.msra.mxu0 %v21486_v50  ;;  %16916 = vmatpush3.msra.mxu1 %v21486_v50 }
 0x731   :  { %16869 = vmatmul.mubr.msk.f32.gmra.mxu0 %vm1809_vm1, %v21769_v15  ;;  %16890 = vmatmul.mubr.msk.f32.gmra.mxu1 %vm1809_vm1, %v21769_v15 }
 0x732   :  { %16896 = vmatprep.subr.mxu0 %v21499_v41  ;;  %16917 = vmatprep.subr.mxu1 %v21499_v41 }
 0x733   :  { %16897 = vmatpush3.msra.mxu0 %v21499_v41  ;;  %16918 = vmatpush3.msra.mxu1 %v21499_v41 }
 0x734   :  { %16898 = vmatprep.subr.mxu0 %v23472_v60  ;;  %16919 = vmatprep.subr.mxu1 %v23472_v60 }
 0x735   :  { %16899 = vmatpush3.msra.mxu0 %v23472_v60  ;;  %16920 = vmatpush3.msra.mxu1 %v23472_v60  ;;  %v22080_v60 = vld [vmem:[%s22566_s5 + $0x10] sm:$0xff] }
 0x736   :  { %16900 = vmatprep.subr.mxu0 %v23473_v24  ;;  %16921 = vmatprep.subr.mxu1 %v23473_v24 }
 0x737   :  { %16901 = vmatpush3.msra.mxu0 %v23473_v24  ;;  %16922 = vmatpush3.msra.mxu1 %v23473_v24 }
 0x738   :  { %16902 = vmatprep.subr.mxu0 %v23474_v40  ;;  %16923 = vmatprep.subr.mxu1 %v23474_v40 }
 0x739   :  { %16903 = vmatpush3.msra.mxu0 %v23474_v40  ;;  %16924 = vmatpush3.msra.mxu1 %v23474_v40 }
 0x73a   :  { %16934 = vmatprep.subr.mxu0 %v21469_v26  ;;  %16955 = vmatprep.subr.mxu1 %v21469_v26 }
 0x762   :  { %v21948_v20 = vpop.f32.mrf.mxu0 }
 0x764   :  { %v21952_v41 = vpop.f32.mrf.mxu0 }
 0x765   :  { %v21950_v50 = vpop.f32.mrf.mxu1 }
 0x767   :  { %v21954_v10 = vpop.f32.mrf.mxu1 }
 0x768   :  { %v21956_v46 = vpop.f32.mrf.mxu0 }
 0x76a   :  { %v21960_v4 = vpop.f32.mrf.mxu0 }
 0x76c   :  { %v21958_v23 = vpop.f32.mrf.mxu1 }
 0x76e   :  { %v21962_v15 = vpop.f32.mrf.mxu1 }
 0x774   :  { %v21964_v30 = vpop.f32.mrf.mxu0  ;;  %v21966_v14 = vpop.f32.mrf.mxu1 }
 0x776   :  { %v21968_v26 = vpop.f32.mrf.mxu0  ;;  %v21970_v1 = vpop.f32.mrf.mxu1 }
 0x779   :  { %v21972_v51 = vpop.f32.mrf.mxu0 }
 0x77b   :  { %v21974_v18 = vpop.f32.mrf.mxu0 }
 0x77e   :  { %v21976_v3 = vpop.f32.mrf.mxu1  ;;  %v21980_v32 = vpop.f32.mrf.mxu0 }
 0x780   :  { %v21978_v22 = vpop.f32.mrf.mxu1  ;;  %v21984_v63 = vpop.f32.mrf.mxu0 }
 0x784   :  { %v21982_v61 = vpop.f32.mrf.mxu1 }
 0x786   :  { %v21986_v57 = vpop.f32.mrf.mxu1 }
 0x787   :  { %v21988_v19 = vpop.f32.mrf.mxu0 }
 0x789   :  { %v21990_v54 = vpop.f32.mrf.mxu1  ;;  %v21992_v11 = vpop.f32.mrf.mxu0 }
 0x78b   :  { %v21994_v29 = vpop.f32.mrf.mxu1 }
 0x78f   :  { %v21996_v16 = vpop.f32.mrf.mxu0 }
 0x790   :  { %v21998_v48 = vpop.f32.mrf.mxu1 }
 0x791   :  { %v22000_v49 = vpop.f32.mrf.mxu0 }
 0x792   :  { %v22002_v38 = vpop.f32.mrf.mxu1 }
 0x796   :  { %v22004_v33 = vpop.f32.mrf.mxu0  ;;  %v22006_v21 = vpop.f32.mrf.mxu1 }
 0x798   :  { %v22008_v6 = vpop.f32.mrf.mxu0  ;;  %v22010_v44 = vpop.f32.mrf.mxu1 }
 0x79c   :  { %v22012_v53 = vpop.f32.mrf.mxu0  ;;  %v22014_v9 = vpop.f32.mrf.mxu1 }
 0x79e   :  { %v22016_v31 = vpop.f32.mrf.mxu0  ;;  %v22018_v59 = vpop.f32.mrf.mxu1 }
 0x7a2   :  { %v22020_v55 = vpop.f32.mrf.mxu0  ;;  %v22022_v58 = vpop.f32.mrf.mxu1 }
 0x7a4   :  { %v22024_v37 = vpop.f32.mrf.mxu0  ;;  %v22026_v43 = vpop.f32.mrf.mxu1 }
 0x7a8   :  { %v22028_v35 = vpop.f32.mrf.mxu0  ;;  %v22030_v0 = vpop.f32.mrf.mxu1 }
 0x7aa   :  { %v22032_v5 = vpop.f32.mrf.mxu0  ;;  %v22034_v56 = vpop.f32.mrf.mxu1 }
 0x7ae   :  { %v22036_v36 = vpop.f32.mrf.mxu0  ;;  %v22038_v28 = vpop.f32.mrf.mxu1 }
 0x7b0   :  { %v22040_v2 = vpop.f32.mrf.mxu0  ;;  %v22042_v42 = vpop.f32.mrf.mxu1 }
 0x7b1   :  { %23475 = vst [vmem:[#allocation157_spill] sm:$0xff] %v22042_v42 }
 0x7b4   :  { %v16738_v25 = vpop.f32.mrf.mxu0  ;;  %v16759_v27 = vpop.f32.mrf.mxu1 }
 0x7b6   :  { %v11078_v12 = vpop.f32.mrf.mxu0  ;;  %v11173_v8 = vpop.f32.mrf.mxu1 }
 0x7b7   :  { %16904 = vmatprep.mubr.msk.f32.mxu0 %vm1809_vm1, %v11078_v12  ;;  %16925 = vmatprep.mubr.msk.f32.mxu1 %vm1809_vm1, %v11173_v8  ;;  %v22102_v8 = vld [vmem:[%s22566_s5] sm:$0xff] }
 0x7b8   :  { %16905 = vmatmul.mubr.msk.f32.vlgmr.msra.gmra.mxu0 %vm1809_vm1, %v16738_v25  ;;  %16926 = vmatmul.mubr.msk.f32.vlgmr.msra.gmra.mxu1 %vm1809_vm1, %v16759_v27  ;;  %v22089_v25 = vld [vmem:[%s22566_s5 + $0x8] sm:$0xff] }
 0x7b9   :  { %16935 = vmatpush3.msra.mxu0 %v22051_v62  ;;  %16956 = vmatpush3.msra.mxu1 %v22051_v62 }
 0x7ba   :  { %v16741_v47 = vpop.f32.mrf.mxu0  ;;  %v16762_v13 = vpop.f32.mrf.mxu1  ;;  %16936 = vmatprep.subr.mxu0 %v22058_v17  ;;  %16957 = vmatprep.subr.mxu1 %v22058_v17 }
 0x7bb   :  { %16937 = vmatpush3.msra.mxu0 %v22058_v17  ;;  %16958 = vmatpush3.msra.mxu1 %v22058_v17 }
 0x7bc   :  { %v11088_v45 = vpop.f32.mrf.mxu0  ;;  %v11183_v52 = vpop.f32.mrf.mxu1  ;;  %16938 = vmatprep.subr.mxu0 %v22067_v7  ;;  %16959 = vmatprep.subr.mxu1 %v22067_v7 }
 0x7bd   :  { %16907 = vmatprep.mubr.msk.f32.mxu0 %vm1809_vm1, %v11088_v45  ;;  %16928 = vmatprep.mubr.msk.f32.mxu1 %vm1809_vm1, %v11183_v52 }
 0x7be   :  { %16908 = vmatmul.mubr.msk.f32.gmra.mxu0 %vm1809_vm1, %v16741_v47  ;;  %16929 = vmatmul.mubr.msk.f32.gmra.mxu1 %vm1809_vm1, %v16762_v13 }
 0x7bf   :  { %16939 = vmatpush3.msra.mxu0 %v22067_v7  ;;  %16960 = vmatpush3.msra.mxu1 %v22067_v7 }
 0x7c0   :  { %v16744_v39 = vpop.f32.mrf.mxu0  ;;  %v16765_v34 = vpop.f32.mrf.mxu1  ;;  %16940 = vmatprep.subr.mxu0 %v22080_v60  ;;  %16961 = vmatprep.subr.mxu1 %v22080_v60 }
 0x7c1   :  { %16941 = vmatpush3.msra.mxu0 %v22080_v60  ;;  %16962 = vmatpush3.msra.mxu1 %v22080_v60 }
 0x7c2   :  { %v11098_v24 = vpop.f32.mrf.mxu0  ;;  %v11193_v40 = vpop.f32.mrf.mxu1  ;;  %16942 = vmatprep.subr.mxu0 %v22089_v25  ;;  %16963 = vmatprep.subr.mxu1 %v22089_v25 }
 0x7c3   :  { %16910 = vmatprep.mubr.msk.f32.mxu0 %vm1809_vm1, %v11098_v24  ;;  %16931 = vmatprep.mubr.msk.f32.mxu1 %vm1809_vm1, %v11193_v40 }
 0x7c4   :  { %16911 = vmatmul.mubr.msk.f32.gmra.mxu0 %vm1809_vm1, %v16744_v39  ;;  %16932 = vmatmul.mubr.msk.f32.gmra.mxu1 %vm1809_vm1, %v16765_v34 }
 0x7c5   :  { %16943 = vmatpush3.msra.mxu0 %v22089_v25  ;;  %16964 = vmatpush3.msra.mxu1 %v22089_v25 }
 0x7c6   :  { %v16780_v27 = vpop.f32.mrf.mxu0  ;;  %v16801_v12 = vpop.f32.mrf.mxu1  ;;  %16944 = vmatprep.subr.mxu0 %v22102_v8  ;;  %16965 = vmatprep.subr.mxu1 %v22102_v8 }
 0x7c7   :  { %16945 = vmatpush3.msra.mxu0 %v22102_v8  ;;  %16966 = vmatpush3.msra.mxu1 %v22102_v8 }
 0x7c8   :  { %v11268_v47 = vpop.f32.mrf.mxu0  ;;  %v11363_v13 = vpop.f32.mrf.mxu1  ;;  %16976 = vmatprep.subr.mxu0 %v22051_v62  ;;  %16997 = vmatprep.subr.mxu1 %v22051_v62 }
 0x7c9   :  { %16946 = vmatprep.mubr.msk.f32.mxu0 %vm1809_vm1, %v11268_v47  ;;  %16967 = vmatprep.mubr.msk.f32.mxu1 %vm1809_vm1, %v11363_v13 }
 0x7ca   :  { %16947 = vmatmul.mubr.msk.f32.vlgmr.msra.gmra.mxu0 %vm1809_vm1, %v16780_v27  ;;  %16968 = vmatmul.mubr.msk.f32.vlgmr.msra.gmra.mxu1 %vm1809_vm1, %v16801_v12 }
 0x7cb   :  { %16977 = vmatpush3.msra.mxu0 %v22051_v62  ;;  %16998 = vmatpush3.msra.mxu1 %v22051_v62 }
 0x7cc   :  { %v16783_v45 = vpop.f32.mrf.mxu0  ;;  %v16804_v52 = vpop.f32.mrf.mxu1  ;;  %16978 = vmatprep.subr.mxu0 %v22058_v17  ;;  %16999 = vmatprep.subr.mxu1 %v22058_v17 }
 0x7cd   :  { %16979 = vmatpush3.msra.mxu0 %v22058_v17  ;;  %17000 = vmatpush3.msra.mxu1 %v22058_v17 }
 0x7ce   :  { %v11278_v39 = vpop.f32.mrf.mxu0  ;;  %v11373_v34 = vpop.f32.mrf.mxu1  ;;  %16980 = vmatprep.subr.mxu0 %v22067_v7  ;;  %17001 = vmatprep.subr.mxu1 %v22067_v7 }
 0x7cf   :  { %16949 = vmatprep.mubr.msk.f32.mxu0 %vm1809_vm1, %v11278_v39  ;;  %16970 = vmatprep.mubr.msk.f32.mxu1 %vm1809_vm1, %v11373_v34 }
 0x7d0   :  { %16950 = vmatmul.mubr.msk.f32.gmra.mxu0 %vm1809_vm1, %v16783_v45  ;;  %16971 = vmatmul.mubr.msk.f32.gmra.mxu1 %vm1809_vm1, %v16804_v52 }
 0x7d1   :  { %16981 = vmatpush3.msra.mxu0 %v22067_v7  ;;  %17002 = vmatpush3.msra.mxu1 %v22067_v7 }
 0x7d2   :  { %v16786_v24 = vpop.f32.mrf.mxu0  ;;  %v16807_v40 = vpop.f32.mrf.mxu1  ;;  %16982 = vmatprep.subr.mxu0 %v22080_v60  ;;  %17003 = vmatprep.subr.mxu1 %v22080_v60 }
 0x7d3   :  { %16983 = vmatpush3.msra.mxu0 %v22080_v60  ;;  %17004 = vmatpush3.msra.mxu1 %v22080_v60 }
 0x7d4   :  { %v11288_v27 = vpop.f32.mrf.mxu0  ;;  %v11383_v12 = vpop.f32.mrf.mxu1  ;;  %16984 = vmatprep.subr.mxu0 %v22089_v25  ;;  %17005 = vmatprep.subr.mxu1 %v22089_v25 }
 0x7d5   :  { %16952 = vmatprep.mubr.msk.f32.mxu0 %vm1809_vm1, %v11288_v27  ;;  %16973 = vmatprep.mubr.msk.f32.mxu1 %vm1809_vm1, %v11383_v12 }
 0x7d6   :  { %16953 = vmatmul.mubr.msk.f32.gmra.mxu0 %vm1809_vm1, %v16786_v24  ;;  %16974 = vmatmul.mubr.msk.f32.gmra.mxu1 %vm1809_vm1, %v16807_v40 }
 0x7d7   :  { %16985 = vmatpush3.msra.mxu0 %v22089_v25  ;;  %17006 = vmatpush3.msra.mxu1 %v22089_v25 }
 0x7d8   :  { %v16822_v47 = vpop.f32.mrf.mxu0  ;;  %v16843_v13 = vpop.f32.mrf.mxu1  ;;  %16986 = vmatprep.subr.mxu0 %v22102_v8  ;;  %17007 = vmatprep.subr.mxu1 %v22102_v8 }
 0x7d9   :  { %16987 = vmatpush3.msra.mxu0 %v22102_v8  ;;  %17008 = vmatpush3.msra.mxu1 %v22102_v8 }
 0x7da   :  { %v11458_v45 = vpop.f32.mrf.mxu0  ;;  %v11553_v52 = vpop.f32.mrf.mxu1  ;;  %17018 = vmatprep.subr.mxu0 %v22051_v62  ;;  %17039 = vmatprep.subr.mxu1 %v22051_v62 }
 0x7db   :  { %16988 = vmatprep.mubr.msk.f32.mxu0 %vm1809_vm1, %v11458_v45  ;;  %17009 = vmatprep.mubr.msk.f32.mxu1 %vm1809_vm1, %v11553_v52 }
 0x7dc   :  { %16989 = vmatmul.mubr.msk.f32.vlgmr.msra.gmra.mxu0 %vm1809_vm1, %v16822_v47  ;;  %17010 = vmatmul.mubr.msk.f32.vlgmr.msra.gmra.mxu1 %vm1809_vm1, %v16843_v13 }
 0x7dd   :  { %17019 = vmatpush3.msra.mxu0 %v22051_v62  ;;  %17040 = vmatpush3.msra.mxu1 %v22051_v62 }
 0x7de   :  { %v16825_v39 = vpop.f32.mrf.mxu0  ;;  %v16846_v34 = vpop.f32.mrf.mxu1  ;;  %17020 = vmatprep.subr.mxu0 %v22058_v17  ;;  %17041 = vmatprep.subr.mxu1 %v22058_v17 }
 0x7df   :  { %17021 = vmatpush3.msra.mxu0 %v22058_v17  ;;  %17042 = vmatpush3.msra.mxu1 %v22058_v17 }
 0x7e0   :  { %v11468_v24 = vpop.f32.mrf.mxu0  ;;  %v11563_v40 = vpop.f32.mrf.mxu1  ;;  %17022 = vmatprep.subr.mxu0 %v22067_v7  ;;  %17043 = vmatprep.subr.mxu1 %v22067_v7 }
 0x7e1   :  { %16991 = vmatprep.mubr.msk.f32.mxu0 %vm1809_vm1, %v11468_v24  ;;  %17012 = vmatprep.mubr.msk.f32.mxu1 %vm1809_vm1, %v11563_v40 }
 0x7e2   :  { %16992 = vmatmul.mubr.msk.f32.gmra.mxu0 %vm1809_vm1, %v16825_v39  ;;  %17013 = vmatmul.mubr.msk.f32.gmra.mxu1 %vm1809_vm1, %v16846_v34 }
 0x7e3   :  { %17023 = vmatpush3.msra.mxu0 %v22067_v7  ;;  %17044 = vmatpush3.msra.mxu1 %v22067_v7 }
 0x7e4   :  { %v16828_v62 = vpop.f32.mrf.mxu0  ;;  %v16849_v17 = vpop.f32.mrf.mxu1  ;;  %17024 = vmatprep.subr.mxu0 %v22080_v60  ;;  %17045 = vmatprep.subr.mxu1 %v22080_v60 }
 0x7e5   :  { %17025 = vmatpush3.msra.mxu0 %v22080_v60  ;;  %17046 = vmatpush3.msra.mxu1 %v22080_v60 }
 0x7e6   :  { %v11478_v27 = vpop.f32.mrf.mxu0  ;;  %v11573_v12 = vpop.f32.mrf.mxu1  ;;  %17026 = vmatprep.subr.mxu0 %v22089_v25  ;;  %17047 = vmatprep.subr.mxu1 %v22089_v25 }
 0x7e7   :  { %16994 = vmatprep.mubr.msk.f32.mxu0 %vm1809_vm1, %v11478_v27  ;;  %17015 = vmatprep.mubr.msk.f32.mxu1 %vm1809_vm1, %v11573_v12  ;;  %v22204_v12 = vld [vmem:[%s22567_s6] sm:$0xff] }
 0x7e8   :  { %16995 = vmatmul.mubr.msk.f32.gmra.mxu0 %vm1809_vm1, %v16828_v62  ;;  %17016 = vmatmul.mubr.msk.f32.gmra.mxu1 %vm1809_vm1, %v16849_v17  ;;  %v22195_v62 = vld [vmem:[%s22567_s6 + $0x8] sm:$0xff] }
 0x7e9   :  { %v16864_v7 = vpop.f32.mrf.mxu0  ;;  %v16885_v47 = vpop.f32.mrf.mxu1  ;;  %17027 = vmatpush3.msra.mxu0 %v22089_v25  ;;  %17048 = vmatpush3.msra.mxu1 %v22089_v25  ;;  %v10917_v17 = vmul.f32 %v22195_v62, %v21948_v20  ;;  %v10923_v27 = vmul.f32 %v22195_v62, %v21950_v50  ;;  %v17264_v50 = vld [vmem:[%s22561_s0 + $0x38] sm:$0xff] }
 0x7ea   :  { %17028 = vmatprep.subr.mxu0 %v22102_v8  ;;  %17049 = vmatprep.subr.mxu1 %v22102_v8 }
 0x7eb   :  { %v11648_v60 = vpop.f32.mrf.mxu0  ;;  %v11743_v13 = vpop.f32.mrf.mxu1  ;;  %17029 = vmatpush3.msra.mxu0 %v22102_v8  ;;  %17050 = vmatpush3.msra.mxu1 %v22102_v8 }
 0x7ec   :  { %17030 = vmatprep.mubr.msk.f32.mxu0 %vm1809_vm1, %v11648_v60  ;;  %17051 = vmatprep.mubr.msk.f32.mxu1 %vm1809_vm1, %v11743_v13  ;;  %v17263_v60 = vld [vmem:[%s22561_s0 + $0x8] sm:$0xff] }
 0x7ed   :  { %v16867_v45 = vpop.f32.mrf.mxu0  ;;  %v16888_v52 = vpop.f32.mrf.mxu1  ;;  %17031 = vmatmul.mubr.msk.f32.vlgmr.msra.gmra.mxu0 %vm1809_vm1, %v16864_v7  ;;  %17052 = vmatmul.mubr.msk.f32.vlgmr.msra.gmra.mxu1 %vm1809_vm1, %v16885_v47  ;;  %v10916_v7 = vmul.f32 %v22204_v12, %v21952_v41  ;;  %v10922_v47 = vmul.f32 %v22204_v12, %v21954_v10  ;;  %v10965_v13 = vmul.f32 %v17263_v60, %v10917_v17 }
 0x7ef   :  { %v11658_v25 = vpop.f32.mrf.mxu0  ;;  %v11753_v39 = vpop.f32.mrf.mxu1 }
 0x7f0   :  { %17033 = vmatprep.mubr.msk.f32.mxu0 %vm1809_vm1, %v11658_v25  ;;  %17054 = vmatprep.mubr.msk.f32.mxu1 %vm1809_vm1, %v11753_v39  ;;  %v17265_v25 = vld [vmem:[%s22561_s0] sm:$0xff] }
 0x7f1   :  { %v16870_v34 = vpop.f32.mrf.mxu0  ;;  %v16891_v24 = vpop.f32.mrf.mxu1  ;;  %17034 = vmatmul.mubr.msk.f32.gmra.mxu0 %vm1809_vm1, %v16867_v45  ;;  %17055 = vmatmul.mubr.msk.f32.gmra.mxu1 %vm1809_vm1, %v16888_v52  ;;  %v10971_v52 = vmul.f32 %v17264_v50, %v10923_v27  ;;  %v10964_v41 = vmul.f32 %v17265_v25, %v10916_v7  ;;  %v22236_v27 = vld [vmem:[%s22567_s6 + $0x10] sm:$0xff] }
 0x7f2   :  { %v10918_v7 = vmul.f32 %v22236_v27, %v21960_v4  ;;  %v17269_v4 = vld [vmem:[%s22561_s0 + $0x18] sm:$0xff] }
 0x7f3   :  { %v11668_v8 = vpop.f32.mrf.mxu0  ;;  %v11763_v40 = vpop.f32.mrf.mxu1 }
 0x7f4   :  { %17036 = vmatprep.mubr.msk.f32.mxu0 %vm1809_vm1, %v11668_v8  ;;  %17057 = vmatprep.mubr.msk.f32.mxu1 %vm1809_vm1, %v11763_v40  ;;  %v22227_v8 = vld [vmem:[%s22567_s6 + $0x18] sm:$0xff] }
 0x7f5   :  { %17037 = vmatmul.mubr.msk.f32.gmra.mxu0 %vm1809_vm1, %v16870_v34  ;;  %17058 = vmatmul.mubr.msk.f32.gmra.mxu1 %vm1809_vm1, %v16891_v24  ;;  %v17266_v34 = vld [vmem:[%s22561_s0 + $0x30] sm:$0xff]  ;;  %v10919_v40 = vmul.f32 %v22227_v8, %v21956_v46  ;;  %v10925_v17 = vmul.f32 %v22227_v8, %v21958_v23  ;;  %v10924_v46 = vmul.f32 %v22236_v27, %v21962_v15 }
 0x7f6   :  { %v10970_v24 = vmul.f32 %v17266_v34, %v10922_v47  ;;  %v17271_v15 = vld [vmem:[%s22561_s0 + $0x10] sm:$0xff] }
 0x7f7   :  { %v10967_v42 = vmul.f32 %v17269_v4, %v10919_v40  ;;  %v17272_v40 = vld [vmem:[%s22561_s0 + $0x40] sm:$0xff] }
 0x878   :  { %v16906_v20 = vpop.f32.mrf.mxu0  ;;  %v16927_v45 = vpop.f32.mrf.mxu1 }
 0x879   :  { %v12677_v39 = vmul.f32 %v22195_v62, %v16906_v20  ;;  %v12683_v10 = vmul.f32 %v22195_v62, %v16927_v45 }
 0x87a   :  { %v11856_v47 = vpop.f32.mrf.mxu0  ;;  %v11969_v60 = vpop.f32.mrf.mxu1 }
 0x87b   :  { %v12725_v20 = vadd.f32 %v12677_v39, %v10965_v13  ;;  %v12731_v45 = vadd.f32 %v12683_v10, %v10971_v52  ;;  %v12676_v50 = vmul.f32 %v22204_v12, %v11856_v47  ;;  %v12682_v25 = vmul.f32 %v22204_v12, %v11969_v60  ;;  %v17270_v39 = vld [vmem:[%s22561_s0 + $0x48] sm:$0xff] }
 0x87c   :  { %v10973_v10 = vmul.f32 %v17270_v39, %v10925_v17  ;;  %v10966_v47 = vmul.f32 %v17271_v15, %v10918_v7  ;;  %v10972_v60 = vmul.f32 %v17272_v40, %v10924_v46  ;;  %v22265_v17 = vld [vmem:[%s22567_s6 + $0x28] sm:$0xff]  ;;  %v17276_v15 = vld [vmem:[%s22561_s0 + $0x58] sm:$0xff] }
 0x87d   :  { %12773 = vst.msk [vmem:[#allocation2 + $0x8] sm:$0xff] %vm1809_vm1, %v12725_v20  ;;  %12779 = vst.msk [vmem:[#allocation2 + $0x38] sm:$0xff] %vm1809_vm1, %v12731_v45  ;;  %v12724_v23 = vadd.f32 %v12676_v50, %v10964_v41  ;;  %v12730_v34 = vadd.f32 %v12682_v25, %v10970_v24  ;;  %v10921_v7 = vmul.f32 %v22265_v17, %v21964_v30  ;;  %v22274_v45 = vld [vmem:[%s22567_s6 + $0x20] sm:$0xff] }
 0x87e   :  { %v16909_v13 = vpop.f32.mrf.mxu0  ;;  %v16930_v52 = vpop.f32.mrf.mxu1  ;;  %v10927_v20 = vmul.f32 %v22265_v17, %v21966_v14  ;;  %v10920_v50 = vmul.f32 %v22274_v45, %v21968_v26  ;;  %v10926_v30 = vmul.f32 %v22274_v45, %v21970_v1  ;;  %v17275_v26 = vld [vmem:[%s22561_s0 + $0x28] sm:$0xff]  ;;  %v17277_v1 = vld [vmem:[%s22561_s0 + $0x20] sm:$0xff] }
 0x87f   :  { %12772 = vst.msk [vmem:[#allocation2] sm:$0xff] %vm1809_vm1, %v12724_v23  ;;  %12778 = vst.msk [vmem:[#allocation2 + $0x30] sm:$0xff] %vm1809_vm1, %v12730_v34  ;;  %v12679_v41 = vmul.f32 %v22227_v8, %v16909_v13  ;;  %v12685_v24 = vmul.f32 %v22227_v8, %v16930_v52  ;;  %v10969_v39 = vmul.f32 %v17275_v26, %v10921_v7  ;;  %v17280_v26 = vld [vmem:[%s22561_s0 + $0x60] sm:$0xff] }
 0x880   :  { %v11866_v25 = vpop.f32.mrf.mxu0  ;;  %v11979_v46 = vpop.f32.mrf.mxu1 }
 0x881   :  { %v12727_v23 = vadd.f32 %v12679_v41, %v10967_v42  ;;  %v12733_v34 = vadd.f32 %v12685_v24, %v10973_v10  ;;  %v12678_v4 = vmul.f32 %v22236_v27, %v11866_v25  ;;  %v12684_v13 = vmul.f32 %v22236_v27, %v11979_v46 }
 0x882   :  { %v10975_v41 = vmul.f32 %v17276_v15, %v10927_v20  ;;  %v10968_v24 = vmul.f32 %v17277_v1, %v10920_v50  ;;  %v10929_v20 = vmul.f32 %v22195_v62, %v21972_v51  ;;  %v10935_v25 = vmul.f32 %v22195_v62, %v21976_v3 }
 0x883   :  { %12775 = vst.msk [vmem:[#allocation2 + $0x18] sm:$0xff] %vm1809_vm1, %v12727_v23  ;;  %12781 = vst.msk [vmem:[#allocation2 + $0x48] sm:$0xff] %vm1809_vm1, %v12733_v34  ;;  %v12726_v14 = vadd.f32 %v12678_v4, %v10966_v47  ;;  %v12732_v52 = vadd.f32 %v12684_v13, %v10972_v60  ;;  %v17278_v60 = vld [vmem:[%s22561_s0 + $0x50] sm:$0xff]  ;;  %v10928_v50 = vmul.f32 %v22204_v12, %v21974_v18  ;;  %v17279_v18 = vld [vmem:[%s22561_s0 + $0x68] sm:$0xff] }
 0x884   :  { %v16912_v42 = vpop.f32.mrf.mxu0  ;;  %v16933_v10 = vpop.f32.mrf.mxu1  ;;  %v10974_v7 = vmul.f32 %v17278_v60, %v10926_v30  ;;  %v10934_v30 = vmul.f32 %v22204_v12, %v21978_v22  ;;  %v17281_v22 = vld [vmem:[%s22561_s0 + $0x98] sm:$0xff]  ;;  %v10937_v60 = vmul.f32 %v22227_v8, %v21982_v61 }
 0x885   :  { %12774 = vst.msk [vmem:[#allocation2 + $0x10] sm:$0xff] %vm1809_vm1, %v12726_v14  ;;  %12780 = vst.msk [vmem:[#allocation2 + $0x40] sm:$0xff] %vm1809_vm1, %v12732_v52  ;;  %v12681_v47 = vmul.f32 %v22265_v17, %v16912_v42  ;;  %v12687_v40 = vmul.f32 %v22265_v17, %v16933_v10  ;;  %v10977_v52 = vmul.f32 %v17279_v18, %v10929_v20 }
 0x886   :  { %v11876_v46 = vpop.f32.mrf.mxu0  ;;  %v11989_v23 = vpop.f32.mrf.mxu1  ;;  %v10983_v15 = vmul.f32 %v17281_v22, %v10935_v25  ;;  %v10939_v22 = vmul.f32 %v22265_v17, %v21990_v54 }
 0x887   :  { %v12729_v34 = vadd.f32 %v12681_v47, %v10969_v39  ;;  %v12735_v4 = vadd.f32 %v12687_v40, %v10975_v41  ;;  %v12680_v13 = vmul.f32 %v22274_v45, %v11876_v46  ;;  %v12686_v14 = vmul.f32 %v22274_v45, %v11989_v23  ;;  %v17282_v47 = vld [vmem:[%s22561_s0 + $0x90] sm:$0xff] }
 0x888   :  { %v10976_v39 = vmul.f32 %v17280_v26, %v10928_v50  ;;  %v10931_v41 = vmul.f32 %v22227_v8, %v21980_v32  ;;  %v10982_v40 = vmul.f32 %v17282_v47, %v10934_v30  ;;  %v10936_v32 = vmul.f32 %v22236_v27, %v21986_v57  ;;  %v17284_v57 = vld [vmem:[%s22561_s0 + $0x70] sm:$0xff] }
 0x889   :  { %12777 = vst.msk [vmem:[#allocation2 + $0x28] sm:$0xff] %vm1809_vm1, %v12729_v34  ;;  %12783 = vst.msk [vmem:[#allocation2 + $0x58] sm:$0xff] %vm1809_vm1, %v12735_v4  ;;  %v12728_v51 = vadd.f32 %v12680_v13, %v10968_v24  ;;  %v12734_v3 = vadd.f32 %v12686_v14, %v10974_v7  ;;  %v10930_v7 = vmul.f32 %v22236_v27, %v21984_v63  ;;  %v17283_v63 = vld [vmem:[%s22561_s0 + $0x78] sm:$0xff] }
 0x88a   :  { %v16948_v42 = vpop.f32.mrf.mxu0  ;;  %v16969_v10 = vpop.f32.mrf.mxu1  ;;  %v10979_v13 = vmul.f32 %v17283_v63, %v10931_v41  ;;  %v10938_v41 = vmul.f32 %v22274_v45, %v21994_v29  ;;  %v17288_v29 = vld [vmem:[%s22561_s0 + $0xb8] sm:$0xff] }
 0x88b   :  { %12776 = vst.msk [vmem:[#allocation2 + $0x20] sm:$0xff] %vm1809_vm1, %v12728_v51  ;;  %12782 = vst.msk [vmem:[#allocation2 + $0x50] sm:$0xff] %vm1809_vm1, %v12734_v3  ;;  %v12689_v1 = vmul.f32 %v22195_v62, %v16948_v42  ;;  %v12695_v24 = vmul.f32 %v22195_v62, %v16969_v10  ;;  %v10978_v14 = vmul.f32 %v17284_v57, %v10930_v7  ;;  %v17285_v3 = vld [vmem:[%s22561_s0 + $0xa8] sm:$0xff] }
 0x88c   :  { %v12082_v20 = vpop.f32.mrf.mxu0  ;;  %v12195_v25 = vpop.f32.mrf.mxu1  ;;  %v10985_v18 = vmul.f32 %v17285_v3, %v10937_v60  ;;  %v10933_v10 = vmul.f32 %v22265_v17, %v21988_v19  ;;  %v10947_v57 = vmul.f32 %v22195_v62, %v21998_v48 }
 0x88d   :  { %v12737_v50 = vadd.f32 %v12689_v1, %v10977_v52  ;;  %v12743_v46 = vadd.f32 %v12695_v24, %v10983_v15  ;;  %v12688_v23 = vmul.f32 %v22204_v12, %v12082_v20  ;;  %v12694_v34 = vmul.f32 %v22204_v12, %v12195_v25  ;;  %v17286_v52 = vld [vmem:[%s22561_s0 + $0xa0] sm:$0xff] }
 0x88e   :  { %v10984_v26 = vmul.f32 %v17286_v52, %v10936_v32  ;;  %v10932_v15 = vmul.f32 %v22274_v45, %v21992_v11  ;;  %v17287_v11 = vld [vmem:[%s22561_s0 + $0x88] sm:$0xff]  ;;  %v10987_v20 = vmul.f32 %v17288_v29, %v10939_v22 }
 0x88f   :  { %12785 = vst.msk [vmem:[#allocation2 + $0x68] sm:$0xff] %vm1809_vm1, %v12737_v50  ;;  %12791 = vst.msk [vmem:[#allocation2 + $0x98] sm:$0xff] %vm1809_vm1, %v12743_v46  ;;  %v12736_v4 = vadd.f32 %v12688_v23, %v10976_v39  ;;  %v12742_v61 = vadd.f32 %v12694_v34, %v10982_v40  ;;  %v10981_v32 = vmul.f32 %v17287_v11, %v10933_v10  ;;  %v17289_v46 = vld [vmem:[%s22561_s0 + $0x80] sm:$0xff]  ;;  %v17290_v34 = vld [vmem:[%s22561_s0 + $0xb0] sm:$0xff] }
 0x890   :  { %v16951_v30 = vpop.f32.mrf.mxu0  ;;  %v16972_v51 = vpop.f32.mrf.mxu1  ;;  %v10980_v23 = vmul.f32 %v17289_v46, %v10932_v15  ;;  %v10948_v11 = vmul.f32 %v22236_v27, %v22010_v44  ;;  %v17296_v44 = vld [vmem:[%s22561_s0 + $0x108] sm:$0xff] }
 0x891   :  { %12784 = vst.msk [vmem:[#allocation2 + $0x60] sm:$0xff] %vm1809_vm1, %v12736_v4  ;;  %12790 = vst.msk [vmem:[#allocation2 + $0x90] sm:$0xff] %vm1809_vm1, %v12742_v61  ;;  %v12691_v39 = vmul.f32 %v22227_v8, %v16951_v30  ;;  %v12697_v42 = vmul.f32 %v22227_v8, %v16972_v51  ;;  %v10986_v4 = vmul.f32 %v17290_v34, %v10938_v41  ;;  %v17293_v41 = vld [vmem:[%s22561_s0 + $0xc0] sm:$0xff] }
 0x892   :  { %v12092_v1 = vpop.f32.mrf.mxu0  ;;  %v12205_v24 = vpop.f32.mrf.mxu1  ;;  %v10946_v30 = vmul.f32 %v22204_v12, %v22002_v38  ;;  %v17292_v38 = vld [vmem:[%s22561_s0 + $0xf8] sm:$0xff] }
 0x893   :  { %v12739_v47 = vadd.f32 %v12691_v39, %v10979_v13  ;;  %v12745_v40 = vadd.f32 %v12697_v42, %v10985_v18  ;;  %v12690_v60 = vmul.f32 %v22236_v27, %v12092_v1  ;;  %v12696_v7 = vmul.f32 %v22236_v27, %v12205_v24  ;;  %v17294_v24 = vld [vmem:[%s22561_s0 + $0xf0] sm:$0xff] }
 0x894   :  { %v10941_v13 = vmul.f32 %v22195_v62, %v21996_v16  ;;  %v10995_v10 = vmul.f32 %v17292_v38, %v10947_v57  ;;  %v17298_v57 = vld [vmem:[%s22561_s0 + $0x100] sm:$0xff] }
 0x895   :  { %12787 = vst.msk [vmem:[#allocation2 + $0x78] sm:$0xff] %vm1809_vm1, %v12739_v47  ;;  %12793 = vst.msk [vmem:[#allocation2 + $0xa8] sm:$0xff] %vm1809_vm1, %v12745_v40  ;;  %v12738_v19 = vadd.f32 %v12690_v60, %v10978_v14  ;;  %v12744_v54 = vadd.f32 %v12696_v7, %v10984_v26  ;;  %v10940_v14 = vmul.f32 %v22204_v12, %v22000_v49  ;;  %v17291_v49 = vld [vmem:[%s22561_s0 + $0xc8] sm:$0xff] }
 0x896   :  { %v16954_v25 = vpop.f32.mrf.mxu0  ;;  %v16975_v50 = vpop.f32.mrf.mxu1  ;;  %v10989_v42 = vmul.f32 %v17291_v49, %v10941_v13  ;;  %v10994_v47 = vmul.f32 %v17294_v24, %v10946_v30  ;;  %v10943_v7 = vmul.f32 %v22227_v8, %v22004_v33 }
 0x897   :  { %12786 = vst.msk [vmem:[#allocation2 + $0x70] sm:$0xff] %vm1809_vm1, %v12738_v19  ;;  %12792 = vst.msk [vmem:[#allocation2 + $0xa0] sm:$0xff] %vm1809_vm1, %v12744_v54  ;;  %v12693_v61 = vmul.f32 %v22265_v17, %v16954_v25  ;;  %v12699_v63 = vmul.f32 %v22265_v17, %v16975_v50  ;;  %v10988_v1 = vmul.f32 %v17293_v41, %v10940_v14 }
 0x898   :  { %v12102_v51 = vpop.f32.mrf.mxu0  ;;  %v12215_v3 = vpop.f32.mrf.mxu1  ;;  %v10949_v19 = vmul.f32 %v22227_v8, %v22006_v21  ;;  %v10942_v54 = vmul.f32 %v22236_v27, %v22008_v6  ;;  %v17295_v6 = vld [vmem:[%s22561_s0 + $0xd8] sm:$0xff]  ;;  %v10996_v14 = vmul.f32 %v17298_v57, %v10948_v11  ;;  %v10952_v11 = vmul.f32 %v22204_v12, %v22024_v37 }
 0x899   :  { %v12741_v18 = vadd.f32 %v12693_v61, %v10981_v32  ;;  %v12747_v52 = vadd.f32 %v12699_v63, %v10987_v20  ;;  %v12692_v26 = vmul.f32 %v22274_v45, %v12102_v51  ;;  %v12698_v39 = vmul.f32 %v22274_v45, %v12215_v3  ;;  %v17297_v63 = vld [vmem:[%s22561_s0 + $0xd0] sm:$0xff] }
 0x89a   :  { %v10997_v34 = vmul.f32 %v17296_v44, %v10949_v19  ;;  %v10990_v13 = vmul.f32 %v17297_v63, %v10942_v54  ;;  %v10945_v3 = vmul.f32 %v22265_v17, %v22012_v53  ;;  %v10953_v19 = vmul.f32 %v22195_v62, %v22020_v55 }
 0x89b   :  { %12789 = vst.msk [vmem:[#allocation2 + $0x88] sm:$0xff] %vm1809_vm1, %v12741_v18  ;;  %12795 = vst.msk [vmem:[#allocation2 + $0xb8] sm:$0xff] %vm1809_vm1, %v12747_v52  ;;  %v12740_v16 = vadd.f32 %v12692_v26, %v10980_v23  ;;  %v12746_v48 = vadd.f32 %v12698_v39, %v10986_v4  ;;  %v10991_v23 = vmul.f32 %v17295_v6, %v10943_v7 }
 0x89c   :  { %v16990_v22 = vpop.f32.mrf.mxu0  ;;  %v17011_v15 = vpop.f32.mrf.mxu1  ;;  %v10951_v18 = vmul.f32 %v22265_v17, %v22014_v9  ;;  %v10944_v52 = vmul.f32 %v22274_v45, %v22016_v31  ;;  %v10950_v26 = vmul.f32 %v22274_v45, %v22018_v59  ;;  %v17299_v31 = vld [vmem:[%s22561_s0 + $0xe8] sm:$0xff]  ;;  %v17300_v59 = vld [vmem:[%s22561_s0 + $0x118] sm:$0xff]  ;;  %v10959_v54 = vmul.f32 %v22195_v62, %v22022_v58 }
 0x89d   :  { %12788 = vst.msk [vmem:[#allocation2 + $0x80] sm:$0xff] %vm1809_vm1, %v12740_v16  ;;  %12794 = vst.msk [vmem:[#allocation2 + $0xb0] sm:$0xff] %vm1809_vm1, %v12746_v48  ;;  %v12701_v40 = vmul.f32 %v22195_v62, %v16990_v22  ;;  %v12707_v60 = vmul.f32 %v22195_v62, %v17011_v15  ;;  %v10955_v55 = vmul.f32 %v22227_v8, %v22028_v35  ;;  %v17304_v35 = vld [vmem:[%s22561_s0 + $0x158] sm:$0xff] }
 0x89e   :  { %v12308_v32 = vpop.f32.mrf.mxu0  ;;  %v12421_v29 = vpop.f32.mrf.mxu1  ;;  %v10999_v22 = vmul.f32 %v17300_v59, %v10951_v18  ;;  %v10961_v58 = vmul.f32 %v22227_v8, %v22030_v0 }
 0x89f   :  { %v12749_v20 = vadd.f32 %v12701_v40, %v10989_v42  ;;  %v12755_v25 = vadd.f32 %v12707_v60, %v10995_v10  ;;  %v12700_v50 = vmul.f32 %v22204_v12, %v12308_v32  ;;  %v12706_v46 = vmul.f32 %v22204_v12, %v12421_v29 }
 0x8a0   :  { %v10993_v10 = vmul.f32 %v17299_v31, %v10945_v3  ;;  %v10958_v32 = vmul.f32 %v22204_v12, %v22026_v43 }
 0x8a1   :  { %12797 = vst.msk [vmem:[#allocation2 + $0xc8] sm:$0xff] %vm1809_vm1, %v12749_v20  ;;  %12803 = vst.msk [vmem:[#allocation2 + $0xf8] sm:$0xff] %vm1809_vm1, %v12755_v25  ;;  %v12748_v33 = vadd.f32 %v12700_v50, %v10988_v1  ;;  %v12754_v21 = vadd.f32 %v12706_v46, %v10994_v47  ;;  %v17301_v1 = vld [vmem:[%s22561_s0 + $0xe0] sm:$0xff]  ;;  %v17302_v47 = vld [vmem:[%s22561_s0 + $0x110] sm:$0xff] }
 0x8a2   :  { %v16993_v4 = vpop.f32.mrf.mxu0  ;;  %v17014_v61 = vpop.f32.mrf.mxu1  ;;  %v10992_v24 = vmul.f32 %v17301_v1, %v10944_v52  ;;  %v10998_v40 = vmul.f32 %v17302_v47, %v10950_v26 }
 0x8a3   :  { %12796 = vst.msk [vmem:[#allocation2 + $0xc0] sm:$0xff] %vm1809_vm1, %v12748_v33  ;;  %12802 = vst.msk [vmem:[#allocation2 + $0xf0] sm:$0xff] %vm1809_vm1, %v12754_v21  ;;  %v12703_v30 = vmul.f32 %v22227_v8, %v16993_v4  ;;  %v12709_v51 = vmul.f32 %v22227_v8, %v17014_v61  ;;  %v17305_v61 = vld [vmem:[%s22561_s0 + $0x120] sm:$0xff] }
 0x8a4   :  { %v12318_v39 = vpop.f32.mrf.mxu0  ;;  %v12431_v16 = vpop.f32.mrf.mxu1  ;;  %v11000_v63 = vmul.f32 %v17305_v61, %v10952_v11 }
 0x8a5   :  { %v12751_v48 = vadd.f32 %v12703_v30, %v10991_v23  ;;  %v12757_v49 = vadd.f32 %v12709_v51, %v10997_v34  ;;  %v12702_v42 = vmul.f32 %v22236_v27, %v12318_v39  ;;  %v12708_v38 = vmul.f32 %v22236_v27, %v12431_v16  ;;  %v17303_v23 = vld [vmem:[%s22561_s0 + $0x128] sm:$0xff]  ;;  %v17307_v39 = vld [vmem:[%s22561_s0 + $0x138] sm:$0xff] }
 0x8a6   :  { %v11001_v44 = vmul.f32 %v17303_v23, %v10953_v19  ;;  %v11007_v34 = vmul.f32 %v17304_v35, %v10959_v54  ;;  %v10960_v30 = vmul.f32 %v22236_v27, %v22034_v56  ;;  %v17308_v56 = vld [vmem:[%s22561_s0 + $0x168] sm:$0xff]  ;;  %v17312_v19 = vld [vmem:[%s22561_s0 + $0x178] sm:$0xff] }
 0x8a7   :  { %12799 = vst.msk [vmem:[#allocation2 + $0xd8] sm:$0xff] %vm1809_vm1, %v12751_v48  ;;  %12805 = vst.msk [vmem:[#allocation2 + $0x108] sm:$0xff] %vm1809_vm1, %v12757_v49  ;;  %v12750_v53 = vadd.f32 %v12702_v42, %v10990_v13  ;;  %v12756_v9 = vadd.f32 %v12708_v38, %v10996_v14  ;;  %v17306_v13 = vld [vmem:[%s22561_s0 + $0x150] sm:$0xff]  ;;  %v10954_v14 = vmul.f32 %v22236_v27, %v22032_v5 }
 0x8a8   :  { %v16996_v15 = vpop.f32.mrf.mxu0  ;;  %v17017_v41 = vpop.f32.mrf.mxu1  ;;  %v11006_v57 = vmul.f32 %v17306_v13, %v10958_v32  ;;  %v11003_v5 = vmul.f32 %v17307_v39, %v10955_v55  ;;  %v11009_v16 = vmul.f32 %v17308_v56, %v10961_v58  ;;  %v10957_v48 = vmul.f32 %v22265_v17, %v22036_v36 }
 0x8a9   :  { %12798 = vst.msk [vmem:[#allocation2 + $0xd0] sm:$0xff] %vm1809_vm1, %v12750_v53  ;;  %12804 = vst.msk [vmem:[#allocation2 + $0x100] sm:$0xff] %vm1809_vm1, %v12756_v9  ;;  %v12705_v60 = vmul.f32 %v22265_v17, %v16996_v15  ;;  %v12711_v7 = vmul.f32 %v22265_v17, %v17017_v41  ;;  %v10963_v49 = vmul.f32 %v22265_v17, %v22038_v28  ;;  %v17310_v28 = vld [vmem:[%s22561_s0 + $0x160] sm:$0xff] }
 0x8aa   :  { %v12328_v29 = vpop.f32.mrf.mxu0  ;;  %v12441_v20 = vpop.f32.mrf.mxu1  ;;  %v11008_v59 = vmul.f32 %v17310_v28, %v10960_v30  ;;  %v23476_v15 = vld [vmem:[#allocation157_spill] sm:$0xff] }
 0x8ab   :  { %v12753_v25 = vadd.f32 %v12705_v60, %v10993_v10  ;;  %v12759_v50 = vadd.f32 %v12711_v7, %v10999_v22  ;;  %v12704_v46 = vmul.f32 %v22274_v45, %v12328_v29  ;;  %v12710_v33 = vmul.f32 %v22274_v45, %v12441_v20  ;;  %v17309_v10 = vld [vmem:[%s22561_s0 + $0x130] sm:$0xff]  ;;  %v17311_v7 = vld [vmem:[%s22561_s0 + $0x148] sm:$0xff] }
 0x8ac   :  { %v11002_v36 = vmul.f32 %v17309_v10, %v10954_v14  ;;  %v10956_v22 = vmul.f32 %v22274_v45, %v22040_v2  ;;  %v10962_v41 = vmul.f32 %v22274_v45, %v23476_v15  ;;  %v11005_v2 = vmul.f32 %v17311_v7, %v10957_v48 }
 0x8ad   :  { %12801 = vst.msk [vmem:[#allocation2 + $0xe8] sm:$0xff] %vm1809_vm1, %v12753_v25  ;;  %12807 = vst.msk [vmem:[#allocation2 + $0x118] sm:$0xff] %vm1809_vm1, %v12759_v50  ;;  %v12752_v37 = vadd.f32 %v12704_v46, %v10992_v24  ;;  %v12758_v43 = vadd.f32 %v12710_v33, %v10998_v40  ;;  %v17032_v21 = vpop.f32.mrf.mxu0  ;;  %v17053_v6 = vpop.f32.mrf.mxu1  ;;  %v11011_v54 = vmul.f32 %v17312_v19, %v10963_v49  ;;  %v17313_v50 = vld [vmem:[%s22561_s0 + $0x140] sm:$0xff]  ;;  %v17314_v33 = vld [vmem:[%s22561_s0 + $0x170] sm:$0xff]  ;;  %s17315_s0 = scalar_lea.vmem %s12826_s11, 6144 }
 0x8ae   :  { %v12713_v0 = vmul.f32 %v22195_v62, %v17032_v21  ;;  %v12719_v4 = vmul.f32 %v22195_v62, %v17053_v6  ;;  %v11004_v46 = vmul.f32 %v17313_v50, %v10956_v22  ;;  %v11010_v55 = vmul.f32 %v17314_v33, %v10962_v41  ;;  %p17316_p0 = scmp.ne.s32.totalorder %s12826_s11, %s17315_s0  ;;  %p17321_p2 = scmp.lt.s32.totalorder %s17315_s0, %s17315_s0 }
 0x8af   :  { %12800 = vst.msk [vmem:[#allocation2 + $0xe0] sm:$0xff] %vm1809_vm1, %v12752_v37  ;;  %12806 = vst.msk [vmem:[#allocation2 + $0x110] sm:$0xff] %vm1809_vm1, %v12758_v43  ;;  %v12534_v62 = vpop.f32.mrf.mxu0  ;;  %v12647_v51 = vpop.f32.mrf.mxu1 }
 0x8b0   :  { %v12761_v3 = vadd.f32 %v12713_v0, %v11001_v44  ;;  %v12767_v18 = vadd.f32 %v12719_v4, %v11007_v34  ;;  %v12712_v52 = vmul.f32 %v22204_v12, %v12534_v62  ;;  %v12718_v26 = vmul.f32 %v22204_v12, %v12647_v51  ;;  %p17322_p3 = por %p17321_p2, %p17320_p1 }
 0x8b1   :  { %v17035_v42 = vpop.f32.mrf.mxu0  ;;  %v17056_v38 = vpop.f32.mrf.mxu1 }
 0x8b2   :  { %12809 = vst.msk [vmem:[#allocation2 + $0x128] sm:$0xff] %vm1809_vm1, %v12761_v3  ;;  %12815 = vst.msk [vmem:[#allocation2 + $0x158] sm:$0xff] %vm1809_vm1, %v12767_v18  ;;  %v12760_v12 = vadd.f32 %v12712_v52, %v11000_v63  ;;  %v12766_v53 = vadd.f32 %v12718_v26, %v11006_v57  ;;  %v12715_v9 = vmul.f32 %v22227_v8, %v17035_v42  ;;  %p17323_p4 = pnand %p17322_p3, %p17316_p0 }
 0x8b3   :  { %v12721_v31 = vmul.f32 %v22227_v8, %v17056_v38  ;;  %v12544_v1 = vpop.f32.mrf.mxu0  ;;  %v12657_v24 = vpop.f32.mrf.mxu1 }
 0x8b4   :  { %12808 = vst.msk [vmem:[#allocation2 + $0x120] sm:$0xff] %vm1809_vm1, %v12760_v12  ;;  %12814 = vst.msk [vmem:[#allocation2 + $0x150] sm:$0xff] %vm1809_vm1, %v12766_v53  ;;  %v12763_v8 = vadd.f32 %v12715_v9, %v11003_v5  ;;  %v12714_v40 = vmul.f32 %v22236_v27, %v12544_v1  ;;  %v12720_v60 = vmul.f32 %v22236_v27, %v12657_v24 }
 0x8b5   :  { %v12769_v47 = vadd.f32 %v12721_v31, %v11009_v16  ;;  %v17038_v11 = vpop.f32.mrf.mxu0  ;;  %v17059_v32 = vpop.f32.mrf.mxu1 }
 0x8b6   :  { %12811 = vst.msk [vmem:[#allocation2 + $0x138] sm:$0xff] %vm1809_vm1, %v12763_v8  ;;  %v12762_v29 = vadd.f32 %v12714_v40, %v11002_v36  ;;  %v12768_v20 = vadd.f32 %v12720_v60, %v11008_v59  ;;  %v12717_v27 = vmul.f32 %v22265_v17, %v17038_v11  ;;  %v12723_v25 = vmul.f32 %v22265_v17, %v17059_v32 }
 0x8b7   :  { %12817 = vst.msk [vmem:[#allocation2 + $0x168] sm:$0xff] %vm1809_vm1, %v12769_v47  ;;  %v12554_v58 = vpop.f32.mrf.mxu0  ;;  %v12667_v37 = vpop.f32.mrf.mxu1 }
 0x8b8   :  { %12810 = vst.msk [vmem:[#allocation2 + $0x130] sm:$0xff] %vm1809_vm1, %v12762_v29  ;;  %12816 = vst.msk [vmem:[#allocation2 + $0x160] sm:$0xff] %vm1809_vm1, %v12768_v20  ;;  %v12765_v43 = vadd.f32 %v12717_v27, %v11005_v2  ;;  %v12771_v17 = vadd.f32 %v12723_v25, %v11011_v54  ;;  %v12716_v21 = vmul.f32 %v22274_v45, %v12554_v58 }
 0x8b9   :  { %v12722_v6 = vmul.f32 %v22274_v45, %v12667_v37 }
 0x8ba   :  { %12813 = vst.msk [vmem:[#allocation2 + $0x148] sm:$0xff] %vm1809_vm1, %v12765_v43  ;;  %12819 = vst.msk [vmem:[#allocation2 + $0x178] sm:$0xff] %vm1809_vm1, %v12771_v17  ;;  %v12764_v23 = vadd.f32 %v12716_v21, %v11004_v46 }
 0x8bb   :  { %v12770_v44 = vadd.f32 %v12722_v6, %v11010_v55 }
 0x8bc   :  { %12812 = vst.msk [vmem:[#allocation2 + $0x140] sm:$0xff] %vm1809_vm1, %v12764_v23 }
 0x8bd   :  { %12818 = vst.msk [vmem:[#allocation2 + $0x170] sm:$0xff] %vm1809_vm1, %v12770_v44 }
 0x8be   :  { %17326 = shalt.err (!%p17323_p4)
}
 0x8bf   :  { %s17338_s12 = smov 128   ;;  %s17339_s13 = smov 8  }
 0x8c0   :  { %12831 = dma.vmem_to_hbm [thread:$0]  %s12826_s11, 6144, %s22568_s7, [#allocation3], %s17338_s12, %s17338_s12, %s17339_s13  }
 0x8c1   :  { %17335 = dma.done.wait [#allocation3], 6144  }
 0x8c2   :  { %17336 = vsyncadd [#allocation3], 4294961152 }
 0x8c3   :  { %12835 = vsyncpa [#allocation3], 1 }

</bundles_post_ra>
